<compile_context>
chip_gen: v7x
topology: tpu7x:2x2x1
jax: 0.10.0
libtpu: 0.0.40
codegen_flags: <defaults>
</compile_context>

<pallas_src>
import functools

import jax
import jax.numpy as jnp
from jax.experimental import pallas as pl
from jax.experimental.pallas import tpu as pltpu

_BN_EPS = 1e-5
# Conservative scoped-VMEM limit: fits v7x's 64 MiB/TC as well as v5e/v6e.
_VMEM_LIMIT_BYTES = 32 * 1024 * 1024


def _round_up(x, m):
    return (x + m - 1) // m * m


# ---------------------------------------------------------------------------
# Pallas kernels
# ---------------------------------------------------------------------------
def _stem_matmul_kernel(a_ref, w_ref, o_ref, sum_ref, sq_ref):
    """Layer 1: (N, nz) @ (nz, Cpad) matmul + fused per-column BN statistics."""
    acc = jnp.dot(a_ref[...], w_ref[...], preferred_element_type=jnp.float32)
    o_ref[...] = acc.astype(o_ref.dtype)
    s = jnp.sum(acc, axis=0, keepdims=True)
    q = jnp.sum(acc * acc, axis=0, keepdims=True)
    sum_ref[...] = jnp.broadcast_to(s, sum_ref.shape)
    sq_ref[...] = jnp.broadcast_to(q, sq_ref.shape)


def _subpixel_conv_kernel(*refs, wp, out_rows, with_stats, act):
    """Fused, im2col-free ConvTranspose2d(k=4, s=2, p=1) for one image.

    The padded input block is a flat (R, Cin) slab, R = (H+3)*(W+2).  Tap
    (a, b) of the 3x3 sub-pixel decomposition is the contiguous row window
    [a*(W+2)+b, a*(W+2)+b + H*(W+2)) of that slab, so the whole conv is 9
    accumulated MXU matmuls over VMEM-resident data.  Output rows with
    (row % (W+2)) >= W are wrap-around garbage: they are dropped by the
    caller and masked out of the BN statistics here.
    """
    if with_stats:
        x_ref, w_ref, m_ref, o_ref, sum_ref, sq_ref = refs
    else:
        x_ref, w_ref, o_ref = refs
    cpad = o_ref.shape[-1]

    acc = jnp.zeros((out_rows, cpad), jnp.float32)
    for a in range(3):
        for b in range(3):
            patch = x_ref[pl.ds(a * wp + b, out_rows), :]       # (out_rows, Cin)
            acc = acc + jnp.dot(patch, w_ref[a * 3 + b],
                                preferred_element_type=jnp.float32)

    if act == "tanh":                      # layer 5: tanh fused, no stats pass
        acc = jnp.tanh(acc)
    o_ref[...] = acc.astype(o_ref.dtype)   # bf16 writeback (f32 only for tanh)

    if with_stats:
        # Masked per-column BN statistics from the f32 accumulator: VPU/XLU
        # work that hides under the MXU and removes a separate HBM pass.
        m = m_ref[...]                                          # (out_rows, 1)
        am = acc * m
        s = jnp.sum(am, axis=0, keepdims=True)
        q = jnp.sum(am * acc, axis=0, keepdims=True)
        sum_ref[...] = jnp.broadcast_to(s, sum_ref.shape)
        sq_ref[...] = jnp.broadcast_to(q, sq_ref.shape)


# ---------------------------------------------------------------------------
# Pallas wrappers
# ---------------------------------------------------------------------------
def pallas_stem_matmul(a, w):
    n, k = a.shape
    _, cpad = w.shape
    cost = pl.CostEstimate(
        flops=2 * n * k * cpad,
        transcendentals=0,
        bytes_accessed=a.size * 2 + w.size * 2 + n * cpad * 2 + 2 * 8 * cpad * 4)
    return pl.pallas_call(
        _stem_matmul_kernel,
        out_shape=(jax.ShapeDtypeStruct((n, cpad), jnp.bfloat16),
                   jax.ShapeDtypeStruct((8, cpad), jnp.float32),
                   jax.ShapeDtypeStruct((8, cpad), jnp.float32)),
        grid_spec=pltpu.PrefetchScalarGridSpec(
            num_scalar_prefetch=0,
            grid=(1,),
            in_specs=[pl.BlockSpec((n, k), lambda i: (0, 0)),
                      pl.BlockSpec((k, cpad), lambda i: (0, 0))],
            out_specs=(pl.BlockSpec((n, cpad), lambda i: (0, 0)),
                       pl.BlockSpec((8, cpad), lambda i: (0, 0)),
                       pl.BlockSpec((8, cpad), lambda i: (0, 0)))),
        compiler_params=pltpu.CompilerParams(
            dimension_semantics=("arbitrary",),
            vmem_limit_bytes=_VMEM_LIMIT_BYTES),
        cost_estimate=cost,
    )(a, w)


def pallas_subpixel_conv(xflat, wtaps, h, wdt, *, with_stats, act, out_dtype):
    """xflat: (N, (H+3)*(W+2), Cin) bf16, wtaps: (9, Cin, Cpad) bf16.

    Returns the raw sub-pixel matmul output (N, H*(W+2), Cpad) (plus optional
    per-image BN partial statistics).  One grid step == one image: >= 2 steps
    for batch >= 2 so both v7x TensorCores get work; the weight block's index
    map is constant so it is fetched once and stays resident.
    """
    n, r, cin = xflat.shape
    _, _, cpad = wtaps.shape
    wp = wdt + 2
    out_rows = h * wp

    kernel = functools.partial(_subpixel_conv_kernel, wp=wp, out_rows=out_rows,
                               with_stats=with_stats, act=act)

    out_bytes = n * out_rows * cpad * jnp.dtype(out_dtype).itemsize
    cost = pl.CostEstimate(
        flops=2 * n * out_rows * cin * cpad * 9,
        transcendentals=(n * out_rows * cpad) if act == "tanh" else 0,
        bytes_accessed=xflat.size * 2 + wtaps.size * 2 + out_bytes
        + (2 * n * 8 * cpad * 4 if with_stats else 0))

    x_spec = pl.BlockSpec((None, r, cin), lambda i: (i, 0, 0))
    w_spec = pl.BlockSpec((9, cin, cpad), lambda i: (0, 0, 0))
    o_spec = pl.BlockSpec((None, out_rows, cpad), lambda i: (i, 0, 0))

    if with_stats:
        # 1.0 for real output pixels, 0.0 for the wrap-around garbage rows.
        vmask = (jnp.arange(out_rows) % wp < wdt).astype(jnp.float32)[:, None]
        in_specs = [x_spec, w_spec,
                    pl.BlockSpec((out_rows, 1), lambda i: (0, 0))]
        out_shape = (jax.ShapeDtypeStruct((n, out_rows, cpad), out_dtype),
                     jax.ShapeDtypeStruct((n * 8, cpad), jnp.float32),
                     jax.ShapeDtypeStruct((n * 8, cpad), jnp.float32))
        out_specs = (o_spec,
                     pl.BlockSpec((8, cpad), lambda i: (i, 0)),
                     pl.BlockSpec((8, cpad), lambda i: (i, 0)))
        args = (xflat, wtaps, vmask)
    else:
        in_specs = [x_spec, w_spec]
        out_shape = jax.ShapeDtypeStruct((n, out_rows, cpad), out_dtype)
        out_specs = o_spec
        args = (xflat, wtaps)

    return pl.pallas_call(
        kernel,
        out_shape=out_shape,
        grid_spec=pltpu.PrefetchScalarGridSpec(
            num_scalar_prefetch=0,
            grid=(n,),
            in_specs=in_specs,
            out_specs=out_specs),
        compiler_params=pltpu.CompilerParams(
            dimension_semantics=("parallel",),
            vmem_limit_bytes=_VMEM_LIMIT_BYTES),
        cost_estimate=cost,
    )(*args)


# ---------------------------------------------------------------------------
# ConvTranspose2d(k=4, s=2, p=1) -> sub-pixel tap weights (no zero-insertion)
# ---------------------------------------------------------------------------
# Output pixel (2m+ry, 2l+rx) only sees a 2x2 window of the input inside the
# 3x3 neighbourhood around (m, l):  parity ry + window row offset a -> tap ky.
_TAP = {(0, 0): 3, (0, 1): 1, (1, 1): 2, (1, 2): 0}


def make_subpixel_weight(w, cpad):
    """(Cin, Cout, 4, 4) ConvT weight -> (9, Cin, Cpad) bf16; tap index
    t = a*3 + b, columns ordered (ry, rx, cout), zero-padded to Cpad lanes."""
    cin, cout = w.shape[0], w.shape[1]
    wb = jnp.zeros((3, 3, cin, 2, 2, cout), dtype=jnp.float32)
    for ry in (0, 1):
        for rx in (0, 1):
            for a in (0, 1, 2):
                for b in (0, 1, 2):
                    if (ry, a) in _TAP and (rx, b) in _TAP:
                        ky, kx = _TAP[(ry, a)], _TAP[(rx, b)]
                        wb = wb.at[a, b, :, ry, rx, :].set(w[:, :, ky, kx])
    wb = wb.reshape(9, cin, 4 * cout)
    wb = jnp.pad(wb, ((0, 0), (0, 0), (0, cpad - 4 * cout)))
    return wb.astype(jnp.bfloat16)


def make_stem_weight(w, cpad):
    """ConvTranspose2d(nz, Cout, 4, 1, 0) on a 1x1 input is a plain matmul:
    (N, nz) @ (nz, 16*Cout), columns ordered (ky, kx, co)."""
    nz, cout = w.shape[0], w.shape[1]
    wm = w.transpose(0, 2, 3, 1).reshape(nz, 16 * cout)
    wm = jnp.pad(wm, ((0, 0), (0, cpad - 16 * cout)))
    return wm.astype(jnp.bfloat16)


# ---------------------------------------------------------------------------
# XLA glue (fuses into a single copy pass per layer)
# ---------------------------------------------------------------------------
def prep_conv_input(x_nhwc):
    """NHWC -> flat padded (N, (H+3)*(W+2), C) bf16 slab for the conv kernel
    (1-pixel conv pad + 2 extra bottom rows so every tap window is in-bounds)."""
    n, h, w, c = x_nhwc.shape
    xp = jnp.pad(x_nhwc, ((0, 0), (1, 2), (1, 1), (0, 0)))
    return xp.reshape(n, (h + 3) * (w + 2), c).astype(jnp.bfloat16)


def bn_scale_shift(col_sum, col_sq, groups, cout, n_rows, gamma, beta):
    """Finalize fused matmul statistics into per-channel BN scale/shift
    (training-mode batch statistics, biased variance, as in the PyTorch ref)."""
    cpad = col_sum.shape[-1]
    s = col_sum.reshape(-1, 8, cpad)[:, 0, :]
    q = col_sq.reshape(-1, 8, cpad)[:, 0, :]
    s = jnp.sum(s, axis=0)[: groups * cout].reshape(groups, cout)
    q = jnp.sum(q, axis=0)[: groups * cout].reshape(groups, cout)
    count = n_rows * groups
    mean = jnp.sum(s, axis=0) / count
    # NOTE: E[x^2]-E[x]^2 in f32; fine at these sizes (clamped >= 0).
    var = jnp.maximum(jnp.sum(q, axis=0) / count - mean * mean, 0.0)
    scale = gamma * jax.lax.rsqrt(var + _BN_EPS)
    shift = beta - mean * scale
    return scale, shift


def affine_relu_d2s(flat, scale, shift, n, h, w, cout):
    """BN normalize + ReLU + depth-to-space on the raw conv output; the slice,
    elementwise math, transpose and following pad fuse into one XLA pass."""
    wp = w + 2
    y = flat.reshape(n, h, wp, -1)[:, :, :w, :4 * cout].astype(jnp.float32)
    y = y.reshape(n, h, w, 2, 2, cout)
    y = jnp.maximum(y * scale + shift, 0.0)
    return y.transpose(0, 1, 3, 2, 4, 5).reshape(n, 2 * h, 2 * w, cout)


def d2s(flat, n, h, w, cout):
    wp = w + 2
    y = flat.reshape(n, h, wp, -1)[:, :, :w, :4 * cout]
    y = y.reshape(n, h, w, 2, 2, cout)
    return y.transpose(0, 1, 3, 2, 4, 5).reshape(n, 2 * h, 2 * w, cout)


# ---------------------------------------------------------------------------
# Generator (DCGAN)
# ---------------------------------------------------------------------------
def init_generator_params(key, latent_vector_z, feature_map_g, channel_number):
    nz, ngf, nc = latent_vector_z, feature_map_g, channel_number
    dims = [(nz, ngf * 8), (ngf * 8, ngf * 4), (ngf * 4, ngf * 2),
            (ngf * 2, ngf), (ngf, nc)]
    params = {}
    keys = jax.random.split(key, 2 * len(dims))
    for li, (cin, cout) in enumerate(dims):
        params[f"w{li + 1}"] = 0.02 * jax.random.normal(
            keys[2 * li], (cin, cout, 4, 4), dtype=jnp.float32)
        if li < 4:  # BN only on the first 4 blocks
            params[f"g{li + 1}"] = 1.0 + 0.02 * jax.random.normal(
                keys[2 * li + 1], (cout,), dtype=jnp.float32)
            params[f"b{li + 1}"] = jnp.zeros((cout,), dtype=jnp.float32)
    return params


def generator_forward(z, params):
    """z: (N, nz, 1, 1) NCHW -> (N, nc, 64, 64) NCHW (PyTorch semantics)."""
    n = z.shape[0]

    # ---- layer 1: ConvTranspose(nz, ngf*8, 4, 1, 0) on a 1x1 input ---------
    w1 = params["w1"]
    cout = w1.shape[1]
    cpad = _round_up(16 * cout, 128)
    a = z.reshape(n, -1).astype(jnp.bfloat16)
    flat, s_, q_ = pallas_stem_matmul(a, make_stem_weight(w1, cpad))
    scale, shift = bn_scale_shift(s_, q_, 16, cout, n,
                                  params["g1"], params["b1"])
    y = flat[:, :16 * cout].astype(jnp.float32).reshape(n, 4, 4, cout)
    x = jnp.maximum(y * scale + shift, 0.0)            # NHWC, (N, 4, 4, ngf*8)

    # ---- layers 2..5: ConvTranspose(k=4, s=2, p=1) via fused sub-pixel conv
    for li in range(2, 6):
        wt = params[f"w{li}"]
        cout = wt.shape[1]
        _, h, wdt, _ = x.shape
        cpad = _round_up(4 * cout, 128)
        wb = make_subpixel_weight(wt, cpad)
        xin = prep_conv_input(x)                        # (N, (H+3)*(W+2), Cin)
        if li < 5:
            flat, s_, q_ = pallas_subpixel_conv(
                xin, wb, h, wdt, with_stats=True, act="none",
                out_dtype=jnp.bfloat16)
            scale, shift = bn_scale_shift(s_, q_, 4, cout, n * h * wdt,
                                          params[f"g{li}"], params[f"b{li}"])
            x = affine_relu_d2s(flat, scale, shift, n, h, wdt, cout)
        else:
            flat = pallas_subpixel_conv(
                xin, wb, h, wdt, with_stats=False, act="tanh",
                out_dtype=jnp.float32)
            x = d2s(flat, n, h, wdt, cout)

    return x.transpose(0, 3, 1, 2)   # NHWC -> NCHW once, at the very end


# ---------------------------------------------------------------------------
# pure-JAX reference (zero-insertion conv_transpose, f32) for validation
# ---------------------------------------------------------------------------
def _ref_conv_transpose(x_nhwc, w, stride, padding):
    kh = w.shape[2]
    k_hwio = w[:, :, ::-1, ::-1].transpose(2, 3, 0, 1)     # (kh, kw, Cin, Cout)
    pad = kh - 1 - padding
    return jax.lax.conv_general_dilated(
        x_nhwc, k_hwio, window_strides=(1, 1),
        padding=((pad, pad), (pad, pad)),
        lhs_dilation=(stride, stride),
        dimension_numbers=("NHWC", "HWIO", "NHWC"))


def reference_forward(z, params):
    x = z.transpose(0, 2, 3, 1)
    cfg = [(1, 0), (2, 1), (2, 1), (2, 1), (2, 1)]
    for li, (stride, pad) in enumerate(cfg, start=1):
        x = _ref_conv_transpose(x, params[f"w{li}"], stride, pad)
        if li < 5:
            mean = jnp.mean(x, axis=(0, 1, 2))
            var = jnp.mean(x * x, axis=(0, 1, 2)) - mean * mean
            x = (x - mean) * jax.lax.rsqrt(var + _BN_EPS)
            x = x * params[f"g{li}"] + params[f"b{li}"]
            x = jnp.maximum(x, 0.0)
        else:
            x = jnp.tanh(x)
    return x.transpose(0, 3, 1, 2)


if __name__ == "__main__":
    # small config: batch=2, latent_vector_z=8, feature_map_g=8, channels=3
    batch, nz, ngf, nc = 2, 8, 8, 3

    key = jax.random.PRNGKey(0)
    pkey, zkey = jax.random.split(key)
    params = init_generator_params(pkey, nz, ngf, nc)
    z = jax.random.normal(zkey, (batch, nz, 1, 1), dtype=jnp.float32)

    fwd = jax.jit(functools.partial(generator_forward, params=params))
    out = fwd(z)
    jax.block_until_ready(out)

    assert out.shape == (batch, nc, 64, 64), out.shape
    assert bool(jnp.all(jnp.isfinite(out)))
    assert bool(jnp.all(jnp.abs(out) <= 1.0 + 1e-6))   # tanh range

    ref = jax.jit(functools.partial(reference_forward, params=params))(z)
    jax.block_until_ready(ref)
    err = float(jnp.max(jnp.abs(out - ref)))
    assert err < 6e-2, err                              # bf16-matmul tolerance

    print("KERNEL_OK")
</pallas_src>

<mosaic_0001>
module attributes {stable_mosaic.version = 11 : i64} {
  func.func @_stem_matmul_kernel(%arg0: i32, %arg1: memref<2x8xbf16, #tpu.memory_space<vmem>>, %arg2: memref<8x1024xbf16, #tpu.memory_space<vmem>>, %arg3: memref<2x1024xbf16, #tpu.memory_space<vmem>>, %arg4: memref<8x1024xf32, #tpu.memory_space<vmem>>, %arg5: memref<8x1024xf32, #tpu.memory_space<vmem>>) attributes {dimension_semantics = [#tpu.dimension_semantics<arbitrary>], iteration_bounds = array<i64: 1>, scalar_prefetch = 0 : i64, scratch_operands = 0 : i64, tpu.core_type = #tpu.core_type<tc>, window_params = [{pipeline_mode = #tpu.pipeline_mode<synchronous>, transform_indices = @transform_0, window_bounds = array<i64: 2, 8>}, {pipeline_mode = #tpu.pipeline_mode<synchronous>, transform_indices = @transform_1, window_bounds = array<i64: 8, 1024>}, {pipeline_mode = #tpu.pipeline_mode<synchronous>, transform_indices = @transform_2, window_bounds = array<i64: 2, 1024>}, {pipeline_mode = #tpu.pipeline_mode<synchronous>, transform_indices = @transform_3, window_bounds = array<i64: 8, 1024>}, {pipeline_mode = #tpu.pipeline_mode<synchronous>, transform_indices = @transform_4, window_bounds = array<i64: 8, 1024>}]} {
    %c0 = arith.constant 0 : index
    %c0_0 = arith.constant 0 : index
    %0 = vector.load %arg1[%c0, %c0_0] : memref<2x8xbf16, #tpu.memory_space<vmem>>, vector<2x8xbf16>
    %c0_1 = arith.constant 0 : index
    %c0_2 = arith.constant 0 : index
    %1 = vector.load %arg2[%c0_1, %c0_2] : memref<8x1024xbf16, #tpu.memory_space<vmem>>, vector<8x1024xbf16>
    %cst = arith.constant dense<0.000000e+00> : vector<2x1024xf32>
    %2 = tpu.matmul %0, %1, %cst {dimension_numbers = #tpu.dot_dimension_numbers<[1], [0], [0], [1], [0, 0, 1, 1], [], []>} : vector<2x8xbf16>, vector<8x1024xbf16>, vector<2x1024xf32> -> vector<2x1024xf32>
    %3 = arith.truncf %2 : vector<2x1024xf32> to vector<2x1024xbf16>
    %c0_3 = arith.constant 0 : index
    %c0_4 = arith.constant 0 : index
    %4 = vector.load %arg3[%c0_3, %c0_4] : memref<2x1024xbf16, #tpu.memory_space<vmem>>, vector<2x1024xbf16>
    tpu.vector_store %arg3[%c0_3, %c0_4], %3 {strides = array<i32>} : memref<2x1024xbf16, #tpu.memory_space<vmem>>, vector<2x1024xbf16>,
    %cst_5 = arith.constant dense<0.000000e+00> : vector<1024xf32>
    %5 = vector.multi_reduction <add>, %2, %cst_5 [0] : vector<2x1024xf32> to vector<1024xf32>
    %6 = vector.shape_cast %5 : vector<1024xf32> to vector<1x1024xf32>
    %7 = arith.mulf %2, %2 : vector<2x1024xf32>
    %cst_6 = arith.constant dense<0.000000e+00> : vector<1024xf32>
    %8 = vector.multi_reduction <add>, %7, %cst_6 [0] : vector<2x1024xf32> to vector<1024xf32>
    %9 = vector.shape_cast %8 : vector<1024xf32> to vector<1x1024xf32>
    %10 = vector.shape_cast %6 : vector<1x1024xf32> to vector<1x1024xf32>
    %11 = vector.broadcast %10 : vector<1x1024xf32> to vector<8x1024xf32>
    %c0_7 = arith.constant 0 : index
    %c0_8 = arith.constant 0 : index
    %12 = vector.load %arg4[%c0_7, %c0_8] : memref<8x1024xf32, #tpu.memory_space<vmem>>, vector<8x1024xf32>
    tpu.vector_store %arg4[%c0_7, %c0_8], %11 {strides = array<i32>} : memref<8x1024xf32, #tpu.memory_space<vmem>>, vector<8x1024xf32>,
    %13 = vector.shape_cast %9 : vector<1x1024xf32> to vector<1x1024xf32>
    %14 = vector.broadcast %13 : vector<1x1024xf32> to vector<8x1024xf32>
    %c0_9 = arith.constant 0 : index
    %c0_10 = arith.constant 0 : index
    %15 = vector.load %arg5[%c0_9, %c0_10] : memref<8x1024xf32, #tpu.memory_space<vmem>>, vector<8x1024xf32>
    tpu.vector_store %arg5[%c0_9, %c0_10], %14 {strides = array<i32>} : memref<8x1024xf32, #tpu.memory_space<vmem>>, vector<8x1024xf32>,
    return
  }
  func.func @transform_0(%arg0: i32) -> (i32, i32) {
    %c0_i32 = arith.constant 0 : i32
    %c0_i32_0 = arith.constant 0 : i32
    %c0_i32_1 = arith.constant 0 : i32
    return %c0_i32, %c0_i32_0 : i32, i32
  }
  func.func @transform_1(%arg0: i32) -> (i32, i32) {
    %c0_i32 = arith.constant 0 : i32
    %c0_i32_0 = arith.constant 0 : i32
    %c0_i32_1 = arith.constant 0 : i32
    return %c0_i32, %c0_i32_0 : i32, i32
  }
  func.func @transform_2(%arg0: i32) -> (i32, i32) {
    %c0_i32 = arith.constant 0 : i32
    %c0_i32_0 = arith.constant 0 : i32
    %c0_i32_1 = arith.constant 0 : i32
    return %c0_i32, %c0_i32_0 : i32, i32
  }
  func.func @transform_3(%arg0: i32) -> (i32, i32) {
    %c0_i32 = arith.constant 0 : i32
    %c0_i32_0 = arith.constant 0 : i32
    %c0_i32_1 = arith.constant 0 : i32
    return %c0_i32, %c0_i32_0 : i32, i32
  }
  func.func @transform_4(%arg0: i32) -> (i32, i32) {
    %c0_i32 = arith.constant 0 : i32
    %c0_i32_0 = arith.constant 0 : i32
    %c0_i32_1 = arith.constant 0 : i32
    return %c0_i32, %c0_i32_0 : i32, i32
  }
}

module attributes {stable_mosaic.version = 11 : i64} {
  func.func @_subpixel_conv_kernel(%arg0: i32, %arg1: memref<1x42x64xbf16, #tpu.memory_space<vmem>>, %arg2: memref<9x64x128xbf16, #tpu.memory_space<vmem>>, %arg3: memref<24x1xf32, #tpu.memory_space<vmem>>, %arg4: memref<1x24x128xbf16, #tpu.memory_space<vmem>>, %arg5: memref<8x128xf32, #tpu.memory_space<vmem>>, %arg6: memref<8x128xf32, #tpu.memory_space<vmem>>) attributes {dimension_semantics = [#tpu.dimension_semantics<parallel>], iteration_bounds = array<i64: 2>, scalar_prefetch = 0 : i64, scratch_operands = 0 : i64, tpu.core_type = #tpu.core_type<tc>, window_params = [{transform_indices = @transform_0, window_bounds = array<i64: 1, 42, 64>}, {pipeline_mode = #tpu.pipeline_mode<synchronous>, transform_indices = @transform_1, window_bounds = array<i64: 9, 64, 128>}, {pipeline_mode = #tpu.pipeline_mode<synchronous>, transform_indices = @transform_2, window_bounds = array<i64: 24, 1>}, {transform_indices = @transform_3, window_bounds = array<i64: 1, 24, 128>}, {transform_indices = @transform_4, window_bounds = array<i64: 8, 128>}, {transform_indices = @transform_5, window_bounds = array<i64: 8, 128>}]} {
    %cst = arith.constant 0.000000e+00 : f32
    %0 = vector.broadcast %cst : f32 to vector<24x128xf32>
    %c0 = arith.constant 0 : index
    %c0_0 = arith.constant 0 : index
    %c0_1 = arith.constant 0 : index
    %1 = vector.load %arg1[%c0, %c0_0, %c0_1] : memref<1x42x64xbf16, #tpu.memory_space<vmem>>, vector<1x24x64xbf16>
    %2 = vector.shape_cast %1 : vector<1x24x64xbf16> to vector<24x64xbf16>
    %c0_2 = arith.constant 0 : index
    %c0_3 = arith.constant 0 : index
    %c0_4 = arith.constant 0 : index
    %3 = vector.load %arg2[%c0_2, %c0_3, %c0_4] : memref<9x64x128xbf16, #tpu.memory_space<vmem>>, vector<1x64x128xbf16>
    %4 = vector.shape_cast %3 : vector<1x64x128xbf16> to vector<64x128xbf16>
    %cst_5 = arith.constant dense<0.000000e+00> : vector<24x128xf32>
    %5 = tpu.matmul %2, %4, %cst_5 {dimension_numbers = #tpu.dot_dimension_numbers<[1], [0], [0], [1], [0, 0, 1, 1], [], []>} : vector<24x64xbf16>, vector<64x128xbf16>, vector<24x128xf32> -> vector<24x128xf32>
    %6 = arith.addf %0, %5 : vector<24x128xf32>
    %c0_6 = arith.constant 0 : index
    %c1 = arith.constant 1 : index
    %c0_7 = arith.constant 0 : index
    %7 = vector.load %arg1[%c0_6, %c1, %c0_7] : memref<1x42x64xbf16, #tpu.memory_space<vmem>>, vector<1x24x64xbf16>
    %8 = vector.shape_cast %7 : vector<1x24x64xbf16> to vector<24x64xbf16>
    %c1_8 = arith.constant 1 : index
    %c0_9 = arith.constant 0 : index
    %c0_10 = arith.constant 0 : index
    %9 = vector.load %arg2[%c1_8, %c0_9, %c0_10] : memref<9x64x128xbf16, #tpu.memory_space<vmem>>, vector<1x64x128xbf16>
    %10 = vector.shape_cast %9 : vector<1x64x128xbf16> to vector<64x128xbf16>
    %cst_11 = arith.constant dense<0.000000e+00> : vector<24x128xf32>
    %11 = tpu.matmul %8, %10, %cst_11 {dimension_numbers = #tpu.dot_dimension_numbers<[1], [0], [0], [1], [0, 0, 1, 1], [], []>} : vector<24x64xbf16>, vector<64x128xbf16>, vector<24x128xf32> -> vector<24x128xf32>
    %12 = arith.addf %6, %11 : vector<24x128xf32>
    %c0_12 = arith.constant 0 : index
    %c2 = arith.constant 2 : index
    %c0_13 = arith.constant 0 : index
    %13 = vector.load %arg1[%c0_12, %c2, %c0_13] : memref<1x42x64xbf16, #tpu.memory_space<vmem>>, vector<1x24x64xbf16>
    %14 = vector.shape_cast %13 : vector<1x24x64xbf16> to vector<24x64xbf16>
    %c2_14 = arith.constant 2 : index
    %c0_15 = arith.constant 0 : index
    %c0_16 = arith.constant 0 : index
    %15 = vector.load %arg2[%c2_14, %c0_15, %c0_16] : memref<9x64x128xbf16, #tpu.memory_space<vmem>>, vector<1x64x128xbf16>
    %16 = vector.shape_cast %15 : vector<1x64x128xbf16> to vector<64x128xbf16>
    %cst_17 = arith.constant dense<0.000000e+00> : vector<24x128xf32>
    %17 = tpu.matmul %14, %16, %cst_17 {dimension_numbers = #tpu.dot_dimension_numbers<[1], [0], [0], [1], [0, 0, 1, 1], [], []>} : vector<24x64xbf16>, vector<64x128xbf16>, vector<24x128xf32> -> vector<24x128xf32>
    %18 = arith.addf %12, %17 : vector<24x128xf32>
    %c0_18 = arith.constant 0 : index
    %c6 = arith.constant 6 : index
    %c0_19 = arith.constant 0 : index
    %19 = vector.load %arg1[%c0_18, %c6, %c0_19] : memref<1x42x64xbf16, #tpu.memory_space<vmem>>, vector<1x24x64xbf16>
    %20 = vector.shape_cast %19 : vector<1x24x64xbf16> to vector<24x64xbf16>
    %c3 = arith.constant 3 : index
    %c0_20 = arith.constant 0 : index
    %c0_21 = arith.constant 0 : index
    %21 = vector.load %arg2[%c3, %c0_20, %c0_21] : memref<9x64x128xbf16, #tpu.memory_space<vmem>>, vector<1x64x128xbf16>
    %22 = vector.shape_cast %21 : vector<1x64x128xbf16> to vector<64x128xbf16>
    %cst_22 = arith.constant dense<0.000000e+00> : vector<24x128xf32>
    %23 = tpu.matmul %20, %22, %cst_22 {dimension_numbers = #tpu.dot_dimension_numbers<[1], [0], [0], [1], [0, 0, 1, 1], [], []>} : vector<24x64xbf16>, vector<64x128xbf16>, vector<24x128xf32> -> vector<24x128xf32>
    %24 = arith.addf %18, %23 : vector<24x128xf32>
    %c0_23 = arith.constant 0 : index
    %c7 = arith.constant 7 : index
    %c0_24 = arith.constant 0 : index
    %25 = vector.load %arg1[%c0_23, %c7, %c0_24] : memref<1x42x64xbf16, #tpu.memory_space<vmem>>, vector<1x24x64xbf16>
    %26 = vector.shape_cast %25 : vector<1x24x64xbf16> to vector<24x64xbf16>
    %c4 = arith.constant 4 : index
    %c0_25 = arith.constant 0 : index
    %c0_26 = arith.constant 0 : index
    %27 = vector.load %arg2[%c4, %c0_25, %c0_26] : memref<9x64x128xbf16, #tpu.memory_space<vmem>>, vector<1x64x128xbf16>
    %28 = vector.shape_cast %27 : vector<1x64x128xbf16> to vector<64x128xbf16>
    %cst_27 = arith.constant dense<0.000000e+00> : vector<24x128xf32>
    %29 = tpu.matmul %26, %28, %cst_27 {dimension_numbers = #tpu.dot_dimension_numbers<[1], [0], [0], [1], [0, 0, 1, 1], [], []>} : vector<24x64xbf16>, vector<64x128xbf16>, vector<24x128xf32> -> vector<24x128xf32>
    %30 = arith.addf %24, %29 : vector<24x128xf32>
    %c0_28 = arith.constant 0 : index
    %c8 = arith.constant 8 : index
    %c0_29 = arith.constant 0 : index
    %31 = vector.load %arg1[%c0_28, %c8, %c0_29] : memref<1x42x64xbf16, #tpu.memory_space<vmem>>, vector<1x24x64xbf16>
    %32 = vector.shape_cast %31 : vector<1x24x64xbf16> to vector<24x64xbf16>
    %c5 = arith.constant 5 : index
    %c0_30 = arith.constant 0 : index
    %c0_31 = arith.constant 0 : index
    %33 = vector.load %arg2[%c5, %c0_30, %c0_31] : memref<9x64x128xbf16, #tpu.memory_space<vmem>>, vector<1x64x128xbf16>
    %34 = vector.shape_cast %33 : vector<1x64x128xbf16> to vector<64x128xbf16>
    %cst_32 = arith.constant dense<0.000000e+00> : vector<24x128xf32>
    %35 = tpu.matmul %32, %34, %cst_32 {dimension_numbers = #tpu.dot_dimension_numbers<[1], [0], [0], [1], [0, 0, 1, 1], [], []>} : vector<24x64xbf16>, vector<64x128xbf16>, vector<24x128xf32> -> vector<24x128xf32>
    %36 = arith.addf %30, %35 : vector<24x128xf32>
    %c0_33 = arith.constant 0 : index
    %c12 = arith.constant 12 : index
    %c0_34 = arith.constant 0 : index
    %37 = vector.load %arg1[%c0_33, %c12, %c0_34] : memref<1x42x64xbf16, #tpu.memory_space<vmem>>, vector<1x24x64xbf16>
    %38 = vector.shape_cast %37 : vector<1x24x64xbf16> to vector<24x64xbf16>
    %c6_35 = arith.constant 6 : index
    %c0_36 = arith.constant 0 : index
    %c0_37 = arith.constant 0 : index
    %39 = vector.load %arg2[%c6_35, %c0_36, %c0_37] : memref<9x64x128xbf16, #tpu.memory_space<vmem>>, vector<1x64x128xbf16>
    %40 = vector.shape_cast %39 : vector<1x64x128xbf16> to vector<64x128xbf16>
    %cst_38 = arith.constant dense<0.000000e+00> : vector<24x128xf32>
    %41 = tpu.matmul %38, %40, %cst_38 {dimension_numbers = #tpu.dot_dimension_numbers<[1], [0], [0], [1], [0, 0, 1, 1], [], []>} : vector<24x64xbf16>, vector<64x128xbf16>, vector<24x128xf32> -> vector<24x128xf32>
    %42 = arith.addf %36, %41 : vector<24x128xf32>
    %c0_39 = arith.constant 0 : index
    %c13 = arith.constant 13 : index
    %c0_40 = arith.constant 0 : index
    %43 = vector.load %arg1[%c0_39, %c13, %c0_40] : memref<1x42x64xbf16, #tpu.memory_space<vmem>>, vector<1x24x64xbf16>
    %44 = vector.shape_cast %43 : vector<1x24x64xbf16> to vector<24x64xbf16>
    %c7_41 = arith.constant 7 : index
    %c0_42 = arith.constant 0 : index
    %c0_43 = arith.constant 0 : index
    %45 = vector.load %arg2[%c7_41, %c0_42, %c0_43] : memref<9x64x128xbf16, #tpu.memory_space<vmem>>, vector<1x64x128xbf16>
    %46 = vector.shape_cast %45 : vector<1x64x128xbf16> to vector<64x128xbf16>
    %cst_44 = arith.constant dense<0.000000e+00> : vector<24x128xf32>
    %47 = tpu.matmul %44, %46, %cst_44 {dimension_numbers = #tpu.dot_dimension_numbers<[1], [0], [0], [1], [0, 0, 1, 1], [], []>} : vector<24x64xbf16>, vector<64x128xbf16>, vector<24x128xf32> -> vector<24x128xf32>
    %48 = arith.addf %42, %47 : vector<24x128xf32>
    %c0_45 = arith.constant 0 : index
    %c14 = arith.constant 14 : index
    %c0_46 = arith.constant 0 : index
    %49 = vector.load %arg1[%c0_45, %c14, %c0_46] : memref<1x42x64xbf16, #tpu.memory_space<vmem>>, vector<1x24x64xbf16>
    %50 = vector.shape_cast %49 : vector<1x24x64xbf16> to vector<24x64xbf16>
    %c8_47 = arith.constant 8 : index
    %c0_48 = arith.constant 0 : index
    %c0_49 = arith.constant 0 : index
    %51 = vector.load %arg2[%c8_47, %c0_48, %c0_49] : memref<9x64x128xbf16, #tpu.memory_space<vmem>>, vector<1x64x128xbf16>
    %52 = vector.shape_cast %51 : vector<1x64x128xbf16> to vector<64x128xbf16>
    %cst_50 = arith.constant dense<0.000000e+00> : vector<24x128xf32>
    %53 = tpu.matmul %50, %52, %cst_50 {dimension_numbers = #tpu.dot_dimension_numbers<[1], [0], [0], [1], [0, 0, 1, 1], [], []>} : vector<24x64xbf16>, vector<64x128xbf16>, vector<24x128xf32> -> vector<24x128xf32>
    %54 = arith.addf %48, %53 : vector<24x128xf32>
    %55 = arith.truncf %54 : vector<24x128xf32> to vector<24x128xbf16>
    %c0_51 = arith.constant 0 : index
    %c0_52 = arith.constant 0 : index
    %c0_53 = arith.constant 0 : index
    %56 = vector.load %arg4[%c0_51, %c0_52, %c0_53] : memref<1x24x128xbf16, #tpu.memory_space<vmem>>, vector<1x24x128xbf16>
    %57 = vector.shape_cast %56 : vector<1x24x128xbf16> to vector<24x128xbf16>
    %58 = vector.shape_cast %55 : vector<24x128xbf16> to vector<1x24x128xbf16>
    tpu.vector_store %arg4[%c0_51, %c0_52, %c0_53], %58 {strides = array<i32>} : memref<1x24x128xbf16, #tpu.memory_space<vmem>>, vector<1x24x128xbf16>,
    %c0_54 = arith.constant 0 : index
    %c0_55 = arith.constant 0 : index
    %59 = vector.load %arg3[%c0_54, %c0_55] : memref<24x1xf32, #tpu.memory_space<vmem>>, vector<24x1xf32>
    %60 = vector.broadcast %59 : vector<24x1xf32> to vector<24x128xf32>
    %61 = arith.mulf %54, %60 : vector<24x128xf32>
    %cst_56 = arith.constant dense<0.000000e+00> : vector<128xf32>
    %62 = vector.multi_reduction <add>, %61, %cst_56 [0] : vector<24x128xf32> to vector<128xf32>
    %63 = vector.shape_cast %62 : vector<128xf32> to vector<1x128xf32>
    %64 = arith.mulf %61, %54 : vector<24x128xf32>
    %cst_57 = arith.constant dense<0.000000e+00> : vector<128xf32>
    %65 = vector.multi_reduction <add>, %64, %cst_57 [0] : vector<24x128xf32> to vector<128xf32>
    %66 = vector.shape_cast %65 : vector<128xf32> to vector<1x128xf32>
    %67 = vector.shape_cast %63 : vector<1x128xf32> to vector<1x128xf32>
    %68 = vector.broadcast %67 : vector<1x128xf32> to vector<8x128xf32>
    %c0_58 = arith.constant 0 : index
    %c0_59 = arith.constant 0 : index
    %69 = vector.load %arg5[%c0_58, %c0_59] : memref<8x128xf32, #tpu.memory_space<vmem>>, vector<8x128xf32>
    tpu.vector_store %arg5[%c0_58, %c0_59], %68 {strides = array<i32>} : memref<8x128xf32, #tpu.memory_space<vmem>>, vector<8x128xf32>,
    %70 = vector.shape_cast %66 : vector<1x128xf32> to vector<1x128xf32>
    %71 = vector.broadcast %70 : vector<1x128xf32> to vector<8x128xf32>
    %c0_60 = arith.constant 0 : index
    %c0_61 = arith.constant 0 : index
    %72 = vector.load %arg6[%c0_60, %c0_61] : memref<8x128xf32, #tpu.memory_space<vmem>>, vector<8x128xf32>
    tpu.vector_store %arg6[%c0_60, %c0_61], %71 {strides = array<i32>} : memref<8x128xf32, #tpu.memory_space<vmem>>, vector<8x128xf32>,
    return
  }
  func.func @transform_0(%arg0: i32) -> (i32, i32, i32) {
    %c0_i32 = arith.constant 0 : i32
    %c0_i32_0 = arith.constant 0 : i32
    %c0_i32_1 = arith.constant 0 : i32
    return %arg0, %c0_i32, %c0_i32_0 : i32, i32, i32
  }
  func.func @transform_1(%arg0: i32) -> (i32, i32, i32) {
    %c0_i32 = arith.constant 0 : i32
    %c0_i32_0 = arith.constant 0 : i32
    %c0_i32_1 = arith.constant 0 : i32
    %c0_i32_2 = arith.constant 0 : i32
    return %c0_i32, %c0_i32_0, %c0_i32_1 : i32, i32, i32
  }
  func.func @transform_2(%arg0: i32) -> (i32, i32) {
    %c0_i32 = arith.constant 0 : i32
    %c0_i32_0 = arith.constant 0 : i32
    %c0_i32_1 = arith.constant 0 : i32
    return %c0_i32, %c0_i32_0 : i32, i32
  }
  func.func @transform_3(%arg0: i32) -> (i32, i32, i32) {
    %c0_i32 = arith.constant 0 : i32
    %c0_i32_0 = arith.constant 0 : i32
    %c0_i32_1 = arith.constant 0 : i32
    return %arg0, %c0_i32, %c0_i32_0 : i32, i32, i32
  }
  func.func @transform_4(%arg0: i32) -> (i32, i32) {
    %c0_i32 = arith.constant 0 : i32
    %c0_i32_0 = arith.constant 0 : i32
    return %arg0, %c0_i32 : i32, i32
  }
  func.func @transform_5(%arg0: i32) -> (i32, i32) {
    %c0_i32 = arith.constant 0 : i32
    %c0_i32_0 = arith.constant 0 : i32
    return %arg0, %c0_i32 : i32, i32
  }
}

module attributes {stable_mosaic.version = 11 : i64} {
  func.func @_subpixel_conv_kernel(%arg0: i32, %arg1: memref<1x110x32xbf16, #tpu.memory_space<vmem>>, %arg2: memref<9x32x128xbf16, #tpu.memory_space<vmem>>, %arg3: memref<80x1xf32, #tpu.memory_space<vmem>>, %arg4: memref<1x80x128xbf16, #tpu.memory_space<vmem>>, %arg5: memref<8x128xf32, #tpu.memory_space<vmem>>, %arg6: memref<8x128xf32, #tpu.memory_space<vmem>>) attributes {dimension_semantics = [#tpu.dimension_semantics<parallel>], iteration_bounds = array<i64: 2>, scalar_prefetch = 0 : i64, scratch_operands = 0 : i64, tpu.core_type = #tpu.core_type<tc>, window_params = [{transform_indices = @transform_0, window_bounds = array<i64: 1, 110, 32>}, {pipeline_mode = #tpu.pipeline_mode<synchronous>, transform_indices = @transform_1, window_bounds = array<i64: 9, 32, 128>}, {pipeline_mode = #tpu.pipeline_mode<synchronous>, transform_indices = @transform_2, window_bounds = array<i64: 80, 1>}, {transform_indices = @transform_3, window_bounds = array<i64: 1, 80, 128>}, {transform_indices = @transform_4, window_bounds = array<i64: 8, 128>}, {transform_indices = @transform_5, window_bounds = array<i64: 8, 128>}]} {
    %cst = arith.constant 0.000000e+00 : f32
    %0 = vector.broadcast %cst : f32 to vector<80x128xf32>
    %c0 = arith.constant 0 : index
    %c0_0 = arith.constant 0 : index
    %c0_1 = arith.constant 0 : index
    %1 = vector.load %arg1[%c0, %c0_0, %c0_1] : memref<1x110x32xbf16, #tpu.memory_space<vmem>>, vector<1x80x32xbf16>
    %2 = vector.shape_cast %1 : vector<1x80x32xbf16> to vector<80x32xbf16>
    %c0_2 = arith.constant 0 : index
    %c0_3 = arith.constant 0 : index
    %c0_4 = arith.constant 0 : index
    %3 = vector.load %arg2[%c0_2, %c0_3, %c0_4] : memref<9x32x128xbf16, #tpu.memory_space<vmem>>, vector<1x32x128xbf16>
    %4 = vector.shape_cast %3 : vector<1x32x128xbf16> to vector<32x128xbf16>
    %cst_5 = arith.constant dense<0.000000e+00> : vector<80x128xf32>
    %5 = tpu.matmul %2, %4, %cst_5 {dimension_numbers = #tpu.dot_dimension_numbers<[1], [0], [0], [1], [0, 0, 1, 1], [], []>} : vector<80x32xbf16>, vector<32x128xbf16>, vector<80x128xf32> -> vector<80x128xf32>
    %6 = arith.addf %0, %5 : vector<80x128xf32>
    %c0_6 = arith.constant 0 : index
    %c1 = arith.constant 1 : index
    %c0_7 = arith.constant 0 : index
    %7 = vector.load %arg1[%c0_6, %c1, %c0_7] : memref<1x110x32xbf16, #tpu.memory_space<vmem>>, vector<1x80x32xbf16>
    %8 = vector.shape_cast %7 : vector<1x80x32xbf16> to vector<80x32xbf16>
    %c1_8 = arith.constant 1 : index
    %c0_9 = arith.constant 0 : index
    %c0_10 = arith.constant 0 : index
    %9 = vector.load %arg2[%c1_8, %c0_9, %c0_10] : memref<9x32x128xbf16, #tpu.memory_space<vmem>>, vector<1x32x128xbf16>
    %10 = vector.shape_cast %9 : vector<1x32x128xbf16> to vector<32x128xbf16>
    %cst_11 = arith.constant dense<0.000000e+00> : vector<80x128xf32>
    %11 = tpu.matmul %8, %10, %cst_11 {dimension_numbers = #tpu.dot_dimension_numbers<[1], [0], [0], [1], [0, 0, 1, 1], [], []>} : vector<80x32xbf16>, vector<32x128xbf16>, vector<80x128xf32> -> vector<80x128xf32>
    %12 = arith.addf %6, %11 : vector<80x128xf32>
    %c0_12 = arith.constant 0 : index
    %c2 = arith.constant 2 : index
    %c0_13 = arith.constant 0 : index
    %13 = vector.load %arg1[%c0_12, %c2, %c0_13] : memref<1x110x32xbf16, #tpu.memory_space<vmem>>, vector<1x80x32xbf16>
    %14 = vector.shape_cast %13 : vector<1x80x32xbf16> to vector<80x32xbf16>
    %c2_14 = arith.constant 2 : index
    %c0_15 = arith.constant 0 : index
    %c0_16 = arith.constant 0 : index
    %15 = vector.load %arg2[%c2_14, %c0_15, %c0_16] : memref<9x32x128xbf16, #tpu.memory_space<vmem>>, vector<1x32x128xbf16>
    %16 = vector.shape_cast %15 : vector<1x32x128xbf16> to vector<32x128xbf16>
    %cst_17 = arith.constant dense<0.000000e+00> : vector<80x128xf32>
    %17 = tpu.matmul %14, %16, %cst_17 {dimension_numbers = #tpu.dot_dimension_numbers<[1], [0], [0], [1], [0, 0, 1, 1], [], []>} : vector<80x32xbf16>, vector<32x128xbf16>, vector<80x128xf32> -> vector<80x128xf32>
    %18 = arith.addf %12, %17 : vector<80x128xf32>
    %c0_18 = arith.constant 0 : index
    %c10 = arith.constant 10 : index
    %c0_19 = arith.constant 0 : index
    %19 = vector.load %arg1[%c0_18, %c10, %c0_19] : memref<1x110x32xbf16, #tpu.memory_space<vmem>>, vector<1x80x32xbf16>
    %20 = vector.shape_cast %19 : vector<1x80x32xbf16> to vector<80x32xbf16>
    %c3 = arith.constant 3 : index
    %c0_20 = arith.constant 0 : index
    %c0_21 = arith.constant 0 : index
    %21 = vector.load %arg2[%c3, %c0_20, %c0_21] : memref<9x32x128xbf16, #tpu.memory_space<vmem>>, vector<1x32x128xbf16>
    %22 = vector.shape_cast %21 : vector<1x32x128xbf16> to vector<32x128xbf16>
    %cst_22 = arith.constant dense<0.000000e+00> : vector<80x128xf32>
    %23 = tpu.matmul %20, %22, %cst_22 {dimension_numbers = #tpu.dot_dimension_numbers<[1], [0], [0], [1], [0, 0, 1, 1], [], []>} : vector<80x32xbf16>, vector<32x128xbf16>, vector<80x128xf32> -> vector<80x128xf32>
    %24 = arith.addf %18, %23 : vector<80x128xf32>
    %c0_23 = arith.constant 0 : index
    %c11 = arith.constant 11 : index
    %c0_24 = arith.constant 0 : index
    %25 = vector.load %arg1[%c0_23, %c11, %c0_24] : memref<1x110x32xbf16, #tpu.memory_space<vmem>>, vector<1x80x32xbf16>
    %26 = vector.shape_cast %25 : vector<1x80x32xbf16> to vector<80x32xbf16>
    %c4 = arith.constant 4 : index
    %c0_25 = arith.constant 0 : index
    %c0_26 = arith.constant 0 : index
    %27 = vector.load %arg2[%c4, %c0_25, %c0_26] : memref<9x32x128xbf16, #tpu.memory_space<vmem>>, vector<1x32x128xbf16>
    %28 = vector.shape_cast %27 : vector<1x32x128xbf16> to vector<32x128xbf16>
    %cst_27 = arith.constant dense<0.000000e+00> : vector<80x128xf32>
    %29 = tpu.matmul %26, %28, %cst_27 {dimension_numbers = #tpu.dot_dimension_numbers<[1], [0], [0], [1], [0, 0, 1, 1], [], []>} : vector<80x32xbf16>, vector<32x128xbf16>, vector<80x128xf32> -> vector<80x128xf32>
    %30 = arith.addf %24, %29 : vector<80x128xf32>
    %c0_28 = arith.constant 0 : index
    %c12 = arith.constant 12 : index
    %c0_29 = arith.constant 0 : index
    %31 = vector.load %arg1[%c0_28, %c12, %c0_29] : memref<1x110x32xbf16, #tpu.memory_space<vmem>>, vector<1x80x32xbf16>
    %32 = vector.shape_cast %31 : vector<1x80x32xbf16> to vector<80x32xbf16>
    %c5 = arith.constant 5 : index
    %c0_30 = arith.constant 0 : index
    %c0_31 = arith.constant 0 : index
    %33 = vector.load %arg2[%c5, %c0_30, %c0_31] : memref<9x32x128xbf16, #tpu.memory_space<vmem>>, vector<1x32x128xbf16>
    %34 = vector.shape_cast %33 : vector<1x32x128xbf16> to vector<32x128xbf16>
    %cst_32 = arith.constant dense<0.000000e+00> : vector<80x128xf32>
    %35 = tpu.matmul %32, %34, %cst_32 {dimension_numbers = #tpu.dot_dimension_numbers<[1], [0], [0], [1], [0, 0, 1, 1], [], []>} : vector<80x32xbf16>, vector<32x128xbf16>, vector<80x128xf32> -> vector<80x128xf32>
    %36 = arith.addf %30, %35 : vector<80x128xf32>
    %c0_33 = arith.constant 0 : index
    %c20 = arith.constant 20 : index
    %c0_34 = arith.constant 0 : index
    %37 = vector.load %arg1[%c0_33, %c20, %c0_34] : memref<1x110x32xbf16, #tpu.memory_space<vmem>>, vector<1x80x32xbf16>
    %38 = vector.shape_cast %37 : vector<1x80x32xbf16> to vector<80x32xbf16>
    %c6 = arith.constant 6 : index
    %c0_35 = arith.constant 0 : index
    %c0_36 = arith.constant 0 : index
    %39 = vector.load %arg2[%c6, %c0_35, %c0_36] : memref<9x32x128xbf16, #tpu.memory_space<vmem>>, vector<1x32x128xbf16>
    %40 = vector.shape_cast %39 : vector<1x32x128xbf16> to vector<32x128xbf16>
    %cst_37 = arith.constant dense<0.000000e+00> : vector<80x128xf32>
    %41 = tpu.matmul %38, %40, %cst_37 {dimension_numbers = #tpu.dot_dimension_numbers<[1], [0], [0], [1], [0, 0, 1, 1], [], []>} : vector<80x32xbf16>, vector<32x128xbf16>, vector<80x128xf32> -> vector<80x128xf32>
    %42 = arith.addf %36, %41 : vector<80x128xf32>
    %c0_38 = arith.constant 0 : index
    %c21 = arith.constant 21 : index
    %c0_39 = arith.constant 0 : index
    %43 = vector.load %arg1[%c0_38, %c21, %c0_39] : memref<1x110x32xbf16, #tpu.memory_space<vmem>>, vector<1x80x32xbf16>
    %44 = vector.shape_cast %43 : vector<1x80x32xbf16> to vector<80x32xbf16>
    %c7 = arith.constant 7 : index
    %c0_40 = arith.constant 0 : index
    %c0_41 = arith.constant 0 : index
    %45 = vector.load %arg2[%c7, %c0_40, %c0_41] : memref<9x32x128xbf16, #tpu.memory_space<vmem>>, vector<1x32x128xbf16>
    %46 = vector.shape_cast %45 : vector<1x32x128xbf16> to vector<32x128xbf16>
    %cst_42 = arith.constant dense<0.000000e+00> : vector<80x128xf32>
    %47 = tpu.matmul %44, %46, %cst_42 {dimension_numbers = #tpu.dot_dimension_numbers<[1], [0], [0], [1], [0, 0, 1, 1], [], []>} : vector<80x32xbf16>, vector<32x128xbf16>, vector<80x128xf32> -> vector<80x128xf32>
    %48 = arith.addf %42, %47 : vector<80x128xf32>
    %c0_43 = arith.constant 0 : index
    %c22 = arith.constant 22 : index
    %c0_44 = arith.constant 0 : index
    %49 = vector.load %arg1[%c0_43, %c22, %c0_44] : memref<1x110x32xbf16, #tpu.memory_space<vmem>>, vector<1x80x32xbf16>
    %50 = vector.shape_cast %49 : vector<1x80x32xbf16> to vector<80x32xbf16>
    %c8 = arith.constant 8 : index
    %c0_45 = arith.constant 0 : index
    %c0_46 = arith.constant 0 : index
    %51 = vector.load %arg2[%c8, %c0_45, %c0_46] : memref<9x32x128xbf16, #tpu.memory_space<vmem>>, vector<1x32x128xbf16>
    %52 = vector.shape_cast %51 : vector<1x32x128xbf16> to vector<32x128xbf16>
    %cst_47 = arith.constant dense<0.000000e+00> : vector<80x128xf32>
    %53 = tpu.matmul %50, %52, %cst_47 {dimension_numbers = #tpu.dot_dimension_numbers<[1], [0], [0], [1], [0, 0, 1, 1], [], []>} : vector<80x32xbf16>, vector<32x128xbf16>, vector<80x128xf32> -> vector<80x128xf32>
    %54 = arith.addf %48, %53 : vector<80x128xf32>
    %55 = arith.truncf %54 : vector<80x128xf32> to vector<80x128xbf16>
    %c0_48 = arith.constant 0 : index
    %c0_49 = arith.constant 0 : index
    %c0_50 = arith.constant 0 : index
    %56 = vector.load %arg4[%c0_48, %c0_49, %c0_50] : memref<1x80x128xbf16, #tpu.memory_space<vmem>>, vector<1x80x128xbf16>
    %57 = vector.shape_cast %56 : vector<1x80x128xbf16> to vector<80x128xbf16>
    %58 = vector.shape_cast %55 : vector<80x128xbf16> to vector<1x80x128xbf16>
    tpu.vector_store %arg4[%c0_48, %c0_49, %c0_50], %58 {strides = array<i32>} : memref<1x80x128xbf16, #tpu.memory_space<vmem>>, vector<1x80x128xbf16>,
    %c0_51 = arith.constant 0 : index
    %c0_52 = arith.constant 0 : index
    %59 = vector.load %arg3[%c0_51, %c0_52] : memref<80x1xf32, #tpu.memory_space<vmem>>, vector<80x1xf32>
    %60 = vector.broadcast %59 : vector<80x1xf32> to vector<80x128xf32>
    %61 = arith.mulf %54, %60 : vector<80x128xf32>
    %cst_53 = arith.constant dense<0.000000e+00> : vector<128xf32>
    %62 = vector.multi_reduction <add>, %61, %cst_53 [0] : vector<80x128xf32> to vector<128xf32>
    %63 = vector.shape_cast %62 : vector<128xf32> to vector<1x128xf32>
    %64 = arith.mulf %61, %54 : vector<80x128xf32>
    %cst_54 = arith.constant dense<0.000000e+00> : vector<128xf32>
    %65 = vector.multi_reduction <add>, %64, %cst_54 [0] : vector<80x128xf32> to vector<128xf32>
    %66 = vector.shape_cast %65 : vector<128xf32> to vector<1x128xf32>
    %67 = vector.shape_cast %63 : vector<1x128xf32> to vector<1x128xf32>
    %68 = vector.broadcast %67 : vector<1x128xf32> to vector<8x128xf32>
    %c0_55 = arith.constant 0 : index
    %c0_56 = arith.constant 0 : index
    %69 = vector.load %arg5[%c0_55, %c0_56] : memref<8x128xf32, #tpu.memory_space<vmem>>, vector<8x128xf32>
    tpu.vector_store %arg5[%c0_55, %c0_56], %68 {strides = array<i32>} : memref<8x128xf32, #tpu.memory_space<vmem>>, vector<8x128xf32>,
    %70 = vector.shape_cast %66 : vector<1x128xf32> to vector<1x128xf32>
    %71 = vector.broadcast %70 : vector<1x128xf32> to vector<8x128xf32>
    %c0_57 = arith.constant 0 : index
    %c0_58 = arith.constant 0 : index
    %72 = vector.load %arg6[%c0_57, %c0_58] : memref<8x128xf32, #tpu.memory_space<vmem>>, vector<8x128xf32>
    tpu.vector_store %arg6[%c0_57, %c0_58], %71 {strides = array<i32>} : memref<8x128xf32, #tpu.memory_space<vmem>>, vector<8x128xf32>,
    return
  }
  func.func @transform_0(%arg0: i32) -> (i32, i32, i32) {
    %c0_i32 = arith.constant 0 : i32
    %c0_i32_0 = arith.constant 0 : i32
    %c0_i32_1 = arith.constant 0 : i32
    return %arg0, %c0_i32, %c0_i32_0 : i32, i32, i32
  }
  func.func @transform_1(%arg0: i32) -> (i32, i32, i32) {
    %c0_i32 = arith.constant 0 : i32
    %c0_i32_0 = arith.constant 0 : i32
    %c0_i32_1 = arith.constant 0 : i32
    %c0_i32_2 = arith.constant 0 : i32
    return %c0_i32, %c0_i32_0, %c0_i32_1 : i32, i32, i32
  }
  func.func @transform_2(%arg0: i32) -> (i32, i32) {
    %c0_i32 = arith.constant 0 : i32
    %c0_i32_0 = arith.constant 0 : i32
    %c0_i32_1 = arith.constant 0 : i32
    return %c0_i32, %c0_i32_0 : i32, i32
  }
  func.func @transform_3(%arg0: i32) -> (i32, i32, i32) {
    %c0_i32 = arith.constant 0 : i32
    %c0_i32_0 = arith.constant 0 : i32
    %c0_i32_1 = arith.constant 0 : i32
    return %arg0, %c0_i32, %c0_i32_0 : i32, i32, i32
  }
  func.func @transform_4(%arg0: i32) -> (i32, i32) {
    %c0_i32 = arith.constant 0 : i32
    %c0_i32_0 = arith.constant 0 : i32
    return %arg0, %c0_i32 : i32, i32
  }
  func.func @transform_5(%arg0: i32) -> (i32, i32) {
    %c0_i32 = arith.constant 0 : i32
    %c0_i32_0 = arith.constant 0 : i32
    return %arg0, %c0_i32 : i32, i32
  }
}

module attributes {stable_mosaic.version = 11 : i64} {
  func.func @_subpixel_conv_kernel(%arg0: i32, %arg1: memref<1x342x16xbf16, #tpu.memory_space<vmem>>, %arg2: memref<9x16x128xbf16, #tpu.memory_space<vmem>>, %arg3: memref<288x1xf32, #tpu.memory_space<vmem>>, %arg4: memref<1x288x128xbf16, #tpu.memory_space<vmem>>, %arg5: memref<8x128xf32, #tpu.memory_space<vmem>>, %arg6: memref<8x128xf32, #tpu.memory_space<vmem>>) attributes {dimension_semantics = [#tpu.dimension_semantics<parallel>], iteration_bounds = array<i64: 2>, scalar_prefetch = 0 : i64, scratch_operands = 0 : i64, tpu.core_type = #tpu.core_type<tc>, window_params = [{transform_indices = @transform_0, window_bounds = array<i64: 1, 342, 16>}, {pipeline_mode = #tpu.pipeline_mode<synchronous>, transform_indices = @transform_1, window_bounds = array<i64: 9, 16, 128>}, {pipeline_mode = #tpu.pipeline_mode<synchronous>, transform_indices = @transform_2, window_bounds = array<i64: 288, 1>}, {transform_indices = @transform_3, window_bounds = array<i64: 1, 288, 128>}, {transform_indices = @transform_4, window_bounds = array<i64: 8, 128>}, {transform_indices = @transform_5, window_bounds = array<i64: 8, 128>}]} {
    %cst = arith.constant 0.000000e+00 : f32
    %0 = vector.broadcast %cst : f32 to vector<288x128xf32>
    %c0 = arith.constant 0 : index
    %c0_0 = arith.constant 0 : index
    %c0_1 = arith.constant 0 : index
    %1 = vector.load %arg1[%c0, %c0_0, %c0_1] : memref<1x342x16xbf16, #tpu.memory_space<vmem>>, vector<1x288x16xbf16>
    %2 = vector.shape_cast %1 : vector<1x288x16xbf16> to vector<288x16xbf16>
    %c0_2 = arith.constant 0 : index
    %c0_3 = arith.constant 0 : index
    %c0_4 = arith.constant 0 : index
    %3 = vector.load %arg2[%c0_2, %c0_3, %c0_4] : memref<9x16x128xbf16, #tpu.memory_space<vmem>>, vector<1x16x128xbf16>
    %4 = vector.shape_cast %3 : vector<1x16x128xbf16> to vector<16x128xbf16>
    %cst_5 = arith.constant dense<0.000000e+00> : vector<288x128xf32>
    %5 = tpu.matmul %2, %4, %cst_5 {dimension_numbers = #tpu.dot_dimension_numbers<[1], [0], [0], [1], [0, 0, 1, 1], [], []>} : vector<288x16xbf16>, vector<16x128xbf16>, vector<288x128xf32> -> vector<288x128xf32>
    %6 = arith.addf %0, %5 : vector<288x128xf32>
    %c0_6 = arith.constant 0 : index
    %c1 = arith.constant 1 : index
    %c0_7 = arith.constant 0 : index
    %7 = vector.load %arg1[%c0_6, %c1, %c0_7] : memref<1x342x16xbf16, #tpu.memory_space<vmem>>, vector<1x288x16xbf16>
    %8 = vector.shape_cast %7 : vector<1x288x16xbf16> to vector<288x16xbf16>
    %c1_8 = arith.constant 1 : index
    %c0_9 = arith.constant 0 : index
    %c0_10 = arith.constant 0 : index
    %9 = vector.load %arg2[%c1_8, %c0_9, %c0_10] : memref<9x16x128xbf16, #tpu.memory_space<vmem>>, vector<1x16x128xbf16>
    %10 = vector.shape_cast %9 : vector<1x16x128xbf16> to vector<16x128xbf16>
    %cst_11 = arith.constant dense<0.000000e+00> : vector<288x128xf32>
    %11 = tpu.matmul %8, %10, %cst_11 {dimension_numbers = #tpu.dot_dimension_numbers<[1], [0], [0], [1], [0, 0, 1, 1], [], []>} : vector<288x16xbf16>, vector<16x128xbf16>, vector<288x128xf32> -> vector<288x128xf32>
    %12 = arith.addf %6, %11 : vector<288x128xf32>
    %c0_12 = arith.constant 0 : index
    %c2 = arith.constant 2 : index
    %c0_13 = arith.constant 0 : index
    %13 = vector.load %arg1[%c0_12, %c2, %c0_13] : memref<1x342x16xbf16, #tpu.memory_space<vmem>>, vector<1x288x16xbf16>
    %14 = vector.shape_cast %13 : vector<1x288x16xbf16> to vector<288x16xbf16>
    %c2_14 = arith.constant 2 : index
    %c0_15 = arith.constant 0 : index
    %c0_16 = arith.constant 0 : index
    %15 = vector.load %arg2[%c2_14, %c0_15, %c0_16] : memref<9x16x128xbf16, #tpu.memory_space<vmem>>, vector<1x16x128xbf16>
    %16 = vector.shape_cast %15 : vector<1x16x128xbf16> to vector<16x128xbf16>
    %cst_17 = arith.constant dense<0.000000e+00> : vector<288x128xf32>
    %17 = tpu.matmul %14, %16, %cst_17 {dimension_numbers = #tpu.dot_dimension_numbers<[1], [0], [0], [1], [0, 0, 1, 1], [], []>} : vector<288x16xbf16>, vector<16x128xbf16>, vector<288x128xf32> -> vector<288x128xf32>
    %18 = arith.addf %12, %17 : vector<288x128xf32>
    %c0_18 = arith.constant 0 : index
    %c18 = arith.constant 18 : index
    %c0_19 = arith.constant 0 : index
    %19 = vector.load %arg1[%c0_18, %c18, %c0_19] : memref<1x342x16xbf16, #tpu.memory_space<vmem>>, vector<1x288x16xbf16>
    %20 = vector.shape_cast %19 : vector<1x288x16xbf16> to vector<288x16xbf16>
    %c3 = arith.constant 3 : index
    %c0_20 = arith.constant 0 : index
    %c0_21 = arith.constant 0 : index
    %21 = vector.load %arg2[%c3, %c0_20, %c0_21] : memref<9x16x128xbf16, #tpu.memory_space<vmem>>, vector<1x16x128xbf16>
    %22 = vector.shape_cast %21 : vector<1x16x128xbf16> to vector<16x128xbf16>
    %cst_22 = arith.constant dense<0.000000e+00> : vector<288x128xf32>
    %23 = tpu.matmul %20, %22, %cst_22 {dimension_numbers = #tpu.dot_dimension_numbers<[1], [0], [0], [1], [0, 0, 1, 1], [], []>} : vector<288x16xbf16>, vector<16x128xbf16>, vector<288x128xf32> -> vector<288x128xf32>
    %24 = arith.addf %18, %23 : vector<288x128xf32>
    %c0_23 = arith.constant 0 : index
    %c19 = arith.constant 19 : index
    %c0_24 = arith.constant 0 : index
    %25 = vector.load %arg1[%c0_23, %c19, %c0_24] : memref<1x342x16xbf16, #tpu.memory_space<vmem>>, vector<1x288x16xbf16>
    %26 = vector.shape_cast %25 : vector<1x288x16xbf16> to vector<288x16xbf16>
    %c4 = arith.constant 4 : index
    %c0_25 = arith.constant 0 : index
    %c0_26 = arith.constant 0 : index
    %27 = vector.load %arg2[%c4, %c0_25, %c0_26] : memref<9x16x128xbf16, #tpu.memory_space<vmem>>, vector<1x16x128xbf16>
    %28 = vector.shape_cast %27 : vector<1x16x128xbf16> to vector<16x128xbf16>
    %cst_27 = arith.constant dense<0.000000e+00> : vector<288x128xf32>
    %29 = tpu.matmul %26, %28, %cst_27 {dimension_numbers = #tpu.dot_dimension_numbers<[1], [0], [0], [1], [0, 0, 1, 1], [], []>} : vector<288x16xbf16>, vector<16x128xbf16>, vector<288x128xf32> -> vector<288x128xf32>
    %30 = arith.addf %24, %29 : vector<288x128xf32>
    %c0_28 = arith.constant 0 : index
    %c20 = arith.constant 20 : index
    %c0_29 = arith.constant 0 : index
    %31 = vector.load %arg1[%c0_28, %c20, %c0_29] : memref<1x342x16xbf16, #tpu.memory_space<vmem>>, vector<1x288x16xbf16>
    %32 = vector.shape_cast %31 : vector<1x288x16xbf16> to vector<288x16xbf16>
    %c5 = arith.constant 5 : index
    %c0_30 = arith.constant 0 : index
    %c0_31 = arith.constant 0 : index
    %33 = vector.load %arg2[%c5, %c0_30, %c0_31] : memref<9x16x128xbf16, #tpu.memory_space<vmem>>, vector<1x16x128xbf16>
    %34 = vector.shape_cast %33 : vector<1x16x128xbf16> to vector<16x128xbf16>
    %cst_32 = arith.constant dense<0.000000e+00> : vector<288x128xf32>
    %35 = tpu.matmul %32, %34, %cst_32 {dimension_numbers = #tpu.dot_dimension_numbers<[1], [0], [0], [1], [0, 0, 1, 1], [], []>} : vector<288x16xbf16>, vector<16x128xbf16>, vector<288x128xf32> -> vector<288x128xf32>
    %36 = arith.addf %30, %35 : vector<288x128xf32>
    %c0_33 = arith.constant 0 : index
    %c36 = arith.constant 36 : index
    %c0_34 = arith.constant 0 : index
    %37 = vector.load %arg1[%c0_33, %c36, %c0_34] : memref<1x342x16xbf16, #tpu.memory_space<vmem>>, vector<1x288x16xbf16>
    %38 = vector.shape_cast %37 : vector<1x288x16xbf16> to vector<288x16xbf16>
    %c6 = arith.constant 6 : index
    %c0_35 = arith.constant 0 : index
    %c0_36 = arith.constant 0 : index
    %39 = vector.load %arg2[%c6, %c0_35, %c0_36] : memref<9x16x128xbf16, #tpu.memory_space<vmem>>, vector<1x16x128xbf16>
    %40 = vector.shape_cast %39 : vector<1x16x128xbf16> to vector<16x128xbf16>
    %cst_37 = arith.constant dense<0.000000e+00> : vector<288x128xf32>
    %41 = tpu.matmul %38, %40, %cst_37 {dimension_numbers = #tpu.dot_dimension_numbers<[1], [0], [0], [1], [0, 0, 1, 1], [], []>} : vector<288x16xbf16>, vector<16x128xbf16>, vector<288x128xf32> -> vector<288x128xf32>
    %42 = arith.addf %36, %41 : vector<288x128xf32>
    %c0_38 = arith.constant 0 : index
    %c37 = arith.constant 37 : index
    %c0_39 = arith.constant 0 : index
    %43 = vector.load %arg1[%c0_38, %c37, %c0_39] : memref<1x342x16xbf16, #tpu.memory_space<vmem>>, vector<1x288x16xbf16>
    %44 = vector.shape_cast %43 : vector<1x288x16xbf16> to vector<288x16xbf16>
    %c7 = arith.constant 7 : index
    %c0_40 = arith.constant 0 : index
    %c0_41 = arith.constant 0 : index
    %45 = vector.load %arg2[%c7, %c0_40, %c0_41] : memref<9x16x128xbf16, #tpu.memory_space<vmem>>, vector<1x16x128xbf16>
    %46 = vector.shape_cast %45 : vector<1x16x128xbf16> to vector<16x128xbf16>
    %cst_42 = arith.constant dense<0.000000e+00> : vector<288x128xf32>
    %47 = tpu.matmul %44, %46, %cst_42 {dimension_numbers = #tpu.dot_dimension_numbers<[1], [0], [0], [1], [0, 0, 1, 1], [], []>} : vector<288x16xbf16>, vector<16x128xbf16>, vector<288x128xf32> -> vector<288x128xf32>
    %48 = arith.addf %42, %47 : vector<288x128xf32>
    %c0_43 = arith.constant 0 : index
    %c38 = arith.constant 38 : index
    %c0_44 = arith.constant 0 : index
    %49 = vector.load %arg1[%c0_43, %c38, %c0_44] : memref<1x342x16xbf16, #tpu.memory_space<vmem>>, vector<1x288x16xbf16>
    %50 = vector.shape_cast %49 : vector<1x288x16xbf16> to vector<288x16xbf16>
    %c8 = arith.constant 8 : index
    %c0_45 = arith.constant 0 : index
    %c0_46 = arith.constant 0 : index
    %51 = vector.load %arg2[%c8, %c0_45, %c0_46] : memref<9x16x128xbf16, #tpu.memory_space<vmem>>, vector<1x16x128xbf16>
    %52 = vector.shape_cast %51 : vector<1x16x128xbf16> to vector<16x128xbf16>
    %cst_47 = arith.constant dense<0.000000e+00> : vector<288x128xf32>
    %53 = tpu.matmul %50, %52, %cst_47 {dimension_numbers = #tpu.dot_dimension_numbers<[1], [0], [0], [1], [0, 0, 1, 1], [], []>} : vector<288x16xbf16>, vector<16x128xbf16>, vector<288x128xf32> -> vector<288x128xf32>
    %54 = arith.addf %48, %53 : vector<288x128xf32>
    %55 = arith.truncf %54 : vector<288x128xf32> to vector<288x128xbf16>
    %c0_48 = arith.constant 0 : index
    %c0_49 = arith.constant 0 : index
    %c0_50 = arith.constant 0 : index
    %56 = vector.load %arg4[%c0_48, %c0_49, %c0_50] : memref<1x288x128xbf16, #tpu.memory_space<vmem>>, vector<1x288x128xbf16>
    %57 = vector.shape_cast %56 : vector<1x288x128xbf16> to vector<288x128xbf16>
    %58 = vector.shape_cast %55 : vector<288x128xbf16> to vector<1x288x128xbf16>
    tpu.vector_store %arg4[%c0_48, %c0_49, %c0_50], %58 {strides = array<i32>} : memref<1x288x128xbf16, #tpu.memory_space<vmem>>, vector<1x288x128xbf16>,
    %c0_51 = arith.constant 0 : index
    %c0_52 = arith.constant 0 : index
    %59 = vector.load %arg3[%c0_51, %c0_52] : memref<288x1xf32, #tpu.memory_space<vmem>>, vector<288x1xf32>
    %60 = vector.broadcast %59 : vector<288x1xf32> to vector<288x128xf32>
    %61 = arith.mulf %54, %60 : vector<288x128xf32>
    %cst_53 = arith.constant dense<0.000000e+00> : vector<128xf32>
    %62 = vector.multi_reduction <add>, %61, %cst_53 [0] : vector<288x128xf32> to vector<128xf32>
    %63 = vector.shape_cast %62 : vector<128xf32> to vector<1x128xf32>
    %64 = arith.mulf %61, %54 : vector<288x128xf32>
    %cst_54 = arith.constant dense<0.000000e+00> : vector<128xf32>
    %65 = vector.multi_reduction <add>, %64, %cst_54 [0] : vector<288x128xf32> to vector<128xf32>
    %66 = vector.shape_cast %65 : vector<128xf32> to vector<1x128xf32>
    %67 = vector.shape_cast %63 : vector<1x128xf32> to vector<1x128xf32>
    %68 = vector.broadcast %67 : vector<1x128xf32> to vector<8x128xf32>
    %c0_55 = arith.constant 0 : index
    %c0_56 = arith.constant 0 : index
    %69 = vector.load %arg5[%c0_55, %c0_56] : memref<8x128xf32, #tpu.memory_space<vmem>>, vector<8x128xf32>
    tpu.vector_store %arg5[%c0_55, %c0_56], %68 {strides = array<i32>} : memref<8x128xf32, #tpu.memory_space<vmem>>, vector<8x128xf32>,
    %70 = vector.shape_cast %66 : vector<1x128xf32> to vector<1x128xf32>
    %71 = vector.broadcast %70 : vector<1x128xf32> to vector<8x128xf32>
    %c0_57 = arith.constant 0 : index
    %c0_58 = arith.constant 0 : index
    %72 = vector.load %arg6[%c0_57, %c0_58] : memref<8x128xf32, #tpu.memory_space<vmem>>, vector<8x128xf32>
    tpu.vector_store %arg6[%c0_57, %c0_58], %71 {strides = array<i32>} : memref<8x128xf32, #tpu.memory_space<vmem>>, vector<8x128xf32>,
    return
  }
  func.func @transform_0(%arg0: i32) -> (i32, i32, i32) {
    %c0_i32 = arith.constant 0 : i32
    %c0_i32_0 = arith.constant 0 : i32
    %c0_i32_1 = arith.constant 0 : i32
    return %arg0, %c0_i32, %c0_i32_0 : i32, i32, i32
  }
  func.func @transform_1(%arg0: i32) -> (i32, i32, i32) {
    %c0_i32 = arith.constant 0 : i32
    %c0_i32_0 = arith.constant 0 : i32
    %c0_i32_1 = arith.constant 0 : i32
    %c0_i32_2 = arith.constant 0 : i32
    return %c0_i32, %c0_i32_0, %c0_i32_1 : i32, i32, i32
  }
  func.func @transform_2(%arg0: i32) -> (i32, i32) {
    %c0_i32 = arith.constant 0 : i32
    %c0_i32_0 = arith.constant 0 : i32
    %c0_i32_1 = arith.constant 0 : i32
    return %c0_i32, %c0_i32_0 : i32, i32
  }
  func.func @transform_3(%arg0: i32) -> (i32, i32, i32) {
    %c0_i32 = arith.constant 0 : i32
    %c0_i32_0 = arith.constant 0 : i32
    %c0_i32_1 = arith.constant 0 : i32
    return %arg0, %c0_i32, %c0_i32_0 : i32, i32, i32
  }
  func.func @transform_4(%arg0: i32) -> (i32, i32) {
    %c0_i32 = arith.constant 0 : i32
    %c0_i32_0 = arith.constant 0 : i32
    return %arg0, %c0_i32 : i32, i32
  }
  func.func @transform_5(%arg0: i32) -> (i32, i32) {
    %c0_i32 = arith.constant 0 : i32
    %c0_i32_0 = arith.constant 0 : i32
    return %arg0, %c0_i32 : i32, i32
  }
}

module attributes {stable_mosaic.version = 11 : i64} {
  func.func @_subpixel_conv_kernel(%arg0: i32, %arg1: memref<1x1190x8xbf16, #tpu.memory_space<vmem>>, %arg2: memref<9x8x128xbf16, #tpu.memory_space<vmem>>, %arg3: memref<1x1088x128xf32, #tpu.memory_space<vmem>>) attributes {dimension_semantics = [#tpu.dimension_semantics<parallel>], iteration_bounds = array<i64: 2>, scalar_prefetch = 0 : i64, scratch_operands = 0 : i64, tpu.core_type = #tpu.core_type<tc>, window_params = [{transform_indices = @transform_0, window_bounds = array<i64: 1, 1190, 8>}, {pipeline_mode = #tpu.pipeline_mode<synchronous>, transform_indices = @transform_1, window_bounds = array<i64: 9, 8, 128>}, {transform_indices = @transform_2, window_bounds = array<i64: 1, 1088, 128>}]} {
    %cst = arith.constant 0.000000e+00 : f32
    %0 = vector.broadcast %cst : f32 to vector<1088x128xf32>
    %c0 = arith.constant 0 : index
    %c0_0 = arith.constant 0 : index
    %c0_1 = arith.constant 0 : index
    %1 = vector.load %arg1[%c0, %c0_0, %c0_1] : memref<1x1190x8xbf16, #tpu.memory_space<vmem>>, vector<1x1088x8xbf16>
    %2 = vector.shape_cast %1 : vector<1x1088x8xbf16> to vector<1088x8xbf16>
    %c0_2 = arith.constant 0 : index
    %c0_3 = arith.constant 0 : index
    %c0_4 = arith.constant 0 : index
    %3 = vector.load %arg2[%c0_2, %c0_3, %c0_4] : memref<9x8x128xbf16, #tpu.memory_space<vmem>>, vector<1x8x128xbf16>
    %4 = vector.shape_cast %3 : vector<1x8x128xbf16> to vector<8x128xbf16>
    %cst_5 = arith.constant dense<0.000000e+00> : vector<1088x128xf32>
    %5 = tpu.matmul %2, %4, %cst_5 {dimension_numbers = #tpu.dot_dimension_numbers<[1], [0], [0], [1], [0, 0, 1, 1], [], []>} : vector<1088x8xbf16>, vector<8x128xbf16>, vector<1088x128xf32> -> vector<1088x128xf32>
    %6 = arith.addf %0, %5 : vector<1088x128xf32>
    %c0_6 = arith.constant 0 : index
    %c1 = arith.constant 1 : index
    %c0_7 = arith.constant 0 : index
    %7 = vector.load %arg1[%c0_6, %c1, %c0_7] : memref<1x1190x8xbf16, #tpu.memory_space<vmem>>, vector<1x1088x8xbf16>
    %8 = vector.shape_cast %7 : vector<1x1088x8xbf16> to vector<1088x8xbf16>
    %c1_8 = arith.constant 1 : index
    %c0_9 = arith.constant 0 : index
    %c0_10 = arith.constant 0 : index
    %9 = vector.load %arg2[%c1_8, %c0_9, %c0_10] : memref<9x8x128xbf16, #tpu.memory_space<vmem>>, vector<1x8x128xbf16>
    %10 = vector.shape_cast %9 : vector<1x8x128xbf16> to vector<8x128xbf16>
    %cst_11 = arith.constant dense<0.000000e+00> : vector<1088x128xf32>
    %11 = tpu.matmul %8, %10, %cst_11 {dimension_numbers = #tpu.dot_dimension_numbers<[1], [0], [0], [1], [0, 0, 1, 1], [], []>} : vector<1088x8xbf16>, vector<8x128xbf16>, vector<1088x128xf32> -> vector<1088x128xf32>
    %12 = arith.addf %6, %11 : vector<1088x128xf32>
    %c0_12 = arith.constant 0 : index
    %c2 = arith.constant 2 : index
    %c0_13 = arith.constant 0 : index
    %13 = vector.load %arg1[%c0_12, %c2, %c0_13] : memref<1x1190x8xbf16, #tpu.memory_space<vmem>>, vector<1x1088x8xbf16>
    %14 = vector.shape_cast %13 : vector<1x1088x8xbf16> to vector<1088x8xbf16>
    %c2_14 = arith.constant 2 : index
    %c0_15 = arith.constant 0 : index
    %c0_16 = arith.constant 0 : index
    %15 = vector.load %arg2[%c2_14, %c0_15, %c0_16] : memref<9x8x128xbf16, #tpu.memory_space<vmem>>, vector<1x8x128xbf16>
    %16 = vector.shape_cast %15 : vector<1x8x128xbf16> to vector<8x128xbf16>
    %cst_17 = arith.constant dense<0.000000e+00> : vector<1088x128xf32>
    %17 = tpu.matmul %14, %16, %cst_17 {dimension_numbers = #tpu.dot_dimension_numbers<[1], [0], [0], [1], [0, 0, 1, 1], [], []>} : vector<1088x8xbf16>, vector<8x128xbf16>, vector<1088x128xf32> -> vector<1088x128xf32>
    %18 = arith.addf %12, %17 : vector<1088x128xf32>
    %c0_18 = arith.constant 0 : index
    %c34 = arith.constant 34 : index
    %c0_19 = arith.constant 0 : index
    %19 = vector.load %arg1[%c0_18, %c34, %c0_19] : memref<1x1190x8xbf16, #tpu.memory_space<vmem>>, vector<1x1088x8xbf16>
    %20 = vector.shape_cast %19 : vector<1x1088x8xbf16> to vector<1088x8xbf16>
    %c3 = arith.constant 3 : index
    %c0_20 = arith.constant 0 : index
    %c0_21 = arith.constant 0 : index
    %21 = vector.load %arg2[%c3, %c0_20, %c0_21] : memref<9x8x128xbf16, #tpu.memory_space<vmem>>, vector<1x8x128xbf16>
    %22 = vector.shape_cast %21 : vector<1x8x128xbf16> to vector<8x128xbf16>
    %cst_22 = arith.constant dense<0.000000e+00> : vector<1088x128xf32>
    %23 = tpu.matmul %20, %22, %cst_22 {dimension_numbers = #tpu.dot_dimension_numbers<[1], [0], [0], [1], [0, 0, 1, 1], [], []>} : vector<1088x8xbf16>, vector<8x128xbf16>, vector<1088x128xf32> -> vector<1088x128xf32>
    %24 = arith.addf %18, %23 : vector<1088x128xf32>
    %c0_23 = arith.constant 0 : index
    %c35 = arith.constant 35 : index
    %c0_24 = arith.constant 0 : index
    %25 = vector.load %arg1[%c0_23, %c35, %c0_24] : memref<1x1190x8xbf16, #tpu.memory_space<vmem>>, vector<1x1088x8xbf16>
    %26 = vector.shape_cast %25 : vector<1x1088x8xbf16> to vector<1088x8xbf16>
    %c4 = arith.constant 4 : index
    %c0_25 = arith.constant 0 : index
    %c0_26 = arith.constant 0 : index
    %27 = vector.load %arg2[%c4, %c0_25, %c0_26] : memref<9x8x128xbf16, #tpu.memory_space<vmem>>, vector<1x8x128xbf16>
    %28 = vector.shape_cast %27 : vector<1x8x128xbf16> to vector<8x128xbf16>
    %cst_27 = arith.constant dense<0.000000e+00> : vector<1088x128xf32>
    %29 = tpu.matmul %26, %28, %cst_27 {dimension_numbers = #tpu.dot_dimension_numbers<[1], [0], [0], [1], [0, 0, 1, 1], [], []>} : vector<1088x8xbf16>, vector<8x128xbf16>, vector<1088x128xf32> -> vector<1088x128xf32>
    %30 = arith.addf %24, %29 : vector<1088x128xf32>
    %c0_28 = arith.constant 0 : index
    %c36 = arith.constant 36 : index
    %c0_29 = arith.constant 0 : index
    %31 = vector.load %arg1[%c0_28, %c36, %c0_29] : memref<1x1190x8xbf16, #tpu.memory_space<vmem>>, vector<1x1088x8xbf16>
    %32 = vector.shape_cast %31 : vector<1x1088x8xbf16> to vector<1088x8xbf16>
    %c5 = arith.constant 5 : index
    %c0_30 = arith.constant 0 : index
    %c0_31 = arith.constant 0 : index
    %33 = vector.load %arg2[%c5, %c0_30, %c0_31] : memref<9x8x128xbf16, #tpu.memory_space<vmem>>, vector<1x8x128xbf16>
    %34 = vector.shape_cast %33 : vector<1x8x128xbf16> to vector<8x128xbf16>
    %cst_32 = arith.constant dense<0.000000e+00> : vector<1088x128xf32>
    %35 = tpu.matmul %32, %34, %cst_32 {dimension_numbers = #tpu.dot_dimension_numbers<[1], [0], [0], [1], [0, 0, 1, 1], [], []>} : vector<1088x8xbf16>, vector<8x128xbf16>, vector<1088x128xf32> -> vector<1088x128xf32>
    %36 = arith.addf %30, %35 : vector<1088x128xf32>
    %c0_33 = arith.constant 0 : index
    %c68 = arith.constant 68 : index
    %c0_34 = arith.constant 0 : index
    %37 = vector.load %arg1[%c0_33, %c68, %c0_34] : memref<1x1190x8xbf16, #tpu.memory_space<vmem>>, vector<1x1088x8xbf16>
    %38 = vector.shape_cast %37 : vector<1x1088x8xbf16> to vector<1088x8xbf16>
    %c6 = arith.constant 6 : index
    %c0_35 = arith.constant 0 : index
    %c0_36 = arith.constant 0 : index
    %39 = vector.load %arg2[%c6, %c0_35, %c0_36] : memref<9x8x128xbf16, #tpu.memory_space<vmem>>, vector<1x8x128xbf16>
    %40 = vector.shape_cast %39 : vector<1x8x128xbf16> to vector<8x128xbf16>
    %cst_37 = arith.constant dense<0.000000e+00> : vector<1088x128xf32>
    %41 = tpu.matmul %38, %40, %cst_37 {dimension_numbers = #tpu.dot_dimension_numbers<[1], [0], [0], [1], [0, 0, 1, 1], [], []>} : vector<1088x8xbf16>, vector<8x128xbf16>, vector<1088x128xf32> -> vector<1088x128xf32>
    %42 = arith.addf %36, %41 : vector<1088x128xf32>
    %c0_38 = arith.constant 0 : index
    %c69 = arith.constant 69 : index
    %c0_39 = arith.constant 0 : index
    %43 = vector.load %arg1[%c0_38, %c69, %c0_39] : memref<1x1190x8xbf16, #tpu.memory_space<vmem>>, vector<1x1088x8xbf16>
    %44 = vector.shape_cast %43 : vector<1x1088x8xbf16> to vector<1088x8xbf16>
    %c7 = arith.constant 7 : index
    %c0_40 = arith.constant 0 : index
    %c0_41 = arith.constant 0 : index
    %45 = vector.load %arg2[%c7, %c0_40, %c0_41] : memref<9x8x128xbf16, #tpu.memory_space<vmem>>, vector<1x8x128xbf16>
    %46 = vector.shape_cast %45 : vector<1x8x128xbf16> to vector<8x128xbf16>
    %cst_42 = arith.constant dense<0.000000e+00> : vector<1088x128xf32>
    %47 = tpu.matmul %44, %46, %cst_42 {dimension_numbers = #tpu.dot_dimension_numbers<[1], [0], [0], [1], [0, 0, 1, 1], [], []>} : vector<1088x8xbf16>, vector<8x128xbf16>, vector<1088x128xf32> -> vector<1088x128xf32>
    %48 = arith.addf %42, %47 : vector<1088x128xf32>
    %c0_43 = arith.constant 0 : index
    %c70 = arith.constant 70 : index
    %c0_44 = arith.constant 0 : index
    %49 = vector.load %arg1[%c0_43, %c70, %c0_44] : memref<1x1190x8xbf16, #tpu.memory_space<vmem>>, vector<1x1088x8xbf16>
    %50 = vector.shape_cast %49 : vector<1x1088x8xbf16> to vector<1088x8xbf16>
    %c8 = arith.constant 8 : index
    %c0_45 = arith.constant 0 : index
    %c0_46 = arith.constant 0 : index
    %51 = vector.load %arg2[%c8, %c0_45, %c0_46] : memref<9x8x128xbf16, #tpu.memory_space<vmem>>, vector<1x8x128xbf16>
    %52 = vector.shape_cast %51 : vector<1x8x128xbf16> to vector<8x128xbf16>
    %cst_47 = arith.constant dense<0.000000e+00> : vector<1088x128xf32>
    %53 = tpu.matmul %50, %52, %cst_47 {dimension_numbers = #tpu.dot_dimension_numbers<[1], [0], [0], [1], [0, 0, 1, 1], [], []>} : vector<1088x8xbf16>, vector<8x128xbf16>, vector<1088x128xf32> -> vector<1088x128xf32>
    %54 = arith.addf %48, %53 : vector<1088x128xf32>
    %55 = math.tanh %54 : vector<1088x128xf32>
    %c0_48 = arith.constant 0 : index
    %c0_49 = arith.constant 0 : index
    %c0_50 = arith.constant 0 : index
    %56 = vector.load %arg3[%c0_48, %c0_49, %c0_50] : memref<1x1088x128xf32, #tpu.memory_space<vmem>>, vector<1x1088x128xf32>
    %57 = vector.shape_cast %56 : vector<1x1088x128xf32> to vector<1088x128xf32>
    %58 = vector.shape_cast %55 : vector<1088x128xf32> to vector<1x1088x128xf32>
    tpu.vector_store %arg3[%c0_48, %c0_49, %c0_50], %58 {strides = array<i32>} : memref<1x1088x128xf32, #tpu.memory_space<vmem>>, vector<1x1088x128xf32>,
    return
  }
  func.func @transform_0(%arg0: i32) -> (i32, i32, i32) {
    %c0_i32 = arith.constant 0 : i32
    %c0_i32_0 = arith.constant 0 : i32
    %c0_i32_1 = arith.constant 0 : i32
    return %arg0, %c0_i32, %c0_i32_0 : i32, i32, i32
  }
  func.func @transform_1(%arg0: i32) -> (i32, i32, i32) {
    %c0_i32 = arith.constant 0 : i32
    %c0_i32_0 = arith.constant 0 : i32
    %c0_i32_1 = arith.constant 0 : i32
    %c0_i32_2 = arith.constant 0 : i32
    return %c0_i32, %c0_i32_0, %c0_i32_1 : i32, i32, i32
  }
  func.func @transform_2(%arg0: i32) -> (i32, i32, i32) {
    %c0_i32 = arith.constant 0 : i32
    %c0_i32_0 = arith.constant 0 : i32
    %c0_i32_1 = arith.constant 0 : i32
    return %arg0, %c0_i32, %c0_i32_0 : i32, i32, i32
  }
}

</mosaic_0001>

<bundles_post_ra>
// kernel: generator_forward.5
= control target key start
LH: loop header
LB: loop body
LE: loop exit
PB: predicated region body
PF: predicated region fallthrough
CT: control target
= control target key end

     0   :  { %10 = vsyncpa [#allocation3], 0  ;;  %s517_s15 = smov [#allocation2]   ;;  %s658_s0 = inlined_call_operand.vmem [shape: bf16[2,8], index: 0, kind: input, shape index: {}]   ;;  %s659_s1 = inlined_call_operand.hbm [shape: bf16[8,1024], index: 1, kind: input, shape index: {}]   ;;  %s660_s2 = inlined_call_operand.vmem [shape: bf16[2,1024], index: 2, kind: output, shape index: {0}]   ;;  %s661_s3 = inlined_call_operand.vmem [shape: f32[8,1024], index: 3, kind: output, shape index: {1}]   ;;  %s662_s4 = inlined_call_operand.vmem [shape: f32[8,1024], index: 4, kind: output, shape index: {2}]  }
   0x1   :  { %s19_s16 = sshll.u32 %s517_s15, 4  ;;  %s493_s19 = scalar_lea.hbm %s659_s1, 512  ;;  %s20_s16 = int_to_ptr.vmem [resolvable:$true] %s19_s16 }
   0x2   :  { %p494_p0 = scmp.ne.s32.totalorder %s659_s1, %s493_s19  ;;  %p497_p1 = scmp.lt.u32.totalorder %s493_s19, %s659_s1 }
   0x4   :  { %p499_p2 = pnand %p497_p1, %p494_p0 }
   0x6   :  { %502 = shalt.err (!%p499_p2)
}
   0x7   :  { %s503_s24 = scalar_lea.vmem %s20_s16, 512  ;;  %p508_p4 = scmp.lt.s32.totalorder %s20_s16, %s20_s16 }
   0x8   :  { %p504_p3 = scmp.ne.s32.totalorder %s20_s16, %s503_s24  ;;  %p509_p5 = scmp.lt.s32.totalorder %s503_s24, %s503_s24 }
   0xa   :  { %p510_p6 = por %p509_p5, %p508_p4 }
   0xc   :  { %p511_p7 = pnand %p510_p6, %p504_p3 }
   0xe   :  { %514 = shalt.err (!%p511_p7)
}
   0xf   :  { %22 = dma.hbm_to_vmem [thread:$0]  %s659_s1, 512, %s20_s16, [#allocation3]  }
  0x10   :  { %515 = dma.done.wait [#allocation3], 512  }
  0x11   :  { %516 = vsyncadd [#allocation3], 4294966784  ;;  %v518_v0 = vmov 0   ;;  %v28_v1 = vld [vmem:[#allocation2] sm:$0xff]  ;;  %vm56_vm0 = vcmask 1043456   ;;  %v29_v2 = vld [vmem:[#allocation2 + $0x8] sm:$0xff]  ;;  %v268_v20 = vlaneseq }
  0x12   :  { %113 = vmatprep.mubr.bf16.mxu0 %v518_v0  ;;  %154 = vmatprep.mubr.bf16.mxu1 %v518_v0  ;;  %v463_v3 = vcombine.high %v28_v1, %v28_v1  ;;  %v465_v4 = vcombine.high %v29_v2, %v29_v2  ;;  %v462_v5 = vcombine.low %v28_v1, %v28_v1  ;;  %v30_v7 = vld [vmem:[#allocation2 + $0x10] sm:$0xff]  ;;  %v31_v8 = vld [vmem:[#allocation2 + $0x18] sm:$0xff]  ;;  %v27_v15 = vld [vmem:[%s658_s0] sm:$0x1]  ;;  %vm52_vm1 = vcmask 64512  }
  0x13   :  { %v464_v6 = vcombine.low %v29_v2, %v29_v2  ;;  %v467_v9 = vcombine.high %v30_v7, %v30_v7  ;;  %v469_v10 = vcombine.high %v31_v8, %v31_v8  ;;  %v466_v11 = vcombine.low %v30_v7, %v30_v7 }
  0x14   :  { %v468_v12 = vcombine.low %v31_v8, %v31_v8  ;;  %470 = vmatprep.subr.msk.bf16.mxu0 %vm56_vm0, %v463_v3  ;;  %472 = vmatprep.subr.msk.bf16.mxu1 %vm56_vm0, %v465_v4  ;;  %v58_v13 = vsel %vm56_vm0, %v462_v5, 0  ;;  %v519_v18 = vmov 1966171168   ;;  %v269_v22 = vshrl.u32 %v268_v20, 7 }
  0x15   :  { %v64_v14 = vsel %vm56_vm0, %v464_v6, 0  ;;  %82 = vmatpush1.bf16.msra.mxu0 %v58_v13  ;;  %v70_v16 = vsel %vm56_vm0, %v466_v11, 0  ;;  %v266_v19 = vunpack.c.l.s4 %v519_v18  ;;  %vm312_vm2 = vcmask 1041408  }
  0x16   :  { %123 = vmatpush1.bf16.msra.mxu1 %v64_v14  ;;  %474 = vmatprep.subr.msk.bf16.mxu0 %vm56_vm0, %v467_v9  ;;  %v76_v17 = vsel %vm56_vm0, %v468_v12, 0 }
  0x17   :  { %476 = vmatprep.subr.msk.bf16.mxu1 %vm56_vm0, %v469_v10  ;;  %v267_v21 = vunpack.c.0.s8 %v266_v19 }
  0x18   :  { %471 = vmatmul.mubr.msk.bf16.vlgmr.msra.gmra.mrb[0].mxu0 %vm52_vm1, %v27_v15 }
  0x19   :  { %473 = vmatmul.mubr.msk.bf16.vlgmr.msra.gmra.mrb[0].mxu1 %vm52_vm1, %v27_v15  ;;  %164 = vmatpush1.bf16.msra.mxu0 %v70_v16  ;;  %v568_v25 = vsub.s32 %v267_v21, %v269_v22 }
  0x1a   :  { %205 = vmatpush1.bf16.msra.mxu1 %v76_v17  ;;  %195 = vmatprep.mubr.bf16.mxu0 %v518_v0 }
  0x1b   :  { %236 = vmatprep.mubr.bf16.mxu1 %v518_v0 }
  0x20   :  { %475 = vmatmul.mubr.msk.bf16.vlgmr.msra.gmra.mrb[4].mxu0 %vm52_vm1, %v27_v15 }
  0x21   :  { %477 = vmatmul.mubr.msk.bf16.vlgmr.msra.gmra.mrb[4].mxu1 %vm52_vm1, %v27_v15 }
  0xeb   :  { %v115_v23 = vpop.f32.mrb[0].mxu0 }
  0xec   :  { %v156_v24 = vpop.f32.mrb[0].mxu1  ;;  %v313_v26 = vsel %vm312_vm2, %v115_v23, 0.0  ;;  %v369_v27 = vmul.f32 %v115_v23, %v115_v23  ;;  %v117_v30 = vpop.f32.mrb[1].mxu0 }
  0xed   :  { %v327_v28 = vsel %vm312_vm2, %v156_v24, 0.0  ;;  %v371_v29 = vmul.f32 %v156_v24, %v156_v24  ;;  %v158_v31 = vpop.f32.mrb[1].mxu1  ;;  %v314_v32 = vrot.slane %v313_v26, 4  ;;  %v478_v34 = vpack.c.bf16 %v117_v30, %v115_v23  ;;  %v119_v36 = vpop.f32.mrb[2].mxu0 }
  0xee   :  { %v328_v33 = vrot.slane %v327_v28, 4  ;;  %v320_v35 = vsel %vm312_vm2, %v117_v30, 0.0  ;;  %v160_v37 = vpop.f32.mrb[2].mxu1  ;;  %v377_v38 = vsel %vm312_vm2, %v369_v27, 0.0  ;;  %v370_v41 = vmul.f32 %v117_v30, %v117_v30  ;;  %v120_v42 = vpop.f32.mrb[3].mxu0 }
  0xef   :  { %v391_v39 = vsel %vm312_vm2, %v371_v29, 0.0  ;;  %v321_v40 = vrot.slane %v320_v35, 4  ;;  %v161_v43 = vpop.f32.mrb[3].mxu1  ;;  %v315_v44 = vadd.f32 %v314_v32, %v313_v26  ;;  %v378_v45 = vrot.slane %v377_v38, 4 }
  0xf0   :  { %v329_v46 = vadd.f32 %v328_v33, %v327_v28  ;;  %v392_v47 = vrot.slane %v391_v39, 4  ;;  %v271_v48 = vrot.slane %v478_v34, %v568_v25  ;;  %v384_v50 = vsel %vm312_vm2, %v370_v41, 0.0 }
  0xf1   :  { %v322_v49 = vadd.f32 %v321_v40, %v320_v35  ;;  %v479_v51 = vpack.c.bf16 %v158_v31, %v156_v24  ;;  %v316_v52 = vrot.slane %v315_v44, 2  ;;  %v379_v53 = vadd.f32 %v378_v45, %v377_v38 }
  0xf2   :  { %v330_v54 = vrot.slane %v329_v46, 2  ;;  %v393_v55 = vadd.f32 %v392_v47, %v391_v39  ;;  %v385_v57 = vrot.slane %v384_v50, 4  ;;  %v334_v59 = vsel %vm312_vm2, %v158_v31, 0.0 }
  0xf3   :  { %v323_v56 = vrot.slane %v322_v49, 2  ;;  %v278_v58 = vrot.slane %v479_v51, %v568_v25  ;;  %v317_v60 = vadd.f32 %v316_v52, %v315_v44  ;;  %v380_v61 = vrot.slane %v379_v53, 2  ;;  %v197_v0 = vpop.f32.mrb[4].mxu0 }
  0xf4   :  { %v331_v62 = vadd.f32 %v330_v54, %v329_v46  ;;  %v394_v63 = vrot.slane %v393_v55, 2  ;;  %v579_v1 = vpop.f32.mrb[4].mxu1  ;;  %v386_v3 = vadd.f32 %v385_v57, %v384_v50  ;;  %v335_v5 = vrot.slane %v334_v59, 4  ;;  %v199_v6 = vpop.f32.mrb[5].mxu0 }
  0xf5   :  { %v324_v2 = vadd.f32 %v323_v56, %v322_v49  ;;  %v293_v4 = vcombine.low %v271_v48, %v278_v58  ;;  %v581_v7 = vpop.f32.mrb[5].mxu1  ;;  %v318_v8 = vrot.slane %v317_v60, 1  ;;  %v381_v9 = vadd.f32 %v380_v61, %v379_v53  ;;  %v201_v12 = vpop.f32.mrb[6].mxu0 }
  0xf6   :  { %v332_v10 = vrot.slane %v331_v62, 1  ;;  %v395_v11 = vadd.f32 %v394_v63, %v393_v55  ;;  %v242_v13 = vpop.f32.mrb[6].mxu1  ;;  %v387_v15 = vrot.slane %v386_v3, 2  ;;  %v336_v17 = vadd.f32 %v335_v5, %v334_v59  ;;  %v202_v18 = vpop.f32.mrb[7].mxu0 }
  0xf7   :  { %v325_v14 = vrot.slane %v324_v2, 1  ;;  %v584_v16 = vrot.slane %v293_v4, %v568_v25  ;;  %v243_v19 = vpop.f32.mrb[7].mxu1  ;;  %v319_v20 = vadd.f32 %v318_v8, %v317_v60  ;;  %v382_v21 = vrot.slane %v381_v9, 1 }
  0xf8   :  { %v333_v22 = vadd.f32 %v332_v10, %v331_v62  ;;  %v396_v23 = vrot.slane %v395_v11, 1  ;;  %v388_v26 = vadd.f32 %v387_v15, %v386_v3  ;;  %v337_v27 = vrot.slane %v336_v17, 2 }
  0xf9   :  { %v326_v24 = vadd.f32 %v325_v14, %v324_v2  ;;  %v372_v28 = vmul.f32 %v158_v31, %v158_v31  ;;  %v383_v29 = vadd.f32 %v382_v21, %v381_v9  ;;  %433 = vst [vmem:[%s661_s3] sm:$0xff] %v319_v20  ;;  %v341_v32 = vsel %vm312_vm2, %v197_v0, 0.0 }
  0xfa   :  { %v397_v30 = vadd.f32 %v396_v23, %v395_v11  ;;  %435 = vst [vmem:[%s661_s3 + $0x10] sm:$0xff] %v333_v22  ;;  %v373_v33 = vmul.f32 %v197_v0, %v197_v0  ;;  %v389_v34 = vrot.slane %v388_v26, 1  ;;  %v338_v35 = vadd.f32 %v337_v27, %v336_v17 }
  0xfb   :  { %434 = vst [vmem:[%s661_s3 + $0x8] sm:$0xff] %v326_v24  ;;  %v398_v31 = vsel %vm312_vm2, %v372_v28, 0.0  ;;  %v342_v36 = vrot.slane %v341_v32, 4  ;;  %441 = vst [vmem:[%s662_s4] sm:$0xff] %v383_v29  ;;  %v355_v39 = vsel %vm312_vm2, %v579_v1, 0.0  ;;  %v375_v40 = vmul.f32 %v579_v1, %v579_v1 }
  0xfc   :  { %443 = vst [vmem:[%s662_s4 + $0x10] sm:$0xff] %v397_v30  ;;  %v399_v37 = vrot.slane %v398_v31, 4  ;;  %v405_v38 = vsel %vm312_vm2, %v373_v33, 0.0  ;;  %v390_v41 = vadd.f32 %v389_v34, %v388_v26  ;;  %v339_v42 = vrot.slane %v338_v35, 1 }
  0xfd   :  { %v343_v43 = vadd.f32 %v342_v36, %v341_v32  ;;  %v406_v44 = vrot.slane %v405_v38, 4  ;;  %v356_v46 = vrot.slane %v355_v39, 4  ;;  %v419_v47 = vsel %vm312_vm2, %v375_v40, 0.0 }
  0xfe   :  { %v400_v45 = vadd.f32 %v399_v37, %v398_v31  ;;  %v480_v48 = vpack.c.bf16 %v199_v6, %v197_v0  ;;  %442 = vst [vmem:[%s662_s4 + $0x8] sm:$0xff] %v390_v41  ;;  %v340_v49 = vadd.f32 %v339_v42, %v338_v35  ;;  %v420_v52 = vrot.slane %v419_v47, 4 }
  0xff   :  { %v344_v50 = vrot.slane %v343_v43, 2  ;;  %v407_v51 = vadd.f32 %v406_v44, %v405_v38  ;;  %v357_v54 = vadd.f32 %v356_v46, %v355_v39  ;;  %v348_v56 = vsel %vm312_vm2, %v199_v6, 0.0 }
 0x100   :  { %v401_v53 = vrot.slane %v400_v45, 2  ;;  %v285_v55 = vrot.slane %v480_v48, %v568_v25  ;;  %436 = vst [vmem:[%s661_s3 + $0x18] sm:$0xff] %v340_v49  ;;  %v421_v59 = vadd.f32 %v420_v52, %v419_v47  ;;  %v349_v60 = vrot.slane %v348_v56, 4 }
 0x101   :  { %v345_v57 = vadd.f32 %v344_v50, %v343_v43  ;;  %v408_v58 = vrot.slane %v407_v51, 2  ;;  %v358_v62 = vrot.slane %v357_v54, 2  ;;  %v374_v63 = vmul.f32 %v199_v6, %v199_v6 }
 0x102   :  { %v402_v61 = vadd.f32 %v401_v53, %v400_v45  ;;  %v481_v0 = vpack.c.bf16 %v581_v7, %v579_v1  ;;  %v422_v4 = vrot.slane %v421_v59, 2  ;;  %v350_v5 = vadd.f32 %v349_v60, %v348_v56 }
 0x103   :  { %v346_v2 = vrot.slane %v345_v57, 1  ;;  %v409_v3 = vadd.f32 %v408_v58, %v407_v51  ;;  %v359_v9 = vadd.f32 %v358_v62, %v357_v54  ;;  %v412_v10 = vsel %vm312_vm2, %v374_v63, 0.0 }
 0x104   :  { %v403_v8 = vrot.slane %v402_v61, 1  ;;  %v292_v11 = vrot.slane %v481_v0, %v568_v25  ;;  %v423_v14 = vadd.f32 %v422_v4, %v421_v59  ;;  %v351_v15 = vrot.slane %v350_v5, 2 }
 0x105   :  { %v347_v12 = vadd.f32 %v346_v2, %v345_v57  ;;  %v410_v13 = vrot.slane %v409_v3, 1  ;;  %v360_v18 = vrot.slane %v359_v9, 1  ;;  %v413_v6 = vrot.slane %v412_v10, 4 }
 0x106   :  { %v404_v17 = vadd.f32 %v403_v8, %v402_v61  ;;  %v294_v19 = vcombine.low %v285_v55, %v292_v11  ;;  %v424_v1 = vrot.slane %v423_v14, 1  ;;  %v352_v21 = vadd.f32 %v351_v15, %v350_v5 }
 0x107   :  { %v411_v20 = vadd.f32 %v410_v13, %v409_v3  ;;  %437 = vst [vmem:[%s661_s3 + $0x20] sm:$0xff] %v347_v12  ;;  %v362_v22 = vsel %vm312_vm2, %v581_v7, 0.0  ;;  %v361_v23 = vadd.f32 %v360_v18, %v359_v9  ;;  %v414_v24 = vadd.f32 %v413_v6, %v412_v10 }
 0x108   :  { %444 = vst [vmem:[%s662_s4 + $0x18] sm:$0xff] %v404_v17  ;;  %v308_v26 = vrot.slane %v294_v19, %v568_v25  ;;  %v363_v27 = vrot.slane %v362_v22, 4  ;;  %v425_v28 = vadd.f32 %v424_v1, %v423_v14  ;;  %v353_v29 = vrot.slane %v352_v21, 1 }
 0x109   :  { %445 = vst [vmem:[%s662_s4 + $0x20] sm:$0xff] %v411_v20  ;;  %v376_v30 = vmul.f32 %v581_v7, %v581_v7  ;;  %439 = vst [vmem:[%s661_s3 + $0x30] sm:$0xff] %v361_v23  ;;  %v415_v32 = vrot.slane %v414_v24, 2 }
 0x10a   :  { %v309_v33 = vcombine.low %v584_v16, %v308_v26  ;;  %v364_v34 = vadd.f32 %v363_v27, %v362_v22  ;;  %447 = vst [vmem:[%s662_s4 + $0x30] sm:$0xff] %v425_v28  ;;  %v354_v25 = vadd.f32 %v353_v29, %v352_v21 }
 0x10b   :  { %v426_v35 = vsel %vm312_vm2, %v376_v30, 0.0  ;;  %v416_v31 = vadd.f32 %v415_v32, %v414_v24 }
 0x10c   :  { %311 = vst [vmem:[%s660_s2] sm:$0xff] %v309_v33  ;;  %v365_v7 = vrot.slane %v364_v34, 2  ;;  %v427_v36 = vrot.slane %v426_v35, 4  ;;  %438 = vst [vmem:[%s661_s3 + $0x28] sm:$0xff] %v354_v25 }
 0x10d   :  { %v417_v16 = vrot.slane %v416_v31, 1 }
 0x10e   :  { %v366_v37 = vadd.f32 %v365_v7, %v364_v34  ;;  %v428_v38 = vadd.f32 %v427_v36, %v426_v35 }
 0x10f   :  { %v418_v39 = vadd.f32 %v417_v16, %v416_v31 }
 0x110   :  { %v367_v40 = vrot.slane %v366_v37, 1  ;;  %v429_v41 = vrot.slane %v428_v38, 2 }
 0x111   :  { %446 = vst [vmem:[%s662_s4 + $0x28] sm:$0xff] %v418_v39 }
 0x112   :  { %v368_v42 = vadd.f32 %v367_v40, %v366_v37  ;;  %v430_v43 = vadd.f32 %v429_v41, %v428_v38 }
 0x114   :  { %v431_v44 = vrot.slane %v430_v43, 1  ;;  %440 = vst [vmem:[%s661_s3 + $0x38] sm:$0xff] %v368_v42 }
 0x116   :  { %v432_v45 = vadd.f32 %v431_v44, %v430_v43 }
 0x118   :  { %448 = vst [vmem:[%s662_s4 + $0x38] sm:$0xff] %v432_v45 }
 0x119   :  { %461 = vsyncpa [#allocation3], 1 }

// kernel: generator_forward.6
= control target key start
LH: loop header
LB: loop body
LE: loop exit
PB: predicated region body
PF: predicated region fallthrough
CT: control target
= control target key end

     0   :  { %11 = vsyncpa [#allocation3], 0  ;;  %s1807_s18 = smov 0   ;;  %s1969_s0 = inlined_call_operand.vmem [shape: bf16[2,42,64], index: 0, kind: input, shape index: {}]   ;;  %s1970_s1 = inlined_call_operand.hbm [shape: bf16[9,64,128], index: 1, kind: input, shape index: {}]   ;;  %s1971_s2 = inlined_call_operand.vmem [shape: f32[24,1], index: 2, kind: input, shape index: {}]   ;;  %s1972_s3 = inlined_call_operand.vmem [shape: bf16[2,24,128], index: 3, kind: output, shape index: {0}]   ;;  %s1973_s4 = inlined_call_operand.vmem [shape: f32[16,128], index: 4, kind: output, shape index: {1}]   ;;  %s1974_s5 = inlined_call_operand.vmem [shape: f32[16,128], index: 5, kind: output, shape index: {2}]  }
   0x1 LB: > { %s1813_s19 = sadd.s32 4294967295, %s1771_s18   ;;  %p1376_p0 = scmp.ge.s32.totalorder %s1771_s18, 1  ;;  %s1771_s18 = sphi %s1807_s18, %s17_s18  }
   0x2   : > { %p168_p1 = scmp.lt.s32.totalorder %s1771_s18, 3  ;;  %s1773_s20 = smov [#allocation2]  }
   0x3   : > { %s180_s21 = sshll.u32 %s1773_s20, 4  ;;  %p1975_p3 = scmp.eq.s32.totalorder %s1813_s19, 0  ;;  %s181_s21 = int_to_ptr.vmem [resolvable:$true] %s180_s21 }
   0x4   : > { %p1817_p2 = pnand %p1376_p0, %p168_p1  ;;  %s1733_s26 = scalar_lea.hbm %s1970_s1, 4608 }
   0x5   : > { %p1734_p6 = scmp.ne.s32.totalorder %s1970_s1, %s1733_s26  ;;  %p1740_p10 = scmp.lt.u32.totalorder %s1733_s26, %s1970_s1 }
   0x6   : > { %s1977_s22 = scalar_select %p1817_p2, 1, 0 }
   0x7   : > { %p1664_p4 = pneg %p1817_p2 }
   0x9   : > { %p1826_p5 = pnand %p1975_p3, %p1664_p4 }
   0xb   : > { %p1735_p7 = pneg %p1826_p5 }
   0xd   : > { %p1736_p8 = pnand %p1735_p7, %p1734_p6 }
   0xf   : > { %p1737_p9 = pneg %p1736_p8 }
  0x11   : > { %p1742_p11 = pnand %p1740_p10, %p1737_p9 }
  0x13   : > { %1745 = shalt.err (!%p1742_p11)
}
  0x14   : > { %s1746_s6 = scalar_lea.vmem %s181_s21, 4608  ;;  %p1754_p1 = scmp.lt.s32.totalorder %s181_s21, %s181_s21 }
  0x15   : > { %p1747_p12 = scmp.ne.s32.totalorder %s181_s21, %s1746_s6  ;;  %p1755_p4 = scmp.lt.s32.totalorder %s1746_s6, %s1746_s6 }
  0x17   : > { %p1749_p13 = pnand %p1747_p12, %p1735_p7  ;;  %p1756_p3 = por %p1755_p4, %p1754_p1 }
  0x19   : > { %p1750_p0 = pneg %p1749_p13 }
  0x1b   : > { %p1757_p2 = pnand %p1756_p3, %p1750_p0 }
  0x1d   : > { %1760 = shalt.err (!%p1757_p2)
}
  0x1e   : > { %s1774_s7 = smov 64   ;;  %s1775_s8 = smov 4  }
  0x1f   : > { %1667 = dma.hbm_to_vmem [thread:$0]  (!%p1826_p5), %s1970_s1, 4608, %s181_s21, [#allocation3], %s1774_s7, %s1774_s7, %s1775_s8  }
  0x20   : > { %p1979_p6 = scmp.ne.s32.totalorder %s1977_s22, 0 }
  0x21   : > { %p1980_p8 = scmp.eq.s32.totalorder (!%p1979_p6), %s1813_s19, 0 }
  0x22   : > { %207 = sbr.rel (%p1979_p6) target bundleno = 364 (0x16c), region = 32 }
  0x29   : > { %1766 = dma.done.wait (%p1980_p8), [#allocation3], 4608   ;;  %p1981_p7 = pmov %p1980_p8 }
  0x2a   : > { %p243_p2 = scmp.lt.s32.totalorder %s1813_s19, 1  ;;  %v1776_v0 = vmov 0   ;;  %v1684_v1 = vld [vmem:[#allocation2 + $0x20] sm:$0xff]   ;;  %v1686_v3 = vld [vmem:[#allocation2 + $0x28] sm:$0xff]   ;;  %v1688_v5 = vld [vmem:[#allocation2 + $0x30] sm:$0xff]   ;;  %vm333_vm1 = vcmask 523264  }
  0x2b   : > { %1768 = vsyncadd (%p1981_p7), [#allocation3], 4294962688  ;;  %1682 = vset.pattern.permute.xlu0 %v1776_v0  ;;  %1683 = vset.pattern.permute.xlu1 %v1776_v0  ;;  %v1685_v2 = vld [vmem:[#allocation2 + $0x80] sm:$0xff]   ;;  %v1687_v4 = vld [vmem:[#allocation2 + $0x88] sm:$0xff]   ;;  %vm293_vm0 = vsmask.f32 7424 }
  0x2c   : > { %s1983_s19 = smov (!%p243_p2, %s1813_s19), 1  ;;  %1519 = vmatprep.subr.bf16.mxu1 %v1684_v1  ;;  %1567 = vmatprep.subr.bf16.mxu0 %v1685_v2  ;;  %v1689_v6 = vld [vmem:[#allocation2 + $0x90] sm:$0xff]   ;;  %v1690_v7 = vld [vmem:[#allocation2 + $0x38] sm:$0xff]   ;;  %vm679_vm2 = vsmask.f32 4352  ;;  %v1694_v23 = vld [vmem:[#allocation2] sm:$0xff]  }
  0x2d   : > { %s1658_s11 = smul.u32 24, %s1983_s19  ;;  %1520 = vmatpush3.bf16.msra.mxu1 %v1684_v1  ;;  %1568 = vmatpush3.bf16.msra.mxu0 %v1685_v2  ;;  %v1691_v8 = vld [vmem:[#allocation2 + $0x98] sm:$0xff]   ;;  %v1698_v24 = vld [vmem:[#allocation2 + $0xa0] sm:$0xff]   ;;  %v1699_v39 = vld [vmem:[#allocation2 + $0x8] sm:$0xff]   ;;  %vm479_vm3 = vcmask 1046528   ;;  %vm893_vm4 = vcmask 1045504  }
  0x2e   : > { %1521 = vmatprep.subr.bf16.mxu1 %v1686_v3  ;;  %1569 = vmatprep.subr.bf16.mxu0 %v1687_v4  ;;  %v1700_v43 = vld [vmem:[#allocation2 + $0xa8] sm:$0xff]   ;;  %v1701_v44 = vld [vmem:[#allocation2 + $0x10] sm:$0xff]   ;;  %v1703_v46 = vld [vmem:[#allocation2 + $0x18] sm:$0xff]   ;;  %vm581_vm5 = vcmask 1044480   ;;  %vm991_vm6 = vsmask.f32 5376 }
  0x2f   : > { %s1860_s14 = scalar_lea.vmem %s1969_s0, %s1658_s11  ;;  %v1702_v45 = vld [vmem:[#allocation2 + $0xb0] sm:$0xff]   ;;  %v1704_v47 = vld [vmem:[#allocation2 + $0xb8] sm:$0xff]   ;;  %v1705_v49 = vld [vmem:[#allocation2 + $0x40] sm:$0xff]   ;;  %s1659_s23 = smul.u32 12, %s1983_s19 }
  0x30   : > { %v262_v9 = vld [vmem:[%s1860_s14] sm:$0xf]  ;;  %v1864_v10 = vld [vmem:[%s1860_s14 + $0x4] sm:$0xf]  ;;  %v1867_v11 = vld [vmem:[%s1860_s14 + $0x8] sm:$0xf] }
  0x31   : > { %1522 = vmatpush3.bf16.msra.mxu1 %v1686_v3  ;;  %1570 = vmatpush3.bf16.msra.mxu0 %v1687_v4  ;;  %v273_v12 = vld [vmem:[%s1860_s14 + $0xc] sm:$0x1]  ;;  %v1385_v13 = vcombine.low %v262_v9, %v1864_v10  ;;  %v564_v15 = vld [vmem:[%s1860_s14] sm:$0x8]  ;;  %v1422_v41 = vcombine.low %v1864_v10, %v1867_v11  ;;  %v870_v51 = vld [vmem:[%s1860_s14 + $0x4] sm:$0xc]  ;;  %v1393_v58 = vcombine.low %v1867_v11, %v1867_v11  ;;  %s252_s26 = scalar_lea.vmem %s1972_s3, %s1659_s23 }
  0x32   : > { %1523 = vmatprep.subr.bf16.mxu1 %v1688_v5  ;;  %1571 = vmatprep.subr.bf16.mxu0 %v1689_v6  ;;  %v1872_v14 = vcombine.low %v1867_v11, %v273_v12  ;;  %v1876_v16 = vld [vmem:[%s1860_s14 + $0xc] sm:$0xf]  ;;  %v1879_v19 = vcombine.low %v564_v15, %v1864_v10  ;;  %v466_v48 = vld [vmem:[%s1860_s14] sm:$0xe]  ;;  %v1901_v52 = vld [vmem:[%s1860_s14 + $0x8] sm:$0xf] }
  0x33   : > { %v295_v17 = vshrl.u32 %v1385_v13, 16  ;;  %v297_v18 = vshll.u32 %v1385_v13, 16  ;;  %v1415_v20 = vcombine.low %v1867_v11, %v1876_v16  ;;  %v1400_v50 = vcombine.low %v466_v48, %v1864_v10  ;;  %v872_v53 = vld [vmem:[%s1860_s14 + $0xc] sm:$0xf]  ;;  %v873_v56 = vld [vmem:[%s1860_s14 + $0x10] sm:$0x3] }
  0x34   : > { %v302_v21 = vshll.u32 %v1872_v14, 16  ;;  %v306_v22 = vshrl.u32 %v1872_v14, 16  ;;  %v681_v26 = vshrl.u32 %v1879_v19, 16  ;;  %v684_v27 = vshll.u32 %v1879_v19, 16  ;;  %v978_v60 = vld [vmem:[%s1860_s14 + $0x10] sm:$0x7] }
  0x35   : > { %1524 = vmatpush3.bf16.msra.mxu1 %v1688_v5  ;;  %1572 = vmatpush3.bf16.msra.mxu0 %v1689_v6  ;;  %v299_v25 = vrot.slane %v297_v18, 1  ;;  %v689_v28 = vshrl.u32 %v1415_v20, 16  ;;  %v692_v30 = vshll.u32 %v1415_v20, 16  ;;  %v480_v54 = vrot.slane %v1400_v50, 1  ;;  %v1707_v61 = vld [vmem:[#allocation2 + $0xc0] sm:$0xff]   ;;  %v1709_v63 = vld [vmem:[#allocation2 + $0x48] sm:$0xff]  }
  0x36   : > { %1525 = vmatprep.subr.bf16.mxu1 %v1690_v7  ;;  %1573 = vmatprep.subr.bf16.mxu0 %v1691_v8  ;;  %v304_v29 = vrot.slane %v302_v21, 1  ;;  %v683_v32 = vrot.slane %v681_v26, 3  ;;  %v686_v33 = vrot.slane %v684_v27, 4  ;;  %v481_v55 = vrot.slane %v1872_v14, 1  ;;  %v1710_v3 = vld [vmem:[#allocation2 + $0xc8] sm:$0xff]   ;;  %v1711_v6 = vld [vmem:[#allocation2 + $0x50] sm:$0xff]  }
  0x37   : > { %v300_v31 = vor.u32 %v299_v25, %v295_v17  ;;  %v691_v34 = vrot.slane %v689_v28, 3  ;;  %v694_v36 = vrot.slane %v692_v30, 4  ;;  %v1430_v57 = vcombine.low %v870_v51, %v1901_v52  ;;  %v1713_v15 = vld [vmem:[#allocation2 + $0x58] sm:$0xff]   ;;  %v1203_v17 = vld [vmem:[%s1971_s2] sm:$0xff]  ;;  %v1205_v18 = vld [vmem:[%s1971_s2 + $0x10] sm:$0xff]  ;;  %s1383_s27 = sshll.u32 %s1983_s19, 3 }
  0x38   : > { %v308_v35 = vor.u32 %v306_v22, %v304_v29  ;;  %v687_v38 = vor.u32 %v686_v33, %v683_v32  ;;  %v1431_v59 = vcombine.low %v872_v53, %v873_v56  ;;  %v1423_v1 = vcombine.low %v1876_v16, %v1876_v16  ;;  %v1714_v20 = vld [vmem:[#allocation2 + $0xd8] sm:$0xff]   ;;  %v1716_v25 = vld [vmem:[#allocation2 + $0x60] sm:$0xff]   ;;  %1208 = vperm.xlu0 %1682, %v1203_v17   ;;  %v1204_v27 = vld [vmem:[%s1971_s2 + $0x8] sm:$0xff]  ;;  %s256_s30 = scalar_lea.vmem %s1973_s4, %s1383_s27  ;;  %s260_s8 = scalar_lea.vmem %s1974_s5, %s1383_s27 }
  0x39   : > { %1526 = vmatpush3.bf16.msra.mxu1 %v1690_v7  ;;  %1574 = vmatpush3.bf16.msra.mxu0 %v1691_v8  ;;  %v305_v37 = vsel %vm293_vm0, %v300_v31, %v304_v29  ;;  %v695_v40 = vor.u32 %v694_v36, %v691_v34  ;;  %v894_v62 = vrot.slane %v1430_v57, 2  ;;  %v482_v2 = vsel %vm479_vm3, %v480_v54, %v481_v55  ;;  %v1712_v7 = vld [vmem:[#allocation2 + $0xd0] sm:$0xff]   ;;  %v565_v8 = vld [vmem:[%s1860_s14 + $0xc] sm:$0x7]  ;;  %v1720_v28 = vld [vmem:[#allocation2 + $0xe0] sm:$0xff]  }
  0x3a   : > { %1531 = vmatprep.subr.bf16.mxu1 %v1694_v23  ;;  %1579 = vmatprep.subr.bf16.mxu0 %v1698_v24  ;;  %v1910_v0 = vrot.slane %v1431_v59, 2  ;;  %v1920_v5 = vcombine.low %v872_v53, %v978_v60  ;;  %v993_v9 = vshrl.u32 %v1430_v57, 16  ;;  %v996_v10 = vshll.u32 %v1430_v57, 16  ;;  %v1721_v31 = vld [vmem:[#allocation2 + $0x68] sm:$0xff]   ;;  %v1723_v34 = vld [vmem:[#allocation2 + $0x70] sm:$0xff]  }
  0x3b   : > { %1527 = vmatprep.mubr.msk.bf16.mxu1 %vm333_vm1, %v305_v37  ;;  %v696_v42 = vsel %vm679_vm2, %v687_v38, %v695_v40  ;;  %v1408_v16 = vcombine.low %v1867_v11, %v565_v8  ;;  %v582_v11 = vrot.slane %v1879_v19, 3  ;;  %1218 = vperm.xlu1 %1683, %v1205_v18   ;;  %v1722_v19 = vld [vmem:[#allocation2 + $0xe8] sm:$0xff]   ;;  %v1724_v14 = vld [vmem:[#allocation2 + $0xf0] sm:$0xff]   ;;  %v1090_v36 = vld [vmem:[%s1860_s14 + $0x4] sm:$0x8] }
  0x3c   : > { %1528 = vmatmul.mubr.msk.bf16.vlgmr.msra.gmra.mrb[0].mxu1 %vm333_vm1, %v308_v35  ;;  %1575 = vmatprep.mubr.msk.bf16.mxu0 %vm333_vm1, %v696_v42  ;;  %v896_v4 = vsel %vm893_vm4, %v894_v62, %v1910_v0  ;;  %v1001_v12 = vshrl.u32 %v1920_v5, 16  ;;  %v995_v21 = vrot.slane %v993_v9, 2  ;;  %v998_v22 = vrot.slane %v996_v10, 3  ;;  %v1725_v35 = vld [vmem:[#allocation2 + $0x78] sm:$0xff]   ;;  %v1729_v42 = vld [vmem:[#allocation2 + $0x108] sm:$0xff]  }
  0x3d   : > { %1532 = vmatpush3.bf16.msra.mxu1 %v1694_v23  ;;  %1539 = vmatprep.mubr.msk.bf16.mxu1 %vm333_vm1, %v1385_v13  ;;  %v1004_v13 = vshll.u32 %v1920_v5, 16  ;;  %v583_v26 = vrot.slane %v1408_v16, 3  ;;  %v1726_v37 = vld [vmem:[#allocation2 + $0xf8] sm:$0xff]   ;;  %v1445_v38 = vcombine.low %v1090_v36, %v1901_v52 }
  0x3e   : > { %1533 = vmatprep.subr.bf16.mxu1 %v1699_v39  ;;  %1576 = vmatmul.mubr.msk.bf16.vlgmr.msra.gmra.mrb[0].mxu0 %vm333_vm1, %v695_v40  ;;  %v1003_v23 = vrot.slane %v1001_v12, 2  ;;  %v999_v29 = vor.u32 %v998_v22, %v995_v21 }
  0x3f   : > { %1580 = vmatpush3.bf16.msra.mxu0 %v1698_v24  ;;  %1587 = vmatprep.mubr.msk.bf16.mxu0 %vm333_vm1, %v1422_v41  ;;  %v1006_v24 = vrot.slane %v1004_v13, 3  ;;  %v584_v32 = vsel %vm581_vm5, %v582_v11, %v583_v26  ;;  %v1103_v40 = vrot.slane %v1445_v38, 3  ;;  %v1104_v41 = vrot.slane %v1920_v5, 3 }
  0x40   : > { %1581 = vmatprep.subr.bf16.mxu0 %v1700_v43  ;;  %1213 = vperm.xlu0 %1682, %v1204_v27  }
  0x41   : > { %1534 = vmatpush3.bf16.msra.mxu1 %v1699_v39  ;;  %v1007_v30 = vor.u32 %v1006_v24, %v1003_v23  ;;  %v1728_v39 = vld [vmem:[#allocation2 + $0x100] sm:$0xff]  }
  0x42   : > { %1535 = vmatprep.subr.bf16.mxu1 %v1701_v44 }
  0x43   : > { %1582 = vmatpush3.bf16.msra.mxu0 %v1700_v43  ;;  %v1008_v33 = vsel %vm991_vm6, %v999_v29, %v1007_v30  ;;  %v1105_v43 = vsel %vm581_vm5, %v1103_v40, %v1104_v41 }
  0x44   : > { %1583 = vmatprep.subr.bf16.mxu0 %v1702_v45 }
  0x45   : > { %1536 = vmatpush3.bf16.msra.mxu1 %v1701_v44  ;;  %v1730_v44 = vld [vmem:[#allocation2 + $0x110] sm:$0xff]  }
  0x46   : > { %1537 = vmatprep.subr.bf16.mxu1 %v1703_v46 }
  0x47   : > { %1584 = vmatpush3.bf16.msra.mxu0 %v1702_v45  ;;  %v1731_v45 = vld [vmem:[#allocation2 + $0x118] sm:$0xff]  }
  0x48   : > { %1585 = vmatprep.subr.bf16.mxu0 %v1704_v47 }
  0x49   : > { %1538 = vmatpush3.bf16.msra.mxu1 %v1703_v46 }
  0x4a   : > { %1543 = vmatprep.subr.bf16.mxu1 %v1705_v49 }
  0x4b   : > { %1586 = vmatpush3.bf16.msra.mxu0 %v1704_v47 }
  0x4c   : > { %1540 = vmatmul.mubr.msk.bf16.vlgmr.msra.gmra.mrb[0].mxu1 %vm333_vm1, %v1393_v58  ;;  %1591 = vmatprep.subr.bf16.mxu0 %v1707_v61 }
  0x4d   : > { %1544 = vmatpush3.bf16.msra.mxu1 %v1705_v49  ;;  %1551 = vmatprep.mubr.msk.bf16.mxu1 %vm333_vm1, %v482_v2 }
  0x4e   : > { %1545 = vmatprep.subr.bf16.mxu1 %v1709_v63  ;;  %1588 = vmatmul.mubr.msk.bf16.vlgmr.msra.gmra.mrb[0].mxu0 %vm333_vm1, %v1423_v1 }
  0x4f   : > { %1592 = vmatpush3.bf16.msra.mxu0 %v1707_v61  ;;  %1599 = vmatprep.mubr.msk.bf16.mxu0 %vm333_vm1, %v896_v4 }
  0x50   : > { %1593 = vmatprep.subr.bf16.mxu0 %v1710_v3 }
  0x51   : > { %1546 = vmatpush3.bf16.msra.mxu1 %v1709_v63 }
  0x52   : > { %1547 = vmatprep.subr.bf16.mxu1 %v1711_v6 }
  0x53   : > { %1594 = vmatpush3.bf16.msra.mxu0 %v1710_v3 }
  0x54   : > { %1595 = vmatprep.subr.bf16.mxu0 %v1712_v7 }
  0x55   : > { %1548 = vmatpush3.bf16.msra.mxu1 %v1711_v6 }
  0x56   : > { %1549 = vmatprep.subr.bf16.mxu1 %v1713_v15 }
  0x57   : > { %1596 = vmatpush3.bf16.msra.mxu0 %v1712_v7 }
  0x58   : > { %1597 = vmatprep.subr.bf16.mxu0 %v1714_v20 }
  0x59   : > { %1550 = vmatpush3.bf16.msra.mxu1 %v1713_v15 }
  0x5a   : > { %1555 = vmatprep.subr.bf16.mxu1 %v1716_v25 }
  0x5b   : > { %1598 = vmatpush3.bf16.msra.mxu0 %v1714_v20 }
  0x5c   : > { %1552 = vmatmul.mubr.msk.bf16.vlgmr.msra.gmra.mrb[0].mxu1 %vm333_vm1, %v481_v55  ;;  %1603 = vmatprep.subr.bf16.mxu0 %v1720_v28 }
  0x5d   : > { %1556 = vmatpush3.bf16.msra.mxu1 %v1716_v25  ;;  %1563 = vmatprep.mubr.msk.bf16.mxu1 %vm333_vm1, %v584_v32 }
  0x5e   : > { %1557 = vmatprep.subr.bf16.mxu1 %v1721_v31  ;;  %1600 = vmatmul.mubr.msk.bf16.vlgmr.msra.gmra.mrb[0].mxu0 %vm333_vm1, %v1910_v0 }
  0x5f   : > { %1604 = vmatpush3.bf16.msra.mxu0 %v1720_v28  ;;  %1611 = vmatprep.mubr.msk.bf16.mxu0 %vm333_vm1, %v1008_v33 }
  0x60   : > { %1605 = vmatprep.subr.bf16.mxu0 %v1722_v19 }
  0x61   : > { %1558 = vmatpush3.bf16.msra.mxu1 %v1721_v31 }
  0x62   : > { %1559 = vmatprep.subr.bf16.mxu1 %v1723_v34 }
  0x63   : > { %1606 = vmatpush3.bf16.msra.mxu0 %v1722_v19 }
  0x64   : > { %1607 = vmatprep.subr.bf16.mxu0 %v1724_v14 }
  0x65   : > { %1560 = vmatpush3.bf16.msra.mxu1 %v1723_v34 }
  0x66   : > { %1561 = vmatprep.subr.bf16.mxu1 %v1725_v35 }
  0x67   : > { %1608 = vmatpush3.bf16.msra.mxu0 %v1724_v14 }
  0x68   : > { %1609 = vmatprep.subr.bf16.mxu0 %v1726_v37 }
  0x69   : > { %1562 = vmatpush3.bf16.msra.mxu1 %v1725_v35 }
  0x6b   : > { %1610 = vmatpush3.bf16.msra.mxu0 %v1726_v37 }
  0x6c   : > { %1564 = vmatmul.mubr.msk.bf16.vlgmr.msra.gmra.mrb[0].mxu1 %vm333_vm1, %v583_v26  ;;  %1615 = vmatprep.subr.bf16.mxu0 %v1728_v39 }
  0x6e   : > { %1612 = vmatmul.mubr.msk.bf16.vlgmr.msra.gmra.mrb[0].mxu0 %vm333_vm1, %v1007_v30 }
  0x6f   : > { %1616 = vmatpush3.bf16.msra.mxu0 %v1728_v39  ;;  %1623 = vmatprep.mubr.msk.bf16.mxu0 %vm333_vm1, %v1105_v43 }
  0x70   : > { %1617 = vmatprep.subr.bf16.mxu0 %v1729_v42 }
  0x73   : > { %1618 = vmatpush3.bf16.msra.mxu0 %v1729_v42 }
  0x74   : > { %1619 = vmatprep.subr.bf16.mxu0 %v1730_v44 }
  0x77   : > { %1620 = vmatpush3.bf16.msra.mxu0 %v1730_v44 }
  0x78   : > { %1621 = vmatprep.subr.bf16.mxu0 %v1731_v45 }
  0x7b   : > { %1622 = vmatpush3.bf16.msra.mxu0 %v1731_v45 }
  0x7e   : > { %1624 = vmatmul.mubr.msk.bf16.vlgmr.msra.gmra.mrb[0].mxu0 %vm333_vm1, %v1104_v41 }
  0xb7   : > { %v1209_v50 = vpop.permute.xlu0 %1208 }
  0xba   : > { %v1219_v57 = vpop.permute.xlu1 %1218 }
  0xbf   : > { %v1214_v61 = vpop.permute.xlu0 %1213 }
 0x13f   : > { %v1565_v46 = vpop.f32.mrb[0].mxu1 }
 0x140   : > { %v649_v47 = vpop.f32.mrb[1].mxu1 }
 0x141   : > { %v1566_v48 = vpop.f32.mrb[2].mxu1 }
 0x142   : > { %v652_v49 = vpop.f32.mrb[3].mxu1 }
 0x151   : > { %v1625_v51 = vpop.f32.mrb[0].mxu0 }
 0x152   : > { %v1627_v52 = vadd.f32 %v1625_v51, %v1565_v46  ;;  %v1170_v53 = vpop.f32.mrb[1].mxu0 }
 0x153   : > { %v1628_v54 = vadd.f32 %v1170_v53, %v649_v47  ;;  %v1626_v55 = vpop.f32.mrb[2].mxu0 }
 0x154   : > { %v1459_v56 = vpack.c.bf16 %v1627_v52, %v1627_v52  ;;  %v1173_v58 = vpop.f32.mrb[3].mxu0  ;;  %v1223_v62 = vmul.f32 %v1627_v52, %v1219_v57 }
 0x155   : > { %v1221_v59 = vmul.f32 %v1628_v54, %v1209_v50  ;;  %v1629_v60 = vadd.f32 %v1173_v58, %v652_v49 }
 0x156   : > { %1202 = vst [vmem:[%s252_s26 + $0x8] sm:$0xf] %v1459_v56  ;;  %v1234_v4 = vmul.f32 %v1627_v52, %v1223_v62 }
 0x157   : > { %v1463_v63 = vpack.c.bf16 %v1629_v60, %v1628_v54  ;;  %v1222_v0 = vmul.f32 %v1629_v60, %v1214_v61  ;;  %v1232_v1 = vmul.f32 %v1628_v54, %v1221_v59 }
 0x159   : > { %1464 = vst [vmem:[%s252_s26] sm:$0xff] %v1463_v63   ;;  %v1224_v2 = vadd.f32 %v1222_v0, %v1221_v59  ;;  %v1233_v3 = vmul.f32 %v1629_v60, %v1222_v0 }
 0x15b   : > { %v1225_v5 = vadd.f32 %v1224_v2, %v1223_v62  ;;  %v1235_v6 = vadd.f32 %v1233_v3, %v1232_v1 }
 0x15d   : > { %v1226_v7 = vrot.slane %v1225_v5, 4  ;;  %v1236_v8 = vadd.f32 %v1235_v6, %v1234_v4 }
 0x15f   : > { %v1227_v9 = vadd.f32 %v1226_v7, %v1225_v5  ;;  %v1237_v10 = vrot.slane %v1236_v8, 4 }
 0x161   : > { %v1228_v12 = vrot.slane %v1227_v9, 2  ;;  %v1238_v13 = vadd.f32 %v1237_v10, %v1236_v8 }
 0x163   : > { %v1229_v15 = vadd.f32 %v1228_v12, %v1227_v9  ;;  %v1239_v16 = vrot.slane %v1238_v13, 2 }
 0x165   : > { %v1230_v17 = vrot.slane %v1229_v15, 1  ;;  %v1240_v18 = vadd.f32 %v1239_v16, %v1238_v13 }
 0x167   : > { %v1231_v20 = vadd.f32 %v1230_v17, %v1229_v15  ;;  %v1241_v21 = vrot.slane %v1240_v18, 1 }
 0x169   : > { %v1242_v22 = vadd.f32 %v1241_v21, %v1240_v18  ;;  %1243 = vst [vmem:[%s256_s30] sm:$0xff] %v1231_v20 }
 0x16b   : > { %1244 = vst [vmem:[%s260_s8] sm:$0xff] %v1242_v22 }
 0x16c PF: > { %s17_s18 = sadd.s32 1, %s1771_s18  }
 0x16d   : > { %p14_p3 = scmp.ge.s32.totalorder %s17_s18, 4  }
 0x16f   :  { %16 = sbr.rel (!%p14_p3) target bundleno = 1 (0x1), region = 99 }
 0x176   :  { %1294 = vsyncpa [#allocation3], 1 }
 0x177   :  { %1296 = vsyncpa [#allocation3 + $0x1], 1 }

// kernel: generator_forward.7
= control target key start
LH: loop header
LB: loop body
LE: loop exit
PB: predicated region body
PF: predicated region fallthrough
CT: control target
= control target key end

     0   :  { %11 = vsyncpa [#allocation3], 0  ;;  %s2637_s18 = smov 0   ;;  %s3138_s0 = inlined_call_operand.vmem [shape: bf16[2,110,32], index: 0, kind: input, shape index: {}]   ;;  %s3139_s1 = inlined_call_operand.hbm [shape: bf16[9,32,128], index: 1, kind: input, shape index: {}]   ;;  %s3140_s2 = inlined_call_operand.vmem [shape: f32[80,1], index: 2, kind: input, shape index: {}]   ;;  %s3141_s3 = inlined_call_operand.vmem [shape: bf16[2,80,128], index: 3, kind: output, shape index: {0}]   ;;  %s3142_s4 = inlined_call_operand.vmem [shape: f32[16,128], index: 4, kind: output, shape index: {1}]   ;;  %s3143_s5 = inlined_call_operand.vmem [shape: f32[16,128], index: 5, kind: output, shape index: {2}]  }
   0x1 LB: > { %s2643_s19 = sadd.s32 4294967295, %s2599_s18   ;;  %p1913_p0 = scmp.ge.s32.totalorder %s2599_s18, 1  ;;  %s2599_s18 = sphi %s2637_s18, %s17_s18  }
   0x2   : > { %p168_p1 = scmp.lt.s32.totalorder %s2599_s18, 3  ;;  %s2601_s20 = smov [#allocation2]  }
   0x3   : > { %s180_s21 = sshll.u32 %s2601_s20, 4  ;;  %p3144_p3 = scmp.eq.s32.totalorder %s2643_s19, 0  ;;  %s181_s21 = int_to_ptr.vmem [resolvable:$true] %s180_s21 }
   0x4   : > { %p2647_p2 = pnand %p1913_p0, %p168_p1  ;;  %s2561_s26 = scalar_lea.hbm %s3139_s1, 2304 }
   0x5   : > { %p2562_p6 = scmp.ne.s32.totalorder %s3139_s1, %s2561_s26  ;;  %p2568_p10 = scmp.lt.u32.totalorder %s2561_s26, %s3139_s1 }
   0x6   : > { %s3146_s22 = scalar_select %p2647_p2, 1, 0 }
   0x7   : > { %p2498_p4 = pneg %p2647_p2 }
   0x9   : > { %p2656_p5 = pnand %p3144_p3, %p2498_p4 }
   0xb   : > { %p2563_p7 = pneg %p2656_p5 }
   0xd   : > { %p2564_p8 = pnand %p2563_p7, %p2562_p6 }
   0xf   : > { %p2565_p9 = pneg %p2564_p8 }
  0x11   : > { %p2570_p11 = pnand %p2568_p10, %p2565_p9 }
  0x13   : > { %2573 = shalt.err (!%p2570_p11)
}
  0x14   : > { %s2574_s6 = scalar_lea.vmem %s181_s21, 2304  ;;  %p2582_p1 = scmp.lt.s32.totalorder %s181_s21, %s181_s21 }
  0x15   : > { %p2575_p12 = scmp.ne.s32.totalorder %s181_s21, %s2574_s6  ;;  %p2583_p4 = scmp.lt.s32.totalorder %s2574_s6, %s2574_s6 }
  0x17   : > { %p2577_p13 = pnand %p2575_p12, %p2563_p7  ;;  %p2584_p3 = por %p2583_p4, %p2582_p1 }
  0x19   : > { %p2578_p0 = pneg %p2577_p13 }
  0x1b   : > { %p2585_p2 = pnand %p2584_p3, %p2578_p0 }
  0x1d   : > { %2588 = shalt.err (!%p2585_p2)
}
  0x1e   : > { %s2602_s7 = smov 64   ;;  %s2603_s8 = smov 4  }
  0x1f   : > { %2501 = dma.hbm_to_vmem [thread:$0]  (!%p2656_p5), %s3139_s1, 2304, %s181_s21, [#allocation3], %s2602_s7, %s2602_s7, %s2603_s8  }
  0x20   : > { %p3148_p6 = scmp.ne.s32.totalorder %s3146_s22, 0 }
  0x21   : > { %p3149_p8 = scmp.eq.s32.totalorder (!%p3148_p6), %s2643_s19, 0 }
  0x22   : > { %207 = sbr.rel (%p3148_p6) target bundleno = 471 (0x1d7), region = 32 }
  0x29   : > { %2594 = dma.done.wait (%p3149_p8), [#allocation3], 2304   ;;  %p3150_p7 = pmov %p3149_p8 }
  0x2a   : > { %p243_p2 = scmp.lt.s32.totalorder %s2643_s19, 1  ;;  %v2604_v0 = vmov 0.0   ;;  %vm2605_vm0 = vmmov 0   ;;  %v2520_v1 = vld [vmem:[#allocation2 + $0x10] sm:$0xff]   ;;  %v2693_v2 = vld [vmem:[#allocation2 + $0x40] sm:$0xff]   ;;  %v2522_v3 = vld [vmem:[#allocation2 + $0x18] sm:$0xff]  }
  0x2b   : > { %2596 = vsyncadd (%p3150_p7), [#allocation3], 4294964992  ;;  %2122 = vmatprep.subr.bf16.mxu1 %v2604_v0  ;;  %2218 = vmatprep.subr.bf16.mxu0 %v2604_v0  ;;  %vm310_vm1 = vsmask.f32 7424  ;;  %v2702_v4 = vld [vmem:[#allocation2 + $0x48] sm:$0xff]   ;;  %vm367_vm3 = vcmask 261120  }
  0x2c   : > { %2126 = vmatprep.mubr.msk.bf16.mxu1 %vm2605_vm0, %v2604_v0  ;;  %2222 = vmatprep.mubr.msk.bf16.mxu0 %vm2605_vm0, %v2604_v0  ;;  %s3152_s19 = smov (!%p243_p2, %s2643_s19), 1  ;;  %vm856_vm2 = vsmask.f32 6400  ;;  %v2531_v35 = vld [vmem:[#allocation2] sm:$0xff]   ;;  %v2528_v37 = vld [vmem:[#allocation2 + $0x50] sm:$0xff]   ;;  %v2532_v46 = vld [vmem:[#allocation2 + $0x58] sm:$0xff]  }
  0x2d   : > { %s2492_s11 = smul.u32 56, %s3152_s19  ;;  %2123 = vmatpush3.bf16.msra.mxu1 %v2520_v1  ;;  %2219 = vmatpush3.bf16.msra.mxu0 %v2693_v2  ;;  %v2538_v52 = vld [vmem:[#allocation2 + $0x8] sm:$0xff]   ;;  %vm560_vm4 = vcmask 1046528   ;;  %vm1029_vm5 = vcmask 1045504   ;;  %vm1498_vm6 = vcmask 1044480   ;;  %s1920_s16 = sshll.u32 %s3152_s19, 3 }
  0x2e   : > { %2124 = vmatprep.subr.bf16.mxu1 %v2604_v0  ;;  %2220 = vmatprep.subr.bf16.mxu0 %v2604_v0  ;;  %vm1325_vm7 = vsmask.f32 5376  ;;  %s2493_s12 = smul.u32 40, %s3152_s19  ;;  %s256_s21 = scalar_lea.vmem %s3142_s4, %s1920_s16 }
  0x2f   : > { %s2698_s14 = scalar_lea.vmem %s3138_s0, %s2492_s11  ;;  %s260_s24 = scalar_lea.vmem %s3143_s5, %s1920_s16 }
  0x30   : > { %v262_v5 = vld [vmem:[%s2698_s14] sm:$0xf]  ;;  %v2707_v6 = vld [vmem:[%s2698_s14 + $0x4] sm:$0xf]  ;;  %v2713_v8 = vld [vmem:[%s2698_s14 + $0x8] sm:$0xff]   ;;  %s3121_s15 = scalar_lea.vmem %s3141_s3, %s2493_s12 }
  0x31   : > { %v2710_v7 = vcombine.low %v262_v5, %v2707_v6  ;;  %v682_v9 = vld [vmem:[%s2698_s14 + $0x4] sm:$0xe]  ;;  %2125 = vmatpush3.bf16.msra.mxu1 %v2522_v3  ;;  %v2717_v10 = vld [vmem:[%s2698_s14 + $0x8] sm:$0xf]  ;;  %2221 = vmatpush3.bf16.msra.mxu0 %v2702_v4  ;;  %v319_v13 = vshll.u32 %v2713_v8, 16  ;;  %v2727_v15 = vld [vmem:[%s2698_s14 + $0xc] sm:$0xff]  }
  0x32   : > { %v2724_v14 = vcombine.low %v682_v9, %v2717_v10  ;;  %2146 = vmatprep.subr.bf16.mxu1 %v2604_v0  ;;  %2242 = vmatprep.subr.bf16.mxu0 %v2604_v0  ;;  %v323_v16 = vshrl.u32 %v2713_v8, 16  ;;  %v866_v21 = vshrl.u32 %v2727_v15, 16  ;;  %v869_v22 = vshll.u32 %v2727_v15, 16  ;;  %v2737_v23 = vld [vmem:[%s2698_s14 + $0x10] sm:$0xff]   ;;  %v2748_v39 = vld [vmem:[%s2698_s14 + $0x18] sm:$0xff]   ;;  %v2769_v57 = vld [vmem:[%s2698_s14 + $0x20] sm:$0xff]  }
  0x33   : > { %v312_v11 = vshrl.u32 %v2710_v7, 16  ;;  %v314_v12 = vshll.u32 %v2710_v7, 16  ;;  %v321_v18 = vrot.slane %v319_v13, 1  ;;  %v2740_v24 = vld [vmem:[%s2698_s14 + $0x14] sm:$0xff]   ;;  %v327_v30 = vshll.u32 %v2737_v23, 16  ;;  %v2754_v44 = vld [vmem:[%s2698_s14 + $0x1c] sm:$0xff]  }
  0x34   : > { %v858_v19 = vshrl.u32 %v2724_v14, 16  ;;  %v861_v20 = vshll.u32 %v2724_v14, 16  ;;  %v868_v28 = vrot.slane %v866_v21, 1  ;;  %v871_v29 = vrot.slane %v869_v22, 2  ;;  %v1020_v60 = vld [vmem:[%s2698_s14 + $0x4] sm:$0xc] }
  0x35   : > { %v316_v17 = vrot.slane %v314_v12, 1  ;;  %v875_v31 = vshrl.u32 %v2740_v24, 16  ;;  %v878_v34 = vshll.u32 %v2740_v24, 16  ;;  %v325_v40 = vor.u32 %v323_v16, %v321_v18  ;;  %v2785_v1 = vld [vmem:[%s2698_s14 + $0x28] ss:$0 sps:$4 sm:$0x11]  }
  0x36   : > { %v860_v26 = vrot.slane %v858_v19, 1  ;;  %v863_v27 = vrot.slane %v861_v20, 2  ;;  %v872_v36 = vor.u32 %v871_v29, %v868_v28  ;;  %v329_v41 = vrot.slane %v327_v30, 1  ;;  %v551_v16 = vld [vmem:[%s2698_s14] sm:$0xe] }
  0x37   : > { %v317_v25 = vor.u32 %v316_v17, %v312_v11  ;;  %v877_v38 = vrot.slane %v875_v31, 1  ;;  %v880_v42 = vrot.slane %v878_v34, 2  ;;  %v335_v47 = vshll.u32 %v2748_v39, 16  ;;  %v2537_v34 = vld [vmem:[#allocation2 + $0x60] sm:$0xff]  }
  0x38   : > { %v864_v33 = vor.u32 %v863_v27, %v860_v26  ;;  %v884_v48 = vshrl.u32 %v2754_v44, 16  ;;  %v887_v49 = vshll.u32 %v2754_v44, 16  ;;  %v330_v50 = vsel %vm310_vm1, %v325_v40, %v329_v41  ;;  %v2816_v27 = vld [vmem:[%s2698_s14 + $0x28] sm:$0xff]  }
  0x39   : > { %v322_v32 = vsel %vm310_vm1, %v317_v25, %v321_v18  ;;  %v881_v45 = vor.u32 %v880_v42, %v877_v38  ;;  %v331_v51 = vshrl.u32 %v2737_v23, 16  ;;  %v337_v54 = vrot.slane %v335_v47, 1  ;;  %v2799_v18 = vld [vmem:[%s2698_s14 + $0x20] sm:$0xff]  }
  0x3a   : > { %2127 = vmatmul.mubr.msk.bf16.vlgmr.msra.gmra.mrb[0].mxu1 %vm367_vm3, %v322_v32  ;;  %v873_v43 = vsel %vm856_vm2, %v864_v33, %v872_v36  ;;  %v886_v55 = vrot.slane %v884_v48, 1  ;;  %v889_v56 = vrot.slane %v887_v49, 2  ;;  %v339_v62 = vshrl.u32 %v2748_v39, 16  ;;  %v2554_v32 = vld [vmem:[%s2698_s14 + $0x30] ss:$0 sps:$4 sm:$0x33]  }
  0x3b   : > { %2130 = vmatprep.mubr.msk.bf16.mxu1 %vm2605_vm0, %v2604_v0  ;;  %2147 = vmatpush3.bf16.msra.mxu1 %v2531_v35  ;;  %v882_v53 = vsel %vm856_vm2, %v872_v36, %v881_v45  ;;  %v333_v58 = vor.u32 %v331_v51, %v329_v41  ;;  %v343_v63 = vshll.u32 %v2769_v57, 16  ;;  %v1971_v3 = vcombine.low %v1020_v60, %v2717_v10  ;;  %v2851_v48 = vld [vmem:[%s2698_s14 + $0x24] sm:$0xff]   ;;  %v2560_v51 = vld [vmem:[%s2698_s14 + $0x2c] ss:$0 sps:$4 sm:$0x11]  }
  0x3c   : > { %2148 = vmatprep.subr.bf16.mxu1 %v2604_v0  ;;  %2223 = vmatmul.mubr.msk.bf16.vlgmr.msra.gmra.mrb[0].mxu0 %vm367_vm3, %v873_v43  ;;  %v2778_v59 = vor.u32 %v889_v56, %v886_v55  ;;  %v562_v9 = vrot.slane %v2713_v8, 1  ;;  %v564_v11 = vrot.slane %v2737_v23, 1  ;;  %v341_v12 = vor.u32 %v339_v62, %v337_v54 }
  0x3d   : > { %2243 = vmatpush3.bf16.msra.mxu0 %v2528_v37  ;;  %2226 = vmatprep.mubr.msk.bf16.mxu0 %vm2605_vm0, %v2604_v0  ;;  %v338_v61 = vsel %vm310_vm1, %v333_v58, %v337_v54  ;;  %v345_v13 = vrot.slane %v343_v63, 1  ;;  %v566_v17 = vrot.slane %v2748_v39, 1  ;;  %v1942_v10 = vcombine.low %v551_v16, %v2707_v6  ;;  %v2875_v58 = vld [vmem:[%s2698_s14 + $0x18] sm:$0xff]  }
  0x3e   : > { %2244 = vmatprep.subr.bf16.mxu0 %v2604_v0  ;;  %v891_v5 = vsel %vm856_vm2, %v881_v45, %v2778_v59  ;;  %v2802_v19 = vsel %vm560_vm4, %v562_v9, %v564_v11  ;;  %v1030_v20 = vrot.slane %v1971_v3, 2  ;;  %v1031_v21 = vrot.slane %v2727_v15, 2  ;;  %v2540_v45 = vld [vmem:[#allocation2 + $0x68] sm:$0xff]  }
  0x3f   : > { %2149 = vmatpush3.bf16.msra.mxu1 %v2538_v52  ;;  %v2809_v22 = vsel %vm560_vm4, %v564_v11, %v566_v17  ;;  %v347_v6 = vshrl.u32 %v2769_v57, 16  ;;  %v351_v25 = vshll.u32 %v2785_v1, 16  ;;  %v561_v26 = vrot.slane %v1942_v10, 1 }
  0x40   : > { %2170 = vmatprep.subr.bf16.mxu1 %v2604_v0  ;;  %v346_v28 = vsel %vm310_vm1, %v341_v12, %v345_v13  ;;  %v1200_v30 = vrot.slane %v2799_v18, 2  ;;  %v1202_v31 = vrot.slane %v2816_v27, 2  ;;  %v1032_v33 = vsel %vm1029_vm5, %v1030_v20, %v1031_v21  ;;  %v2542_v12 = vld [vmem:[#allocation2 + $0x20] sm:$0xff]  }
  0x41   : > { %2245 = vmatpush3.bf16.msra.mxu0 %v2532_v46  ;;  %v2820_v29 = vsel %vm560_vm4, %v561_v26, %v562_v9  ;;  %v1204_v36 = vrot.slane %v2554_v32, 2  ;;  %v349_v37 = vor.u32 %v347_v6, %v345_v13  ;;  %v353_v38 = vrot.slane %v351_v25, 1 }
  0x42   : > { %2131 = vmatmul.mubr.msk.bf16.gmra.mrb[4].mxu1 %vm367_vm3, %v330_v50  ;;  %2266 = vmatprep.subr.bf16.mxu0 %v2604_v0  ;;  %v2830_v35 = vsel %vm1029_vm5, %v1200_v30, %v1202_v31  ;;  %v726_v41 = vrot.slane %v2724_v14, 1  ;;  %v727_v42 = vrot.slane %v2727_v15, 1  ;;  %v1033_v43 = vrot.slane %v2740_v24, 2  ;;  %v1489_v15 = vld [vmem:[%s2698_s14 + $0x8] sm:$0x8] }
  0x43   : > { %2134 = vmatprep.mubr.msk.bf16.mxu1 %vm2605_vm0, %v2604_v0  ;;  %v2835_v40 = vsel %vm1029_vm5, %v1202_v31, %v1204_v36  ;;  %v354_v46 = vsel %vm310_vm1, %v349_v37, %v353_v38  ;;  %v729_v14 = vrot.slane %v2740_v24, 1  ;;  %v731_v50 = vrot.slane %v2754_v44, 1  ;;  %v2866_v24 = vld [vmem:[%s2698_s14 + $0x10] sm:$0xff]  }
  0x44   : > { %2227 = vmatmul.mubr.msk.bf16.gmra.mrb[4].mxu0 %vm367_vm3, %v882_v53  ;;  %v2846_v47 = vsel %vm560_vm4, %v726_v41, %v727_v42  ;;  %v1034_v52 = vsel %vm1029_vm5, %v1031_v21, %v1033_v43  ;;  %v2861_v53 = vld [vmem:[%s2698_s14 + $0xc] sm:$0xf]  ;;  %v733_v55 = vrot.slane %v2851_v48, 1  ;;  %v1500_v62 = vrot.slane %v2866_v24, 3 }
  0x45   : > { %2230 = vmatprep.mubr.msk.bf16.mxu0 %vm2605_vm0, %v2604_v0  ;;  %v2854_v49 = vsel %vm560_vm4, %v727_v42, %v729_v14  ;;  %v2870_v54 = vsel %vm560_vm4, %v729_v14, %v731_v50  ;;  %v2000_v56 = vcombine.low %v1489_v15, %v2861_v53  ;;  %v735_v63 = vrot.slane %v2560_v51, 1  ;;  %v2910_v38 = vld [vmem:[%s2698_s14 + $0x30] ss:$0 sps:$4 sm:$0x77]   ;;  %v1670_v15 = vld [vmem:[%s3140_s2] sm:$0xff] }
  0x46   : > { %v2879_v60 = vsel %vm560_vm4, %v731_v50, %v733_v55  ;;  %v1035_v3 = vrot.slane %v2754_v44, 2  ;;  %v1502_v9 = vrot.slane %v2875_v58, 3  ;;  %v893_v11 = vshrl.u32 %v2851_v48, 16  ;;  %v1151_v51 = vld [vmem:[%s2698_s14 + $0x8] sm:$0xc] }
  0x47   : > { %v2892_v16 = vsel %vm560_vm4, %v733_v55, %v735_v63  ;;  %v896_v10 = vshll.u32 %v2851_v48, 16  ;;  %v1504_v20 = vrot.slane %v2799_v18, 3  ;;  %v1673_v55 = vld [vmem:[%s3140_s2 + $0x18] sm:$0xff]  ;;  %v1675_v63 = vld [vmem:[%s3140_s2 + $0x28] sm:$0xff] }
  0x48   : > { %v2897_v21 = vsel %vm1498_vm6, %v1500_v62, %v1502_v9  ;;  %v895_v44 = vrot.slane %v893_v11, 1  ;;  %v1036_v31 = vsel %vm1029_vm5, %v1033_v43, %v1035_v3  ;;  %v1037_v43 = vrot.slane %v2851_v48, 2  ;;  %v1672_v48 = vld [vmem:[%s3140_s2 + $0x10] sm:$0xff] }
  0x49   : > { %v898_v25 = vrot.slane %v896_v10, 2  ;;  %v2900_v26 = vsel %vm1498_vm6, %v1502_v9, %v1504_v20  ;;  %v2546_v11 = vld [vmem:[#allocation2 + $0x70] sm:$0xff]   ;;  %v1679_v10 = vld [vmem:[%s3140_s2 + $0x48] sm:$0xff] }
  0x4a   : > { %2135 = vmatmul.mubr.msk.bf16.gmra.mrb[8].mxu1 %vm367_vm3, %v338_v61  ;;  %v1499_v61 = vrot.slane %v2000_v56, 3 }
  0x4b   : > { %2138 = vmatprep.mubr.msk.bf16.mxu1 %vm2605_vm0, %v2604_v0  ;;  %v899_v36 = vor.u32 %v898_v25, %v895_v44  ;;  %v2551_v44 = vld [vmem:[#allocation2 + $0x78] sm:$0xff]   ;;  %v2553_v25 = vld [vmem:[#allocation2 + $0x30] sm:$0xff]  }
  0x4c   : > { %2231 = vmatmul.mubr.msk.bf16.gmra.mrb[8].mxu0 %vm367_vm3, %v891_v5  ;;  %v2543_v5 = vld [vmem:[%s2698_s14 + $0x2c] ss:$0 sps:$4 sm:$0x33]   ;;  %v2889_v13 = vsel %vm1498_vm6, %v1499_v61, %v1500_v62  ;;  %v1979_v61 = vcombine.low %v1151_v51, %v2861_v53  ;;  %v1674_v62 = vld [vmem:[%s3140_s2 + $0x20] sm:$0xff]  ;;  %v1196_v53 = vrot.slane %v2866_v24, 2 }
  0x4d   : > { %2246 = vmatprep.mubr.msk.bf16.mxu0 %vm2605_vm0, %v2604_v0  ;;  %v902_v6 = vshrl.u32 %v2543_v5, 16  ;;  %v1039_v50 = vrot.slane %v2543_v5, 2 }
  0x4f   : > { %v904_v32 = vrot.slane %v902_v6, 1  ;;  %v1040_v56 = vsel %vm1029_vm5, %v1037_v43, %v1039_v50  ;;  %v2557_v50 = vld [vmem:[#allocation2 + $0x88] sm:$0xff]  }
  0x52   : > { %2139 = vmatmul.mubr.msk.bf16.gmra.mrb[12].mxu1 %vm367_vm3, %v346_v28  ;;  %v905_v28 = vshll.u32 %v2543_v5, 16  ;;  %v1677_v5 = vld [vmem:[%s3140_s2 + $0x38] sm:$0xff] }
  0x53   : > { %2142 = vmatprep.mubr.msk.bf16.mxu1 %vm2605_vm0, %v2604_v0 }
  0x54   : > { %2247 = vmatmul.mubr.msk.bf16.vlgmr.msra.gmra.mrb[0].mxu0 %vm367_vm3, %v1032_v33  ;;  %v1506_v33 = vrot.slane %v2816_v27, 3  ;;  %v907_v37 = vrot.slane %v905_v28, 2 }
  0x55   : > { %2267 = vmatpush3.bf16.msra.mxu0 %v2537_v34  ;;  %2250 = vmatprep.mubr.msk.bf16.mxu0 %vm2605_vm0, %v2604_v0  ;;  %v2547_v34 = vld [vmem:[#allocation2 + $0x28] sm:$0xff]  }
  0x56   : > { %2268 = vmatprep.subr.bf16.mxu0 %v2604_v0  ;;  %v2913_v41 = vsel %vm1498_vm6, %v1504_v20, %v1506_v33  ;;  %v908_v42 = vor.u32 %v907_v37, %v904_v32  ;;  %v1198_v20 = vrot.slane %v2875_v58, 2  ;;  %v1335_v32 = vshrl.u32 %v2866_v24, 16 }
  0x58   : > { %v1199_v6 = vsel %vm1029_vm5, %v1196_v53, %v1198_v20  ;;  %v1201_v28 = vsel %vm1029_vm5, %v1198_v20, %v1200_v30  ;;  %v1330_v30 = vshll.u32 %v1979_v61, 16 }
  0x59   : > { %2269 = vmatpush3.bf16.msra.mxu0 %v2540_v45  ;;  %v1508_v45 = vrot.slane %v2910_v38, 3 }
  0x5a   : > { %2143 = vmatmul.mubr.msk.bf16.gmra.mrb[16].mxu1 %vm367_vm3, %v354_v46  ;;  %2290 = vmatprep.subr.bf16.mxu0 %v2604_v0  ;;  %v2925_v46 = vsel %vm856_vm2, %v899_v36, %v908_v42 }
  0x5b   : > { %2150 = vmatprep.mubr.msk.bf16.mxu1 %vm2605_vm0, %v2604_v0  ;;  %v2929_v14 = vsel %vm1498_vm6, %v1506_v33, %v1508_v45  ;;  %v1338_v33 = vshll.u32 %v2866_v24, 16 }
  0x5c   : > { %2251 = vmatmul.mubr.msk.bf16.gmra.mrb[4].mxu0 %vm367_vm3, %v1034_v52  ;;  %v1671_v52 = vld [vmem:[%s3140_s2 + $0x8] sm:$0xff] }
  0x5d   : > { %2254 = vmatprep.mubr.msk.bf16.mxu0 %vm2605_vm0, %v2604_v0  ;;  %v1340_v37 = vrot.slane %v1338_v33, 3 }
  0x62   : > { %2151 = vmatmul.mubr.msk.bf16.vlgmr.msra.gmra.mrb[0].mxu1 %vm367_vm3, %v2710_v7  ;;  %v2918_v7 = vsel %vm856_vm2, %v2778_v59, %v899_v36  ;;  %v1038_v59 = vsel %vm1029_vm5, %v1035_v3, %v1037_v43  ;;  %v1676_v3 = vld [vmem:[%s3140_s2 + $0x30] sm:$0xff]  ;;  %v1337_v36 = vrot.slane %v1335_v32, 2  ;;  %v1344_v43 = vshrl.u32 %v2875_v58, 16 }
  0x63   : > { %2154 = vmatprep.mubr.msk.bf16.mxu1 %vm2605_vm0, %v2604_v0  ;;  %2171 = vmatpush3.bf16.msra.mxu1 %v2542_v12  ;;  %v1678_v12 = vld [vmem:[%s3140_s2 + $0x40] sm:$0xff] }
  0x64   : > { %2172 = vmatprep.subr.bf16.mxu1 %v2604_v0  ;;  %2255 = vmatmul.mubr.msk.bf16.gmra.mrb[8].mxu0 %vm367_vm3, %v1036_v31  ;;  %v2556_v31 = vld [vmem:[#allocation2 + $0x38] sm:$0xff]   ;;  %v1341_v24 = vor.u32 %v1340_v37, %v1337_v36 }
  0x65   : > { %2258 = vmatprep.mubr.msk.bf16.mxu0 %vm2605_vm0, %v2604_v0 }
  0x67   : > { %2173 = vmatpush3.bf16.msra.mxu1 %v2547_v34 }
  0x68   : > { %2194 = vmatprep.subr.bf16.mxu1 %v2604_v0 }
  0x6a   : > { %2155 = vmatmul.mubr.msk.bf16.gmra.mrb[4].mxu1 %vm367_vm3, %v2713_v8  ;;  %v2606_v8 = vmov 0  }
  0x6b   : > { %2158 = vmatprep.mubr.msk.bf16.mxu1 %vm2605_vm0, %v2604_v0  ;;  %2518 = vset.pattern.permute.xlu0 %v2606_v8 }
  0x6c   : > { %2259 = vmatmul.mubr.msk.bf16.gmra.mrb[12].mxu0 %vm367_vm3, %v1038_v59  ;;  %1682 = vperm.xlu0 %2518, %v1670_v15   ;;  %v2555_v59 = vld [vmem:[#allocation2 + $0x80] sm:$0xff]  }
  0x6d   : > { %2262 = vmatprep.mubr.msk.bf16.mxu0 %vm2605_vm0, %v2604_v0  ;;  %2519 = vset.pattern.permute.xlu1 %v2606_v8 }
  0x6e   : > { %1692 = vperm.xlu1 %2519, %v1672_v48   ;;  %v570_v48 = vrot.slane %v2785_v1, 1 }
  0x70   : > { %1687 = vperm.xlu0 %2518, %v1671_v52  }
  0x72   : > { %2159 = vmatmul.mubr.msk.bf16.gmra.mrb[8].mxu1 %vm367_vm3, %v2737_v23  ;;  %1697 = vperm.xlu1 %2519, %v1673_v55   ;;  %v1195_v23 = vrot.slane %v1979_v61, 2  ;;  %v1362_v55 = vshrl.u32 %v2816_v27, 16 }
  0x73   : > { %2162 = vmatprep.mubr.msk.bf16.mxu1 %vm2605_vm0, %v2604_v0 }
  0x74   : > { %2263 = vmatmul.mubr.msk.bf16.gmra.mrb[16].mxu0 %vm367_vm3, %v1040_v56  ;;  %1702 = vperm.xlu0 %2518, %v1674_v62   ;;  %v1197_v9 = vsel %vm1029_vm5, %v1195_v23, %v1196_v53  ;;  %v1365_v56 = vshll.u32 %v2816_v27, 16  ;;  %v1364_v62 = vrot.slane %v1362_v55, 2  ;;  %v1371_v23 = vshrl.u32 %v2910_v38, 16 }
  0x75   : > { %2270 = vmatprep.mubr.msk.bf16.mxu0 %vm2605_vm0, %v2604_v0 }
  0x76   : > { %1707 = vperm.xlu1 %2519, %v1675_v63   ;;  %v1367_v63 = vrot.slane %v1365_v56, 3 }
  0x78   : > { %1712 = vperm.xlu0 %2518, %v1676_v3   ;;  %v1368_v27 = vor.u32 %v1367_v63, %v1364_v62 }
  0x7a   : > { %2163 = vmatmul.mubr.msk.bf16.gmra.mrb[12].mxu1 %vm367_vm3, %v2748_v39  ;;  %1717 = vperm.xlu1 %2519, %v1677_v5  }
  0x7b   : > { %2166 = vmatprep.mubr.msk.bf16.mxu1 %vm2605_vm0, %v2604_v0 }
  0x7c   : > { %2271 = vmatmul.mubr.msk.bf16.vlgmr.msra.gmra.mrb[0].mxu0 %vm367_vm3, %v1197_v9  ;;  %1722 = vperm.xlu0 %2518, %v1678_v12  }
  0x7d   : > { %2291 = vmatpush3.bf16.msra.mxu0 %v2546_v11  ;;  %2274 = vmatprep.mubr.msk.bf16.mxu0 %vm2605_vm0, %v2604_v0 }
  0x7e   : > { %2292 = vmatprep.subr.bf16.mxu0 %v2604_v0  ;;  %1727 = vperm.xlu1 %2519, %v1679_v10  }
  0x81   : > { %2293 = vmatpush3.bf16.msra.mxu0 %v2551_v44 }
  0x82   : > { %2167 = vmatmul.mubr.msk.bf16.gmra.mrb[16].mxu1 %vm367_vm3, %v2769_v57  ;;  %2314 = vmatprep.subr.bf16.mxu0 %v2604_v0 }
  0x83   : > { %2174 = vmatprep.mubr.msk.bf16.mxu1 %vm2605_vm0, %v2604_v0 }
  0x84   : > { %2275 = vmatmul.mubr.msk.bf16.gmra.mrb[4].mxu0 %vm367_vm3, %v1199_v6 }
  0x85   : > { %2278 = vmatprep.mubr.msk.bf16.mxu0 %vm2605_vm0, %v2604_v0 }
  0x8a   : > { %2175 = vmatmul.mubr.msk.bf16.vlgmr.msra.gmra.mrb[0].mxu1 %vm367_vm3, %v2820_v29  ;;  %v1327_v29 = vshrl.u32 %v1979_v61, 16 }
  0x8b   : > { %2178 = vmatprep.mubr.msk.bf16.mxu1 %vm2605_vm0, %v2604_v0  ;;  %2195 = vmatpush3.bf16.msra.mxu1 %v2553_v25 }
  0x8c   : > { %2196 = vmatprep.subr.bf16.mxu1 %v2604_v0  ;;  %2279 = vmatmul.mubr.msk.bf16.gmra.mrb[8].mxu0 %vm367_vm3, %v1201_v28  ;;  %v1329_v34 = vrot.slane %v1327_v29, 2 }
  0x8d   : > { %2282 = vmatprep.mubr.msk.bf16.mxu0 %vm2605_vm0, %v2604_v0 }
  0x8f   : > { %2197 = vmatpush3.bf16.msra.mxu1 %v2556_v31 }
  0x90   : > { %2338 = vmatprep.subr.bf16.mxu1 %v2604_v0 }
  0x92   : > { %2179 = vmatmul.mubr.msk.bf16.gmra.mrb[4].mxu1 %vm367_vm3, %v2802_v19  ;;  %v1332_v19 = vrot.slane %v1330_v30, 3 }
  0x93   : > { %2182 = vmatprep.mubr.msk.bf16.mxu1 %vm2605_vm0, %v2604_v0 }
  0x94   : > { %2283 = vmatmul.mubr.msk.bf16.gmra.mrb[12].mxu0 %vm367_vm3, %v2830_v35  ;;  %v568_v35 = vrot.slane %v2769_v57, 1  ;;  %v1333_v42 = vor.u32 %v1332_v19, %v1329_v34 }
  0x95   : > { %2286 = vmatprep.mubr.msk.bf16.mxu0 %vm2605_vm0, %v2604_v0 }
  0x96   : > { %v569_v45 = vsel %vm560_vm4, %v566_v17, %v568_v35  ;;  %v1342_v57 = vsel %vm1325_vm7, %v1333_v42, %v1341_v24  ;;  %v1353_v17 = vshrl.u32 %v2799_v18, 16  ;;  %v571_v8 = vsel %vm560_vm4, %v568_v35, %v570_v48 }
  0x98   : > { %v1355_v51 = vrot.slane %v1353_v17, 2 }
  0x9a   : > { %2183 = vmatmul.mubr.msk.bf16.gmra.mrb[8].mxu1 %vm367_vm3, %v2809_v22  ;;  %v1347_v22 = vshll.u32 %v2875_v58, 16  ;;  %v1356_v58 = vshll.u32 %v2799_v18, 16 }
  0x9b   : > { %2186 = vmatprep.mubr.msk.bf16.mxu1 %vm2605_vm0, %v2604_v0 }
  0x9c   : > { %2287 = vmatmul.mubr.msk.bf16.gmra.mrb[16].mxu0 %vm367_vm3, %v2835_v40  ;;  %v1346_v40 = vrot.slane %v1344_v43, 2  ;;  %v1349_v15 = vrot.slane %v1347_v22, 3  ;;  %v1358_v52 = vrot.slane %v1356_v58, 3 }
  0x9d   : > { %2294 = vmatprep.mubr.msk.bf16.mxu0 %vm2605_vm0, %v2604_v0 }
  0x9e   : > { %v1350_v39 = vor.u32 %v1349_v15, %v1346_v40  ;;  %v1359_v18 = vor.u32 %v1358_v52, %v1355_v51 }
  0xa0   : > { %v1351_v1 = vsel %vm1325_vm7, %v1341_v24, %v1350_v39  ;;  %v1360_v61 = vsel %vm1325_vm7, %v1350_v39, %v1359_v18  ;;  %v1369_v53 = vsel %vm1325_vm7, %v1359_v18, %v1368_v27 }
  0xa2   : > { %2187 = vmatmul.mubr.msk.bf16.gmra.mrb[12].mxu1 %vm367_vm3, %v569_v45 }
  0xa3   : > { %2190 = vmatprep.mubr.msk.bf16.mxu1 %vm2605_vm0, %v2604_v0 }
  0xa4   : > { %2295 = vmatmul.mubr.msk.bf16.vlgmr.msra.gmra.mrb[0].mxu0 %vm367_vm3, %v1342_v57 }
  0xa5   : > { %2315 = vmatpush3.bf16.msra.mxu0 %v2555_v59  ;;  %2298 = vmatprep.mubr.msk.bf16.mxu0 %vm2605_vm0, %v2604_v0 }
  0xa6   : > { %2316 = vmatprep.subr.bf16.mxu0 %v2604_v0 }
  0xa9   : > { %2317 = vmatpush3.bf16.msra.mxu0 %v2557_v50 }
  0xaa   : > { %2191 = vmatmul.mubr.msk.bf16.gmra.mrb[16].mxu1 %vm367_vm3, %v571_v8 }
  0xab   : > { %2198 = vmatprep.mubr.msk.bf16.mxu1 %vm2605_vm0, %v2604_v0 }
  0xac   : > { %2299 = vmatmul.mubr.msk.bf16.gmra.mrb[4].mxu0 %vm367_vm3, %v1351_v1 }
  0xad   : > { %2302 = vmatprep.mubr.msk.bf16.mxu0 %vm2605_vm0, %v2604_v0 }
  0xb2   : > { %2199 = vmatmul.mubr.msk.bf16.vlgmr.msra.gmra.mrb[0].mxu1 %vm367_vm3, %v2846_v47  ;;  %v1374_v47 = vshll.u32 %v2910_v38, 16 }
  0xb3   : > { %2202 = vmatprep.mubr.msk.bf16.mxu1 %vm2605_vm0, %v2604_v0  ;;  %2340 = vmatpush3.bf16.msra.mxu1 %v2693_v2  ;;  %v1373_v2 = vrot.slane %v1371_v23, 2 }
  0xb4   : > { %2339 = vmatprep.subr.bf16.mxu1 %v2604_v0  ;;  %2303 = vmatmul.mubr.msk.bf16.gmra.mrb[8].mxu0 %vm367_vm3, %v1360_v61  ;;  %v1376_v3 = vrot.slane %v1374_v47, 3 }
  0xb5   : > { %2306 = vmatprep.mubr.msk.bf16.mxu0 %vm2605_vm0, %v2604_v0 }
  0xb6   : > { %v1377_v5 = vor.u32 %v1376_v3, %v1373_v2 }
  0xb7   : > { %2341 = vmatpush3.bf16.msra.mxu1 %v2702_v4 }
  0xb8   : > { %v1378_v4 = vsel %vm1325_vm7, %v1368_v27, %v1377_v5 }
  0xba   : > { %2203 = vmatmul.mubr.msk.bf16.gmra.mrb[4].mxu1 %vm367_vm3, %v2854_v49 }
  0xbb   : > { %2206 = vmatprep.mubr.msk.bf16.mxu1 %vm2605_vm0, %v2604_v0 }
  0xbc   : > { %2307 = vmatmul.mubr.msk.bf16.gmra.mrb[12].mxu0 %vm367_vm3, %v1369_v53 }
  0xbd   : > { %2310 = vmatprep.mubr.msk.bf16.mxu0 %vm2605_vm0, %v2604_v0 }
  0xc2   : > { %2207 = vmatmul.mubr.msk.bf16.gmra.mrb[8].mxu1 %vm367_vm3, %v2870_v54 }
  0xc3   : > { %2210 = vmatprep.mubr.msk.bf16.mxu1 %vm2605_vm0, %v2604_v0 }
  0xc4   : > { %2311 = vmatmul.mubr.msk.bf16.gmra.mrb[16].mxu0 %vm367_vm3, %v1378_v4 }
  0xc5   : > { %2318 = vmatprep.mubr.msk.bf16.mxu0 %vm2605_vm0, %v2604_v0 }
  0xca   : > { %2211 = vmatmul.mubr.msk.bf16.gmra.mrb[12].mxu1 %vm367_vm3, %v2879_v60 }
  0xcb   : > { %2214 = vmatprep.mubr.msk.bf16.mxu1 %vm2605_vm0, %v2604_v0 }
  0xcc   : > { %2319 = vmatmul.mubr.msk.bf16.vlgmr.msra.gmra.mrb[0].mxu0 %vm367_vm3, %v2889_v13 }
  0xcd   : > { %2322 = vmatprep.mubr.msk.bf16.mxu0 %vm2605_vm0, %v2604_v0 }
  0xd2   : > { %2215 = vmatmul.mubr.msk.bf16.gmra.mrb[16].mxu1 %vm367_vm3, %v2892_v16 }
  0xd3   : > { %2234 = vmatprep.mubr.msk.bf16.mxu1 %vm2605_vm0, %v2604_v0 }
  0xd4   : > { %2323 = vmatmul.mubr.msk.bf16.gmra.mrb[4].mxu0 %vm367_vm3, %v2897_v21 }
  0xd5   : > { %2326 = vmatprep.mubr.msk.bf16.mxu0 %vm2605_vm0, %v2604_v0 }
  0xda   : > { %2235 = vmatmul.mubr.msk.bf16.vlgmr.msra.gmra.mrb[12].mxu1 %vm367_vm3, %v2918_v7 }
  0xdb   : > { %2238 = vmatprep.mubr.msk.bf16.mxu1 %vm2605_vm0, %v2604_v0 }
  0xdc   : > { %2327 = vmatmul.mubr.msk.bf16.gmra.mrb[8].mxu0 %vm367_vm3, %v2900_v26 }
  0xdd   : > { %2330 = vmatprep.mubr.msk.bf16.mxu0 %vm2605_vm0, %v2604_v0 }
  0xe2   : > { %2239 = vmatmul.mubr.msk.bf16.gmra.mrb[16].mxu1 %vm367_vm3, %v2925_v46 }
  0xe4   : > { %2331 = vmatmul.mubr.msk.bf16.gmra.mrb[12].mxu0 %vm367_vm3, %v2913_v41 }
  0xe5   : > { %2334 = vmatprep.mubr.msk.bf16.mxu0 %vm2605_vm0, %v2604_v0 }
  0xeb   : > { %v1683_v41 = vpop.permute.xlu0 %1682 }
  0xec   : > { %2335 = vmatmul.mubr.msk.bf16.gmra.mrb[16].mxu0 %vm367_vm3, %v2929_v14 }
  0xed   : > { %v1693_v29 = vpop.permute.xlu1 %1692 }
  0xef   : > { %v1688_v44 = vpop.permute.xlu0 %1687 }
  0xf1   : > { %v1698_v22 = vpop.permute.xlu1 %1697 }
  0xf3   : > { %v1703_v55 = vpop.permute.xlu0 %1702 }
  0xf5   : > { %v1708_v27 = vpop.permute.xlu1 %1707 }
 0x185   : > { %v798_v49 = vpop.f32.mrb[0].mxu1 }
 0x186   : > { %v2200_v54 = vpop.f32.mrb[1].mxu1 }
 0x187   : > { %v801_v60 = vpop.f32.mrb[2].mxu1 }
 0x188   : > { %v2201_v13 = vpop.f32.mrb[3].mxu1 }
 0x18d   : > { %v806_v16 = vpop.f32.mrb[4].mxu1 }
 0x18e   : > { %v2204_v21 = vpop.f32.mrb[5].mxu1 }
 0x18f   : > { %v809_v26 = vpop.f32.mrb[6].mxu1 }
 0x190   : > { %v2205_v38 = vpop.f32.mrb[7].mxu1 }
 0x195   : > { %v814_v7 = vpop.f32.mrb[8].mxu1 }
 0x196   : > { %v2208_v46 = vpop.f32.mrb[9].mxu1 }
 0x197   : > { %v817_v9 = vpop.f32.mrb[10].mxu1 }
 0x198   : > { %v2209_v11 = vpop.f32.mrb[11].mxu1 }
 0x19f   : > { %v1571_v12 = vpop.f32.mrb[0].mxu0 }
 0x1a0   : > { %v2342_v0 = vadd.f32 %v1571_v12, %v798_v49  ;;  %v2320_v10 = vpop.f32.mrb[1].mxu0  ;;  %v1718_v12 = vpop.permute.xlu1 %1717 }
 0x1a1   : > { %v1574_v20 = vpop.f32.mrb[2].mxu0 }
 0x1a2   : > { %v2343_v14 = vadd.f32 %v1574_v20, %v801_v60  ;;  %v2321_v6 = vpop.f32.mrb[3].mxu0  ;;  %v1730_v25 = vmul.f32 %v2342_v0, %v1683_v41 }
 0x1a4   : > { %v2033_v28 = vpack.c.bf16 %v2343_v14, %v2342_v0  ;;  %v1731_v31 = vmul.f32 %v2343_v14, %v1688_v44  ;;  %v1755_v32 = vmul.f32 %v2342_v0, %v1730_v25 }
 0x1a6   : > { %2034 = vst [vmem:[%s3121_s15] sm:$0xff] %v2033_v28   ;;  %v1740_v30 = vadd.f32 %v1731_v31, %v1730_v25  ;;  %v1756_v33 = vmul.f32 %v2343_v14, %v1731_v31 }
 0x1a7   : > { %v1579_v34 = vpop.f32.mrb[4].mxu0 }
 0x1a8   : > { %v1765_v19 = vadd.f32 %v1756_v33, %v1755_v32  ;;  %v2344_v36 = vadd.f32 %v1579_v34, %v806_v16  ;;  %v2324_v37 = vpop.f32.mrb[5].mxu0 }
 0x1a9   : > { %v1582_v35 = vpop.f32.mrb[6].mxu0  ;;  %v1728_v37 = vpop.permute.xlu1 %1727 }
 0x1aa   : > { %v1732_v42 = vmul.f32 %v2344_v36, %v1693_v29  ;;  %v2345_v24 = vadd.f32 %v1582_v35, %v809_v26  ;;  %v2325_v43 = vpop.f32.mrb[7].mxu0 }
 0x1ac   : > { %v1741_v45 = vadd.f32 %v1740_v30, %v1732_v42  ;;  %v1757_v57 = vmul.f32 %v2344_v36, %v1732_v42  ;;  %v2038_v59 = vpack.c.bf16 %v2345_v24, %v2344_v36  ;;  %v1733_v40 = vmul.f32 %v2345_v24, %v1698_v22 }
 0x1ad   : > { %v995_v15 = vpop.f32.mrb[12].mxu1 }
 0x1ae   : > { %v2236_v48 = vpop.f32.mrb[13].mxu1  ;;  %v1766_v39 = vadd.f32 %v1765_v19, %v1757_v57  ;;  %2055 = vst [vmem:[%s3121_s15 + $0x8] sm:$0xff] %v2038_v59   ;;  %v1742_v17 = vadd.f32 %v1741_v45, %v1733_v40  ;;  %v1758_v58 = vmul.f32 %v2345_v24, %v1733_v40 }
 0x1af   : > { %v998_v50 = vpop.f32.mrb[14].mxu1  ;;  %v1587_v8 = vpop.f32.mrb[8].mxu0 }
 0x1b0   : > { %v2237_v1 = vpop.f32.mrb[15].mxu1  ;;  %v1767_v51 = vadd.f32 %v1766_v39, %v1758_v58  ;;  %v2346_v52 = vadd.f32 %v1587_v8, %v814_v7  ;;  %v2328_v18 = vpop.f32.mrb[9].mxu0 }
 0x1b1   : > { %v1590_v56 = vpop.f32.mrb[10].mxu0  ;;  %v1713_v7 = vpop.permute.xlu0 %1712 }
 0x1b2   : > { %v1734_v61 = vmul.f32 %v2346_v52, %v1703_v55  ;;  %v2347_v62 = vadd.f32 %v1590_v56, %v817_v9  ;;  %v2329_v63 = vpop.f32.mrb[11].mxu0 }
 0x1b4   : > { %v1743_v23 = vadd.f32 %v1742_v17, %v1734_v61  ;;  %v1759_v47 = vmul.f32 %v2346_v52, %v1734_v61  ;;  %v2043_v53 = vpack.c.bf16 %v2347_v62, %v2346_v52  ;;  %v1735_v2 = vmul.f32 %v2347_v62, %v1708_v27 }
 0x1b5   : > { %v1003_v3 = vpop.f32.mrb[16].mxu1  ;;  %v1723_v32 = vpop.permute.xlu0 %1722 }
 0x1b6   : > { %v2240_v5 = vpop.f32.mrb[17].mxu1  ;;  %v1768_v4 = vadd.f32 %v1767_v51, %v1759_v47  ;;  %2056 = vst [vmem:[%s3121_s15 + $0x10] sm:$0xff] %v2043_v53   ;;  %v1744_v49 = vadd.f32 %v1743_v23, %v1735_v2  ;;  %v1760_v54 = vmul.f32 %v2347_v62, %v1735_v2 }
 0x1b7   : > { %v1006_v60 = vpop.f32.mrb[18].mxu1  ;;  %v1595_v13 = vpop.f32.mrb[12].mxu0 }
 0x1b8   : > { %v2241_v16 = vpop.f32.mrb[19].mxu1  ;;  %v1769_v21 = vadd.f32 %v1768_v4, %v1760_v54  ;;  %v2348_v26 = vadd.f32 %v1595_v13, %v995_v15  ;;  %v2332_v38 = vpop.f32.mrb[13].mxu0 }
 0x1b9   : > { %v1598_v46 = vpop.f32.mrb[14].mxu0 }
 0x1ba   : > { %v1736_v9 = vmul.f32 %v2348_v26, %v1713_v7  ;;  %v2349_v11 = vadd.f32 %v1598_v46, %v998_v50  ;;  %v2333_v41 = vpop.f32.mrb[15].mxu0 }
 0x1bc   : > { %v1745_v0 = vadd.f32 %v1744_v49, %v1736_v9  ;;  %v1761_v10 = vmul.f32 %v2348_v26, %v1736_v9  ;;  %v2048_v20 = vpack.c.bf16 %v2349_v11, %v2348_v26  ;;  %v1737_v44 = vmul.f32 %v2349_v11, %v1718_v12 }
 0x1be   : > { %v1770_v14 = vadd.f32 %v1769_v21, %v1761_v10  ;;  %2057 = vst [vmem:[%s3121_s15 + $0x18] sm:$0xff] %v2048_v20   ;;  %v1746_v6 = vadd.f32 %v1745_v0, %v1737_v44  ;;  %v1762_v25 = vmul.f32 %v2349_v11, %v1737_v44 }
 0x1bf   : > { %v1603_v28 = vpop.f32.mrb[16].mxu0 }
 0x1c0   : > { %v1771_v31 = vadd.f32 %v1770_v14, %v1762_v25  ;;  %v2350_v29 = vadd.f32 %v1603_v28, %v1003_v3  ;;  %v2336_v30 = vpop.f32.mrb[17].mxu0 }
 0x1c1   : > { %v1606_v33 = vpop.f32.mrb[18].mxu0 }
 0x1c2   : > { %v1738_v34 = vmul.f32 %v2350_v29, %v1723_v32  ;;  %v2351_v19 = vadd.f32 %v1606_v33, %v1006_v60  ;;  %v2337_v36 = vpop.f32.mrb[19].mxu0 }
 0x1c4   : > { %v1747_v35 = vadd.f32 %v1746_v6, %v1738_v34  ;;  %v1763_v42 = vmul.f32 %v2350_v29, %v1738_v34  ;;  %v2053_v24 = vpack.c.bf16 %v2351_v19, %v2350_v29  ;;  %v1739_v43 = vmul.f32 %v2351_v19, %v1728_v37 }
 0x1c6   : > { %v1772_v22 = vadd.f32 %v1771_v31, %v1763_v42  ;;  %2058 = vst [vmem:[%s3121_s15 + $0x20] sm:$0xff] %v2053_v24   ;;  %v1748_v45 = vadd.f32 %v1747_v35, %v1739_v43  ;;  %v1764_v57 = vmul.f32 %v2351_v19, %v1739_v43 }
 0x1c8   : > { %v1749_v59 = vrot.slane %v1748_v45, 4  ;;  %v1773_v40 = vadd.f32 %v1772_v22, %v1764_v57 }
 0x1ca   : > { %v1750_v15 = vadd.f32 %v1749_v59, %v1748_v45  ;;  %v1774_v48 = vrot.slane %v1773_v40, 4 }
 0x1cc   : > { %v1751_v39 = vrot.slane %v1750_v15, 2  ;;  %v1775_v17 = vadd.f32 %v1774_v48, %v1773_v40 }
 0x1ce   : > { %v1752_v58 = vadd.f32 %v1751_v39, %v1750_v15  ;;  %v1776_v50 = vrot.slane %v1775_v17, 2 }
 0x1d0   : > { %v1753_v8 = vrot.slane %v1752_v58, 1  ;;  %v1777_v1 = vadd.f32 %v1776_v50, %v1775_v17 }
 0x1d2   : > { %v1754_v51 = vadd.f32 %v1753_v8, %v1752_v58  ;;  %v1778_v52 = vrot.slane %v1777_v1, 1 }
 0x1d4   : > { %v1779_v18 = vadd.f32 %v1778_v52, %v1777_v1  ;;  %1780 = vst [vmem:[%s256_s21] sm:$0xff] %v1754_v51 }
 0x1d6   : > { %1781 = vst [vmem:[%s260_s24] sm:$0xff] %v1779_v18 }
 0x1d7 PF: > { %s17_s18 = sadd.s32 1, %s2599_s18  }
 0x1d8   : > { %p14_p3 = scmp.ge.s32.totalorder %s17_s18, 4  }
 0x1da   :  { %16 = sbr.rel (!%p14_p3) target bundleno = 1 (0x1), region = 99 }
 0x1e1   :  { %1831 = vsyncpa [#allocation3], 1 }
 0x1e2   :  { %1833 = vsyncpa [#allocation3 + $0x1], 1 }

// kernel: generator_forward.8
= control target key start
LH: loop header
LB: loop body
LE: loop exit
PB: predicated region body
PF: predicated region fallthrough
CT: control target
= control target key end

     0   :  { %s5775_s18 = smov 0   ;;  %s6794_s0 = inlined_call_operand.vmem [shape: bf16[2,342,16], index: 0, kind: input, shape index: {}]   ;;  %s6795_s1 = inlined_call_operand.vmem [shape: bf16[9,16,128], index: 1, kind: input, shape index: {}]   ;;  %s6796_s2 = inlined_call_operand.vmem [shape: f32[288,1], index: 2, kind: input, shape index: {}]   ;;  %s6797_s3 = inlined_call_operand.vmem [shape: bf16[2,288,128], index: 3, kind: output, shape index: {0}]   ;;  %s6798_s4 = inlined_call_operand.vmem [shape: f32[16,128], index: 4, kind: output, shape index: {1}]   ;;  %s6799_s5 = inlined_call_operand.vmem [shape: f32[16,128], index: 5, kind: output, shape index: {2}]  }
   0x1 LB: > { %s4399_s19 = sadd.s32 4294967295, %s5742_s18   ;;  %p4403_p0 = scmp.ge.s32.totalorder %s5742_s18, 1  ;;  %s5742_s18 = sphi %s5775_s18, %s16_s18  }
   0x2   : > { %p192_p1 = scmp.lt.s32.totalorder %s5742_s18, 3 }
   0x4   : > { %p193_p2 = pnand %p4403_p0, %p192_p1 }
   0x5   : > { %v5654_v0 = vld [vmem:[%s6795_s1 + $0x20] sm:$0xff] (!%p193_p2)   ;;  %p228_p3 = scmp.lt.s32.totalorder (!%p193_p2), %s4399_s19, 1  ;;  %v5655_v1 = vld [vmem:[%s6795_s1 + $0x8] sm:$0xff] (!%p193_p2)   ;;  %vm382_vm0 = vsmask.f32 (!%p193_p2), 7424  ;;  %vm537_vm1 = vcmask (!%p193_p2), 130048  }
   0x6   : > { %196 = sbr.rel (%p193_p2) target bundleno = 592 (0x250), region = 32  ;;  %5161 = vmatprep.subr.bf16.mxu0 (!%p193_p2), %v5654_v0  ;;  %v5794_v2 = vld [vmem:[%s6795_s1 + $0x28] sm:$0xff] (!%p193_p2)   ;;  %5009 = vmatprep.subr.bf16.mxu1 (!%p193_p2), %v5655_v1  ;;  %v5664_v3 = vld [vmem:[%s6795_s1] sm:$0xff] (!%p193_p2)   ;;  %vm1756_vm2 = vsmask.f32 (!%p193_p2), 6400  ;;  %v5850_v31 = vld [vmem:[%s6795_s1 + $0x10] sm:$0xff] (!%p193_p2)  }
   0x7   : > { %5162 = vmatpush3.bf16.msra.mxu0 (!%p193_p2), %v5654_v0  ;;  %5010 = vmatpush3.bf16.msra.mxu1 (!%p193_p2), %v5655_v1  ;;  %v5880_v56 = vld [vmem:[%s6795_s1 + $0x30] sm:$0xff] (!%p193_p2)   ;;  %vm2207_vm3 = vcmask (!%p193_p2), 1045504   ;;  %vm995_vm4 = vcmask (!%p193_p2), 1046528   ;;  %vm2968_vm5 = vsmask.f32 (!%p193_p2), 5376  ;;  %vm3419_vm6 = vcmask (!%p193_p2), 1044480  }
   0x8   : > { %5199 = vmatprep.subr.bf16.mxu0 (!%p193_p2), %v5794_v2  ;;  %5047 = vmatprep.subr.bf16.mxu1 (!%p193_p2), %v5664_v3 }
   0xd   : > { %s6801_s19 = smov (!%p228_p3, %s4399_s19), 1 }
   0xe   : > { %s5641_s26 = smul.u32 172, %s6801_s19  ;;  %s4406_s30 = sshll.u32 %s6801_s19, 3 }
   0xf   : > { %s241_s9 = scalar_lea.vmem %s6798_s4, %s4406_s30  ;;  %s245_s12 = scalar_lea.vmem %s6799_s5, %s4406_s30 }
  0x10   : > { %s5804_s6 = scalar_lea.vmem %s6794_s0, %s5641_s26 }
  0x11   : > { %v247_v4 = vld [vmem:[%s5804_s6] sm:$0xf]  ;;  %v5808_v5 = vld [vmem:[%s5804_s6 + $0x4] sm:$0xf]  ;;  %v5814_v7 = vld [vmem:[%s5804_s6 + $0x8] sm:$0xff]  }
  0x12   : > { %v5811_v6 = vcombine.low %v247_v4, %v5808_v5  ;;  %v1306_v8 = vld [vmem:[%s5804_s6 + $0x8] sm:$0xe]  ;;  %v5818_v9 = vld [vmem:[%s5804_s6 + $0xc] sm:$0xf]  ;;  %v391_v12 = vshll.u32 %v5814_v7, 16  ;;  %v395_v13 = vshrl.u32 %v5814_v7, 16 }
  0x13   : > { %v5825_v14 = vld [vmem:[%s5804_s6 + $0x10] sm:$0xff]   ;;  %v5831_v16 = vcombine.low %v1306_v8, %v5818_v9  ;;  %v5839_v24 = vld [vmem:[%s5804_s6 + $0x18] sm:$0xff]   ;;  %v5845_v30 = vld [vmem:[%s5804_s6 + $0x20] sm:$0xff]  }
  0x14   : > { %v384_v10 = vshrl.u32 %v5811_v6, 16  ;;  %v386_v11 = vshll.u32 %v5811_v6, 16  ;;  %v5828_v15 = vld [vmem:[%s5804_s6 + $0x10] sm:$0xff]   ;;  %v393_v18 = vrot.slane %v391_v12, 1  ;;  %v1766_v19 = vshrl.u32 %v5825_v14, 16  ;;  %v5842_v29 = vld [vmem:[%s5804_s6 + $0x18] sm:$0xff]  }
  0x15   : > { %v1769_v20 = vshll.u32 %v5825_v14, 16  ;;  %v1758_v21 = vshrl.u32 %v5831_v16, 16  ;;  %v1761_v22 = vshll.u32 %v5831_v16, 16  ;;  %v399_v23 = vshll.u32 %v5828_v15, 16  ;;  %v5860_v44 = vld [vmem:[%s5804_s6 + $0x20] sm:$0xff]   ;;  %v5863_v45 = vld [vmem:[%s5804_s6 + $0x28] sm:$0xff]  }
  0x16   : > { %v388_v17 = vrot.slane %v386_v11, 1  ;;  %v397_v26 = vor.u32 %v395_v13, %v393_v18  ;;  %v1768_v27 = vrot.slane %v1766_v19, 1  ;;  %v1775_v35 = vshrl.u32 %v5839_v24, 16  ;;  %v5869_v50 = vld [vmem:[%s5804_s6 + $0x28] sm:$0xff]   ;;  %v5875_v55 = vld [vmem:[%s5804_s6 + $0x30] sm:$0xff]  }
  0x17   : > { %v1771_v28 = vrot.slane %v1769_v20, 2  ;;  %v1760_v32 = vrot.slane %v1758_v21, 1  ;;  %v1763_v33 = vrot.slane %v1761_v22, 2  ;;  %v401_v34 = vrot.slane %v399_v23, 1  ;;  %v5885_v61 = vld [vmem:[%s5804_s6 + $0x30] sm:$0xff]  }
  0x18   : > { %v389_v25 = vor.u32 %v388_v17, %v384_v10  ;;  %v1778_v38 = vshll.u32 %v5839_v24, 16  ;;  %v403_v39 = vshrl.u32 %v5828_v15, 16  ;;  %v1777_v42 = vrot.slane %v1775_v35, 1 }
  0x19   : > { %v1772_v37 = vor.u32 %v1771_v28, %v1768_v27  ;;  %v1764_v40 = vor.u32 %v1763_v33, %v1760_v32  ;;  %v402_v41 = vsel %vm382_vm0, %v397_v26, %v401_v34  ;;  %v407_v43 = vshll.u32 %v5842_v29, 16  ;;  %v5907_v28 = vld [vmem:[%s5804_s6 + $0x38] sm:$0xff]  }
  0x1a   : > { %v394_v36 = vsel %vm382_vm0, %v389_v25, %v393_v18  ;;  %v1780_v46 = vrot.slane %v1778_v38, 2  ;;  %v405_v47 = vor.u32 %v403_v39, %v401_v34  ;;  %v1784_v48 = vshrl.u32 %v5845_v30, 16  ;;  %v5898_v18 = vld [vmem:[%s5804_s6 + $0x38] sm:$0xff]   ;;  %v5917_v39 = vld [vmem:[%s5804_s6 + $0x40] sm:$0xff]  }
  0x1b   : > { %5011 = vmatprep.mubr.msk.bf16.mxu1 %vm537_vm1, %v394_v36  ;;  %v1787_v49 = vshll.u32 %v5845_v30, 16  ;;  %v1773_v51 = vsel %vm1756_vm2, %v1764_v40, %v1772_v37  ;;  %v409_v52 = vrot.slane %v407_v43, 1  ;;  %v411_v53 = vshrl.u32 %v5842_v29, 16 }
  0x1c   : > { %5012 = vmatmul.mubr.msk.bf16.vlgmr.msra.gmra.mrb[0].mxu1 %vm537_vm1, %v402_v41  ;;  %v415_v54 = vshll.u32 %v5860_v44, 16  ;;  %5163 = vmatprep.mubr.msk.bf16.mxu0 %vm537_vm1, %v1773_v51  ;;  %v1781_v57 = vor.u32 %v1780_v46, %v1777_v42  ;;  %v1786_v58 = vrot.slane %v1784_v48, 1  ;;  %v1793_v60 = vshrl.u32 %v5863_v45, 16  ;;  %v5922_v46 = vld [vmem:[%s5804_s6 + $0x40] sm:$0xff]  }
  0x1d   : > { %5048 = vmatpush3.bf16.msra.mxu1 %v5664_v3  ;;  %v1789_v59 = vrot.slane %v1787_v49, 2  ;;  %v410_v62 = vsel %vm382_vm0, %v405_v47, %v409_v52  ;;  %v413_v63 = vor.u32 %v411_v53, %v409_v52  ;;  %v1796_v1 = vshll.u32 %v5863_v45, 16 }
  0x1e   : > { %5085 = vmatprep.subr.bf16.mxu1 %v5850_v31  ;;  %v417_v0 = vrot.slane %v415_v54, 1  ;;  %v1782_v3 = vsel %vm1756_vm2, %v1772_v37, %v1781_v57  ;;  %5015 = vmatprep.mubr.msk.bf16.mxu1 %vm537_vm1, %v410_v62  ;;  %v1795_v8 = vrot.slane %v1793_v60, 1  ;;  %v419_v10 = vshrl.u32 %v5860_v44, 16 }
  0x1f   : > { %v1790_v4 = vor.u32 %v1789_v59, %v1786_v58  ;;  %5164 = vmatmul.mubr.msk.bf16.vlgmr.msra.gmra.mrb[0].mxu0 %vm537_vm1, %v1782_v3  ;;  %v1798_v12 = vrot.slane %v1796_v1, 2  ;;  %v423_v13 = vshll.u32 %v5869_v50, 16  ;;  %v1802_v17 = vshrl.u32 %v5875_v55, 16  ;;  %v5930_v58 = vld [vmem:[%s5804_s6 + $0x48] sm:$0xff]  }
  0x20   : > { %v418_v11 = vsel %vm382_vm0, %v413_v63, %v417_v0  ;;  %5200 = vmatpush3.bf16.msra.mxu0 %v5794_v2  ;;  %v421_v20 = vor.u32 %v419_v10, %v417_v0  ;;  %v1805_v21 = vshll.u32 %v5875_v55, 16  ;;  %v427_v22 = vshrl.u32 %v5869_v50, 16  ;;  %v5933_v59 = vld [vmem:[%s5804_s6 + $0x48] sm:$0xff]  }
  0x21   : > { %v1791_v19 = vsel %vm1756_vm2, %v1781_v57, %v1790_v4  ;;  %v1799_v23 = vor.u32 %v1798_v12, %v1795_v8  ;;  %v425_v25 = vrot.slane %v423_v13, 1  ;;  %v1804_v26 = vrot.slane %v1802_v17, 1  ;;  %5237 = vmatprep.subr.bf16.mxu0 %v5880_v56 }
  0x22   : > { %5167 = vmatprep.mubr.msk.bf16.mxu0 %vm537_vm1, %v1791_v19  ;;  %v431_v27 = vshll.u32 %v5885_v61, 16  ;;  %v1807_v2 = vrot.slane %v1805_v21, 2  ;;  %v1811_v32 = vshrl.u32 %v5898_v18, 16  ;;  %v1814_v33 = vshll.u32 %v5898_v18, 16  ;;  %v5950_v19 = vld [vmem:[%s5804_s6 + $0x50] sm:$0xff]  }
  0x23   : > { %v435_v34 = vshrl.u32 %v5885_v61, 16  ;;  %v1800_v35 = vsel %vm1756_vm2, %v1790_v4, %v1799_v23  ;;  %v426_v36 = vsel %vm382_vm0, %v421_v20, %v425_v25  ;;  %v429_v37 = vor.u32 %v427_v22, %v425_v25  ;;  %v5942_v4 = vld [vmem:[%s5804_s6 + $0x50] sm:$0xff]   ;;  %v5955_v22 = vld [vmem:[%s5804_s6 + $0x58] sm:$0xff]  }
  0x24   : > { %5016 = vmatmul.mubr.msk.bf16.gmra.mrb[4].mxu1 %vm537_vm1, %v418_v11  ;;  %v433_v38 = vrot.slane %v431_v27, 1  ;;  %v1808_v40 = vor.u32 %v1807_v2, %v1804_v26  ;;  %v1813_v41 = vrot.slane %v1811_v32, 1  ;;  %v1816_v42 = vrot.slane %v1814_v33, 2 }
  0x25   : > { %5019 = vmatprep.mubr.msk.bf16.mxu1 %vm537_vm1, %v426_v36  ;;  %v439_v43 = vshll.u32 %v5907_v28, 16  ;;  %v1820_v49 = vshrl.u32 %v5917_v39, 16  ;;  %v1823_v51 = vshll.u32 %v5917_v39, 16  ;;  %v443_v57 = vshrl.u32 %v5907_v28, 16 }
  0x26   : > { %v434_v47 = vsel %vm382_vm0, %v429_v37, %v433_v38  ;;  %v437_v48 = vor.u32 %v435_v34, %v433_v38  ;;  %v1809_v52 = vsel %vm1756_vm2, %v1799_v23, %v1808_v40  ;;  %v1817_v53 = vor.u32 %v1816_v42, %v1813_v41 }
  0x27   : > { %v441_v54 = vrot.slane %v439_v43, 1  ;;  %5168 = vmatmul.mubr.msk.bf16.gmra.mrb[4].mxu0 %vm537_vm1, %v1800_v35  ;;  %v1822_v60 = vrot.slane %v1820_v49, 1  ;;  %v1825_v62 = vrot.slane %v1823_v51, 2  ;;  %v447_v63 = vshll.u32 %v5922_v46, 16  ;;  %v5960_v35 = vld [vmem:[%s5804_s6 + $0x58] sm:$0xff]  }
  0x28   : > { %v451_v0 = vshrl.u32 %v5922_v46, 16  ;;  %5171 = vmatprep.mubr.msk.bf16.mxu0 %vm537_vm1, %v1809_v52  ;;  %v1829_v3 = vshrl.u32 %v5930_v58, 16  ;;  %v1832_v10 = vshll.u32 %v5930_v58, 16  ;;  %v455_v11 = vshll.u32 %v5933_v59, 16  ;;  %v2200_v51 = vld [vmem:[%s5804_s6 + $0x8] sm:$0xc] }
  0x29   : > { %v442_v1 = vsel %vm382_vm0, %v437_v48, %v441_v54  ;;  %v1826_v8 = vor.u32 %v1825_v62, %v1822_v60  ;;  %v449_v12 = vrot.slane %v447_v63, 1  ;;  %v1838_v13 = vshrl.u32 %v5942_v4, 16  ;;  %v5974_v52 = vld [vmem:[%s5804_s6 + $0x60] sm:$0xff]  }
  0x2a   : > { %v1841_v17 = vshll.u32 %v5942_v4, 16  ;;  %v1818_v20 = vsel %vm1756_vm2, %v1808_v40, %v1817_v53  ;;  %v445_v21 = vor.u32 %v443_v57, %v441_v54  ;;  %v1831_v23 = vrot.slane %v1829_v3, 1 }
  0x2b   : > { %v1834_v25 = vrot.slane %v1832_v10, 2  ;;  %v453_v26 = vor.u32 %v451_v0, %v449_v12  ;;  %v457_v27 = vrot.slane %v455_v11, 1  ;;  %v1827_v2 = vsel %vm1756_vm2, %v1817_v53, %v1826_v8  ;;  %v5979_v0 = vld [vmem:[%s5804_s6 + $0x68] sm:$0xff]  }
  0x2c   : > { %5020 = vmatmul.mubr.msk.bf16.gmra.mrb[8].mxu1 %vm537_vm1, %v434_v47  ;;  %v1840_v32 = vrot.slane %v1838_v13, 1  ;;  %v1843_v33 = vrot.slane %v1841_v17, 2  ;;  %v463_v34 = vshll.u32 %v5950_v19, 16  ;;  %v450_v36 = vsel %vm382_vm0, %v445_v21, %v449_v12 }
  0x2d   : > { %5023 = vmatprep.mubr.msk.bf16.mxu1 %vm537_vm1, %v442_v1  ;;  %v459_v37 = vshrl.u32 %v5933_v59, 16  ;;  %v1847_v38 = vshrl.u32 %v5955_v22, 16  ;;  %v1850_v40 = vshll.u32 %v5955_v22, 16  ;;  %v1835_v41 = vor.u32 %v1834_v25, %v1831_v23  ;;  %v5996_v25 = vld [vmem:[%s5804_s6 + $0x70] sm:$0xff]  }
  0x2e   : > { %v458_v42 = vsel %vm382_vm0, %v453_v26, %v457_v27  ;;  %v467_v43 = vshrl.u32 %v5950_v19, 16  ;;  %v471_v47 = vshll.u32 %v5960_v35, 16  ;;  %v1844_v48 = vor.u32 %v1843_v33, %v1840_v32  ;;  %v6002_v33 = vld [vmem:[%s5804_s6 + $0x78] sm:$0xff]  }
  0x2f   : > { %5172 = vmatmul.mubr.msk.bf16.gmra.mrb[8].mxu0 %vm537_vm1, %v1818_v20  ;;  %v465_v49 = vrot.slane %v463_v34, 1  ;;  %v461_v53 = vor.u32 %v459_v37, %v457_v27  ;;  %v1849_v54 = vrot.slane %v1847_v38, 1  ;;  %v1852_v57 = vrot.slane %v1850_v40, 2 }
  0x30   : > { %5175 = vmatprep.mubr.msk.bf16.mxu0 %vm537_vm1, %v1827_v2  ;;  %v1836_v60 = vsel %vm1756_vm2, %v1826_v8, %v1835_v41  ;;  %v473_v63 = vrot.slane %v471_v47, 1  ;;  %v1845_v1 = vsel %vm1756_vm2, %v1835_v41, %v1844_v48  ;;  %v4553_v3 = vcombine.low %v2200_v51, %v5818_v9 }
  0x31   : > { %v469_v62 = vor.u32 %v467_v43, %v465_v49  ;;  %v479_v10 = vshll.u32 %v5974_v52, 16  ;;  %v466_v11 = vsel %vm382_vm0, %v461_v53, %v465_v49  ;;  %v475_v12 = vshrl.u32 %v5960_v35, 16 }
  0x32   : > { %v5988_v8 = vor.u32 %v1852_v57, %v1849_v54  ;;  %v483_v17 = vshrl.u32 %v5974_v52, 16  ;;  %v487_v20 = vshll.u32 %v5979_v0, 16  ;;  %v2208_v9 = vrot.slane %v4553_v3, 2  ;;  %v6022_v54 = vld [vmem:[%s5804_s6 + $0x88] sm:$0xff]  }
  0x33   : > { %v474_v13 = vsel %vm382_vm0, %v469_v62, %v473_v63  ;;  %v2209_v21 = vrot.slane %v5825_v14, 2  ;;  %v481_v23 = vrot.slane %v479_v10, 1  ;;  %v477_v26 = vor.u32 %v475_v12, %v473_v63 }
  0x34   : > { %5024 = vmatmul.mubr.msk.bf16.gmra.mrb[12].mxu1 %vm537_vm1, %v450_v36  ;;  %v1854_v27 = vsel %vm1756_vm2, %v1844_v48, %v5988_v8  ;;  %v489_v32 = vrot.slane %v487_v20, 1  ;;  %v495_v14 = vshll.u32 %v5996_v25, 16  ;;  %v2211_v37 = vrot.slane %v5839_v24, 2  ;;  %v6017_v48 = vld [vmem:[%s5804_s6 + $0x80] sm:$0xff]  }
  0x35   : > { %5027 = vmatprep.mubr.msk.bf16.mxu1 %vm537_vm1, %v458_v42  ;;  %v485_v2 = vor.u32 %v483_v17, %v481_v23  ;;  %v2210_v34 = vsel %vm2207_vm3, %v2208_v9, %v2209_v21  ;;  %v482_v36 = vsel %vm382_vm0, %v477_v26, %v481_v23  ;;  %v491_v38 = vshrl.u32 %v5979_v0, 16  ;;  %v6045_v17 = vld [vmem:[%s5804_s6 + $0x90] ss:$0 sps:$4 sm:$0x11]  }
  0x36   : > { %v499_v41 = vshrl.u32 %v5996_v25, 16  ;;  %v503_v42 = vshll.u32 %v6002_v33, 16  ;;  %v2213_v43 = vrot.slane %v5845_v30, 2  ;;  %v497_v47 = vrot.slane %v495_v14, 1  ;;  %v6028_v30 = vld [vmem:[%s6795_s1 + $0x38] sm:$0xff]  }
  0x37   : > { %5176 = vmatmul.mubr.msk.bf16.gmra.mrb[12].mxu0 %vm537_vm1, %v1836_v60  ;;  %v490_v40 = vsel %vm382_vm0, %v485_v2, %v489_v32  ;;  %v493_v24 = vor.u32 %v491_v38, %v489_v32  ;;  %v2212_v49 = vsel %vm2207_vm3, %v2209_v21, %v2211_v37  ;;  %v511_v60 = vshll.u32 %v6017_v48, 16 }
  0x38   : > { %5179 = vmatprep.mubr.msk.bf16.mxu0 %vm537_vm1, %v1845_v1  ;;  %v501_v51 = vor.u32 %v499_v41, %v497_v47  ;;  %v505_v53 = vrot.slane %v503_v42, 1  ;;  %v2214_v57 = vsel %vm2207_vm3, %v2211_v37, %v2213_v43  ;;  %v2215_v63 = vrot.slane %v5863_v45, 2  ;;  %v6072_v42 = vld [vmem:[%s5804_s6 + $0x60] sm:$0xff]  }
  0x39   : > { %v498_v62 = vsel %vm382_vm0, %v493_v24, %v497_v47  ;;  %v507_v1 = vshrl.u32 %v6002_v33, 16  ;;  %v515_v10 = vshrl.u32 %v6017_v48, 16  ;;  %v2217_v12 = vrot.slane %v5875_v55, 2  ;;  %v6095_v24 = vld [vmem:[%s5804_s6 + $0x70] sm:$0xff]  }
  0x3a   : > { %v506_v3 = vsel %vm382_vm0, %v501_v51, %v505_v53  ;;  %v523_v23 = vshrl.u32 %v6022_v54, 16  ;;  %v527_v26 = vshll.u32 %v6045_v17, 16  ;;  %v2221_v32 = vrot.slane %v5917_v39, 2 }
  0x3b   : > { %v509_v45 = vor.u32 %v507_v1, %v505_v53  ;;  %v2218_v21 = vsel %vm2207_vm3, %v2215_v63, %v2217_v12  ;;  %v2225_v39 = vrot.slane %v5942_v4, 2  ;;  %v6080_v4 = vld [vmem:[%s6795_s1 + $0x18] sm:$0xff]   ;;  %v2233_v51 = vrot.slane %v6095_v24, 2 }
  0x3c   : > { %5028 = vmatmul.mubr.msk.bf16.gmra.mrb[16].mxu1 %vm537_vm1, %v466_v11  ;;  %v519_v11 = vshll.u32 %v6022_v54, 16  ;;  %v529_v14 = vrot.slane %v527_v26, 1  ;;  %v6107_v53 = vld [vmem:[%s5804_s6 + $0x78] sm:$0xff]  }
  0x3d   : > { %5031 = vmatprep.mubr.msk.bf16.mxu1 %vm537_vm1, %v474_v13  ;;  %v513_v13 = vrot.slane %v511_v60, 1  ;;  %v6111_v60 = vld [vmem:[%s5804_s6 + $0x80] sm:$0xff]  }
  0x3e   : > { %v521_v9 = vrot.slane %v519_v11, 1  ;;  %v6127_v11 = vld [vmem:[%s5804_s6 + $0x90] sm:$0xff]  }
  0x3f   : > { %5180 = vmatmul.mubr.msk.bf16.gmra.mrb[16].mxu0 %vm537_vm1, %v1854_v27  ;;  %v517_v20 = vor.u32 %v515_v10, %v513_v13  ;;  %v514_v55 = vsel %vm382_vm0, %v509_v45, %v513_v13  ;;  %v2219_v27 = vrot.slane %v5898_v18, 2  ;;  %v2223_v18 = vrot.slane %v5930_v58, 2  ;;  %v2518_v45 = vld [vmem:[%s5804_s6 + $0x10] sm:$0xc] }
  0x40   : > { %5201 = vmatprep.mubr.msk.bf16.mxu0 %vm537_vm1, %v2210_v34  ;;  %v525_v34 = vor.u32 %v523_v23, %v521_v9  ;;  %v2227_v58 = vrot.slane %v5955_v22, 2  ;;  %v6090_v22 = vld [vmem:[%s5804_s6 + $0x68] sm:$0xff]   ;;  %v2241_v13 = vrot.slane %v6127_v11, 2  ;;  %v6150_v23 = vld [vmem:[%s5804_s6 + $0x18] sm:$0xff]  }
  0x41   : > { %v522_v2 = vsel %vm382_vm0, %v517_v20, %v521_v9  ;;  %v2222_v37 = vsel %vm2207_vm3, %v2219_v27, %v2221_v32  ;;  %v2226_v41 = vsel %vm2207_vm3, %v2223_v18, %v2225_v39  ;;  %v6143_v9 = vld [vmem:[%s5804_s6 + $0x98] ss:$0 sps:$4 sm:$0x33]  }
  0x42   : > { %v530_v38 = vsel %vm382_vm0, %v525_v34, %v529_v14  ;;  %v2243_v26 = vrot.slane %v6143_v9, 2  ;;  %v6163_v34 = vld [vmem:[%s5804_s6 + $0x20] sm:$0xff]  }
  0x44   : > { %5032 = vmatmul.mubr.msk.bf16.gmra.mrb[20].mxu1 %vm537_vm1, %v482_v36  ;;  %v2220_v36 = vsel %vm2207_vm3, %v2217_v12, %v2219_v27 }
  0x45   : > { %5035 = vmatprep.mubr.msk.bf16.mxu1 %vm537_vm1, %v490_v40  ;;  %v2224_v40 = vsel %vm2207_vm3, %v2221_v32, %v2223_v18  ;;  %v2244_v32 = vsel %vm2207_vm3, %v2241_v13, %v2243_v26 }
  0x47   : > { %5202 = vmatmul.mubr.msk.bf16.vlgmr.msra.gmra.mrb[0].mxu0 %vm537_vm1, %v2212_v49  ;;  %v2231_v49 = vrot.slane %v6090_v22, 2 }
  0x48   : > { %5238 = vmatpush3.bf16.msra.mxu0 %v5880_v56  ;;  %5205 = vmatprep.mubr.msk.bf16.mxu0 %vm537_vm1, %v2214_v57  ;;  %v2216_v56 = vsel %vm2207_vm3, %v2213_v43, %v2215_v63  ;;  %v2228_v43 = vsel %vm2207_vm3, %v2225_v39, %v2227_v58  ;;  %v2237_v63 = vrot.slane %v6111_v60, 2  ;;  %v6179_v39 = vld [vmem:[%s5804_s6 + $0x30] sm:$0xff]  }
  0x49   : > { %5275 = vmatprep.subr.bf16.mxu0 %v6028_v30  ;;  %v2234_v57 = vsel %vm2207_vm3, %v2231_v49, %v2233_v51 }
  0x4c   : > { %5036 = vmatmul.mubr.msk.bf16.gmra.mrb[24].mxu1 %vm537_vm1, %v498_v62  ;;  %v2235_v62 = vrot.slane %v6107_v53, 2 }
  0x4d   : > { %5039 = vmatprep.mubr.msk.bf16.mxu1 %vm537_vm1, %v506_v3  ;;  %v6123_v3 = vld [vmem:[%s5804_s6 + $0x88] sm:$0xff]  }
  0x4e   : > { %v2236_v1 = vsel %vm2207_vm3, %v2233_v51, %v2235_v62  ;;  %v2238_v10 = vsel %vm2207_vm3, %v2235_v62, %v2237_v63  ;;  %v2239_v12 = vrot.slane %v6123_v3, 2  ;;  %v6206_v51 = vld [vmem:[%s5804_s6 + $0x48] sm:$0xff]  }
  0x4f   : > { %5206 = vmatmul.mubr.msk.bf16.gmra.mrb[4].mxu0 %vm537_vm1, %v2216_v56  ;;  %v6137_v56 = vld [vmem:[%s5804_s6 + $0x14] sm:$0xf] }
  0x50   : > { %5209 = vmatprep.mubr.msk.bf16.mxu0 %vm537_vm1, %v2218_v21  ;;  %v2240_v20 = vsel %vm2207_vm3, %v2237_v63, %v2239_v12  ;;  %v2242_v21 = vsel %vm2207_vm3, %v2239_v12, %v2241_v13  ;;  %v2664_v63 = vrot.slane %v6206_v51, 2  ;;  %v997_v13 = vrot.slane %v5814_v7, 1 }
  0x54   : > { %5040 = vmatmul.mubr.msk.bf16.gmra.mrb[28].mxu1 %vm537_vm1, %v514_v55  ;;  %v6147_v55 = vcombine.low %v2518_v45, %v6137_v56 }
  0x55   : > { %5043 = vmatprep.mubr.msk.bf16.mxu1 %vm537_vm1, %v522_v2  ;;  %v2652_v2 = vrot.slane %v6150_v23, 2 }
  0x56   : > { %v2651_v27 = vrot.slane %v6147_v55, 2 }
  0x57   : > { %5210 = vmatmul.mubr.msk.bf16.gmra.mrb[8].mxu0 %vm537_vm1, %v2220_v36  ;;  %v6167_v36 = vld [vmem:[%s5804_s6 + $0x28] sm:$0xff]  }
  0x58   : > { %5213 = vmatprep.mubr.msk.bf16.mxu0 %vm537_vm1, %v2222_v37  ;;  %v2653_v14 = vsel %vm2207_vm3, %v2651_v27, %v2652_v2  ;;  %v2654_v37 = vrot.slane %v6163_v34, 2 }
  0x5a   : > { %v2655_v18 = vsel %vm2207_vm3, %v2652_v2, %v2654_v37  ;;  %v6238_v2 = vld [vmem:[%s5804_s6 + $0x60] sm:$0xff]  }
  0x5c   : > { %5044 = vmatmul.mubr.msk.bf16.gmra.mrb[32].mxu1 %vm537_vm1, %v530_v38  ;;  %v2656_v38 = vrot.slane %v6167_v36, 2 }
  0x5d   : > { %5049 = vmatprep.mubr.msk.bf16.mxu1 %vm537_vm1, %v5811_v6  ;;  %v2229_v6 = vrot.slane %v6072_v42, 2 }
  0x5f   : > { %5214 = vmatmul.mubr.msk.bf16.gmra.mrb[12].mxu0 %vm537_vm1, %v2224_v40  ;;  %v2230_v47 = vsel %vm2207_vm3, %v2227_v58, %v2229_v6  ;;  %v2657_v40 = vsel %vm2207_vm3, %v2654_v37, %v2656_v38  ;;  %v6188_v58 = vld [vmem:[%s6795_s1 + $0x40] sm:$0xff]   ;;  %v6243_v37 = vld [vmem:[%s5804_s6 + $0x68] sm:$0xff]  }
  0x60   : > { %5217 = vmatprep.mubr.msk.bf16.mxu0 %vm537_vm1, %v2226_v41  ;;  %v6183_v41 = vld [vmem:[%s5804_s6 + $0x38] sm:$0xff]  }
  0x64   : > { %5050 = vmatmul.mubr.msk.bf16.vlgmr.msra.gmra.mrb[0].mxu1 %vm537_vm1, %v5814_v7  ;;  %v999_v7 = vrot.slane %v5828_v15, 1 }
  0x65   : > { %5053 = vmatprep.mubr.msk.bf16.mxu1 %vm537_vm1, %v5828_v15  ;;  %5086 = vmatpush3.bf16.msra.mxu1 %v5850_v31  ;;  %v2232_v31 = vsel %vm2207_vm3, %v2229_v6, %v2231_v49  ;;  %v2658_v6 = vrot.slane %v6179_v39, 2  ;;  %v6202_v49 = vld [vmem:[%s5804_s6 + $0x40] sm:$0xff]  }
  0x66   : > { %5123 = vmatprep.subr.bf16.mxu1 %v6080_v4 }
  0x67   : > { %5218 = vmatmul.mubr.msk.bf16.gmra.mrb[16].mxu0 %vm537_vm1, %v2228_v43  ;;  %v2660_v43 = vrot.slane %v6183_v41, 2 }
  0x68   : > { %5221 = vmatprep.mubr.msk.bf16.mxu0 %vm537_vm1, %v2230_v47  ;;  %v2659_v47 = vsel %vm2207_vm3, %v2656_v38, %v2658_v6  ;;  %v1000_v38 = vsel %vm995_vm4, %v997_v13, %v999_v7 }
  0x6c   : > { %5054 = vmatmul.mubr.msk.bf16.gmra.mrb[4].mxu1 %vm537_vm1, %v5842_v29 }
  0x6d   : > { %5057 = vmatprep.mubr.msk.bf16.mxu1 %vm537_vm1, %v5860_v44 }
  0x6f   : > { %5222 = vmatmul.mubr.msk.bf16.gmra.mrb[20].mxu0 %vm537_vm1, %v2232_v31  ;;  %v988_v31 = vld [vmem:[%s5804_s6] sm:$0xe] }
  0x70   : > { %5225 = vmatprep.mubr.msk.bf16.mxu0 %vm537_vm1, %v2234_v57  ;;  %v2662_v57 = vrot.slane %v6202_v49, 2  ;;  %v4469_v62 = vcombine.low %v988_v31, %v5808_v5  ;;  %v6225_v5 = vld [vmem:[%s5804_s6 + $0x58] sm:$0xff]   ;;  %v6263_v31 = vld [vmem:[%s6795_s1 + $0x20] sm:$0xff]  }
  0x71   : > { %v2668_v26 = vrot.slane %v6225_v5, 2 }
  0x72   : > { %v996_v12 = vrot.slane %v4469_v62, 1  ;;  %v2665_v45 = vsel %vm2207_vm3, %v2662_v57, %v2664_v63  ;;  %v6268_v62 = vld [vmem:[%s5804_s6 + $0x78] sm:$0xff]  }
  0x74   : > { %5058 = vmatmul.mubr.msk.bf16.gmra.mrb[8].mxu1 %vm537_vm1, %v5869_v50 }
  0x75   : > { %5061 = vmatprep.mubr.msk.bf16.mxu1 %vm537_vm1, %v5885_v61 }
  0x77   : > { %5226 = vmatmul.mubr.msk.bf16.gmra.mrb[24].mxu0 %vm537_vm1, %v2236_v1  ;;  %v2663_v1 = vsel %vm2207_vm3, %v2660_v43, %v2662_v57 }
  0x78   : > { %5229 = vmatprep.mubr.msk.bf16.mxu0 %vm537_vm1, %v2238_v10  ;;  %v6220_v10 = vld [vmem:[%s5804_s6 + $0x50] sm:$0xff]  }
  0x7c   : > { %5062 = vmatmul.mubr.msk.bf16.gmra.mrb[12].mxu1 %vm537_vm1, %v5907_v28 }
  0x7d   : > { %5065 = vmatprep.mubr.msk.bf16.mxu1 %vm537_vm1, %v5922_v46 }
  0x7f   : > { %5230 = vmatmul.mubr.msk.bf16.gmra.mrb[28].mxu0 %vm537_vm1, %v2240_v20  ;;  %v2666_v20 = vrot.slane %v6220_v10, 2 }
  0x80   : > { %5233 = vmatprep.mubr.msk.bf16.mxu0 %vm537_vm1, %v2242_v21  ;;  %v998_v21 = vsel %vm995_vm4, %v996_v12, %v997_v13  ;;  %v2676_v12 = vrot.slane %v6268_v62, 2  ;;  %v3911_v13 = vld [vmem:[%s6796_s2 + $0x8] sm:$0xff] }
  0x81   : > { %v2667_v27 = vsel %vm2207_vm3, %v2664_v63, %v2666_v20 }
  0x84   : > { %5066 = vmatmul.mubr.msk.bf16.gmra.mrb[16].mxu1 %vm537_vm1, %v5933_v59 }
  0x85   : > { %5069 = vmatprep.mubr.msk.bf16.mxu1 %vm537_vm1, %v5950_v19 }
  0x87   : > { %5234 = vmatmul.mubr.msk.bf16.gmra.mrb[32].mxu0 %vm537_vm1, %v2244_v32  ;;  %v1001_v32 = vrot.slane %v5842_v29, 1  ;;  %v1003_v29 = vrot.slane %v5860_v44, 1 }
  0x88   : > { %5239 = vmatprep.mubr.msk.bf16.mxu0 %vm537_vm1, %v2653_v14  ;;  %v2669_v14 = vsel %vm2207_vm3, %v2666_v20, %v2668_v26 }
  0x89   : > { %v1002_v15 = vsel %vm995_vm4, %v999_v7, %v1001_v32  ;;  %v1004_v44 = vsel %vm995_vm4, %v1001_v32, %v1003_v29 }
  0x8c   : > { %5070 = vmatmul.mubr.msk.bf16.gmra.mrb[20].mxu1 %vm537_vm1, %v5960_v35 }
  0x8d   : > { %5073 = vmatprep.mubr.msk.bf16.mxu1 %vm537_vm1, %v5974_v52 }
  0x8f   : > { %5240 = vmatmul.mubr.msk.bf16.vlgmr.msra.gmra.mrb[0].mxu0 %vm537_vm1, %v2655_v18  ;;  %v2670_v18 = vrot.slane %v6238_v2, 2 }
  0x90   : > { %5276 = vmatpush3.bf16.msra.mxu0 %v6028_v30  ;;  %5243 = vmatprep.mubr.msk.bf16.mxu0 %vm537_vm1, %v2657_v40  ;;  %v2661_v30 = vsel %vm2207_vm3, %v2658_v6, %v2660_v43  ;;  %v2672_v40 = vrot.slane %v6243_v37, 2  ;;  %v5744_v6 = vmov 0  }
  0x91   : > { %5313 = vmatprep.subr.bf16.mxu0 %v6188_v58  ;;  %5652 = vset.pattern.permute.xlu0 %v5744_v6  ;;  %v2671_v43 = vsel %vm2207_vm3, %v2668_v26, %v2670_v18  ;;  %v1009_v26 = vrot.slane %v5907_v28, 1 }
  0x92   : > { %5653 = vset.pattern.permute.xlu1 %v5744_v6  ;;  %v2673_v57 = vsel %vm2207_vm3, %v2670_v18, %v2672_v40  ;;  %v1011_v6 = vrot.slane %v5922_v46, 1  ;;  %v3917_v46 = vld [vmem:[%s6796_s2 + $0x38] sm:$0xff] }
  0x94   : > { %5074 = vmatmul.mubr.msk.bf16.gmra.mrb[24].mxu1 %vm537_vm1, %v5979_v0 }
  0x95   : > { %5077 = vmatprep.mubr.msk.bf16.mxu1 %vm537_vm1, %v5996_v25 }
  0x97   : > { %5244 = vmatmul.mubr.msk.bf16.gmra.mrb[4].mxu0 %vm537_vm1, %v2659_v47  ;;  %v6257_v47 = vld [vmem:[%s5804_s6 + $0x70] sm:$0xff]  }
  0x98   : > { %5247 = vmatprep.mubr.msk.bf16.mxu0 %vm537_vm1, %v2661_v30  ;;  %v1005_v30 = vrot.slane %v5869_v50, 1  ;;  %v3910_v50 = vld [vmem:[%s6796_s2] sm:$0xff]  ;;  %v2674_v63 = vrot.slane %v6257_v47, 2 }
  0x99   : > { %3948 = vperm.xlu0 %5652, %v3910_v50   ;;  %v1012_v50 = vsel %vm995_vm4, %v1009_v26, %v1011_v6 }
  0x9a   : > { %v2675_v20 = vsel %vm2207_vm3, %v2672_v40, %v2674_v63  ;;  %v2677_v7 = vsel %vm2207_vm3, %v2674_v63, %v2676_v12  ;;  %v3916_v40 = vld [vmem:[%s6796_s2 + $0x30] sm:$0xff] }
  0x9c   : > { %5078 = vmatmul.mubr.msk.bf16.gmra.mrb[28].mxu1 %vm537_vm1, %v6002_v33 }
  0x9d   : > { %5081 = vmatprep.mubr.msk.bf16.mxu1 %vm537_vm1, %v6017_v48  ;;  %3953 = vperm.xlu0 %5652, %v3911_v13   ;;  %v2973_v13 = vshll.u32 %v6147_v55, 16 }
  0x9f   : > { %5248 = vmatmul.mubr.msk.bf16.gmra.mrb[8].mxu0 %vm537_vm1, %v2663_v1  ;;  %v1006_v1 = vsel %vm995_vm4, %v1003_v29, %v1005_v30 }
  0xa0   : > { %5251 = vmatprep.mubr.msk.bf16.mxu0 %vm537_vm1, %v2665_v45  ;;  %v1007_v45 = vrot.slane %v5885_v61, 1  ;;  %v3913_v61 = vld [vmem:[%s6796_s2 + $0x18] sm:$0xff] }
  0xa2   : > { %v1008_v32 = vsel %vm995_vm4, %v1005_v30, %v1007_v45  ;;  %v1013_v30 = vrot.slane %v5933_v59, 1 }
  0xa4   : > { %5082 = vmatmul.mubr.msk.bf16.gmra.mrb[32].mxu1 %vm537_vm1, %v6022_v54  ;;  %v1014_v63 = vsel %vm995_vm4, %v1011_v6, %v1013_v30 }
  0xa5   : > { %5087 = vmatprep.mubr.msk.bf16.mxu1 %vm537_vm1, %v998_v21  ;;  %v6290_v21 = vld [vmem:[%s5804_s6 + $0x80] sm:$0xff]  }
  0xa6   : > { %v2678_v28 = vrot.slane %v6290_v21, 2 }
  0xa7   : > { %5252 = vmatmul.mubr.msk.bf16.gmra.mrb[12].mxu0 %vm537_vm1, %v2667_v27  ;;  %v6295_v27 = vld [vmem:[%s5804_s6 + $0x88] sm:$0xff]  }
  0xa8   : > { %5255 = vmatprep.mubr.msk.bf16.mxu0 %vm537_vm1, %v2669_v14  ;;  %v3914_v14 = vld [vmem:[%s6796_s2 + $0x20] sm:$0xff]  ;;  %v2680_v18 = vrot.slane %v6295_v27, 2  ;;  %v2679_v29 = vsel %vm2207_vm3, %v2676_v12, %v2678_v28  ;;  %v2970_v12 = vshrl.u32 %v6147_v55, 16 }
  0xa9   : > { %3968 = vperm.xlu0 %5652, %v3914_v14   ;;  %v5720_v14 = vld [vmem:[%s5804_s6 + $0xa0] ss:$0 sps:$4 sm:$0x33]  }
  0xac   : > { %5088 = vmatmul.mubr.msk.bf16.vlgmr.msra.gmra.mrb[0].mxu1 %vm537_vm1, %v1000_v38  ;;  %v1010_v38 = vsel %vm995_vm4, %v1007_v45, %v1009_v26  ;;  %v2978_v45 = vshrl.u32 %v6150_v23, 16  ;;  %v3919_v26 = vld [vmem:[%s6796_s2 + $0x48] sm:$0xff] }
  0xad   : > { %5091 = vmatprep.mubr.msk.bf16.mxu1 %vm537_vm1, %v1002_v15  ;;  %5124 = vmatpush3.bf16.msra.mxu1 %v6080_v4  ;;  %v3912_v4 = vld [vmem:[%s6796_s2 + $0x10] sm:$0xff]  ;;  %v3915_v15 = vld [vmem:[%s6796_s2 + $0x28] sm:$0xff] }
  0xae   : > { %5351 = vmatprep.subr.bf16.mxu1 %v6263_v31  ;;  %3958 = vperm.xlu1 %5653, %v3912_v4   ;;  %v3918_v4 = vld [vmem:[%s6796_s2 + $0x40] sm:$0xff] }
  0xaf   : > { %5256 = vmatmul.mubr.msk.bf16.gmra.mrb[16].mxu0 %vm537_vm1, %v2671_v43  ;;  %v6320_v43 = vld [vmem:[%s5804_s6 + $0x90] sm:$0xff]   ;;  %3978 = vperm.xlu0 %5652, %v3916_v40   ;;  %v2980_v40 = vrot.slane %v2978_v45, 2  ;;  %v1019_v45 = vrot.slane %v5974_v52, 1  ;;  %v3925_v52 = vld [vmem:[%s6796_s2 + $0x78] sm:$0xff] }
  0xb0   : > { %5259 = vmatprep.mubr.msk.bf16.mxu0 %vm537_vm1, %v2673_v57  ;;  %v6324_v57 = vld [vmem:[%s5804_s6 + $0x98] sm:$0xff]   ;;  %v2682_v59 = vrot.slane %v6320_v43, 2 }
  0xb2   : > { %3963 = vperm.xlu1 %5653, %v3913_v61   ;;  %v2683_v55 = vsel %vm2207_vm3, %v2680_v18, %v2682_v59 }
  0xb3   : > { %3988 = vperm.xlu0 %5652, %v3918_v4  }
  0xb4   : > { %5092 = vmatmul.mubr.msk.bf16.gmra.mrb[4].mxu1 %vm537_vm1, %v1004_v44  ;;  %v2681_v44 = vsel %vm2207_vm3, %v2678_v28, %v2680_v18  ;;  %v1017_v28 = vrot.slane %v5960_v35, 1  ;;  %v3922_v18 = vld [vmem:[%s6796_s2 + $0x60] sm:$0xff]  ;;  %v2686_v35 = vrot.slane %v5720_v14, 2 }
  0xb5   : > { %5095 = vmatprep.mubr.msk.bf16.mxu1 %vm537_vm1, %v1006_v1  ;;  %v2684_v1 = vrot.slane %v6324_v57, 2 }
  0xb6   : > { %3973 = vperm.xlu1 %5653, %v3915_v15   ;;  %v2975_v15 = vrot.slane %v2973_v13, 3  ;;  %v3924_v13 = vld [vmem:[%s6796_s2 + $0x70] sm:$0xff] }
  0xb7   : > { %5260 = vmatmul.mubr.msk.bf16.gmra.mrb[20].mxu0 %vm537_vm1, %v2675_v20  ;;  %v2981_v20 = vshll.u32 %v6150_v23, 16  ;;  %v2685_v61 = vsel %vm2207_vm3, %v2682_v59, %v2684_v1  ;;  %v2996_v59 = vshrl.u32 %v6167_v36, 16 }
  0xb8   : > { %5263 = vmatprep.mubr.msk.bf16.mxu0 %vm537_vm1, %v2677_v7  ;;  %v3920_v7 = vld [vmem:[%s6796_s2 + $0x50] sm:$0xff] }
  0xb9   : > { %v2983_v6 = vrot.slane %v2981_v20, 3  ;;  %3998 = vperm.xlu0 %5652, %v3920_v7   ;;  %v2687_v20 = vsel %vm2207_vm3, %v2684_v1, %v2686_v35  ;;  %v3926_v1 = vld [vmem:[%s6796_s2 + $0x80] sm:$0xff]  ;;  %v3928_v35 = vld [vmem:[%s6796_s2 + $0x90] sm:$0xff] }
  0xba   : > { %3983 = vperm.xlu1 %5653, %v3917_v46   ;;  %v2990_v46 = vshll.u32 %v6163_v34, 16 }
  0xbc   : > { %5096 = vmatmul.mubr.msk.bf16.gmra.mrb[8].mxu1 %vm537_vm1, %v1008_v32  ;;  %v1015_v32 = vrot.slane %v5950_v19, 1  ;;  %v3921_v19 = vld [vmem:[%s6796_s2 + $0x58] sm:$0xff]  ;;  %v2992_v7 = vrot.slane %v2990_v46, 3 }
  0xbd   : > { %5099 = vmatprep.mubr.msk.bf16.mxu1 %vm537_vm1, %v1010_v38  ;;  %v2972_v38 = vrot.slane %v2970_v12, 2  ;;  %4008 = vperm.xlu0 %5652, %v3922_v18   ;;  %v3923_v12 = vld [vmem:[%s6796_s2 + $0x68] sm:$0xff] }
  0xbe   : > { %3993 = vperm.xlu1 %5653, %v3919_v26   ;;  %v3927_v18 = vld [vmem:[%s6796_s2 + $0x88] sm:$0xff] }
  0xbf   : > { %5264 = vmatmul.mubr.msk.bf16.gmra.mrb[24].mxu0 %vm537_vm1, %v2679_v29  ;;  %v1016_v29 = vsel %vm995_vm4, %v1013_v30, %v1015_v32  ;;  %v2976_v4 = vor.u32 %v2975_v15, %v2972_v38  ;;  %v2984_v30 = vor.u32 %v2983_v6, %v2980_v40  ;;  %v1020_v38 = vsel %vm995_vm4, %v1017_v28, %v1019_v45 }
  0xc0   : > { %5267 = vmatprep.mubr.msk.bf16.mxu0 %vm537_vm1, %v2681_v44  ;;  %v1018_v44 = vsel %vm995_vm4, %v1015_v32, %v1017_v28  ;;  %v1021_v32 = vrot.slane %v5979_v0, 1  ;;  %v3005_v40 = vshrl.u32 %v6179_v39, 16  ;;  %v3008_v6 = vshll.u32 %v6179_v39, 16 }
  0xc1   : > { %4018 = vperm.xlu0 %5652, %v3924_v13   ;;  %v3014_v28 = vshrl.u32 %v6183_v41, 16 }
  0xc2   : > { %4003 = vperm.xlu1 %5653, %v3921_v19   ;;  %v1022_v15 = vsel %vm995_vm4, %v1019_v45, %v1021_v32  ;;  %v3017_v19 = vshll.u32 %v6183_v41, 16  ;;  %v3007_v46 = vrot.slane %v3005_v40, 2 }
  0xc4   : > { %5100 = vmatmul.mubr.msk.bf16.gmra.mrb[12].mxu1 %vm537_vm1, %v1012_v50  ;;  %v2987_v50 = vshrl.u32 %v6163_v34, 16  ;;  %v3019_v13 = vrot.slane %v3017_v19, 3 }
  0xc5   : > { %5103 = vmatprep.mubr.msk.bf16.mxu1 %vm537_vm1, %v1014_v63  ;;  %v2999_v63 = vshll.u32 %v6167_v36, 16  ;;  %4028 = vperm.xlu0 %5652, %v3926_v1  }
  0xc6   : > { %v2989_v26 = vrot.slane %v2987_v50, 2  ;;  %4013 = vperm.xlu1 %5653, %v3923_v12   ;;  %v3016_v12 = vrot.slane %v3014_v28, 2 }
  0xc7   : > { %5268 = vmatmul.mubr.msk.bf16.gmra.mrb[28].mxu0 %vm537_vm1, %v2683_v55  ;;  %v2985_v55 = vsel %vm2968_vm5, %v2976_v4, %v2984_v30  ;;  %v3001_v14 = vrot.slane %v2999_v63, 3  ;;  %v3010_v4 = vrot.slane %v3008_v6, 3 }
  0xc8   : > { %5271 = vmatprep.mubr.msk.bf16.mxu0 %vm537_vm1, %v2685_v61  ;;  %v2998_v61 = vrot.slane %v2996_v59, 2  ;;  %v2993_v0 = vor.u32 %v2992_v7, %v2989_v26  ;;  %v1025_v59 = vrot.slane %v6002_v33, 1  ;;  %v3023_v26 = vshrl.u32 %v6202_v49, 16 }
  0xc9   : > { %4038 = vperm.xlu0 %5652, %v3928_v35   ;;  %v3011_v33 = vor.u32 %v3010_v4, %v3007_v46  ;;  %v3026_v7 = vshll.u32 %v6202_v49, 16  ;;  %v3050_v46 = vshrl.u32 %v6225_v5, 16  ;;  %v3053_v4 = vshll.u32 %v6225_v5, 16 }
  0xca   : > { %4023 = vperm.xlu1 %5653, %v3925_v52   ;;  %v2994_v50 = vsel %vm2968_vm5, %v2984_v30, %v2993_v0  ;;  %v3930_v30 = vld [vmem:[%s6796_s2 + $0xa0] sm:$0xff]  ;;  %v3025_v1 = vrot.slane %v3023_v26, 2 }
  0xcc   : > { %5104 = vmatmul.mubr.msk.bf16.gmra.mrb[16].mxu1 %vm537_vm1, %v1016_v29  ;;  %v3002_v29 = vor.u32 %v3001_v14, %v2998_v61  ;;  %v3035_v61 = vshll.u32 %v6206_v51, 16  ;;  %v3932_v14 = vld [vmem:[%s6796_s2 + $0xb0] sm:$0xff] }
  0xcd   : > { %5107 = vmatprep.mubr.msk.bf16.mxu1 %vm537_vm1, %v1018_v44  ;;  %v1023_v44 = vrot.slane %v5996_v25, 1  ;;  %v3929_v25 = vld [vmem:[%s6796_s2 + $0x98] sm:$0xff]  ;;  %4048 = vperm.xlu0 %5652, %v3930_v30   ;;  %v1439_v30 = vrot.slane %v5831_v16, 1 }
  0xce   : > { %4033 = vperm.xlu1 %5653, %v3927_v18   ;;  %v3003_v63 = vsel %vm2968_vm5, %v2993_v0, %v3002_v29  ;;  %v3012_v52 = vsel %vm2968_vm5, %v3002_v29, %v3011_v33  ;;  %v3028_v0 = vrot.slane %v3026_v7, 3  ;;  %v3037_v28 = vrot.slane %v3035_v61, 3  ;;  %v3937_v61 = vld [vmem:[%s6796_s2 + $0xd8] sm:$0xff] }
  0xcf   : > { %5272 = vmatmul.mubr.msk.bf16.gmra.mrb[32].mxu0 %vm537_vm1, %v2687_v20  ;;  %v1024_v45 = vsel %vm995_vm4, %v1021_v32, %v1023_v44  ;;  %v1026_v20 = vsel %vm995_vm4, %v1023_v44, %v1025_v59  ;;  %v3020_v32 = vor.u32 %v3019_v13, %v3016_v12  ;;  %v3041_v18 = vshrl.u32 %v6220_v10, 16 }
  0xd0   : > { %5277 = vmatprep.mubr.msk.bf16.mxu0 %vm537_vm1, %v2985_v55  ;;  %v3032_v55 = vshrl.u32 %v6206_v51, 16  ;;  %v3029_v29 = vor.u32 %v3028_v0, %v3025_v1  ;;  %v3044_v44 = vshll.u32 %v6220_v10, 16  ;;  %v1031_v12 = vrot.slane %v6045_v17, 1  ;;  %v3938_v17 = vld [vmem:[%s6796_s2 + $0xe0] sm:$0xff] }
  0xd1   : > { %v3021_v40 = vsel %vm2968_vm5, %v3011_v33, %v3020_v32  ;;  %4058 = vperm.xlu0 %5652, %v3932_v14   ;;  %v3043_v13 = vrot.slane %v3041_v18, 2  ;;  %v5726_v33 = vld [vmem:[%s5804_s6 + $0x10] sm:$0xff]   ;;  %v3052_v7 = vrot.slane %v3050_v46, 2  ;;  %v3059_v14 = vshrl.u32 %v6238_v2, 16 }
  0xd2   : > { %4043 = vperm.xlu1 %5653, %v3929_v25   ;;  %v3034_v6 = vrot.slane %v3032_v55, 2  ;;  %v3046_v25 = vrot.slane %v3044_v44, 3  ;;  %v3055_v55 = vrot.slane %v3053_v4, 3  ;;  %v3068_v1 = vshrl.u32 %v6243_v37, 16  ;;  %v3941_v4 = vld [vmem:[%s6796_s2 + $0xf8] sm:$0xff] }
  0xd3   : > { %v3071_v0 = vshll.u32 %v6243_v37, 16  ;;  %v3061_v18 = vrot.slane %v3059_v14, 2 }
  0xd4   : > { %5108 = vmatmul.mubr.msk.bf16.gmra.mrb[20].mxu1 %vm537_vm1, %v1020_v38  ;;  %v1027_v38 = vrot.slane %v6017_v48, 1  ;;  %v3933_v48 = vld [vmem:[%s6796_s2 + $0xb8] sm:$0xff]  ;;  %v3070_v44 = vrot.slane %v3068_v1, 2 }
  0xd5   : > { %5111 = vmatprep.mubr.msk.bf16.mxu1 %vm537_vm1, %v1022_v15  ;;  %v1029_v15 = vrot.slane %v6022_v54, 1  ;;  %v3934_v54 = vld [vmem:[%s6796_s2 + $0xc0] sm:$0xff]  ;;  %v3073_v46 = vrot.slane %v3071_v0, 3  ;;  %v3945_v0 = vld [vmem:[%s6796_s2 + $0x118] sm:$0xff] }
  0xd6   : > { %v1028_v19 = vsel %vm995_vm4, %v1025_v59, %v1027_v38  ;;  %4068 = vperm.xlu0 %5652, %v3934_v54   ;;  %v3935_v59 = vld [vmem:[%s6796_s2 + $0xc8] sm:$0xff]  ;;  %v5728_v54 = vld [vmem:[%s5804_s6 + $0x20] sm:$0xff]  }
  0xd7   : > { %5278 = vmatmul.mubr.msk.bf16.vlgmr.msra.gmra.mrb[0].mxu0 %vm537_vm1, %v2994_v50  ;;  %v1030_v35 = vsel %vm995_vm4, %v1027_v38, %v1029_v15  ;;  %v3038_v50 = vor.u32 %v3037_v28, %v3034_v6  ;;  %v1032_v16 = vsel %vm995_vm4, %v1029_v15, %v1031_v12  ;;  %v3062_v38 = vshll.u32 %v6238_v2, 16  ;;  %v3939_v15 = vld [vmem:[%s6796_s2 + $0xe8] sm:$0xff]  ;;  %v5727_v6 = vld [vmem:[%s5804_s6 + $0x18] sm:$0xff]  }
  0xd8   : > { %5314 = vmatpush3.bf16.msra.mxu0 %v6188_v58  ;;  %5281 = vmatprep.mubr.msk.bf16.mxu0 %vm537_vm1, %v3003_v63  ;;  %v3931_v58 = vld [vmem:[%s6796_s2 + $0xa8] sm:$0xff]  ;;  %v3936_v63 = vld [vmem:[%s6796_s2 + $0xd0] sm:$0xff]  ;;  %v1442_v28 = vrot.slane %v5727_v6, 1  ;;  %v3098_v6 = vshll.u32 %v6290_v21, 16 }
  0xd9   : > { %4053 = vperm.xlu1 %5653, %v3931_v58   ;;  %v3039_v26 = vsel %vm2968_vm5, %v3029_v29, %v3038_v50 }
  0xda   : > { %4078 = vperm.xlu0 %5652, %v3936_v63  }
  0xdc   : > { %5112 = vmatmul.mubr.msk.bf16.gmra.mrb[24].mxu1 %vm537_vm1, %v1024_v45  ;;  %v3030_v45 = vsel %vm2968_vm5, %v3020_v32, %v3029_v29  ;;  %v3047_v32 = vor.u32 %v3046_v25, %v3043_v13  ;;  %v1444_v29 = vrot.slane %v5728_v54, 1  ;;  %v3077_v13 = vshrl.u32 %v6257_v47, 16 }
  0xdd   : > { %5115 = vmatprep.mubr.msk.bf16.mxu1 %vm537_vm1, %v1026_v20  ;;  %4063 = vperm.xlu1 %5653, %v3933_v48   ;;  %v1440_v20 = vrot.slane %v5726_v33, 1  ;;  %v3064_v48 = vrot.slane %v3062_v38, 3  ;;  %v3074_v25 = vor.u32 %v3073_v46, %v3070_v44  ;;  %v3089_v33 = vshll.u32 %v6268_v62, 16  ;;  %v5732_v46 = vld [vmem:[%s5804_s6 + $0x40] sm:$0xff]  }
  0xde   : > { %4088 = vperm.xlu0 %5652, %v3938_v17   ;;  %v1445_v12 = vsel %vm995_vm4, %v1442_v28, %v1444_v29  ;;  %v3079_v17 = vrot.slane %v3077_v13, 2  ;;  %v3100_v44 = vrot.slane %v3098_v6, 3 }
  0xdf   : > { %5282 = vmatmul.mubr.msk.bf16.gmra.mrb[4].mxu0 %vm537_vm1, %v3012_v52  ;;  %v1441_v58 = vsel %vm995_vm4, %v1439_v30, %v1440_v20  ;;  %v3056_v52 = vor.u32 %v3055_v55, %v3052_v7  ;;  %v3065_v63 = vor.u32 %v3064_v48, %v3061_v18  ;;  %v3086_v30 = vshrl.u32 %v6268_v62, 16  ;;  %v5729_v7 = vld [vmem:[%s5804_s6 + $0x28] sm:$0xff]   ;;  %v5731_v48 = vld [vmem:[%s5804_s6 + $0x38] sm:$0xff]  }
  0xe0   : > { %5285 = vmatprep.mubr.msk.bf16.mxu0 %vm537_vm1, %v3021_v40  ;;  %v3940_v40 = vld [vmem:[%s6796_s2 + $0xf0] sm:$0xff]  ;;  %v1446_v55 = vrot.slane %v5729_v7, 1  ;;  %v3091_v1 = vrot.slane %v3089_v33, 3  ;;  %v3107_v18 = vshll.u32 %v6295_v27, 16  ;;  %v1450_v54 = vrot.slane %v5731_v48, 1  ;;  %v5733_v7 = vld [vmem:[%s5804_s6 + $0x48] sm:$0xff]  }
  0xe1   : > { %4073 = vperm.xlu1 %5653, %v3935_v59   ;;  %v3942_v59 = vld [vmem:[%s6796_s2 + $0x100] sm:$0xff]  ;;  %v3075_v14 = vsel %vm2968_vm5, %v3065_v63, %v3074_v25  ;;  %v3088_v38 = vrot.slane %v3086_v30, 2  ;;  %v3116_v30 = vshll.u32 %v6320_v43, 16 }
  0xe2   : > { %4098 = vperm.xlu0 %5652, %v3940_v40   ;;  %v3095_v40 = vshrl.u32 %v6290_v21, 16 }
  0xe4   : > { %5116 = vmatmul.mubr.msk.bf16.gmra.mrb[28].mxu1 %vm537_vm1, %v1028_v19  ;;  %v3048_v19 = vsel %vm2968_vm5, %v3038_v50, %v3047_v32  ;;  %v1443_v50 = vsel %vm995_vm4, %v1440_v20, %v1442_v28  ;;  %v3943_v20 = vld [vmem:[%s6796_s2 + $0x108] sm:$0xff]  ;;  %v3092_v28 = vor.u32 %v3091_v1, %v3088_v38 }
  0xe5   : > { %5119 = vmatprep.mubr.msk.bf16.mxu1 %vm537_vm1, %v1030_v35  ;;  %4083 = vperm.xlu1 %5653, %v3937_v61   ;;  %v3057_v35 = vsel %vm2968_vm5, %v3047_v32, %v3056_v52  ;;  %v3066_v61 = vsel %vm2968_vm5, %v3056_v52, %v3065_v63  ;;  %v5730_v32 = vld [vmem:[%s5804_s6 + $0x30] sm:$0xff]   ;;  %v3109_v63 = vrot.slane %v3107_v18, 3  ;;  %v5735_v18 = vld [vmem:[%s5804_s6 + $0x58] sm:$0xff]  }
  0xe6   : > { %4108 = vperm.xlu0 %5652, %v3942_v59   ;;  %v1458_v48 = vrot.slane %v5735_v18, 1  ;;  %v1865_v18 = vshrl.u32 %v6090_v22, 16 }
  0xe7   : > { %5286 = vmatmul.mubr.msk.bf16.gmra.mrb[8].mxu0 %vm537_vm1, %v3030_v45  ;;  %v3080_v45 = vshll.u32 %v6257_v47, 16 }
  0xe8   : > { %5289 = vmatprep.mubr.msk.bf16.mxu0 %vm537_vm1, %v3039_v26  ;;  %v3944_v26 = vld [vmem:[%s6796_s2 + $0x110] sm:$0xff] }
  0xe9   : > { %4093 = vperm.xlu1 %5653, %v3939_v15  }
  0xea   : > { %4118 = vperm.xlu0 %5652, %v3944_v26   ;;  %v3125_v26 = vshll.u32 %v6324_v57, 16 }
  0xec   : > { %5120 = vmatmul.mubr.msk.bf16.gmra.mrb[32].mxu1 %vm537_vm1, %v1032_v16  ;;  %v3082_v16 = vrot.slane %v3080_v45, 3 }
  0xed   : > { %5125 = vmatprep.mubr.msk.bf16.mxu1 %vm537_vm1, %v1441_v58  ;;  %4103 = vperm.xlu1 %5653, %v3941_v4   ;;  %v1448_v58 = vrot.slane %v5730_v32, 1  ;;  %v1452_v4 = vrot.slane %v5732_v46, 1  ;;  %v5734_v32 = vld [vmem:[%s5804_s6 + $0x50] sm:$0xff]  }
  0xee   : > { %v3083_v52 = vor.u32 %v3082_v16, %v3079_v17  ;;  %v3118_v16 = vrot.slane %v3116_v30, 3 }
  0xef   : > { %5290 = vmatmul.mubr.msk.bf16.gmra.mrb[12].mxu0 %vm537_vm1, %v3048_v19  ;;  %v1449_v15 = vsel %vm995_vm4, %v1446_v55, %v1448_v58  ;;  %v3104_v19 = vshrl.u32 %v6295_v27, 16  ;;  %v1453_v45 = vsel %vm995_vm4, %v1450_v54, %v1452_v4 }
  0xf0   : > { %5293 = vmatprep.mubr.msk.bf16.mxu0 %vm537_vm1, %v3057_v35  ;;  %v3097_v35 = vrot.slane %v3095_v40, 2  ;;  %v3093_v59 = vsel %vm2968_vm5, %v3083_v52, %v3092_v28 }
  0xf1   : > { %4113 = vperm.xlu1 %5653, %v3943_v20   ;;  %v3122_v20 = vshrl.u32 %v6324_v57, 16 }
  0xf2   : > { %v3101_v13 = vor.u32 %v3100_v44, %v3097_v35  ;;  %v1460_v44 = vrot.slane %v6072_v42, 1 }
  0xf3   : > { %v3124_v1 = vrot.slane %v3122_v20, 2 }
  0xf4   : > { %5126 = vmatmul.mubr.msk.bf16.vlgmr.msra.gmra.mrb[0].mxu1 %vm537_vm1, %v1443_v50  ;;  %v3106_v50 = vrot.slane %v3104_v19, 2  ;;  %v3412_v19 = vld [vmem:[%s5804_s6 + $0x10] sm:$0x8] }
  0xf5   : > { %5129 = vmatprep.mubr.msk.bf16.mxu1 %vm537_vm1, %v1445_v12  ;;  %5352 = vmatpush3.bf16.msra.mxu1 %v6263_v31  ;;  %v1447_v31 = vsel %vm995_vm4, %v1444_v29, %v1446_v55  ;;  %v3084_v29 = vsel %vm2968_vm5, %v3074_v25, %v3083_v52  ;;  %v1451_v12 = vsel %vm995_vm4, %v1448_v58, %v1450_v54  ;;  %v3113_v25 = vshrl.u32 %v6320_v43, 16 }
  0xf6   : > { %4123 = vperm.xlu1 %5653, %v3945_v0   ;;  %v3110_v33 = vor.u32 %v3109_v63, %v3106_v50  ;;  %v1454_v55 = vrot.slane %v5733_v7, 1  ;;  %v1456_v58 = vrot.slane %v5734_v32, 1  ;;  %v3127_v0 = vrot.slane %v3125_v26, 3 }
  0xf7   : > { %5294 = vmatmul.mubr.msk.bf16.gmra.mrb[16].mxu0 %vm537_vm1, %v3066_v61  ;;  %v3102_v61 = vsel %vm2968_vm5, %v3092_v28, %v3101_v13  ;;  %v3115_v17 = vrot.slane %v3113_v25, 2  ;;  %v1461_v63 = vsel %vm995_vm4, %v1458_v48, %v1460_v44  ;;  %v1464_v25 = vrot.slane %v6095_v24, 1 }
  0xf8   : > { %5297 = vmatprep.mubr.msk.bf16.mxu0 %vm537_vm1, %v3075_v14  ;;  %v6546_v14 = vld [vmem:[%s5804_s6 + $0xa0] ss:$0 sps:$4 sm:$0x77]   ;;  %v3111_v38 = vsel %vm2968_vm5, %v3101_v13, %v3110_v33  ;;  %v3128_v28 = vor.u32 %v3127_v0, %v3124_v1  ;;  %v3421_v13 = vrot.slane %v6150_v23, 3  ;;  %v3423_v23 = vrot.slane %v6163_v34, 3 }
  0xf9   : > { %v3119_v52 = vor.u32 %v3118_v16, %v3115_v17  ;;  %v3131_v40 = vshrl.u32 %v6546_v14, 16  ;;  %v3134_v6 = vshll.u32 %v6546_v14, 16  ;;  %v3425_v26 = vrot.slane %v6167_v36, 3 }
  0xfa   : > { %v1466_v7 = vrot.slane %v6107_v53, 1  ;;  %v3427_v36 = vrot.slane %v6179_v39, 3  ;;  %v3429_v32 = vrot.slane %v6183_v41, 3  ;;  %v1472_v1 = vrot.slane %v6127_v11, 1 }
  0xfb   : > { %v3120_v54 = vsel %vm2968_vm5, %v3110_v33, %v3119_v52  ;;  %v3136_v35 = vrot.slane %v3134_v6, 3  ;;  %v3129_v46 = vsel %vm2968_vm5, %v3119_v52, %v3128_v28  ;;  %v3426_v17 = vsel %vm3419_vm6, %v3423_v23, %v3425_v26  ;;  %v5724_v52 = vld [vmem:[%s5804_s6 + $0x98] ss:$0 sps:$4 sm:$0x11]   ;;  %s5642_s6 = smul.u32 144, %s6801_s19 }
  0xfc   : > { %5130 = vmatmul.mubr.msk.bf16.gmra.mrb[4].mxu1 %vm537_vm1, %v1447_v31  ;;  %v1455_v31 = vsel %vm995_vm4, %v1452_v4, %v1454_v55  ;;  %v4637_v4 = vcombine.low %v3412_v19, %v6137_v56  ;;  %v1467_v34 = vsel %vm995_vm4, %v1464_v25, %v1466_v7  ;;  %v1856_v0 = vshrl.u32 %v6072_v42, 16 }
  0xfd   : > { %5133 = vmatprep.mubr.msk.bf16.mxu1 %vm537_vm1, %v1449_v15  ;;  %v1457_v15 = vsel %vm995_vm4, %v1454_v55, %v1456_v58  ;;  %v3424_v55 = vsel %vm3419_vm6, %v3421_v13, %v3423_v23  ;;  %v3430_v39 = vsel %vm3419_vm6, %v3427_v36, %v3429_v32  ;;  %v3433_v19 = vrot.slane %v6206_v51, 3  ;;  %s6719_s29 = scalar_lea.vmem %s6797_s3, %s5642_s6 }
  0xfe   : > { %v1858_v6 = vrot.slane %v1856_v0, 1 }
  0xff   : > { %5298 = vmatmul.mubr.msk.bf16.gmra.mrb[20].mxu0 %vm537_vm1, %v3084_v29  ;;  %v3133_v29 = vrot.slane %v3131_v40, 2 }
 0x100   : > { %5301 = vmatprep.mubr.msk.bf16.mxu0 %vm537_vm1, %v3093_v59  ;;  %v1459_v59 = vsel %vm995_vm4, %v1456_v58, %v1458_v48  ;;  %v1470_v58 = vrot.slane %v6123_v3, 1  ;;  %v1868_v48 = vshll.u32 %v6090_v22, 16 }
 0x101   : > { %v3137_v50 = vor.u32 %v3136_v35, %v3133_v29  ;;  %v1877_v35 = vshll.u32 %v6095_v24, 16 }
 0x102   : > { %v1473_v40 = vsel %vm995_vm4, %v1470_v58, %v1472_v1 }
 0x103   : > { %v3138_v56 = vsel %vm2968_vm5, %v3128_v28, %v3137_v50 }
 0x104   : > { %5134 = vmatmul.mubr.msk.bf16.gmra.mrb[8].mxu1 %vm537_vm1, %v1451_v12  ;;  %v3420_v12 = vrot.slane %v4637_v4, 3  ;;  %v1870_v4 = vrot.slane %v1868_v48, 2 }
 0x105   : > { %5137 = vmatprep.mubr.msk.bf16.mxu1 %vm537_vm1, %v1453_v45  ;;  %v1462_v45 = vrot.slane %v6090_v22, 1 }
 0x106   : > { %v3422_v30 = vsel %vm3419_vm6, %v3420_v12, %v3421_v13  ;;  %v3437_v12 = vrot.slane %v6225_v5, 3  ;;  %v1883_v13 = vshrl.u32 %v6107_v53, 16 }
 0x107   : > { %5302 = vmatmul.mubr.msk.bf16.gmra.mrb[24].mxu0 %vm537_vm1, %v3102_v61  ;;  %v1463_v33 = vsel %vm995_vm4, %v1460_v44, %v1462_v45  ;;  %v1465_v20 = vsel %vm995_vm4, %v1462_v45, %v1464_v25  ;;  %v1468_v61 = vrot.slane %v6111_v60, 1  ;;  %v1886_v45 = vshll.u32 %v6107_v53, 16 }
 0x108   : > { %5305 = vmatprep.mubr.msk.bf16.mxu0 %vm537_vm1, %v3111_v38  ;;  %v3428_v38 = vsel %vm3419_vm6, %v3425_v26, %v3427_v36 }
 0x109   : > { %v1469_v16 = vsel %vm995_vm4, %v1466_v7, %v1468_v61  ;;  %v1471_v41 = vsel %vm995_vm4, %v1468_v61, %v1470_v58  ;;  %v1888_v23 = vrot.slane %v1886_v45, 2  ;;  %v1901_v61 = vshrl.u32 %v6123_v3, 16 }
 0x10b   : > { %v1903_v58 = vrot.slane %v1901_v61, 1 }
 0x10c   : > { %5138 = vmatmul.mubr.msk.bf16.gmra.mrb[12].mxu1 %vm537_vm1, %v1455_v31  ;;  %v1859_v31 = vshll.u32 %v6072_v42, 16  ;;  %v1474_v42 = vrot.slane %v5724_v52, 1  ;;  %v1922_v52 = vshll.u32 %v6143_v9, 16 }
 0x10d   : > { %5141 = vmatprep.mubr.msk.bf16.mxu1 %vm537_vm1, %v1457_v15  ;;  %v3431_v15 = vrot.slane %v6202_v49, 3  ;;  %v1874_v49 = vshrl.u32 %v6095_v24, 16 }
 0x10e   : > { %v1861_v28 = vrot.slane %v1859_v31, 2  ;;  %v1475_v51 = vsel %vm995_vm4, %v1472_v1, %v1474_v42  ;;  %v3443_v1 = vrot.slane %v6257_v47, 3 }
 0x10f   : > { %5306 = vmatmul.mubr.msk.bf16.gmra.mrb[28].mxu0 %vm537_vm1, %v3120_v54  ;;  %v3432_v54 = vsel %vm3419_vm6, %v3429_v32, %v3431_v15  ;;  %v3434_v44 = vsel %vm3419_vm6, %v3431_v15, %v3433_v19  ;;  %v1876_v50 = vrot.slane %v1874_v49, 1  ;;  %v3453_v49 = vrot.slane %v6324_v57, 3 }
 0x110   : > { %5309 = vmatprep.mubr.msk.bf16.mxu0 %vm537_vm1, %v3129_v46  ;;  %v1862_v29 = vor.u32 %v1861_v28, %v1858_v6  ;;  %v1867_v46 = vrot.slane %v1865_v18, 1  ;;  %v3449_v18 = vrot.slane %v6295_v27, 3 }
 0x112   : > { %v1863_v22 = vsel %vm1756_vm2, %v5988_v8, %v1862_v29  ;;  %v1871_v24 = vor.u32 %v1870_v4, %v1867_v46  ;;  %v1895_v8 = vshll.u32 %v6111_v60, 16 }
 0x114   : > { %5142 = vmatmul.mubr.msk.bf16.gmra.mrb[16].mxu1 %vm537_vm1, %v1459_v59  ;;  %v3435_v59 = vrot.slane %v6220_v10, 3  ;;  %v1892_v10 = vshrl.u32 %v6111_v60, 16  ;;  %v1872_v5 = vsel %vm1756_vm2, %v1862_v29, %v1871_v24  ;;  %v1897_v7 = vrot.slane %v1895_v8, 2 }
 0x115   : > { %5145 = vmatprep.mubr.msk.bf16.mxu1 %vm537_vm1, %v1461_v63  ;;  %v1879_v63 = vrot.slane %v1877_v35, 2 }
 0x116   : > { %v1894_v26 = vrot.slane %v1892_v10, 1 }
 0x117   : > { %5310 = vmatmul.mubr.msk.bf16.gmra.mrb[32].mxu0 %vm537_vm1, %v3138_v56  ;;  %v3436_v56 = vsel %vm3419_vm6, %v3433_v19, %v3435_v59  ;;  %v1880_v25 = vor.u32 %v1879_v63, %v1876_v50  ;;  %v3447_v19 = vrot.slane %v6290_v21, 3  ;;  %v3451_v21 = vrot.slane %v6320_v43, 3 }
 0x118   : > { %5315 = vmatprep.mubr.msk.bf16.mxu0 %vm537_vm1, %v3422_v30  ;;  %v3438_v30 = vsel %vm3419_vm6, %v3435_v59, %v3437_v12  ;;  %v1898_v36 = vor.u32 %v1897_v7, %v1894_v26 }
 0x119   : > { %v1881_v53 = vsel %vm1756_vm2, %v1871_v24, %v1880_v25  ;;  %v3452_v27 = vsel %vm3419_vm6, %v3449_v18, %v3451_v21  ;;  %v3454_v35 = vsel %vm3419_vm6, %v3451_v21, %v3453_v49 }
 0x11c   : > { %5146 = vmatmul.mubr.msk.bf16.gmra.mrb[20].mxu1 %vm537_vm1, %v1463_v33  ;;  %v1885_v33 = vrot.slane %v1883_v13, 1 }
 0x11d   : > { %5149 = vmatprep.mubr.msk.bf16.mxu1 %vm537_vm1, %v1465_v20  ;;  %v3439_v20 = vrot.slane %v6238_v2, 3  ;;  %v1910_v2 = vshrl.u32 %v6127_v11, 16 }
 0x11e   : > { %v1889_v60 = vor.u32 %v1888_v23, %v1885_v33 }
 0x11f   : > { %5316 = vmatmul.mubr.msk.bf16.vlgmr.msra.gmra.mrb[0].mxu0 %vm537_vm1, %v3424_v55  ;;  %v3441_v55 = vrot.slane %v6243_v37, 3  ;;  %v1912_v0 = vrot.slane %v1910_v2, 1 }
 0x120   : > { %5319 = vmatprep.mubr.msk.bf16.mxu0 %vm537_vm1, %v3426_v17  ;;  %v1904_v17 = vshll.u32 %v6123_v3, 16  ;;  %v1890_v37 = vsel %vm1756_vm2, %v1880_v25, %v1889_v60  ;;  %v1899_v3 = vsel %vm1756_vm2, %v1889_v60, %v1898_v36 }
 0x121   : > { %v3442_v32 = vsel %vm3419_vm6, %v3439_v20, %v3441_v55  ;;  %v3444_v15 = vsel %vm3419_vm6, %v3441_v55, %v3443_v1 }
 0x124   : > { %5150 = vmatmul.mubr.msk.bf16.gmra.mrb[24].mxu1 %vm537_vm1, %v1467_v34  ;;  %v3440_v34 = vsel %vm3419_vm6, %v3437_v12, %v3439_v20  ;;  %v3949_v12 = vpop.permute.xlu0 %3948 }
 0x125   : > { %5153 = vmatprep.mubr.msk.bf16.mxu1 %vm537_vm1, %v1469_v16  ;;  %v1913_v16 = vshll.u32 %v6127_v11, 16 }
 0x127   : > { %5320 = vmatmul.mubr.msk.bf16.gmra.mrb[4].mxu0 %vm537_vm1, %v3428_v38  ;;  %v1906_v38 = vrot.slane %v1904_v17, 2  ;;  %v1915_v31 = vrot.slane %v1913_v16, 2 }
 0x128   : > { %5323 = vmatprep.mubr.msk.bf16.mxu0 %vm537_vm1, %v3430_v39  ;;  %v3445_v39 = vrot.slane %v6268_v62, 3  ;;  %v1924_v62 = vrot.slane %v1922_v52, 2 }
 0x129   : > { %v1907_v11 = vor.u32 %v1906_v38, %v1903_v58 }
 0x12a   : > { %v3446_v47 = vsel %vm3419_vm6, %v3443_v1, %v3445_v39  ;;  %v3448_v48 = vsel %vm3419_vm6, %v3445_v39, %v3447_v19 }
 0x12b   : > { %v1908_v6 = vsel %vm1756_vm2, %v1898_v36, %v1907_v11 }
 0x12c   : > { %5154 = vmatmul.mubr.msk.bf16.gmra.mrb[28].mxu1 %vm537_vm1, %v1471_v41  ;;  %v1919_v41 = vshrl.u32 %v6143_v9, 16 }
 0x12d   : > { %5157 = vmatprep.mubr.msk.bf16.mxu1 %vm537_vm1, %v1473_v40  ;;  %v1916_v40 = vor.u32 %v1915_v31, %v1912_v0  ;;  %v3959_v24 = vpop.permute.xlu1 %3958 }
 0x12e   : > { %v1921_v28 = vrot.slane %v1919_v41, 1 }
 0x12f   : > { %5324 = vmatmul.mubr.msk.bf16.gmra.mrb[8].mxu0 %vm537_vm1, %v3432_v54  ;;  %v1917_v42 = vsel %vm1756_vm2, %v1907_v11, %v1916_v40  ;;  %v3450_v54 = vsel %vm3419_vm6, %v3447_v19, %v3449_v18 }
 0x130   : > { %5327 = vmatprep.mubr.msk.bf16.mxu0 %vm537_vm1, %v3434_v44  ;;  %v1925_v9 = vor.u32 %v1924_v62, %v1921_v28  ;;  %v3455_v44 = vrot.slane %v6546_v14, 3 }
 0x131   : > { %v3964_v10 = vpop.permute.xlu1 %3963 }
 0x132   : > { %v1926_v29 = vsel %vm1756_vm2, %v1916_v40, %v1925_v9 }
 0x134   : > { %5158 = vmatmul.mubr.msk.bf16.gmra.mrb[32].mxu1 %vm537_vm1, %v1475_v51  ;;  %v3456_v51 = vsel %vm3419_vm6, %v3453_v49, %v3455_v44 }
 0x135   : > { %5183 = vmatprep.mubr.msk.bf16.mxu1 %vm537_vm1, %v1863_v22  ;;  %v3974_v23 = vpop.permute.xlu1 %3973 }
 0x137   : > { %5328 = vmatmul.mubr.msk.bf16.gmra.mrb[12].mxu0 %vm537_vm1, %v3436_v56  ;;  %v3954_v56 = vpop.permute.xlu0 %3953 }
 0x138   : > { %5331 = vmatprep.mubr.msk.bf16.mxu0 %vm537_vm1, %v3438_v30 }
 0x139   : > { %v3984_v7 = vpop.permute.xlu1 %3983 }
 0x13b   : > { %v3969_v30 = vpop.permute.xlu0 %3968 }
 0x13c   : > { %5184 = vmatmul.mubr.msk.bf16.vlgmr.msra.gmra.mrb[20].mxu1 %vm537_vm1, %v1872_v5 }
 0x13d   : > { %5187 = vmatprep.mubr.msk.bf16.mxu1 %vm537_vm1, %v1881_v53 }
 0x13f   : > { %5332 = vmatmul.mubr.msk.bf16.gmra.mrb[16].mxu0 %vm537_vm1, %v3440_v34  ;;  %v3979_v53 = vpop.permute.xlu0 %3978  ;;  %v6707_v34 = vpop.permute.xlu1 %3993 }
 0x140   : > { %5335 = vmatprep.mubr.msk.bf16.mxu0 %vm537_vm1, %v3442_v32 }
 0x143   : > { %v6705_v17 = vpop.permute.xlu0 %3988  ;;  %v6711_v2 = vpop.permute.xlu1 %4003 }
 0x144   : > { %5188 = vmatmul.mubr.msk.bf16.gmra.mrb[24].mxu1 %vm537_vm1, %v1890_v37 }
 0x145   : > { %5191 = vmatprep.mubr.msk.bf16.mxu1 %vm537_vm1, %v1899_v3 }
 0x147   : > { %5336 = vmatmul.mubr.msk.bf16.gmra.mrb[20].mxu0 %vm537_vm1, %v3444_v15  ;;  %v6709_v36 = vpop.permute.xlu0 %3998  ;;  %v6721_v41 = vpop.permute.xlu1 %4013 }
 0x148   : > { %5339 = vmatprep.mubr.msk.bf16.mxu0 %vm537_vm1, %v3446_v47 }
 0x14b   : > { %v6714_v0 = vpop.permute.xlu0 %4008 }
 0x14c   : > { %5192 = vmatmul.mubr.msk.bf16.gmra.mrb[28].mxu1 %vm537_vm1, %v1908_v6 }
 0x14d   : > { %5195 = vmatprep.mubr.msk.bf16.mxu1 %vm537_vm1, %v1917_v42 }
 0x14f   : > { %5340 = vmatmul.mubr.msk.bf16.gmra.mrb[24].mxu0 %vm537_vm1, %v3448_v48  ;;  %v6725_v9 = vpop.permute.xlu0 %4018 }
 0x150   : > { %5343 = vmatprep.mubr.msk.bf16.mxu0 %vm537_vm1, %v3450_v54 }
 0x154   : > { %5196 = vmatmul.mubr.msk.bf16.gmra.mrb[32].mxu1 %vm537_vm1, %v1926_v29 }
 0x157   : > { %5344 = vmatmul.mubr.msk.bf16.gmra.mrb[28].mxu0 %vm537_vm1, %v3452_v27 }
 0x158   : > { %5347 = vmatprep.mubr.msk.bf16.mxu0 %vm537_vm1, %v3454_v35 }
 0x15f   : > { %5348 = vmatmul.mubr.msk.bf16.gmra.mrb[32].mxu0 %vm537_vm1, %v3456_v51  ;;  %v6727_v51 = vpop.permute.xlu1 %4023 }
 0x1c7   : > { %v5127_v46 = vpop.f32.mrb[0].mxu1 }
 0x1c8   : > { %v1570_v43 = vpop.f32.mrb[1].mxu1 }
 0x1c9   : > { %v5128_v4 = vpop.f32.mrb[2].mxu1 }
 0x1ca   : > { %v1573_v57 = vpop.f32.mrb[3].mxu1 }
 0x1cf   : > { %v5131_v59 = vpop.f32.mrb[4].mxu1 }
 0x1d0   : > { %v1586_v22 = vpop.f32.mrb[5].mxu1 }
 0x1d1   : > { %v5132_v50 = vpop.f32.mrb[6].mxu1 }
 0x1d2   : > { %v6679_v63 = vpop.f32.mrb[7].mxu1 }
 0x1d7   : > { %v6681_v13 = vpop.f32.mrb[8].mxu1 }
 0x1d8   : > { %v6683_v45 = vpop.f32.mrb[9].mxu1 }
 0x1d9   : > { %v6685_v14 = vpop.f32.mrb[10].mxu1 }
 0x1da   : > { %v6687_v25 = vpop.f32.mrb[11].mxu1 }
 0x1df   : > { %v6689_v8 = vpop.f32.mrb[12].mxu1 }
 0x1e0   : > { %v6691_v5 = vpop.f32.mrb[13].mxu1 }
 0x1e1   : > { %v6693_v33 = vpop.f32.mrb[14].mxu1 }
 0x1e2   : > { %v6695_v20 = vpop.f32.mrb[15].mxu1 }
 0x1e7   : > { %v6697_v26 = vpop.f32.mrb[16].mxu1 }
 0x1e8   : > { %v6699_v55 = vpop.f32.mrb[17].mxu1 }
 0x1e9   : > { %v6701_v60 = vpop.f32.mrb[18].mxu1 }
 0x1ea   : > { %v6703_v61 = vpop.f32.mrb[19].mxu1 }
 0x1f2   : > { %v5317_v16 = vpop.f32.mrb[0].mxu0 }
 0x1f3   : > { %v5353_v32 = vadd.f32 %v5317_v16, %v5127_v46  ;;  %v3551_v37 = vpop.f32.mrb[1].mxu0 }
 0x1f4   : > { %v5354_v58 = vadd.f32 %v3551_v37, %v1570_v43  ;;  %v5318_v38 = vpop.f32.mrb[2].mxu0 }
 0x1f5   : > { %v5355_v1 = vadd.f32 %v5318_v38, %v5128_v4  ;;  %v3554_v3 = vpop.f32.mrb[3].mxu0  ;;  %v4128_v52 = vmul.f32 %v5353_v32, %v3959_v24 }
 0x1f6   : > { %v4126_v31 = vmul.f32 %v5354_v58, %v3949_v12  ;;  %v5356_v39 = vadd.f32 %v3554_v3, %v1573_v57 }
 0x1f7   : > { %v4739_v11 = vpack.c.bf16 %v5355_v1, %v5353_v32  ;;  %v4129_v47 = vmul.f32 %v5355_v1, %v3964_v10  ;;  %v4205_v48 = vmul.f32 %v5353_v32, %v4128_v52  ;;  %v6731_v32 = vpop.permute.xlu0 %4028 }
 0x1f8   : > { %v4734_v15 = vpack.c.bf16 %v5356_v39, %v5354_v58  ;;  %v4127_v40 = vmul.f32 %v5356_v39, %v3954_v56  ;;  %v4203_v6 = vmul.f32 %v5354_v58, %v4126_v31 }
 0x1f9   : > { %4821 = vst [vmem:[%s6719_s29 + $0x8] sm:$0xff] %v4739_v11   ;;  %v4206_v27 = vmul.f32 %v5355_v1, %v4129_v47 }
 0x1fa   : > { %4735 = vst [vmem:[%s6719_s29] sm:$0xff] %v4734_v15   ;;  %v4162_v28 = vadd.f32 %v4127_v40, %v4126_v31  ;;  %v4204_v62 = vmul.f32 %v5356_v39, %v4127_v40  ;;  %v5321_v19 = vpop.f32.mrb[4].mxu0 }
 0x1fb   : > { %v5357_v42 = vadd.f32 %v5321_v19, %v5131_v59  ;;  %v3567_v18 = vpop.f32.mrb[5].mxu0 }
 0x1fc   : > { %v4163_v54 = vadd.f32 %v4162_v28, %v4128_v52  ;;  %v4239_v29 = vadd.f32 %v4204_v62, %v4203_v6  ;;  %v5358_v21 = vadd.f32 %v3567_v18, %v1586_v22  ;;  %v5322_v49 = vpop.f32.mrb[6].mxu0  ;;  %v6741_v62 = vpop.permute.xlu0 %4038 }
 0x1fd   : > { %v5359_v35 = vadd.f32 %v5322_v49, %v5132_v50  ;;  %v3570_v44 = vpop.f32.mrb[7].mxu0  ;;  %v4132_v16 = vmul.f32 %v5357_v42, %v3979_v53 }
 0x1fe   : > { %v4240_v46 = vadd.f32 %v4239_v29, %v4205_v48  ;;  %v4130_v43 = vmul.f32 %v5358_v21, %v3969_v30  ;;  %v4164_v4 = vadd.f32 %v4163_v54, %v4129_v47  ;;  %v5360_v57 = vadd.f32 %v3570_v44, %v6679_v63  ;;  %v6735_v63 = vpop.permute.xlu1 %4033 }
 0x1ff   : > { %v4749_v59 = vpack.c.bf16 %v5359_v35, %v5357_v42  ;;  %v4133_v58 = vmul.f32 %v5359_v35, %v3984_v7  ;;  %v4209_v11 = vmul.f32 %v5357_v42, %v4132_v16 }
 0x200   : > { %v4165_v12 = vadd.f32 %v4164_v4, %v4130_v43  ;;  %v4207_v24 = vmul.f32 %v5358_v21, %v4130_v43  ;;  %v4241_v56 = vadd.f32 %v4240_v46, %v4206_v27  ;;  %v4744_v10 = vpack.c.bf16 %v5360_v57, %v5358_v21 }
 0x201   : > { %4823 = vst [vmem:[%s6719_s29 + $0x18] sm:$0xff] %v4749_v59   ;;  %v4131_v22 = vmul.f32 %v5360_v57, %v3974_v23  ;;  %v4210_v47 = vmul.f32 %v5359_v35, %v4133_v58 }
 0x202   : > { %v4242_v50 = vadd.f32 %v4241_v56, %v4207_v24  ;;  %4822 = vst [vmem:[%s6719_s29 + $0x10] sm:$0xff] %v4744_v10   ;;  %v5325_v37 = vpop.f32.mrb[8].mxu0  ;;  %v6746_v54 = vpop.permute.xlu1 %4043 }
 0x203   : > { %v4166_v38 = vadd.f32 %v4165_v12, %v4131_v22  ;;  %v4208_v1 = vmul.f32 %v5360_v57, %v4131_v22  ;;  %v5361_v30 = vadd.f32 %v5325_v37, %v6681_v13  ;;  %v3583_v3 = vpop.f32.mrb[9].mxu0  ;;  %v6753_v12 = vpop.permute.xlu0 %4048 }
 0x204   : > { %v5362_v31 = vadd.f32 %v3583_v3, %v6683_v45  ;;  %v5326_v39 = vpop.f32.mrb[10].mxu0 }
 0x205   : > { %v4167_v53 = vadd.f32 %v4166_v38, %v4132_v16  ;;  %v4243_v52 = vadd.f32 %v4242_v50, %v4208_v1  ;;  %v5363_v23 = vadd.f32 %v5326_v39, %v6685_v14  ;;  %v3586_v15 = vpop.f32.mrb[11].mxu0  ;;  %v4136_v18 = vmul.f32 %v5361_v30, %v6709_v36 }
 0x206   : > { %v4134_v7 = vmul.f32 %v5362_v31, %v6705_v17  ;;  %v5364_v40 = vadd.f32 %v3586_v15, %v6687_v25  ;;  %v6757_v50 = vpop.permute.xlu1 %4053 }
 0x207   : > { %v4244_v13 = vadd.f32 %v4243_v52, %v4209_v11  ;;  %v4168_v6 = vadd.f32 %v4167_v53, %v4133_v58  ;;  %v4759_v28 = vpack.c.bf16 %v5363_v23, %v5361_v30  ;;  %v4137_v21 = vmul.f32 %v5363_v23, %v6711_v2 }
 0x208   : > { %v4211_v45 = vmul.f32 %v5362_v31, %v4134_v7  ;;  %v4754_v19 = vpack.c.bf16 %v5364_v40, %v5362_v31  ;;  %v4135_v42 = vmul.f32 %v5364_v40, %v6707_v34  ;;  %v4213_v46 = vmul.f32 %v5361_v30, %v4136_v18 }
 0x209   : > { %v4169_v48 = vadd.f32 %v4168_v6, %v4134_v7  ;;  %v4245_v14 = vadd.f32 %v4244_v13, %v4210_v47  ;;  %4825 = vst [vmem:[%s6719_s29 + $0x28] sm:$0xff] %v4759_v28   ;;  %v4214_v56 = vmul.f32 %v5363_v23, %v4137_v21  ;;  %v4059_v23 = vpop.permute.xlu0 %4058 }
 0x20a   : > { %4824 = vst [vmem:[%s6719_s29 + $0x20] sm:$0xff] %v4754_v19   ;;  %v4212_v17 = vmul.f32 %v5364_v40, %v4135_v42  ;;  %v5329_v25 = vpop.f32.mrb[12].mxu0  ;;  %v4064_v28 = vpop.permute.xlu1 %4063 }
 0x20b   : > { %v4246_v29 = vadd.f32 %v4245_v14, %v4211_v45  ;;  %v4170_v49 = vadd.f32 %v4169_v48, %v4135_v42  ;;  %v5365_v27 = vadd.f32 %v5329_v25, %v6689_v8  ;;  %v3599_v35 = vpop.f32.mrb[13].mxu0 }
 0x20c   : > { %v5366_v44 = vadd.f32 %v3599_v35, %v6691_v5  ;;  %v5330_v34 = vpop.f32.mrb[14].mxu0 }
 0x20d   : > { %v4171_v36 = vadd.f32 %v4170_v49, %v4136_v18  ;;  %v4247_v43 = vadd.f32 %v4246_v29, %v4212_v17  ;;  %v5367_v4 = vadd.f32 %v5330_v34, %v6693_v33  ;;  %v3602_v57 = vpop.f32.mrb[15].mxu0  ;;  %v4140_v1 = vmul.f32 %v5365_v27, %v6725_v9 }
 0x20e   : > { %v4138_v24 = vmul.f32 %v5366_v44, %v6714_v0  ;;  %v5368_v2 = vadd.f32 %v3602_v57, %v6695_v20 }
 0x20f   : > { %v5185_v59 = vpop.f32.mrb[20].mxu1  ;;  %v4248_v10 = vadd.f32 %v4247_v43, %v4213_v46  ;;  %v4172_v5 = vadd.f32 %v4171_v36, %v4137_v21  ;;  %v4769_v16 = vpack.c.bf16 %v5367_v4, %v5365_v27  ;;  %v4141_v39 = vmul.f32 %v5367_v4, %v6727_v51  ;;  %v4074_v43 = vpop.permute.xlu1 %4073 }
 0x210   : > { %v2101_v8 = vpop.f32.mrb[21].mxu1  ;;  %v4215_v37 = vmul.f32 %v5366_v44, %v4138_v24  ;;  %v4764_v33 = vpack.c.bf16 %v5368_v2, %v5366_v44  ;;  %v4139_v58 = vmul.f32 %v5368_v2, %v6721_v41  ;;  %v4217_v7 = vmul.f32 %v5365_v27, %v4140_v1 }
 0x211   : > { %v5186_v22 = vpop.f32.mrb[22].mxu1  ;;  %v4173_v0 = vadd.f32 %v4172_v5, %v4138_v24  ;;  %v4249_v30 = vadd.f32 %v4248_v10, %v4214_v56  ;;  %4827 = vst [vmem:[%s6719_s29 + $0x38] sm:$0xff] %v4769_v16   ;;  %v4218_v19 = vmul.f32 %v5367_v4, %v4141_v39 }
 0x212   : > { %v2104_v38 = vpop.f32.mrb[23].mxu1  ;;  %4826 = vst [vmem:[%s6719_s29 + $0x30] sm:$0xff] %v4764_v33   ;;  %v4216_v20 = vmul.f32 %v5368_v2, %v4139_v58  ;;  %v5333_v3 = vpop.f32.mrb[16].mxu0 }
 0x213   : > { %v4250_v31 = vadd.f32 %v4249_v30, %v4215_v37  ;;  %v4174_v11 = vadd.f32 %v4173_v0, %v4139_v58  ;;  %v5369_v53 = vadd.f32 %v5333_v3, %v6697_v26  ;;  %v3615_v52 = vpop.f32.mrb[17].mxu0 }
 0x214   : > { %v5370_v15 = vadd.f32 %v3615_v52, %v6699_v55  ;;  %v5334_v41 = vpop.f32.mrb[18].mxu0 }
 0x215   : > { %v4175_v40 = vadd.f32 %v4174_v11, %v4140_v1  ;;  %v4251_v9 = vadd.f32 %v4250_v31, %v4216_v20  ;;  %v5371_v47 = vadd.f32 %v5334_v41, %v6701_v60  ;;  %v3618_v13 = vpop.f32.mrb[19].mxu0  ;;  %v4144_v29 = vmul.f32 %v5369_v53, %v6741_v62 }
 0x216   : > { %v4142_v45 = vmul.f32 %v5370_v15, %v6731_v32  ;;  %v5372_v51 = vadd.f32 %v3618_v13, %v6703_v61  ;;  %v4069_v32 = vpop.permute.xlu0 %4068 }
 0x217   : > { %v5189_v6 = vpop.f32.mrb[24].mxu1  ;;  %v4252_v42 = vadd.f32 %v4251_v9, %v4217_v7  ;;  %v4176_v18 = vadd.f32 %v4175_v40, %v4141_v39  ;;  %v4779_v55 = vpack.c.bf16 %v5371_v47, %v5369_v53  ;;  %v4145_v44 = vmul.f32 %v5371_v47, %v6746_v54 }
 0x218   : > { %v2117_v26 = vpop.f32.mrb[25].mxu1  ;;  %v4219_v14 = vmul.f32 %v5370_v15, %v4142_v45  ;;  %v4774_v17 = vpack.c.bf16 %v5372_v51, %v5370_v15  ;;  %v4143_v25 = vmul.f32 %v5372_v51, %v6735_v63  ;;  %v4221_v63 = vmul.f32 %v5369_v53, %v4144_v29 }
 0x219   : > { %v5190_v48 = vpop.f32.mrb[26].mxu1  ;;  %v4177_v21 = vadd.f32 %v4176_v18, %v4142_v45  ;;  %v4253_v49 = vadd.f32 %v4252_v42, %v4218_v19  ;;  %4829 = vst [vmem:[%s6719_s29 + $0x48] sm:$0xff] %v4779_v55   ;;  %v4222_v33 = vmul.f32 %v5371_v47, %v4145_v44 }
 0x21a   : > { %v2120_v60 = vpop.f32.mrb[27].mxu1  ;;  %4828 = vst [vmem:[%s6719_s29 + $0x40] sm:$0xff] %v4774_v17   ;;  %v4220_v61 = vmul.f32 %v5372_v51, %v4143_v25  ;;  %v5337_v27 = vpop.f32.mrb[20].mxu0 }
 0x21b   : > { %v4254_v35 = vadd.f32 %v4253_v49, %v4219_v14  ;;  %v4178_v34 = vadd.f32 %v4177_v21, %v4143_v25  ;;  %v5373_v46 = vadd.f32 %v5337_v27, %v5185_v59  ;;  %v3631_v36 = vpop.f32.mrb[21].mxu0  ;;  %v4079_v0 = vpop.permute.xlu0 %4078 }
 0x21c   : > { %v5374_v4 = vadd.f32 %v3631_v36, %v2101_v8  ;;  %v5338_v57 = vpop.f32.mrb[22].mxu0 }
 0x21d   : > { %v4179_v24 = vadd.f32 %v4178_v34, %v4144_v29  ;;  %v4255_v2 = vadd.f32 %v4254_v35, %v4220_v61  ;;  %v5375_v62 = vadd.f32 %v5338_v57, %v5186_v22  ;;  %v3634_v56 = vpop.f32.mrb[23].mxu0  ;;  %v4148_v22 = vmul.f32 %v5373_v46, %v4059_v23 }
 0x21e   : > { %v4146_v5 = vmul.f32 %v5374_v4, %v6753_v12  ;;  %v5376_v16 = vadd.f32 %v3634_v56, %v2104_v38  ;;  %v4084_v12 = vpop.permute.xlu1 %4083 }
 0x21f   : > { %v5193_v10 = vpop.f32.mrb[28].mxu1  ;;  %v4256_v54 = vadd.f32 %v4255_v2, %v4221_v63  ;;  %v4180_v58 = vadd.f32 %v4179_v24, %v4145_v44  ;;  %v4789_v59 = vpack.c.bf16 %v5375_v62, %v5373_v46  ;;  %v4149_v52 = vmul.f32 %v5375_v62, %v4064_v28  ;;  %v4089_v19 = vpop.permute.xlu0 %4088 }
 0x220   : > { %v2133_v37 = vpop.f32.mrb[29].mxu1  ;;  %v4223_v8 = vmul.f32 %v5374_v4, %v4146_v5  ;;  %v4784_v30 = vpack.c.bf16 %v5376_v16, %v5374_v4  ;;  %v4147_v20 = vmul.f32 %v5376_v16, %v6757_v50  ;;  %v4225_v47 = vmul.f32 %v5373_v46, %v4148_v22 }
 0x221   : > { %v5194_v1 = vpop.f32.mrb[30].mxu1  ;;  %v4181_v31 = vadd.f32 %v4180_v58, %v4146_v5  ;;  %v4257_v39 = vadd.f32 %v4256_v54, %v4222_v33  ;;  %4831 = vst [vmem:[%s6719_s29 + $0x58] sm:$0xff] %v4789_v59   ;;  %v4226_v14 = vmul.f32 %v5375_v62, %v4149_v52 }
 0x222   : > { %v2136_v3 = vpop.f32.mrb[31].mxu1  ;;  %4830 = vst [vmem:[%s6719_s29 + $0x50] sm:$0xff] %v4784_v30   ;;  %v4224_v38 = vmul.f32 %v5376_v16, %v4147_v20  ;;  %v5341_v11 = vpop.f32.mrb[24].mxu0 }
 0x223   : > { %v4258_v53 = vadd.f32 %v4257_v39, %v4223_v8  ;;  %v4182_v15 = vadd.f32 %v4181_v31, %v4147_v20  ;;  %v5377_v41 = vadd.f32 %v5341_v11, %v5189_v6  ;;  %v3647_v7 = vpop.f32.mrb[25].mxu0  ;;  %v4094_v29 = vpop.permute.xlu1 %4093 }
 0x224   : > { %v5378_v40 = vadd.f32 %v3647_v7, %v2117_v26  ;;  %v5342_v9 = vpop.f32.mrb[26].mxu0  ;;  %v4099_v57 = vpop.permute.xlu0 %4098 }
 0x225   : > { %v4183_v13 = vadd.f32 %v4182_v15, %v4148_v22  ;;  %v4259_v45 = vadd.f32 %v4258_v53, %v4224_v38  ;;  %v5379_v50 = vadd.f32 %v5342_v9, %v5190_v48  ;;  %v3650_v51 = vpop.f32.mrb[27].mxu0  ;;  %v4152_v27 = vmul.f32 %v5377_v41, %v4079_v0 }
 0x226   : > { %v4150_v42 = vmul.f32 %v5378_v40, %v4069_v32  ;;  %v5380_v18 = vadd.f32 %v3650_v51, %v2120_v60 }
 0x227   : > { %v5197_v23 = vpop.f32.mrb[32].mxu1  ;;  %v4260_v17 = vadd.f32 %v4259_v45, %v4225_v47  ;;  %v4184_v28 = vadd.f32 %v4183_v13, %v4149_v52  ;;  %v4799_v25 = vpack.c.bf16 %v5379_v50, %v5377_v41  ;;  %v4153_v34 = vmul.f32 %v5379_v50, %v4084_v12  ;;  %v4104_v16 = vpop.permute.xlu1 %4103 }
 0x228   : > { %v2149_v55 = vpop.f32.mrb[33].mxu1  ;;  %v4227_v26 = vmul.f32 %v5378_v40, %v4150_v42  ;;  %v4794_v21 = vpack.c.bf16 %v5380_v18, %v5378_v40  ;;  %v4151_v49 = vmul.f32 %v5380_v18, %v4074_v43  ;;  %v4229_v2 = vmul.f32 %v5377_v41, %v4152_v27  ;;  %v4109_v39 = vpop.permute.xlu0 %4108 }
 0x229   : > { %v5198_v6 = vpop.f32.mrb[34].mxu1  ;;  %v4185_v48 = vadd.f32 %v4184_v28, %v4150_v42  ;;  %v4261_v35 = vadd.f32 %v4260_v17, %v4226_v14  ;;  %4833 = vst [vmem:[%s6719_s29 + $0x68] sm:$0xff] %v4799_v25   ;;  %v4230_v58 = vmul.f32 %v5379_v50, %v4153_v34 }
 0x22a   : > { %v2152_v61 = vpop.f32.mrb[35].mxu1  ;;  %4832 = vst [vmem:[%s6719_s29 + $0x60] sm:$0xff] %v4794_v21   ;;  %v4228_v32 = vmul.f32 %v5380_v18, %v4151_v49  ;;  %v5345_v44 = vpop.f32.mrb[28].mxu0 }
 0x22b   : > { %v4262_v60 = vadd.f32 %v4261_v35, %v4227_v26  ;;  %v4186_v46 = vadd.f32 %v4185_v48, %v4151_v49  ;;  %v5381_v36 = vadd.f32 %v5345_v44, %v5193_v10  ;;  %v3663_v4 = vpop.f32.mrb[29].mxu0  ;;  %v4114_v15 = vpop.permute.xlu1 %4113 }
 0x22c   : > { %v5382_v63 = vadd.f32 %v3663_v4, %v2133_v37  ;;  %v5346_v24 = vpop.f32.mrb[30].mxu0  ;;  %v4119_v17 = vpop.permute.xlu0 %4118 }
 0x22d   : > { %v4187_v62 = vadd.f32 %v4186_v46, %v4152_v27  ;;  %v4263_v56 = vadd.f32 %v4262_v60, %v4228_v32  ;;  %v5383_v43 = vadd.f32 %v5346_v24, %v5194_v1  ;;  %v3666_v5 = vpop.f32.mrb[31].mxu0  ;;  %v4156_v22 = vmul.f32 %v5381_v36, %v4099_v57 }
 0x22e   : > { %v4154_v33 = vmul.f32 %v5382_v63, %v4089_v19  ;;  %v5384_v54 = vadd.f32 %v3666_v5, %v2136_v3 }
 0x22f   : > { %v4264_v59 = vadd.f32 %v4263_v56, %v4229_v2  ;;  %v4188_v0 = vadd.f32 %v4187_v62, %v4153_v34  ;;  %v4809_v8 = vpack.c.bf16 %v5383_v43, %v5381_v36  ;;  %v4157_v11 = vmul.f32 %v5383_v43, %v4104_v16  ;;  %v4124_v21 = vpop.permute.xlu1 %4123 }
 0x230   : > { %v4231_v30 = vmul.f32 %v5382_v63, %v4154_v33  ;;  %v4804_v10 = vpack.c.bf16 %v5384_v54, %v5382_v63  ;;  %v4155_v20 = vmul.f32 %v5384_v54, %v4094_v29  ;;  %v4233_v40 = vmul.f32 %v5381_v36, %v4156_v22 }
 0x231   : > { %v4189_v37 = vadd.f32 %v4188_v0, %v4154_v33  ;;  %v4265_v31 = vadd.f32 %v4264_v59, %v4230_v58  ;;  %4835 = vst [vmem:[%s6719_s29 + $0x78] sm:$0xff] %v4809_v8   ;;  %v4234_v19 = vmul.f32 %v5383_v43, %v4157_v11 }
 0x232   : > { %4834 = vst [vmem:[%s6719_s29 + $0x70] sm:$0xff] %v4804_v10   ;;  %v4232_v12 = vmul.f32 %v5384_v54, %v4155_v20  ;;  %v5349_v1 = vpop.f32.mrb[32].mxu0 }
 0x233   : > { %v4266_v38 = vadd.f32 %v4265_v31, %v4231_v30  ;;  %v4190_v53 = vadd.f32 %v4189_v37, %v4155_v20  ;;  %v5385_v52 = vadd.f32 %v5349_v1, %v5197_v23  ;;  %v3679_v3 = vpop.f32.mrb[33].mxu0 }
 0x234   : > { %v5386_v41 = vadd.f32 %v3679_v3, %v2149_v55  ;;  %v5350_v7 = vpop.f32.mrb[34].mxu0 }
 0x235   : > { %v4191_v9 = vadd.f32 %v4190_v53, %v4156_v22  ;;  %v4267_v47 = vadd.f32 %v4266_v38, %v4232_v12  ;;  %v5387_v13 = vadd.f32 %v5350_v7, %v5198_v6  ;;  %v3682_v45 = vpop.f32.mrb[35].mxu0  ;;  %v4160_v29 = vmul.f32 %v5385_v52, %v4119_v17 }
 0x236   : > { %v4158_v50 = vmul.f32 %v5386_v41, %v4109_v39  ;;  %v5388_v51 = vadd.f32 %v3682_v45, %v2152_v61 }
 0x237   : > { %v4268_v42 = vadd.f32 %v4267_v47, %v4233_v40  ;;  %v4192_v18 = vadd.f32 %v4191_v9, %v4157_v11  ;;  %v4819_v14 = vpack.c.bf16 %v5387_v13, %v5385_v52  ;;  %v4161_v27 = vmul.f32 %v5387_v13, %v4124_v21 }
 0x238   : > { %v4235_v28 = vmul.f32 %v5386_v41, %v4158_v50  ;;  %v4814_v23 = vpack.c.bf16 %v5388_v51, %v5386_v41  ;;  %v4159_v25 = vmul.f32 %v5388_v51, %v4114_v15  ;;  %v4237_v61 = vmul.f32 %v5385_v52, %v4160_v29 }
 0x239   : > { %v4193_v55 = vadd.f32 %v4192_v18, %v4158_v50  ;;  %v4269_v26 = vadd.f32 %v4268_v42, %v4234_v19  ;;  %4837 = vst [vmem:[%s6719_s29 + $0x88] sm:$0xff] %v4819_v14   ;;  %v4238_v44 = vmul.f32 %v5387_v13, %v4161_v27 }
 0x23a   : > { %4836 = vst [vmem:[%s6719_s29 + $0x80] sm:$0xff] %v4814_v23   ;;  %v4236_v49 = vmul.f32 %v5388_v51, %v4159_v25 }
 0x23b   : > { %v4270_v6 = vadd.f32 %v4269_v26, %v4235_v28  ;;  %v4194_v48 = vadd.f32 %v4193_v55, %v4159_v25 }
 0x23d   : > { %v4195_v35 = vadd.f32 %v4194_v48, %v4160_v29  ;;  %v4271_v32 = vadd.f32 %v4270_v6, %v4236_v49 }
 0x23f   : > { %v4196_v60 = vadd.f32 %v4195_v35, %v4161_v27  ;;  %v4272_v34 = vadd.f32 %v4271_v32, %v4237_v61 }
 0x241   : > { %v4197_v46 = vrot.slane %v4196_v60, 4  ;;  %v4273_v36 = vadd.f32 %v4272_v34, %v4238_v44 }
 0x243   : > { %v4198_v4 = vadd.f32 %v4197_v46, %v4196_v60  ;;  %v4274_v57 = vrot.slane %v4273_v36, 4 }
 0x245   : > { %v4199_v63 = vrot.slane %v4198_v4, 2  ;;  %v4275_v24 = vadd.f32 %v4274_v57, %v4273_v36 }
 0x247   : > { %v4200_v2 = vadd.f32 %v4199_v63, %v4198_v4  ;;  %v4276_v62 = vrot.slane %v4275_v24, 2 }
 0x249   : > { %v4201_v56 = vrot.slane %v4200_v2, 1  ;;  %v4277_v43 = vadd.f32 %v4276_v62, %v4275_v24 }
 0x24b   : > { %v4202_v5 = vadd.f32 %v4201_v56, %v4200_v2  ;;  %v4278_v16 = vrot.slane %v4277_v43, 1 }
 0x24d   : > { %v4279_v33 = vadd.f32 %v4278_v16, %v4277_v43  ;;  %4280 = vst [vmem:[%s241_s9] sm:$0xff] %v4202_v5 }
 0x24f   : > { %4281 = vst [vmem:[%s245_s12] sm:$0xff] %v4279_v33 }
 0x250 PF: > { %s16_s18 = sadd.s32 1, %s5742_s18  }
 0x251   : > { %p13_p4 = scmp.ge.s32.totalorder %s16_s18, 4  }
 0x253   :  { %15 = sbr.rel (!%p13_p4) target bundleno = 1 (0x1), region = 94 }

// kernel: generator_forward.9
= control target key start
LH: loop header
LB: loop body
LE: loop exit
PB: predicated region body
PF: predicated region fallthrough
CT: control target
= control target key end

     0   :  { %s16984_s9 = smov 0   ;;  %s19633_s0 = inlined_call_operand.vmem [shape: bf16[2,1190,8], index: 0, kind: input, shape index: {}]   ;;  %s19634_s1 = inlined_call_operand.vmem [shape: bf16[9,8,128], index: 1, kind: input, shape index: {}]   ;;  %s19635_s2 = inlined_call_operand.vmem [shape: f32[2,1088,128], index: 2, kind: output, shape index: {}]  }
   0x1 LB: > { %s12370_s10 = sadd.s32 4294967295, %s16967_s9   ;;  %p12374_p0 = scmp.ge.s32.totalorder %s16967_s9, 1  ;;  %s16967_s9 = sphi %s16984_s9, %s12_s9  }
   0x2   : > { %p112_p1 = scmp.lt.s32.totalorder %s16967_s9, 3 }
   0x4   : > { %p113_p2 = pnand %p12374_p0, %p112_p1 }
   0x6   : > { %116 = sbr.rel (%p113_p2) target bundleno = 1479 (0x5c7), region = 28 }
   0xd   : > { %v12377_v0 = vld [vmem:[%s19634_s1 + $0x4] sm:$0xf]  ;;  %vm1382_vm0 = vcmask 1043456   ;;  %v12791_v1 = vld [vmem:[%s19634_s1 + $0x10] sm:$0xf]  ;;  %p134_p3 = scmp.lt.s32.totalorder %s12370_s10, 1 }
   0xe   : > { %16164 = vmatprep.subr.msk.bf16.mxu1 %vm1382_vm0, %v12377_v0  ;;  %16168 = vmatprep.subr.msk.bf16.mxu0 %vm1382_vm0, %v12791_v1  ;;  %v1384_v2 = vsel %vm1382_vm0, %v12377_v0, 0  ;;  %v17002_v3 = vsel %vm1382_vm0, %v12791_v1, 0  ;;  %v281_v4 = vld [vmem:[%s19634_s1] sm:$0xf]  ;;  %v12861_v5 = vld [vmem:[%s19634_s1 + $0x14] sm:$0xf] }
   0xf   : > { %19692 = vst [vmem:[#allocation2_spill] sm:$0xff] %v17002_v3  ;;  %13833 = vmatpush3.bf16.msra.mxu1 %v1384_v2  ;;  %14385 = vmatpush3.bf16.msra.mxu0 %v17002_v3  ;;  %s19835_s10 = smov (!%p134_p3, %s12370_s10), 1  ;;  %vm628_vm1 = vsmask.f32 7424  ;;  %vm1177_vm2 = vcmask 64512   ;;  %v2100_v6 = vsel %vm1382_vm0, %v281_v4, 0 }
  0x10   : > { %16165 = vmatprep.subr.msk.bf16.mxu1 %vm1382_vm0, %v281_v4  ;;  %s16174_s19 = smul.u32 596, %s19835_s10  ;;  %16170 = vmatprep.subr.msk.bf16.mxu0 %vm1382_vm0, %v12861_v5  ;;  %vm5288_vm3 = vsmask.f32 6400  ;;  %v17029_v12 = vsel %vm1382_vm0, %v12861_v5, 0  ;;  %vm6835_vm4 = vcmask 1045504   ;;  %vm2685_vm5 = vcmask 1046528  }
  0x11   : > { %vm9438_vm6 = vsmask.f32 5376  ;;  %vm10985_vm7 = vcmask 1044480   ;;  %s16175_s7 = smul.u32 1088, %s19835_s10 }
  0x12   : > { %s17019_s22 = scalar_lea.vmem %s19633_s0, %s16174_s19 }
  0x13   : > { %v145_v7 = vld [vmem:[%s17019_s22] sm:$0xf]  ;;  %v146_v8 = vld [vmem:[%s17019_s22 + $0x4] sm:$0xf]  ;;  %v16185_v10 = vld [vmem:[%s17019_s22 + $0x8] sm:$0xff]   ;;  %s19373_s11 = scalar_lea.vmem %s19635_s2, %s16175_s7 }
  0x14   : > { %v17024_v9 = vcombine.low %v145_v7, %v146_v8  ;;  %v3743_v11 = vld [vmem:[%s17019_s22 + $0x10] sm:$0xe]  ;;  %v3744_v13 = vld [vmem:[%s17019_s22 + $0x14] sm:$0xf]  ;;  %v637_v16 = vshll.u32 %v16185_v10, 16  ;;  %v641_v17 = vshrl.u32 %v16185_v10, 16 }
  0x15   : > { %v16187_v18 = vld [vmem:[%s17019_s22 + $0x18] sm:$0xff]   ;;  %v16188_v19 = vld [vmem:[%s17019_s22 + $0x10] sm:$0xff]   ;;  %v17036_v20 = vcombine.low %v3743_v11, %v3744_v13  ;;  %v16189_v28 = vld [vmem:[%s17019_s22 + $0x20] sm:$0xff]  }
  0x16   : > { %v630_v14 = vshrl.u32 %v17024_v9, 16  ;;  %v632_v15 = vshll.u32 %v17024_v9, 16  ;;  %v639_v22 = vrot.slane %v637_v16, 1  ;;  %v5298_v23 = vshrl.u32 %v16187_v18, 16  ;;  %v16190_v33 = vld [vmem:[%s17019_s22 + $0x18] sm:$0xff]   ;;  %v16191_v34 = vld [vmem:[%s17019_s22 + $0x28] sm:$0xff]  }
  0x17   : > { %19693 = vst [vmem:[#allocation3_spill] sm:$0xff] %v17036_v20  ;;  %v5301_v24 = vshll.u32 %v16187_v18, 16  ;;  %v5290_v25 = vshrl.u32 %v17036_v20, 16  ;;  %v5293_v26 = vshll.u32 %v17036_v20, 16  ;;  %v645_v27 = vshll.u32 %v16188_v19, 16  ;;  %v16192_v47 = vld [vmem:[%s17019_s22 + $0x20] sm:$0xff]  }
  0x18   : > { %v634_v21 = vrot.slane %v632_v15, 1  ;;  %v643_v30 = vor.u32 %v641_v17, %v639_v22  ;;  %v5300_v31 = vrot.slane %v5298_v23, 1  ;;  %v5307_v38 = vshrl.u32 %v16189_v28, 16  ;;  %v16193_v48 = vld [vmem:[%s17019_s22 + $0x30] sm:$0xff]   ;;  %v16194_v53 = vld [vmem:[%s17019_s22 + $0x28] sm:$0xff]   ;;  %v16195_v58 = vld [vmem:[%s17019_s22 + $0x38] sm:$0xff]  }
  0x19   : > { %v5303_v32 = vrot.slane %v5301_v24, 2  ;;  %v5292_v35 = vrot.slane %v5290_v25, 1  ;;  %v5295_v36 = vrot.slane %v5293_v26, 2  ;;  %v647_v37 = vrot.slane %v645_v27, 1  ;;  %v16196_v63 = vld [vmem:[%s17019_s22 + $0x30] sm:$0xff]   ;;  %v16197_v15 = vld [vmem:[%s17019_s22 + $0x40] sm:$0xff]  }
  0x1a   : > { %v635_v29 = vor.u32 %v634_v21, %v630_v14  ;;  %v5310_v41 = vshll.u32 %v16189_v28, 16  ;;  %v649_v42 = vshrl.u32 %v16188_v19, 16  ;;  %v5309_v45 = vrot.slane %v5307_v38, 1  ;;  %v16198_v25 = vld [vmem:[%s17019_s22 + $0x38] sm:$0xff]   ;;  %v16200_v38 = vld [vmem:[%s17019_s22 + $0x40] sm:$0xff]  }
  0x1b   : > { %v5304_v40 = vor.u32 %v5303_v32, %v5300_v31  ;;  %v5296_v43 = vor.u32 %v5295_v36, %v5292_v35  ;;  %v648_v44 = vsel %vm628_vm1, %v643_v30, %v647_v37  ;;  %v653_v46 = vshll.u32 %v16190_v33, 16 }
  0x1c   : > { %v640_v39 = vsel %vm628_vm1, %v635_v29, %v639_v22  ;;  %v5312_v49 = vrot.slane %v5310_v41, 2  ;;  %v651_v50 = vor.u32 %v649_v42, %v647_v37  ;;  %v5316_v51 = vshrl.u32 %v16191_v34, 16 }
  0x1d   : > { %13834 = vmatprep.mubr.msk.bf16.mxu1 %vm1177_vm2, %v640_v39  ;;  %v5319_v52 = vshll.u32 %v16191_v34, 16  ;;  %v5305_v54 = vsel %vm5288_vm3, %v5296_v43, %v5304_v40  ;;  %v655_v55 = vrot.slane %v653_v46, 1  ;;  %v657_v56 = vshrl.u32 %v16190_v33, 16  ;;  %v16199_v33 = vld [vmem:[%s17019_s22 + $0x48] sm:$0xff]   ;;  %v16201_v46 = vld [vmem:[%s17019_s22 + $0x50] sm:$0xff]  }
  0x1e   : > { %13835 = vmatmul.mubr.msk.bf16.vlgmr.msra.gmra.mrb[0].mxu1 %vm1177_vm2, %v648_v44  ;;  %v661_v57 = vshll.u32 %v16192_v47, 16  ;;  %14386 = vmatprep.mubr.msk.bf16.mxu0 %vm1177_vm2, %v5305_v54  ;;  %v5313_v59 = vor.u32 %v5312_v49, %v5309_v45  ;;  %v5318_v60 = vrot.slane %v5316_v51, 1  ;;  %v5325_v62 = vshrl.u32 %v16193_v48, 16 }
  0x1f   : > { %13971 = vmatpush3.bf16.msra.mxu1 %v2100_v6  ;;  %v5321_v61 = vrot.slane %v5319_v52, 2  ;;  %v656_v0 = vsel %vm628_vm1, %v651_v50, %v655_v55  ;;  %v659_v1 = vor.u32 %v657_v56, %v655_v55  ;;  %v5328_v4 = vshll.u32 %v16193_v48, 16  ;;  %v16203_v55 = vld [vmem:[%s17019_s22 + $0x58] sm:$0xff]  }
  0x20   : > { %v663_v2 = vrot.slane %v661_v57, 1  ;;  %v5314_v5 = vsel %vm5288_vm3, %v5304_v40, %v5313_v59  ;;  %13838 = vmatprep.mubr.msk.bf16.mxu1 %vm1177_vm2, %v656_v0  ;;  %v5327_v7 = vrot.slane %v5325_v62, 1  ;;  %v665_v8 = vshrl.u32 %v16192_v47, 16  ;;  %v16202_v47 = vld [vmem:[%s17019_s22 + $0x48] sm:$0xff]  }
  0x21   : > { %v5322_v6 = vor.u32 %v5321_v61, %v5318_v60  ;;  %14387 = vmatmul.mubr.msk.bf16.vlgmr.msra.gmra.mrb[0].mxu0 %vm1177_vm2, %v5314_v5  ;;  %v5330_v11 = vrot.slane %v5328_v4, 2  ;;  %v669_v13 = vshll.u32 %v16194_v53, 16  ;;  %v5334_v14 = vshrl.u32 %v16195_v58, 16 }
  0x22   : > { %v664_v10 = vsel %vm628_vm1, %v659_v1, %v663_v2  ;;  %14523 = vmatpush3.bf16.msra.mxu0 %v17029_v12  ;;  %v667_v17 = vor.u32 %v665_v8, %v663_v2  ;;  %v5337_v18 = vshll.u32 %v16195_v58, 16  ;;  %v673_v19 = vshrl.u32 %v16194_v53, 16  ;;  %v16205_v2 = vld [vmem:[%s17019_s22 + $0x60] sm:$0xff]  }
  0x23   : > { %v5323_v16 = vsel %vm5288_vm3, %v5313_v59, %v5322_v6  ;;  %v5331_v21 = vor.u32 %v5330_v11, %v5327_v7  ;;  %v671_v22 = vrot.slane %v669_v13, 1  ;;  %v5336_v23 = vrot.slane %v5334_v14, 1  ;;  %v16206_v13 = vld [vmem:[%s17019_s22 + $0x58] sm:$0xff]  }
  0x24   : > { %14390 = vmatprep.mubr.msk.bf16.mxu0 %vm1177_vm2, %v5323_v16  ;;  %v677_v24 = vshll.u32 %v16196_v63, 16  ;;  %v5339_v26 = vrot.slane %v5337_v18, 2  ;;  %v5343_v27 = vshrl.u32 %v16197_v15, 16  ;;  %v5346_v28 = vshll.u32 %v16197_v15, 16  ;;  %v16207_v18 = vld [vmem:[%s17019_s22 + $0x68] sm:$0xff]  }
  0x25   : > { %v681_v12 = vshrl.u32 %v16196_v63, 16  ;;  %v5332_v29 = vsel %vm5288_vm3, %v5322_v6, %v5331_v21  ;;  %v672_v30 = vsel %vm628_vm1, %v667_v17, %v671_v22  ;;  %v675_v31 = vor.u32 %v673_v19, %v671_v22  ;;  %v16204_v63 = vld [vmem:[%s17019_s22 + $0x50] sm:$0xff]  }
  0x26   : > { %13839 = vmatmul.mubr.msk.bf16.gmra.mrb[4].mxu1 %vm1177_vm2, %v664_v10  ;;  %v679_v32 = vrot.slane %v677_v24, 1  ;;  %v5340_v34 = vor.u32 %v5339_v26, %v5336_v23  ;;  %v5345_v35 = vrot.slane %v5343_v27, 1  ;;  %v5348_v36 = vrot.slane %v5346_v28, 2  ;;  %v16208_v28 = vld [vmem:[%s17019_s22 + $0x60] sm:$0xff]  }
  0x27   : > { %13842 = vmatprep.mubr.msk.bf16.mxu1 %vm1177_vm2, %v672_v30  ;;  %v685_v37 = vshll.u32 %v16198_v25, 16  ;;  %v5352_v40 = vshrl.u32 %v16199_v33, 16  ;;  %v5355_v41 = vshll.u32 %v16199_v33, 16  ;;  %v689_v45 = vshrl.u32 %v16198_v25, 16 }
  0x28   : > { %v683_v39 = vor.u32 %v681_v12, %v679_v32  ;;  %v5341_v42 = vsel %vm5288_vm3, %v5331_v21, %v5340_v34  ;;  %v680_v43 = vsel %vm628_vm1, %v675_v31, %v679_v32  ;;  %v693_v50 = vshll.u32 %v16200_v38, 16  ;;  %v16209_v12 = vld [vmem:[%s17019_s22 + $0x70] sm:$0xff]   ;;  %v16210_v31 = vld [vmem:[%s17019_s22 + $0x68] sm:$0xff]  }
  0x29   : > { %v687_v44 = vrot.slane %v685_v37, 1  ;;  %14391 = vmatmul.mubr.msk.bf16.gmra.mrb[4].mxu0 %vm1177_vm2, %v5332_v29  ;;  %v5354_v48 = vrot.slane %v5352_v40, 1  ;;  %v5357_v49 = vrot.slane %v5355_v41, 2  ;;  %v697_v51 = vshrl.u32 %v16200_v38, 16  ;;  %v16211_v40 = vld [vmem:[%s17019_s22 + $0x78] sm:$0xff]  }
  0x2a   : > { %14394 = vmatprep.mubr.msk.bf16.mxu0 %vm1177_vm2, %v5341_v42  ;;  %v5349_v52 = vor.u32 %v5348_v36, %v5345_v35  ;;  %v5361_v54 = vshrl.u32 %v16201_v46, 16  ;;  %v695_v57 = vrot.slane %v693_v50, 1  ;;  %v5364_v58 = vshll.u32 %v16201_v46, 16  ;;  %v16213_v50 = vld [vmem:[%s17019_s22 + $0x80] sm:$0xff]  }
  0x2b   : > { %v688_v53 = vsel %vm628_vm1, %v683_v39, %v687_v44  ;;  %v5358_v56 = vor.u32 %v5357_v49, %v5354_v48  ;;  %v701_v59 = vshll.u32 %v16202_v47, 16  ;;  %v5370_v61 = vshrl.u32 %v16203_v55, 16  ;;  %v16212_v49 = vld [vmem:[%s17019_s22 + $0x70] sm:$0xff]  }
  0x2c   : > { %v5363_v60 = vrot.slane %v5361_v54, 1  ;;  %v5373_v62 = vshll.u32 %v16203_v55, 16  ;;  %v691_v0 = vor.u32 %v689_v45, %v687_v44  ;;  %v5366_v1 = vrot.slane %v5364_v58, 2 }
  0x2d   : > { %v5350_v4 = vsel %vm5288_vm3, %v5340_v34, %v5349_v52  ;;  %v699_v5 = vor.u32 %v697_v51, %v695_v57  ;;  %v703_v6 = vrot.slane %v701_v59, 1  ;;  %v5359_v7 = vsel %vm5288_vm3, %v5349_v52, %v5358_v56 }
  0x2e   : > { %13843 = vmatmul.mubr.msk.bf16.gmra.mrb[8].mxu1 %vm1177_vm2, %v680_v43  ;;  %v5372_v8 = vrot.slane %v5370_v61, 1  ;;  %v5375_v10 = vrot.slane %v5373_v62, 2  ;;  %v709_v11 = vshll.u32 %v16204_v63, 16  ;;  %v696_v14 = vsel %vm628_vm1, %v691_v0, %v695_v57  ;;  %v16214_v62 = vld [vmem:[%s17019_s22 + $0x78] sm:$0xff]  }
  0x2f   : > { %13846 = vmatprep.mubr.msk.bf16.mxu1 %vm1177_vm2, %v688_v53  ;;  %v5367_v15 = vor.u32 %v5366_v1, %v5363_v60  ;;  %v705_v16 = vshrl.u32 %v16202_v47, 16  ;;  %v5379_v17 = vshrl.u32 %v16205_v2, 16  ;;  %v704_v19 = vsel %vm628_vm1, %v699_v5, %v703_v6 }
  0x30   : > { %v5382_v21 = vshll.u32 %v16205_v2, 16  ;;  %v713_v22 = vshrl.u32 %v16204_v63, 16  ;;  %v717_v23 = vshll.u32 %v16206_v13, 16  ;;  %v5376_v24 = vor.u32 %v5375_v10, %v5372_v8 }
  0x31   : > { %14395 = vmatmul.mubr.msk.bf16.gmra.mrb[8].mxu0 %vm1177_vm2, %v5350_v4  ;;  %v5388_v25 = vshrl.u32 %v16207_v18, 16  ;;  %v5391_v26 = vshll.u32 %v16207_v18, 16  ;;  %v711_v27 = vrot.slane %v709_v11, 1  ;;  %v707_v29 = vor.u32 %v705_v16, %v703_v6  ;;  %v16215_v4 = vld [vmem:[%s17019_s22 + $0x88] sm:$0xff]  }
  0x32   : > { %14398 = vmatprep.mubr.msk.bf16.mxu0 %vm1177_vm2, %v5359_v7  ;;  %v5381_v30 = vrot.slane %v5379_v17, 1  ;;  %v5368_v32 = vsel %vm5288_vm3, %v5358_v56, %v5367_v15  ;;  %v5384_v33 = vrot.slane %v5382_v21, 2  ;;  %v719_v35 = vrot.slane %v717_v23, 1  ;;  %v16217_v23 = vld [vmem:[%s17019_s22 + $0x90] sm:$0xff]  }
  0x33   : > { %v715_v34 = vor.u32 %v713_v22, %v711_v27  ;;  %v5377_v36 = vsel %vm5288_vm3, %v5367_v15, %v5376_v24  ;;  %v5390_v37 = vrot.slane %v5388_v25, 1  ;;  %v5393_v38 = vrot.slane %v5391_v26, 2  ;;  %v16216_v22 = vld [vmem:[%s17019_s22 + $0x80] sm:$0xff]  }
  0x34   : > { %v721_v39 = vshrl.u32 %v16206_v13, 16  ;;  %v725_v41 = vshll.u32 %v16208_v28, 16  ;;  %v5397_v42 = vshrl.u32 %v16209_v12, 16  ;;  %v712_v43 = vsel %vm628_vm1, %v707_v29, %v711_v27 }
  0x35   : > { %v5400_v44 = vshll.u32 %v16209_v12, 16  ;;  %v733_v45 = vshll.u32 %v16210_v31, 16  ;;  %v5385_v46 = vor.u32 %v5384_v33, %v5381_v30  ;;  %v720_v47 = vsel %vm628_vm1, %v715_v34, %v719_v35 }
  0x36   : > { %13847 = vmatmul.mubr.msk.bf16.gmra.mrb[12].mxu1 %vm1177_vm2, %v696_v14  ;;  %v729_v48 = vshrl.u32 %v16208_v28, 16  ;;  %v5394_v51 = vor.u32 %v5393_v38, %v5390_v37  ;;  %v5406_v52 = vshrl.u32 %v16211_v40, 16  ;;  %v5409_v53 = vshll.u32 %v16211_v40, 16  ;;  %v16219_v28 = vld [vmem:[%s17019_s22 + $0x98] sm:$0xff]  }
  0x37   : > { %13850 = vmatprep.mubr.msk.bf16.mxu1 %vm1177_vm2, %v704_v19  ;;  %v727_v54 = vrot.slane %v725_v41, 1  ;;  %v5399_v55 = vrot.slane %v5397_v42, 1  ;;  %v723_v56 = vor.u32 %v721_v39, %v719_v35  ;;  %v5402_v57 = vrot.slane %v5400_v44, 2 }
  0x38   : > { %v735_v58 = vrot.slane %v733_v45, 1  ;;  %v5386_v59 = vsel %vm5288_vm3, %v5376_v24, %v5385_v46  ;;  %v741_v61 = vshll.u32 %v16212_v49, 16  ;;  %v5395_v63 = vsel %vm5288_vm3, %v5385_v46, %v5394_v51  ;;  %v16218_v24 = vld [vmem:[%s17019_s22 + $0x88] sm:$0xff]   ;;  %v16221_v45 = vld [vmem:[%s17019_s22 + $0xa0] sm:$0xff]  }
  0x39   : > { %14399 = vmatmul.mubr.msk.bf16.gmra.mrb[12].mxu0 %vm1177_vm2, %v5368_v32  ;;  %v731_v60 = vor.u32 %v729_v48, %v727_v54  ;;  %v5408_v0 = vrot.slane %v5406_v52, 1  ;;  %v5411_v1 = vrot.slane %v5409_v53, 2  ;;  %v5415_v2 = vshrl.u32 %v16213_v50, 16  ;;  %v16222_v53 = vld [vmem:[%s17019_s22 + $0x98] sm:$0xff]  }
  0x3a   : > { %14402 = vmatprep.mubr.msk.bf16.mxu0 %vm1177_vm2, %v5377_v36  ;;  %v737_v5 = vshrl.u32 %v16210_v31, 16  ;;  %v5418_v6 = vshll.u32 %v16213_v50, 16  ;;  %v728_v7 = vsel %vm628_vm1, %v723_v56, %v727_v54  ;;  %v5403_v8 = vor.u32 %v5402_v57, %v5399_v55  ;;  %v16223_v56 = vld [vmem:[%s17019_s22 + $0xa8] sm:$0xff]  }
  0x3b   : > { %v736_v10 = vsel %vm628_vm1, %v731_v60, %v735_v58  ;;  %v743_v11 = vrot.slane %v741_v61, 1  ;;  %v745_v13 = vshrl.u32 %v16212_v49, 16  ;;  %v749_v14 = vshll.u32 %v16214_v62, 16 }
  0x3c   : > { %v5412_v15 = vor.u32 %v5411_v1, %v5408_v0  ;;  %v5417_v16 = vrot.slane %v5415_v2, 1  ;;  %v5424_v17 = vshrl.u32 %v16215_v4, 16  ;;  %v5427_v18 = vshll.u32 %v16215_v4, 16 }
  0x3d   : > { %v739_v19 = vor.u32 %v737_v5, %v735_v58  ;;  %v5420_v21 = vrot.slane %v5418_v6, 2  ;;  %v5404_v25 = vsel %vm5288_vm3, %v5394_v51, %v5403_v8  ;;  %v747_v26 = vor.u32 %v745_v13, %v743_v11  ;;  %v16225_v13 = vld [vmem:[%s17019_s22 + $0xb0] sm:$0xff]  }
  0x3e   : > { %13851 = vmatmul.mubr.msk.bf16.gmra.mrb[16].mxu1 %vm1177_vm2, %v712_v43  ;;  %v751_v27 = vrot.slane %v749_v14, 1  ;;  %v5413_v12 = vsel %vm5288_vm3, %v5403_v8, %v5412_v15  ;;  %v5426_v29 = vrot.slane %v5424_v17, 1  ;;  %v5429_v30 = vrot.slane %v5427_v18, 2  ;;  %v16220_v43 = vld [vmem:[%s17019_s22 + $0x90] sm:$0xff]   ;;  %v16226_v17 = vld [vmem:[%s17019_s22 + $0xa8] sm:$0xff]  }
  0x3f   : > { %13854 = vmatprep.mubr.msk.bf16.mxu1 %vm1177_vm2, %v720_v47  ;;  %v744_v31 = vsel %vm628_vm1, %v739_v19, %v743_v11  ;;  %v5421_v32 = vor.u32 %v5420_v21, %v5417_v16  ;;  %v757_v33 = vshll.u32 %v16216_v22, 16  ;;  %v753_v34 = vshrl.u32 %v16214_v62, 16 }
  0x40   : > { %v5433_v35 = vshrl.u32 %v16217_v23, 16  ;;  %v5436_v36 = vshll.u32 %v16217_v23, 16  ;;  %v761_v37 = vshrl.u32 %v16216_v22, 16  ;;  %v752_v38 = vsel %vm628_vm1, %v747_v26, %v751_v27  ;;  %v16227_v22 = vld [vmem:[%s17019_s22 + $0xb8] sm:$0xff]  }
  0x41   : > { %14403 = vmatmul.mubr.msk.bf16.gmra.mrb[16].mxu0 %vm1177_vm2, %v5386_v59  ;;  %v765_v39 = vshll.u32 %v16218_v24, 16  ;;  %v5442_v40 = vshrl.u32 %v16219_v28, 16  ;;  %v5430_v41 = vor.u32 %v5429_v30, %v5426_v29  ;;  %v5445_v42 = vshll.u32 %v16219_v28, 16 }
  0x42   : > { %14406 = vmatprep.mubr.msk.bf16.mxu0 %vm1177_vm2, %v5395_v63  ;;  %v759_v44 = vrot.slane %v757_v33, 1  ;;  %v5422_v46 = vsel %vm5288_vm3, %v5412_v15, %v5421_v32  ;;  %v755_v47 = vor.u32 %v753_v34, %v751_v27  ;;  %v5435_v48 = vrot.slane %v5433_v35, 1  ;;  %v16228_v35 = vld [vmem:[%s17019_s22 + $0xb0] sm:$0xff]  }
  0x43   : > { %v5438_v49 = vrot.slane %v5436_v36, 2  ;;  %v767_v51 = vrot.slane %v765_v39, 1  ;;  %v5444_v52 = vrot.slane %v5442_v40, 1  ;;  %v5431_v54 = vsel %vm5288_vm3, %v5421_v32, %v5430_v41 }
  0x44   : > { %v763_v50 = vor.u32 %v761_v37, %v759_v44  ;;  %v5447_v55 = vrot.slane %v5445_v42, 2  ;;  %v769_v57 = vshrl.u32 %v16218_v24, 16  ;;  %v773_v58 = vshll.u32 %v16220_v43, 16 }
  0x45   : > { %v5451_v59 = vshrl.u32 %v16221_v45, 16  ;;  %v760_v60 = vsel %vm628_vm1, %v755_v47, %v759_v44  ;;  %v5454_v61 = vshll.u32 %v16221_v45, 16  ;;  %v5439_v62 = vor.u32 %v5438_v49, %v5435_v48  ;;  %v16231_v47 = vld [vmem:[%s17019_s22 + $0xc8] sm:$0xff]  }
  0x46   : > { %13855 = vmatmul.mubr.msk.bf16.gmra.mrb[20].mxu1 %vm1177_vm2, %v728_v7  ;;  %v768_v63 = vsel %vm628_vm1, %v763_v50, %v767_v51  ;;  %v777_v0 = vshrl.u32 %v16220_v43, 16  ;;  %v781_v1 = vshll.u32 %v16222_v53, 16  ;;  %v5448_v2 = vor.u32 %v5447_v55, %v5444_v52  ;;  %v16230_v43 = vld [vmem:[%s17019_s22 + $0xb8] sm:$0xff]  }
  0x47   : > { %13858 = vmatprep.mubr.msk.bf16.mxu1 %vm1177_vm2, %v736_v10  ;;  %v5460_v4 = vshrl.u32 %v16223_v56, 16  ;;  %v5463_v5 = vshll.u32 %v16223_v56, 16  ;;  %v771_v6 = vor.u32 %v769_v57, %v767_v51  ;;  %v775_v7 = vrot.slane %v773_v58, 1  ;;  %v16224_v10 = vld [vmem:[%s17019_s22 + $0xa0] sm:$0xff]  }
  0x48   : > { %v5453_v8 = vrot.slane %v5451_v59, 1  ;;  %v5456_v11 = vrot.slane %v5454_v61, 2  ;;  %v5440_v14 = vsel %vm5288_vm3, %v5430_v41, %v5439_v62  ;;  %v783_v16 = vrot.slane %v781_v1, 1  ;;  %v16232_v61 = vld [vmem:[%s17019_s22 + $0xc0] sm:$0xff]  }
  0x49   : > { %14407 = vmatmul.mubr.msk.bf16.gmra.mrb[20].mxu0 %vm1177_vm2, %v5404_v25  ;;  %v779_v15 = vor.u32 %v777_v0, %v775_v7  ;;  %v5449_v18 = vsel %vm5288_vm3, %v5439_v62, %v5448_v2  ;;  %v5462_v19 = vrot.slane %v5460_v4, 1  ;;  %v5465_v21 = vrot.slane %v5463_v5, 2  ;;  %v16233_v62 = vld [vmem:[%s17019_s22 + $0xd0] sm:$0xff]  }
  0x4a   : > { %14410 = vmatprep.mubr.msk.bf16.mxu0 %vm1177_vm2, %v5413_v12  ;;  %v776_v23 = vsel %vm628_vm1, %v771_v6, %v775_v7  ;;  %v789_v24 = vshll.u32 %v16224_v10, 16  ;;  %v5457_v25 = vor.u32 %v5456_v11, %v5453_v8  ;;  %v785_v26 = vshrl.u32 %v16222_v53, 16  ;;  %v16234_v6 = vld [vmem:[%s17019_s22 + $0xc8] sm:$0xff]   ;;  %v16235_v11 = vld [vmem:[%s17019_s22 + $0xd8] sm:$0xff]  }
  0x4b   : > { %v5469_v27 = vshrl.u32 %v16225_v13, 16  ;;  %v5472_v28 = vshll.u32 %v16225_v13, 16  ;;  %v784_v12 = vsel %vm628_vm1, %v779_v15, %v783_v16  ;;  %v793_v29 = vshrl.u32 %v16224_v10, 16 }
  0x4c   : > { %v797_v30 = vshll.u32 %v16226_v17, 16  ;;  %v5478_v32 = vshrl.u32 %v16227_v22, 16  ;;  %v5481_v33 = vshll.u32 %v16227_v22, 16  ;;  %v791_v34 = vrot.slane %v789_v24, 1 }
  0x4d   : > { %v5458_v36 = vsel %vm5288_vm3, %v5448_v2, %v5457_v25  ;;  %v787_v37 = vor.u32 %v785_v26, %v783_v16  ;;  %v5471_v39 = vrot.slane %v5469_v27, 1  ;;  %v5474_v40 = vrot.slane %v5472_v28, 2  ;;  %v16236_v28 = vld [vmem:[%s17019_s22 + $0xd0] sm:$0xff]  }
  0x4e   : > { %13859 = vmatmul.mubr.msk.bf16.gmra.mrb[24].mxu1 %vm1177_vm2, %v744_v31  ;;  %v5466_v31 = vor.u32 %v5465_v21, %v5462_v19  ;;  %v795_v41 = vor.u32 %v793_v29, %v791_v34  ;;  %v799_v42 = vrot.slane %v797_v30, 1  ;;  %v5480_v45 = vrot.slane %v5478_v32, 1 }
  0x4f   : > { %13862 = vmatprep.mubr.msk.bf16.mxu1 %vm1177_vm2, %v752_v38  ;;  %v16229_v38 = vld [vmem:[%s17019_s22 + $0xc0] sm:$0xff]   ;;  %v805_v48 = vshll.u32 %v16228_v35, 16  ;;  %v792_v49 = vsel %vm628_vm1, %v787_v37, %v791_v34  ;;  %v801_v50 = vshrl.u32 %v16226_v17, 16  ;;  %v5475_v53 = vor.u32 %v5474_v40, %v5471_v39 }
  0x50   : > { %v5467_v44 = vsel %vm5288_vm3, %v5457_v25, %v5466_v31  ;;  %v5487_v51 = vshrl.u32 %v16229_v38, 16  ;;  %v5490_v52 = vshll.u32 %v16229_v38, 16  ;;  %v809_v55 = vshrl.u32 %v16228_v35, 16  ;;  %v16239_v35 = vld [vmem:[%s17019_s22 + $0xe8] sm:$0xff]  }
  0x51   : > { %14411 = vmatmul.mubr.msk.bf16.gmra.mrb[24].mxu0 %vm1177_vm2, %v5422_v46  ;;  %v5483_v46 = vrot.slane %v5481_v33, 2  ;;  %v813_v56 = vshll.u32 %v16230_v43, 16  ;;  %v5496_v58 = vshrl.u32 %v16231_v47, 16  ;;  %v5499_v59 = vshll.u32 %v16231_v47, 16 }
  0x52   : > { %14414 = vmatprep.mubr.msk.bf16.mxu0 %vm1177_vm2, %v5431_v54  ;;  %v800_v54 = vsel %vm628_vm1, %v795_v41, %v799_v42  ;;  %v5489_v0 = vrot.slane %v5487_v51, 1  ;;  %v5492_v1 = vrot.slane %v5490_v52, 2  ;;  %v5476_v2 = vsel %vm5288_vm3, %v5466_v31, %v5475_v53  ;;  %v16238_v31 = vld [vmem:[%s17019_s22 + $0xd8] sm:$0xff]   ;;  %v16240_v52 = vld [vmem:[%s17019_s22 + $0xe0] sm:$0xff]  }
  0x53   : > { %v5484_v57 = vor.u32 %v5483_v46, %v5480_v45  ;;  %v815_v5 = vrot.slane %v813_v56, 1  ;;  %v5498_v8 = vrot.slane %v5496_v58, 1  ;;  %v5501_v10 = vrot.slane %v5499_v59, 2 }
  0x54   : > { %v821_v13 = vshll.u32 %v16232_v61, 16  ;;  %v817_v16 = vshrl.u32 %v16230_v43, 16  ;;  %v5508_v17 = vshll.u32 %v16233_v62, 16  ;;  %v825_v21 = vshrl.u32 %v16232_v61, 16 }
  0x55   : > { %v5485_v7 = vsel %vm5288_vm3, %v5475_v53, %v5484_v57  ;;  %v829_v22 = vshll.u32 %v16234_v6, 16  ;;  %v5514_v24 = vshrl.u32 %v16235_v11, 16  ;;  %v5517_v25 = vshll.u32 %v16235_v11, 16  ;;  %v16241_v53 = vld [vmem:[%s17019_s22 + $0xf0] sm:$0xff]  }
  0x56   : > { %13863 = vmatmul.mubr.msk.bf16.gmra.mrb[28].mxu1 %vm1177_vm2, %v760_v60  ;;  %v807_v60 = vrot.slane %v805_v48, 1  ;;  %v823_v26 = vrot.slane %v821_v13, 1  ;;  %v819_v29 = vor.u32 %v817_v16, %v815_v5  ;;  %v5510_v30 = vrot.slane %v5508_v17, 2 }
  0x57   : > { %13866 = vmatprep.mubr.msk.bf16.mxu1 %vm1177_vm2, %v768_v63  ;;  %v803_v63 = vor.u32 %v801_v50, %v799_v42  ;;  %v831_v34 = vrot.slane %v829_v22, 1  ;;  %v5516_v37 = vrot.slane %v5514_v24, 1  ;;  %v5519_v38 = vrot.slane %v5517_v25, 2  ;;  %v16244_v22 = vld [vmem:[%s17019_s22 + $0xf0] sm:$0xff]  }
  0x58   : > { %v811_v4 = vor.u32 %v809_v55, %v807_v60  ;;  %v827_v33 = vor.u32 %v825_v21, %v823_v26  ;;  %v833_v39 = vshrl.u32 %v16234_v6, 16  ;;  %v837_v40 = vshll.u32 %v16236_v28, 16 }
  0x59   : > { %14415 = vmatmul.mubr.msk.bf16.gmra.mrb[28].mxu0 %vm1177_vm2, %v5440_v14  ;;  %v5505_v14 = vshrl.u32 %v16233_v62, 16  ;;  %v808_v15 = vsel %vm628_vm1, %v803_v63, %v807_v60  ;;  %v824_v42 = vsel %vm628_vm1, %v819_v29, %v823_v26  ;;  %v841_v47 = vshrl.u32 %v16236_v28, 16  ;;  %v16242_v62 = vld [vmem:[%s17019_s22 + $0xe8] sm:$0xff]  }
  0x5a   : > { %14418 = vmatprep.mubr.msk.bf16.mxu0 %vm1177_vm2, %v5449_v18  ;;  %v5493_v18 = vor.u32 %v5492_v1, %v5489_v0  ;;  %v816_v19 = vsel %vm628_vm1, %v811_v4, %v815_v5  ;;  %v832_v46 = vsel %vm628_vm1, %v827_v33, %v831_v34  ;;  %v5532_v48 = vshrl.u32 %v16239_v35, 16  ;;  %v16243_v1 = vld [vmem:[%s17019_s22 + $0xf8] sm:$0xff]   ;;  %v16247_v28 = vld [vmem:[%s17019_s22 + $0x108] sm:$0xff]  }
  0x5b   : > { %v5507_v27 = vrot.slane %v5505_v14, 1  ;;  %v5535_v50 = vshll.u32 %v16239_v35, 16  ;;  %v839_v51 = vrot.slane %v837_v40, 1  ;;  %v835_v55 = vor.u32 %v833_v39, %v831_v34 }
  0x5c   : > { %v5494_v32 = vsel %vm5288_vm3, %v5484_v57, %v5493_v18  ;;  %v5534_v61 = vrot.slane %v5532_v48, 1  ;;  %v853_v4 = vshll.u32 %v16240_v52, 16  ;;  %v5541_v5 = vshrl.u32 %v16241_v53, 16  ;;  %v16249_v48 = vld [vmem:[%s17019_s22 + $0x110] sm:$0xff]  }
  0x5d   : > { %v5511_v45 = vor.u32 %v5510_v30, %v5507_v27  ;;  %v843_v60 = vor.u32 %v841_v47, %v839_v51  ;;  %v5537_v0 = vrot.slane %v5535_v50, 2  ;;  %v5544_v6 = vshll.u32 %v16241_v53, 16  ;;  %v16246_v27 = vld [vmem:[%s17019_s22 + $0xf8] sm:$0xff]   ;;  %v16250_v53 = vld [vmem:[%s17019_s22 + $0x108] sm:$0xff]  }
  0x5e   : > { %13867 = vmatmul.mubr.msk.bf16.gmra.mrb[32].mxu1 %vm1177_vm2, %v776_v23  ;;  %v5502_v23 = vor.u32 %v5501_v10, %v5498_v8  ;;  %v857_v11 = vshrl.u32 %v16240_v52, 16  ;;  %v861_v13 = vshll.u32 %v16242_v62, 16  ;;  %v5553_v16 = vshll.u32 %v16243_v1, 16 }
  0x5f   : > { %13870 = vmatprep.mubr.msk.bf16.mxu1 %vm1177_vm2, %v784_v12  ;;  %v16237_v12 = vld [vmem:[%s17019_s22 + $0xe0] sm:$0xff]   ;;  %v5538_v14 = vor.u32 %v5537_v0, %v5534_v61  ;;  %v5546_v21 = vrot.slane %v5544_v6, 2  ;;  %v869_v33 = vshll.u32 %v16244_v22, 16  ;;  %v865_v34 = vshrl.u32 %v16242_v62, 16 }
  0x60   : > { %v5523_v41 = vshrl.u32 %v16237_v12, 16  ;;  %v5526_v43 = vshll.u32 %v16237_v12, 16  ;;  %v5512_v59 = vsel %vm5288_vm3, %v5502_v23, %v5511_v45  ;;  %v863_v26 = vrot.slane %v861_v13, 1 }
  0x61   : > { %14419 = vmatmul.mubr.msk.bf16.gmra.mrb[32].mxu0 %vm1177_vm2, %v5458_v36  ;;  %v5503_v36 = vsel %vm5288_vm3, %v5493_v18, %v5502_v23  ;;  %v855_v18 = vrot.slane %v853_v4, 1  ;;  %v16245_v23 = vld [vmem:[%s17019_s22 + $0x100] sm:$0xff]   ;;  %v5555_v30 = vrot.slane %v5553_v16, 2  ;;  %v877_v39 = vshll.u32 %v16246_v27, 16 }
  0x62   : > { %14422 = vmatprep.mubr.msk.bf16.mxu0 %vm1177_vm2, %v5467_v44  ;;  %v845_v44 = vshll.u32 %v16238_v31, 16  ;;  %v5525_v56 = vrot.slane %v5523_v41, 1  ;;  %v5528_v57 = vrot.slane %v5526_v43, 2  ;;  %v5559_v35 = vshrl.u32 %v16245_v23, 16 }
  0x63   : > { %v859_v25 = vor.u32 %v857_v11, %v855_v18  ;;  %v5568_v40 = vshrl.u32 %v16247_v28, 16  ;;  %v871_v43 = vrot.slane %v869_v33, 1  ;;  %v5577_v61 = vshrl.u32 %v16249_v48, 16  ;;  %v6829_v33 = vld [vmem:[%s17019_s22 + $0x10] sm:$0xc] }
  0x64   : > { %v847_v58 = vrot.slane %v845_v44, 1  ;;  %v5529_v8 = vor.u32 %v5528_v57, %v5525_v56  ;;  %v16248_v44 = vld [vmem:[%s17019_s22 + $0x100] sm:$0xff]   ;;  %v5561_v47 = vrot.slane %v5559_v35, 1  ;;  %v16251_v57 = vld [vmem:[%s17019_s22 + $0x118] sm:$0xff]   ;;  %v5580_v62 = vshll.u32 %v16249_v48, 16 }
  0x65   : > { %v5570_v52 = vrot.slane %v5568_v40, 1  ;;  %v5589_v6 = vshll.u32 %v16251_v57, 16  ;;  %v5579_v11 = vrot.slane %v5577_v61, 1 }
  0x66   : > { %13871 = vmatmul.mubr.msk.bf16.gmra.mrb[36].mxu1 %vm1177_vm2, %v792_v49  ;;  %v5520_v49 = vor.u32 %v5519_v38, %v5516_v37  ;;  %v848_v10 = vsel %vm628_vm1, %v843_v60, %v847_v58  ;;  %v5539_v12 = vsel %vm5288_vm3, %v5529_v8, %v5538_v14  ;;  %v873_v37 = vshrl.u32 %v16244_v22, 16 }
  0x67   : > { %13874 = vmatprep.mubr.msk.bf16.mxu1 %vm1177_vm2, %v800_v54  ;;  %v17192_v54 = vld [vmem:[%s19634_s1 + $0x18] sm:$0xf]  ;;  %v864_v38 = vsel %vm628_vm1, %v859_v25, %v863_v26  ;;  %v5582_v13 = vrot.slane %v5580_v62, 2  ;;  %v5591_v22 = vrot.slane %v5589_v6, 2 }
  0x68   : > { %16171 = vmatprep.subr.msk.bf16.mxu0 %vm1382_vm0, %v17192_v54  ;;  %v5521_v63 = vsel %vm5288_vm3, %v5511_v45, %v5520_v49  ;;  %v5530_v24 = vsel %vm5288_vm3, %v5520_v49, %v5529_v8  ;;  %v875_v50 = vor.u32 %v873_v37, %v871_v43  ;;  %v16252_v8 = vld [vmem:[%s17019_s22 + $0x110] sm:$0xff]   ;;  %v16259_v62 = vld [vmem:[%s17019_s22 + $0x138] sm:$0xff]  }
  0x69   : > { %14423 = vmatmul.mubr.msk.bf16.gmra.mrb[36].mxu0 %vm1177_vm2, %v5476_v2  ;;  %v849_v2 = vshrl.u32 %v16238_v31, 16 }
  0x6a   : > { %14426 = vmatprep.mubr.msk.bf16.mxu0 %vm1177_vm2, %v5485_v7  ;;  %v840_v7 = vsel %vm628_vm1, %v835_v55, %v839_v51  ;;  %v879_v51 = vrot.slane %v877_v39, 1 }
  0x6b   : > { %v851_v17 = vor.u32 %v849_v2, %v847_v58  ;;  %v881_v58 = vshrl.u32 %v16246_v27, 16  ;;  %v893_v2 = vshll.u32 %v16250_v53, 16 }
  0x6c   : > { %v880_v0 = vsel %vm628_vm1, %v875_v50, %v879_v51 }
  0x6d   : > { %v856_v31 = vsel %vm628_vm1, %v851_v17, %v855_v18  ;;  %v895_v17 = vrot.slane %v893_v2, 1  ;;  %v16254_v18 = vld [vmem:[%s17019_s22 + $0x118] sm:$0xff]  }
  0x6e   : > { %13875 = vmatmul.mubr.msk.bf16.gmra.mrb[40].mxu1 %vm1177_vm2, %v808_v15  ;;  %v5550_v15 = vshrl.u32 %v16243_v1, 16  ;;  %v889_v1 = vshrl.u32 %v16248_v44, 16 }
  0x6f   : > { %13878 = vmatprep.mubr.msk.bf16.mxu1 %vm1177_vm2, %v816_v19  ;;  %v5543_v19 = vrot.slane %v5541_v5, 1  ;;  %v5586_v5 = vshrl.u32 %v16251_v57, 16  ;;  %v16258_v57 = vld [vmem:[%s17019_s22 + $0x130] sm:$0xff]  }
  0x70   : > { %v5552_v29 = vrot.slane %v5550_v15, 1 }
  0x71   : > { %14427 = vmatmul.mubr.msk.bf16.gmra.mrb[40].mxu0 %vm1177_vm2, %v5494_v32  ;;  %v5547_v32 = vor.u32 %v5546_v21, %v5543_v19  ;;  %v5588_v21 = vrot.slane %v5586_v5, 1 }
  0x72   : > { %14430 = vmatprep.mubr.msk.bf16.mxu0 %vm1177_vm2, %v5503_v36  ;;  %v5562_v36 = vshll.u32 %v16245_v23, 16  ;;  %v5556_v41 = vor.u32 %v5555_v30, %v5552_v29  ;;  %v897_v23 = vshrl.u32 %v16250_v53, 16  ;;  %v905_v29 = vshrl.u32 %v16252_v8, 16  ;;  %v16669_v53 = vld [vmem:[%s17019_s22 + $0x18] sm:$0xff]  }
  0x73   : > { %v5548_v45 = vsel %vm5288_vm3, %v5538_v14, %v5547_v32  ;;  %v16253_v14 = vld [vmem:[%s17019_s22 + $0x120] sm:$0xff]   ;;  %v909_v30 = vshll.u32 %v16254_v18, 16 }
  0x74   : > { %v5564_v49 = vrot.slane %v5562_v36, 2  ;;  %v5557_v55 = vsel %vm5288_vm3, %v5547_v32, %v5556_v41  ;;  %v5595_v27 = vshrl.u32 %v16253_v14, 16  ;;  %v899_v36 = vor.u32 %v897_v23, %v895_v17 }
  0x75   : > { %v911_v40 = vrot.slane %v909_v30, 1  ;;  %v16673_v30 = vld [vmem:[%s17019_s22 + $0x38] sm:$0xff]  }
  0x76   : > { %13879 = vmatmul.mubr.msk.bf16.gmra.mrb[44].mxu1 %vm1177_vm2, %v824_v42  ;;  %v5571_v42 = vshll.u32 %v16247_v28, 16  ;;  %v5598_v28 = vshll.u32 %v16253_v14, 16  ;;  %v5597_v37 = vrot.slane %v5595_v27, 1  ;;  %v16260_v14 = vld [vmem:[%s17019_s22 + $0x140] sm:$0xff]   ;;  %v945_v27 = vshrl.u32 %v16259_v62, 16 }
  0x77   : > { %13882 = vmatprep.mubr.msk.bf16.mxu1 %vm1177_vm2, %v832_v46  ;;  %v867_v46 = vor.u32 %v865_v34, %v863_v26  ;;  %v5583_v26 = vor.u32 %v5582_v13, %v5579_v11  ;;  %v16256_v34 = vld [vmem:[%s17019_s22 + $0x120] sm:$0xff]   ;;  %v949_v23 = vshll.u32 %v16260_v14, 16 }
  0x78   : > { %v5573_v56 = vrot.slane %v5571_v42, 2  ;;  %v921_v50 = vshrl.u32 %v16256_v34, 16 }
  0x79   : > { %14431 = vmatmul.mubr.msk.bf16.gmra.mrb[44].mxu0 %vm1177_vm2, %v5512_v59  ;;  %v885_v59 = vshll.u32 %v16248_v44, 16  ;;  %v872_v60 = vsel %vm628_vm1, %v867_v46, %v871_v43  ;;  %v16668_v43 = vld [vmem:[%s17019_s22 + $0x14] sm:$0xf] }
  0x7a   : > { %14434 = vmatprep.mubr.msk.bf16.mxu0 %vm1177_vm2, %v5521_v63  ;;  %v5565_v63 = vor.u32 %v5564_v49, %v5561_v47  ;;  %v5574_v4 = vor.u32 %v5573_v56, %v5570_v52  ;;  %v12862_v44 = vcombine.low %v6829_v33, %v16668_v43  ;;  %v913_v47 = vshrl.u32 %v16254_v18, 16  ;;  %v16262_v33 = vld [vmem:[%s17019_s22 + $0x150] sm:$0xff]  }
  0x7c   : > { %v5566_v15 = vsel %vm5288_vm3, %v5556_v41, %v5565_v63  ;;  %v5575_v19 = vsel %vm5288_vm3, %v5565_v63, %v5574_v4  ;;  %v5584_v35 = vsel %vm5288_vm3, %v5574_v4, %v5583_v26  ;;  %v16257_v41 = vld [vmem:[%s17019_s22 + $0x128] sm:$0xff]   ;;  %v6836_v52 = vrot.slane %v12862_v44, 2  ;;  %v16670_v4 = vld [vmem:[%s17019_s22 + $0x20] sm:$0xff]  }
  0x7d   : > { %v929_v2 = vshrl.u32 %v16257_v41, 16  ;;  %v6839_v5 = vrot.slane %v16670_v4, 2  ;;  %v16674_v44 = vld [vmem:[%s17019_s22 + $0x40] sm:$0xff]  }
  0x7e   : > { %13883 = vmatmul.mubr.msk.bf16.gmra.mrb[48].mxu1 %vm1177_vm2, %v840_v7  ;;  %v887_v7 = vrot.slane %v885_v59, 1 }
  0x7f   : > { %13886 = vmatprep.mubr.msk.bf16.mxu1 %vm1177_vm2, %v848_v10  ;;  %v883_v10 = vor.u32 %v881_v58, %v879_v51  ;;  %v925_v51 = vshll.u32 %v16257_v41, 16  ;;  %v915_v58 = vor.u32 %v913_v47, %v911_v40  ;;  %v16264_v41 = vld [vmem:[%s17019_s22 + $0x160] sm:$0xff]   ;;  %v969_v47 = vshrl.u32 %v16262_v33, 16 }
  0x80   : > { %v891_v16 = vor.u32 %v889_v1, %v887_v7  ;;  %v985_v4 = vshrl.u32 %v16264_v41, 16 }
  0x81   : > { %14435 = vmatmul.mubr.msk.bf16.gmra.mrb[48].mxu0 %vm1177_vm2, %v5530_v24  ;;  %v901_v24 = vshll.u32 %v16252_v8, 16  ;;  %v888_v25 = vsel %vm628_vm1, %v883_v10, %v887_v7  ;;  %v927_v61 = vrot.slane %v925_v51, 1  ;;  %v937_v7 = vshrl.u32 %v16258_v57, 16  ;;  %v16671_v10 = vld [vmem:[%s17019_s22 + $0x28] sm:$0xff]  }
  0x82   : > { %14438 = vmatprep.mubr.msk.bf16.mxu0 %vm1177_vm2, %v5539_v12  ;;  %v896_v12 = vsel %vm628_vm1, %v891_v16, %v895_v17  ;;  %v941_v8 = vshll.u32 %v16259_v62, 16  ;;  %v6841_v11 = vrot.slane %v16671_v10, 2  ;;  %v16675_v51 = vld [vmem:[%s17019_s22 + $0x48] sm:$0xff]  }
  0x83   : > { %v903_v32 = vrot.slane %v901_v24, 1 }
  0x84   : > { %v943_v18 = vrot.slane %v941_v8, 1  ;;  %v16678_v8 = vld [vmem:[%s17019_s22 + $0x60] sm:$0xff]  }
  0x85   : > { %v907_v39 = vor.u32 %v905_v29, %v903_v32  ;;  %v904_v46 = vsel %vm628_vm1, %v899_v36, %v903_v32  ;;  %v951_v32 = vrot.slane %v949_v23, 1  ;;  %v6855_v10 = vrot.slane %v16678_v8, 2  ;;  %v16269_v23 = vld [vmem:[%s17019_s22 + $0x188] sm:$0xff]  }
  0x86   : > { %13887 = vmatmul.mubr.msk.bf16.gmra.mrb[52].mxu1 %vm1177_vm2, %v856_v31  ;;  %v5592_v31 = vor.u32 %v5591_v22, %v5588_v21  ;;  %v8717_v21 = vsel %vm1382_vm0, %v17192_v54, 0  ;;  %v6842_v22 = vsel %vm6835_vm4, %v6839_v5, %v6841_v11 }
  0x87   : > { %13890 = vmatprep.mubr.msk.bf16.mxu1 %vm1177_vm2, %v864_v38  ;;  %v5600_v38 = vrot.slane %v5598_v28, 2  ;;  %v912_v49 = vsel %vm628_vm1, %v907_v39, %v911_v40  ;;  %v17282_v28 = vld [vmem:[%s19634_s1 + $0x8] sm:$0xf]  ;;  %v965_v40 = vshll.u32 %v16262_v33, 16 }
  0x88   : > { %v5593_v42 = vsel %vm5288_vm3, %v5583_v26, %v5592_v31  ;;  %16166 = vmatprep.subr.msk.bf16.mxu1 %vm1382_vm0, %v17282_v28 }
  0x89   : > { %14439 = vmatmul.mubr.msk.bf16.gmra.mrb[52].mxu0 %vm1177_vm2, %v5548_v45  ;;  %v917_v45 = vshll.u32 %v16256_v34, 16  ;;  %v17251_v48 = vor.u32 %v5600_v38, %v5597_v37  ;;  %v947_v34 = vor.u32 %v945_v27, %v943_v18  ;;  %v16263_v38 = vld [vmem:[%s17019_s22 + $0x158] sm:$0xff]  }
  0x8a   : > { %14442 = vmatprep.mubr.msk.bf16.mxu0 %vm1177_vm2, %v5557_v55  ;;  %v6837_v55 = vrot.slane %v16669_v53, 2  ;;  %v16676_v53 = vld [vmem:[%s17019_s22 + $0x50] sm:$0xff]  }
  0x8b   : > { %19694 = vst [vmem:[#allocation4_spill] sm:$0xff] %v17251_v48  ;;  %v919_v56 = vrot.slane %v917_v45, 1  ;;  %v5602_v59 = vsel %vm5288_vm3, %v5592_v31, %v17251_v48  ;;  %v6845_v31 = vrot.slane %v16673_v30, 2  ;;  %v6847_v45 = vrot.slane %v16674_v44, 2  ;;  %v16681_v44 = vld [vmem:[%s17019_s22 + $0x78] sm:$0xff]  }
  0x8c   : > { %v6838_v63 = vsel %vm6835_vm4, %v6836_v52, %v6837_v55  ;;  %v6840_v16 = vsel %vm6835_vm4, %v6837_v55, %v6839_v5  ;;  %v6849_v52 = vrot.slane %v16675_v51, 2  ;;  %v6851_v55 = vrot.slane %v16676_v53, 2  ;;  %v17856_v48 = vld [vmem:[%s17019_s22 + $0x58] sm:$0xff]  }
  0x8d   : > { %v920_v1 = vsel %vm628_vm1, %v915_v58, %v919_v56  ;;  %19699 = vst [vmem:[#allocation9_spill] sm:$0xff] %v17856_v48  ;;  %v8388_v20 = vrot.slane %v17856_v48, 2 }
  0x8e   : > { %13891 = vmatmul.mubr.msk.bf16.gmra.mrb[56].mxu1 %vm1177_vm2, %v872_v60  ;;  %v923_v60 = vor.u32 %v921_v50, %v919_v56  ;;  %v16265_v50 = vld [vmem:[%s17019_s22 + $0x168] sm:$0xff]   ;;  %v967_v56 = vrot.slane %v965_v40, 1 }
  0x8f   : > { %13894 = vmatprep.mubr.msk.bf16.mxu1 %vm1177_vm2, %v880_v0  ;;  %v933_v0 = vshll.u32 %v16258_v57, 16  ;;  %v981_v57 = vshll.u32 %v16264_v41, 16  ;;  %v989_v62 = vshll.u32 %v16265_v50, 16 }
  0x90   : > { %v928_v6 = vsel %vm628_vm1, %v923_v60, %v927_v61  ;;  %v971_v60 = vor.u32 %v969_v47, %v967_v56 }
  0x91   : > { %14443 = vmatmul.mubr.msk.bf16.gmra.mrb[56].mxu0 %vm1177_vm2, %v5566_v15  ;;  %v935_v13 = vrot.slane %v933_v0, 1  ;;  %v931_v15 = vor.u32 %v929_v2, %v927_v61  ;;  %v16266_v0 = vld [vmem:[%s17019_s22 + $0x170] sm:$0xff]   ;;  %v977_v2 = vshrl.u32 %v16263_v38, 16 }
  0x92   : > { %14446 = vmatprep.mubr.msk.bf16.mxu0 %vm1177_vm2, %v5575_v19  ;;  %v16261_v19 = vld [vmem:[%s17019_s22 + $0x148] sm:$0xff]  }
  0x93   : > { %v939_v17 = vor.u32 %v937_v7, %v935_v13  ;;  %v936_v24 = vsel %vm628_vm1, %v931_v15, %v935_v13  ;;  %v957_v29 = vshll.u32 %v16261_v19, 16  ;;  %v961_v43 = vshrl.u32 %v16261_v19, 16 }
  0x94   : > { %v983_v13 = vrot.slane %v981_v57, 1  ;;  %v997_v19 = vshll.u32 %v16266_v0, 16 }
  0x95   : > { %v944_v54 = vsel %vm628_vm1, %v939_v17, %v943_v18  ;;  %v959_v37 = vrot.slane %v957_v29, 1  ;;  %v993_v18 = vshrl.u32 %v16265_v50, 16  ;;  %v16680_v29 = vld [vmem:[%s17019_s22 + $0x70] sm:$0xff]  }
  0x96   : > { %13895 = vmatmul.mubr.msk.bf16.gmra.mrb[60].mxu1 %vm1177_vm2, %v888_v25  ;;  %v16672_v25 = vld [vmem:[%s17019_s22 + $0x30] sm:$0xff]   ;;  %v987_v17 = vor.u32 %v985_v4, %v983_v13  ;;  %v6859_v30 = vrot.slane %v16680_v29, 2 }
  0x97   : > { %13898 = vmatprep.mubr.msk.bf16.mxu1 %vm1177_vm2, %v896_v12  ;;  %v6843_v26 = vrot.slane %v16672_v25, 2  ;;  %v953_v12 = vshrl.u32 %v16260_v14, 16  ;;  %v963_v58 = vor.u32 %v961_v43, %v959_v37  ;;  %v991_v14 = vrot.slane %v989_v62, 1  ;;  %v16684_v4 = vld [vmem:[%s17019_s22 + $0x90] sm:$0xff]  }
  0x98   : > { %v1001_v25 = vshrl.u32 %v16266_v0, 16 }
  0x99   : > { %14447 = vmatmul.mubr.msk.bf16.gmra.mrb[60].mxu0 %vm1177_vm2, %v5584_v35  ;;  %v6844_v35 = vsel %vm6835_vm4, %v6841_v11, %v6843_v26  ;;  %v955_v36 = vor.u32 %v953_v12, %v951_v32  ;;  %v6846_v39 = vsel %vm6835_vm4, %v6843_v26, %v6845_v31  ;;  %v16267_v11 = vld [vmem:[%s17019_s22 + $0x178] sm:$0xff]   ;;  %v992_v27 = vsel %vm628_vm1, %v987_v17, %v991_v14 }
  0x9a   : > { %14450 = vmatprep.mubr.msk.bf16.mxu0 %vm1177_vm2, %v5593_v42  ;;  %v952_v42 = vsel %vm628_vm1, %v947_v34, %v951_v32  ;;  %v1005_v26 = vshll.u32 %v16267_v11, 16  ;;  %v995_v33 = vor.u32 %v993_v18, %v991_v14  ;;  %v1009_v41 = vshrl.u32 %v16267_v11, 16 }
  0x9e   : > { %13899 = vmatmul.mubr.msk.bf16.gmra.mrb[64].mxu1 %vm1177_vm2, %v904_v46  ;;  %v960_v46 = vsel %vm628_vm1, %v955_v36, %v959_v37  ;;  %v1007_v36 = vrot.slane %v1005_v26, 1  ;;  %v1021_v37 = vshll.u32 %v16269_v23, 16  ;;  %v16275_v26 = vld [vmem:[%s17019_s22 + $0x1b8] sm:$0xff]  }
  0x9f   : > { %13902 = vmatprep.mubr.msk.bf16.mxu1 %vm1177_vm2, %v912_v49  ;;  %v973_v49 = vshll.u32 %v16263_v38, 16 }
  0xa0   : > { %v1023_v51 = vrot.slane %v1021_v37, 1 }
  0xa1   : > { %14451 = vmatmul.mubr.msk.bf16.gmra.mrb[64].mxu0 %vm1177_vm2, %v5602_v59  ;;  %v6848_v59 = vsel %vm6835_vm4, %v6845_v31, %v6847_v45  ;;  %v975_v61 = vrot.slane %v973_v49, 1  ;;  %v999_v31 = vrot.slane %v997_v19, 1  ;;  %v16271_v49 = vld [vmem:[%s17019_s22 + $0x198] sm:$0xff]  }
  0xa2   : > { %14524 = vmatprep.mubr.msk.bf16.mxu0 %vm1177_vm2, %v6838_v63  ;;  %v6850_v63 = vsel %vm6835_vm4, %v6847_v45, %v6849_v52  ;;  %v6861_v45 = vrot.slane %v16681_v44, 2  ;;  %v1041_v18 = vshrl.u32 %v16271_v49, 16 }
  0xa3   : > { %v976_v5 = vsel %vm628_vm1, %v971_v60, %v975_v61  ;;  %v979_v15 = vor.u32 %v977_v2, %v975_v61  ;;  %v1000_v40 = vsel %vm628_vm1, %v995_v33, %v999_v31  ;;  %v16273_v60 = vld [vmem:[%s17019_s22 + $0x1a8] sm:$0xff]   ;;  %v16276_v33 = vld [vmem:[%s17019_s22 + $0x1c0] sm:$0xff]  }
  0xa4   : > { %v1053_v14 = vshll.u32 %v16273_v60, 16 }
  0xa6   : > { %13903 = vmatmul.mubr.msk.bf16.gmra.mrb[68].mxu1 %vm1177_vm2, %v920_v1  ;;  %v968_v1 = vsel %vm628_vm1, %v963_v58, %v967_v56  ;;  %v1025_v56 = vshrl.u32 %v16269_v23, 16  ;;  %v16272_v58 = vld [vmem:[%s17019_s22 + $0x1a0] sm:$0xff]  }
  0xa7   : > { %13906 = vmatprep.mubr.msk.bf16.mxu1 %vm1177_vm2, %v928_v6  ;;  %v16677_v6 = vld [vmem:[%s17019_s22 + $0x58] sm:$0xff]   ;;  %v1049_v19 = vshrl.u32 %v16272_v58, 16 }
  0xa8   : > { %v6853_v7 = vrot.slane %v16677_v6, 2  ;;  %v1027_v8 = vor.u32 %v1025_v56, %v1023_v51  ;;  %v1073_v56 = vshrl.u32 %v16275_v26, 16 }
  0xa9   : > { %14525 = vmatmul.mubr.msk.bf16.vlgmr.msra.gmra.mrb[0].mxu0 %vm1177_vm2, %v6840_v16  ;;  %v6852_v16 = vsel %vm6835_vm4, %v6849_v52, %v6851_v55  ;;  %v1011_v52 = vor.u32 %v1009_v41, %v1007_v36 }
  0xaa   : > { %14661 = vmatpush3.bf16.msra.mxu0 %v8717_v21  ;;  %14528 = vmatprep.mubr.msk.bf16.mxu0 %vm1177_vm2, %v6842_v22  ;;  %v16268_v21 = vld [vmem:[%s17019_s22 + $0x180] sm:$0xff]   ;;  %v6854_v22 = vsel %vm6835_vm4, %v6851_v55, %v6853_v7  ;;  %v6856_v34 = vsel %vm6835_vm4, %v6853_v7, %v6855_v10  ;;  %v1045_v7 = vshll.u32 %v16272_v58, 16 }
  0xab   : > { %v1013_v32 = vshll.u32 %v16268_v21, 16 }
  0xad   : > { %v1015_v50 = vrot.slane %v1013_v32, 1 }
  0xae   : > { %13907 = vmatmul.mubr.msk.bf16.gmra.mrb[72].mxu1 %vm1177_vm2, %v936_v24  ;;  %v984_v24 = vsel %vm628_vm1, %v979_v15, %v983_v13 }
  0xaf   : > { %13910 = vmatprep.mubr.msk.bf16.mxu1 %vm1177_vm2, %v944_v54  ;;  %v16679_v54 = vld [vmem:[%s17019_s22 + $0x68] sm:$0xff]   ;;  %v1016_v61 = vsel %vm628_vm1, %v1011_v52, %v1015_v50 }
  0xb0   : > { %v6857_v12 = vrot.slane %v16679_v54, 2  ;;  %v1055_v54 = vrot.slane %v1053_v14, 1 }
  0xb1   : > { %14529 = vmatmul.mubr.msk.bf16.gmra.mrb[4].mxu0 %vm1177_vm2, %v6844_v35  ;;  %v1003_v35 = vor.u32 %v1001_v25, %v999_v31  ;;  %v1057_v31 = vshrl.u32 %v16273_v60, 16 }
  0xb2   : > { %14532 = vmatprep.mubr.msk.bf16.mxu0 %vm1177_vm2, %v6846_v39  ;;  %v6858_v38 = vsel %vm6835_vm4, %v6855_v10, %v6857_v12  ;;  %v16270_v39 = vld [vmem:[%s17019_s22 + $0x190] sm:$0xff]   ;;  %v6860_v53 = vsel %vm6835_vm4, %v6857_v12, %v6859_v30 }
  0xb3   : > { %v1008_v43 = vsel %vm628_vm1, %v1003_v35, %v1007_v36  ;;  %v1029_v57 = vshll.u32 %v16270_v39, 16  ;;  %v1033_v62 = vshrl.u32 %v16270_v39, 16  ;;  %v16277_v35 = vld [vmem:[%s17019_s22 + $0x1c8] sm:$0xff]  }
  0xb5   : > { %v1031_v6 = vrot.slane %v1029_v57, 1  ;;  %v1081_v57 = vshrl.u32 %v16276_v33, 16 }
  0xb6   : > { %13911 = vmatmul.mubr.msk.bf16.gmra.mrb[76].mxu1 %vm1177_vm2, %v952_v42  ;;  %v1017_v42 = vshrl.u32 %v16268_v21, 16 }
  0xb7   : > { %13914 = vmatprep.mubr.msk.bf16.mxu1 %vm1177_vm2, %v960_v46  ;;  %v16682_v46 = vld [vmem:[%s17019_s22 + $0x80] sm:$0xff]   ;;  %v1035_v11 = vor.u32 %v1033_v62, %v1031_v6  ;;  %v1032_v17 = vsel %vm628_vm1, %v1027_v8, %v1031_v6  ;;  %v1089_v6 = vshrl.u32 %v16277_v35, 16 }
  0xb8   : > { %v6863_v47 = vrot.slane %v16682_v46, 2  ;;  %v1019_v55 = vor.u32 %v1017_v42, %v1015_v50  ;;  %v16688_v42 = vld [vmem:[%s17019_s22 + $0xb0] sm:$0xff]   ;;  %v1059_v46 = vor.u32 %v1057_v31, %v1055_v54 }
  0xb9   : > { %14533 = vmatmul.mubr.msk.bf16.gmra.mrb[8].mxu0 %vm1177_vm2, %v6848_v59  ;;  %v6862_v59 = vsel %vm6835_vm4, %v6859_v30, %v6861_v45 }
  0xba   : > { %14536 = vmatprep.mubr.msk.bf16.mxu0 %vm1177_vm2, %v6850_v63  ;;  %v1037_v63 = vshll.u32 %v16271_v49, 16  ;;  %v1024_v0 = vsel %vm628_vm1, %v1019_v55, %v1023_v51  ;;  %v6864_v10 = vsel %vm6835_vm4, %v6861_v45, %v6863_v47  ;;  %v1077_v45 = vshll.u32 %v16276_v33, 16  ;;  %v16693_v33 = vld [vmem:[%s17019_s22 + $0xd8] sm:$0xff]  }
  0xbb   : > { %v1085_v51 = vshll.u32 %v16277_v35, 16 }
  0xbc   : > { %v1039_v13 = vrot.slane %v1037_v63, 1  ;;  %v17390_v63 = vld [vmem:[%s17019_s22 + $0x1d8] sm:$0xff]  }
  0xbd   : > { %v1101_v14 = vshll.u32 %v17390_v63, 16 }
  0xbe   : > { %13915 = vmatmul.mubr.msk.bf16.gmra.mrb[80].mxu1 %vm1177_vm2, %v968_v1  ;;  %v16683_v1 = vld [vmem:[%s17019_s22 + $0x88] sm:$0xff]   ;;  %v1040_v21 = vsel %vm628_vm1, %v1035_v11, %v1039_v13  ;;  %v1043_v12 = vor.u32 %v1041_v18, %v1039_v13  ;;  %v16692_v18 = vld [vmem:[%s17019_s22 + $0xd0] sm:$0xff]  }
  0xbf   : > { %13918 = vmatprep.mubr.msk.bf16.mxu1 %vm1177_vm2, %v976_v5  ;;  %v6865_v2 = vrot.slane %v16683_v1, 2  ;;  %v6867_v5 = vrot.slane %v16684_v4, 2  ;;  %v1087_v1 = vrot.slane %v1085_v51, 1 }
  0xc1   : > { %14537 = vmatmul.mubr.msk.bf16.gmra.mrb[12].mxu0 %vm1177_vm2, %v6852_v16  ;;  %v6866_v15 = vsel %vm6835_vm4, %v6863_v47, %v6865_v2  ;;  %v16274_v16 = vld [vmem:[%s17019_s22 + $0x1b0] sm:$0xff]   ;;  %v6868_v29 = vsel %vm6835_vm4, %v6865_v2, %v6867_v5 }
  0xc2   : > { %14540 = vmatprep.mubr.msk.bf16.mxu0 %vm1177_vm2, %v6854_v22  ;;  %v16685_v22 = vld [vmem:[%s17019_s22 + $0x98] sm:$0xff]   ;;  %v1061_v32 = vshll.u32 %v16274_v16, 16  ;;  %v1065_v37 = vshrl.u32 %v16274_v16, 16  ;;  %v16691_v16 = vld [vmem:[%s17019_s22 + $0xc8] sm:$0xff]  }
  0xc3   : > { %v6869_v23 = vrot.slane %v16685_v22, 2 }
  0xc4   : > { %v1063_v44 = vrot.slane %v1061_v32, 1 }
  0xc6   : > { %13919 = vmatmul.mubr.msk.bf16.gmra.mrb[84].mxu1 %vm1177_vm2, %v984_v24  ;;  %v16686_v24 = vld [vmem:[%s17019_s22 + $0xa0] sm:$0xff]   ;;  %v1067_v49 = vor.u32 %v1065_v37, %v1063_v44  ;;  %v1064_v55 = vsel %vm628_vm1, %v1059_v46, %v1063_v44 }
  0xc7   : > { %13922 = vmatprep.mubr.msk.bf16.mxu1 %vm1177_vm2, %v992_v27  ;;  %v6871_v25 = vrot.slane %v16686_v24, 2  ;;  %v1047_v27 = vrot.slane %v1045_v7, 1  ;;  %v1091_v24 = vor.u32 %v1089_v6, %v1087_v1  ;;  %v16694_v46 = vld [vmem:[%s17019_s22 + $0xe0] sm:$0xff]  }
  0xc9   : > { %14541 = vmatmul.mubr.msk.bf16.gmra.mrb[16].mxu0 %vm1177_vm2, %v6856_v34  ;;  %v1051_v30 = vor.u32 %v1049_v19, %v1047_v27  ;;  %v6870_v34 = vsel %vm6835_vm4, %v6867_v5, %v6869_v23  ;;  %v1048_v36 = vsel %vm628_vm1, %v1043_v12, %v1047_v27  ;;  %v6872_v47 = vsel %vm6835_vm4, %v6869_v23, %v6871_v25 }
  0xca   : > { %14544 = vmatprep.mubr.msk.bf16.mxu0 %vm1177_vm2, %v6858_v38  ;;  %v1069_v38 = vshll.u32 %v16275_v26, 16  ;;  %v6883_v19 = vrot.slane %v16692_v18, 2  ;;  %v1105_v23 = vshrl.u32 %v17390_v63, 16  ;;  %v1103_v27 = vrot.slane %v1101_v14, 1 }
  0xcb   : > { %v1056_v39 = vsel %vm628_vm1, %v1051_v30, %v1055_v54 }
  0xcc   : > { %v1071_v50 = vrot.slane %v1069_v38, 1  ;;  %v1107_v37 = vor.u32 %v1105_v23, %v1103_v27  ;;  %v17471_v23 = vld [vmem:[%s17019_s22 + $0x218] sm:$0xff]  }
  0xce   : > { %13923 = vmatmul.mubr.msk.bf16.gmra.mrb[88].mxu1 %vm1177_vm2, %v1000_v40  ;;  %v16687_v40 = vld [vmem:[%s17019_s22 + $0xa8] sm:$0xff]   ;;  %v1072_v58 = vsel %vm628_vm1, %v1067_v49, %v1071_v50  ;;  %v1075_v2 = vor.u32 %v1073_v56, %v1071_v50 }
  0xcf   : > { %13926 = vmatprep.mubr.msk.bf16.mxu1 %vm1177_vm2, %v1008_v43  ;;  %v6873_v41 = vrot.slane %v16687_v40, 2  ;;  %v6875_v43 = vrot.slane %v16688_v42, 2 }
  0xd1   : > { %14545 = vmatmul.mubr.msk.bf16.gmra.mrb[20].mxu0 %vm1177_vm2, %v6860_v53  ;;  %v6874_v52 = vsel %vm6835_vm4, %v6871_v25, %v6873_v41  ;;  %v17381_v53 = vld [vmem:[%s17019_s22 + $0x1d0] sm:$0xff]   ;;  %v6876_v4 = vsel %vm6835_vm4, %v6873_v41, %v6875_v43  ;;  %v17431_v41 = vld [vmem:[%s17019_s22 + $0x1f8] sm:$0xff]  }
  0xd2   : > { %14548 = vmatprep.mubr.msk.bf16.mxu0 %vm1177_vm2, %v6862_v59  ;;  %v16689_v59 = vld [vmem:[%s17019_s22 + $0xb8] sm:$0xff]   ;;  %v1093_v7 = vshll.u32 %v17381_v53, 16  ;;  %v1097_v13 = vshrl.u32 %v17381_v53, 16  ;;  %v1133_v51 = vshll.u32 %v17431_v41, 16 }
  0xd3   : > { %v6877_v60 = vrot.slane %v16689_v59, 2 }
  0xd4   : > { %v1095_v22 = vrot.slane %v1093_v7, 1 }
  0xd5   : > { %v6878_v8 = vsel %vm6835_vm4, %v6875_v43, %v6877_v60 }
  0xd6   : > { %13927 = vmatmul.mubr.msk.bf16.gmra.mrb[92].mxu1 %vm1177_vm2, %v1016_v61  ;;  %v16690_v61 = vld [vmem:[%s17019_s22 + $0xc0] sm:$0xff]   ;;  %v1099_v26 = vor.u32 %v1097_v13, %v1095_v22  ;;  %v16697_v13 = vld [vmem:[%s17019_s22 + $0xf8] sm:$0xff]  }
  0xd7   : > { %13930 = vmatprep.mubr.msk.bf16.mxu1 %vm1177_vm2, %v1024_v0  ;;  %v6879_v62 = vrot.slane %v16690_v61, 2  ;;  %v1079_v0 = vrot.slane %v1077_v45, 1  ;;  %v1135_v61 = vrot.slane %v1133_v51, 1  ;;  %v6893_v14 = vrot.slane %v16697_v13, 2  ;;  %v17517_v13 = vld [vmem:[%s17019_s22 + $0x8] sm:$0xff]  }
  0xd8   : > { %v1104_v32 = vsel %vm628_vm1, %v1099_v26, %v1103_v27 }
  0xd9   : > { %14549 = vmatmul.mubr.msk.bf16.gmra.mrb[24].mxu0 %vm1177_vm2, %v6864_v10  ;;  %v1083_v5 = vor.u32 %v1081_v57, %v1079_v0  ;;  %v17398_v10 = vld [vmem:[%s17019_s22 + $0x1e0] sm:$0xff]   ;;  %v1080_v11 = vsel %vm628_vm1, %v1075_v2, %v1079_v0  ;;  %v6880_v25 = vsel %vm6835_vm4, %v6877_v60, %v6879_v62 }
  0xda   : > { %14552 = vmatprep.mubr.msk.bf16.mxu0 %vm1177_vm2, %v6866_v15  ;;  %v1109_v54 = vshll.u32 %v17398_v10, 16  ;;  %v1113_v30 = vshrl.u32 %v17398_v10, 16  ;;  %v17446_v57 = vld [vmem:[%s17019_s22 + $0x200] sm:$0xff]  }
  0xdb   : > { %v1088_v15 = vsel %vm628_vm1, %v1083_v5, %v1087_v1  ;;  %v1141_v1 = vshll.u32 %v17446_v57, 16  ;;  %v16696_v5 = vld [vmem:[%s17019_s22 + $0xf0] sm:$0xff]  }
  0xdc   : > { %v1111_v35 = vrot.slane %v1109_v54, 1  ;;  %v6891_v6 = vrot.slane %v16696_v5, 2  ;;  %v16698_v54 = vld [vmem:[%s17019_s22 + $0x100] sm:$0xff]  }
  0xde   : > { %13931 = vmatmul.mubr.msk.bf16.gmra.mrb[96].mxu1 %vm1177_vm2, %v1032_v17  ;;  %v6881_v17 = vrot.slane %v16691_v16, 2  ;;  %v1112_v44 = vsel %vm628_vm1, %v1107_v37, %v1111_v35  ;;  %v17466_v16 = vld [vmem:[%s17019_s22 + $0x210] sm:$0xff]   ;;  %v16288_v37 = vld [vmem:[%s17019_s22 + $0x220] ss:$0 sps:$4 sm:$0x11]  }
  0xdf   : > { %13934 = vmatprep.mubr.msk.bf16.mxu1 %vm1177_vm2, %v1040_v21  ;;  %v17409_v21 = vld [vmem:[%s17019_s22 + $0x1e8] sm:$0xff]  }
  0xe0   : > { %v6882_v12 = vsel %vm6835_vm4, %v6879_v62, %v6881_v17  ;;  %v1117_v31 = vshll.u32 %v17409_v21, 16  ;;  %v6884_v38 = vsel %vm6835_vm4, %v6881_v17, %v6883_v19  ;;  %v1121_v45 = vshrl.u32 %v17409_v21, 16  ;;  %v17451_v62 = vld [vmem:[%s17019_s22 + $0x208] sm:$0xff]  }
  0xe1   : > { %14553 = vmatmul.mubr.msk.bf16.gmra.mrb[28].mxu0 %vm1177_vm2, %v6868_v29  ;;  %v1096_v29 = vsel %vm628_vm1, %v1091_v24, %v1095_v22  ;;  %v6894_v24 = vsel %vm6835_vm4, %v6891_v6, %v6893_v14  ;;  %v1153_v27 = vshrl.u32 %v17451_v62, 16 }
  0xe2   : > { %14556 = vmatprep.mubr.msk.bf16.mxu0 %vm1177_vm2, %v6870_v34  ;;  %v6885_v34 = vrot.slane %v16693_v33, 2  ;;  %v1119_v40 = vrot.slane %v1117_v31, 1  ;;  %v1165_v31 = vshll.u32 %v17471_v23, 16 }
  0xe4   : > { %v6886_v42 = vsel %vm6835_vm4, %v6883_v19, %v6885_v34 }
  0xe6   : > { %13935 = vmatmul.mubr.msk.bf16.gmra.mrb[100].mxu1 %vm1177_vm2, %v1048_v36  ;;  %v17426_v36 = vld [vmem:[%s17019_s22 + $0x1f0] sm:$0xff]  }
  0xe7   : > { %13938 = vmatprep.mubr.msk.bf16.mxu1 %vm1177_vm2, %v1056_v39  ;;  %v1115_v39 = vor.u32 %v1113_v30, %v1111_v35  ;;  %v1125_v43 = vshll.u32 %v17426_v36, 16  ;;  %v1129_v50 = vshrl.u32 %v17426_v36, 16  ;;  %v1161_v30 = vshrl.u32 %v17466_v16, 16 }
  0xe9   : > { %14557 = vmatmul.mubr.msk.bf16.gmra.mrb[32].mxu0 %vm1177_vm2, %v6872_v47  ;;  %v6887_v47 = vrot.slane %v16694_v46, 2  ;;  %v1120_v49 = vsel %vm628_vm1, %v1115_v39, %v1119_v40  ;;  %v1127_v56 = vrot.slane %v1125_v43, 1  ;;  %v16700_v46 = vld [vmem:[%s17019_s22 + $0x110] sm:$0xff]  }
  0xea   : > { %14560 = vmatprep.mubr.msk.bf16.mxu0 %vm1177_vm2, %v6874_v52  ;;  %v16695_v52 = vld [vmem:[%s17019_s22 + $0xe8] sm:$0xff]  }
  0xeb   : > { %v6888_v59 = vsel %vm6835_vm4, %v6885_v34, %v6887_v47  ;;  %v1131_v60 = vor.u32 %v1129_v50, %v1127_v56  ;;  %v16701_v50 = vld [vmem:[%s17019_s22 + $0x118] sm:$0xff]  }
  0xec   : > { %v6901_v51 = vrot.slane %v16701_v50, 2  ;;  %v17588_v50 = vld [vmem:[%s17019_s22 + $0x48] sm:$0xff]  }
  0xed   : > { %v1136_v7 = vsel %vm628_vm1, %v1131_v60, %v1135_v61 }
  0xee   : > { %13939 = vmatmul.mubr.msk.bf16.gmra.mrb[104].mxu1 %vm1177_vm2, %v1064_v55  ;;  %v6889_v55 = vrot.slane %v16695_v52, 2 }
  0xef   : > { %13942 = vmatprep.mubr.msk.bf16.mxu1 %vm1177_vm2, %v1072_v58  ;;  %v1123_v58 = vor.u32 %v1121_v45, %v1119_v40  ;;  %v1167_v40 = vrot.slane %v1165_v31, 1  ;;  %v1173_v45 = vshll.u32 %v16288_v37, 16  ;;  %v17556_v31 = vld [vmem:[%s17019_s22 + $0x28] sm:$0xff]  }
  0xf0   : > { %v6890_v0 = vsel %vm6835_vm4, %v6887_v47, %v6889_v55  ;;  %v6892_v18 = vsel %vm6835_vm4, %v6889_v55, %v6891_v6  ;;  %v6899_v47 = vrot.slane %v16700_v46, 2  ;;  %v16291_v6 = vld [vmem:[%s17019_s22 + $0x138] sm:$0xff]   ;;  %v16297_v37 = vld [vmem:[%s17019_s22 + $0x168] sm:$0xff]  }
  0xf1   : > { %14561 = vmatmul.mubr.msk.bf16.gmra.mrb[36].mxu0 %vm1177_vm2, %v6876_v4  ;;  %v1128_v2 = vsel %vm628_vm1, %v1123_v58, %v1127_v56  ;;  %v1137_v4 = vshrl.u32 %v17431_v41, 16  ;;  %v1175_v55 = vrot.slane %v1173_v45, 1  ;;  %v16299_v46 = vld [vmem:[%s17019_s22 + $0x178] sm:$0xff]  }
  0xf2   : > { %14564 = vmatprep.mubr.msk.bf16.mxu0 %vm1177_vm2, %v6878_v8  ;;  %v1145_v8 = vshrl.u32 %v17446_v57, 16  ;;  %v6902_v58 = vsel %vm6835_vm4, %v6899_v47, %v6901_v51 }
  0xf3   : > { %v1139_v17 = vor.u32 %v1137_v4, %v1135_v61  ;;  %v16702_v61 = vld [vmem:[%s17019_s22 + $0x120] sm:$0xff]   ;;  %v16290_v4 = vld [vmem:[%s17019_s22 + $0x130] sm:$0xff]  }
  0xf6   : > { %13943 = vmatmul.mubr.msk.bf16.gmra.mrb[108].mxu1 %vm1177_vm2, %v1080_v11  ;;  %v1149_v11 = vshll.u32 %v17451_v62, 16 }
  0xf7   : > { %13946 = vmatprep.mubr.msk.bf16.mxu1 %vm1177_vm2, %v1088_v15  ;;  %v1143_v15 = vrot.slane %v1141_v1, 1 }
  0xf8   : > { %v1151_v22 = vrot.slane %v1149_v11, 1  ;;  %v6909_v11 = vrot.slane %v16291_v6, 2 }
  0xf9   : > { %14565 = vmatmul.mubr.msk.bf16.gmra.mrb[40].mxu0 %vm1177_vm2, %v6880_v25  ;;  %v1147_v19 = vor.u32 %v1145_v8, %v1143_v15  ;;  %v1157_v25 = vshll.u32 %v17466_v16, 16  ;;  %v1144_v26 = vsel %vm628_vm1, %v1139_v17, %v1143_v15  ;;  %v6907_v8 = vrot.slane %v16290_v4, 2  ;;  %v16292_v15 = vld [vmem:[%s17019_s22 + $0x140] sm:$0xff]   ;;  %v16293_v17 = vld [vmem:[%s17019_s22 + $0x148] sm:$0xff]  }
  0xfa   : > { %14568 = vmatprep.mubr.msk.bf16.mxu0 %vm1177_vm2, %v6882_v12  ;;  %v6895_v12 = vrot.slane %v16698_v54, 2  ;;  %v1155_v35 = vor.u32 %v1153_v27, %v1151_v22  ;;  %v16294_v27 = vld [vmem:[%s17019_s22 + $0x150] sm:$0xff]  }
  0xfb   : > { %v1159_v34 = vrot.slane %v1157_v25, 1  ;;  %v17545_v25 = vld [vmem:[%s17019_s22 + $0x20] sm:$0xff]  }
  0xfd   : > { %v1163_v39 = vor.u32 %v1161_v30, %v1159_v34  ;;  %v1160_v43 = vsel %vm628_vm1, %v1155_v35, %v1159_v34  ;;  %v16296_v34 = vld [vmem:[%s17019_s22 + $0x160] sm:$0xff]  }
  0xfe   : > { %13947 = vmatmul.mubr.msk.bf16.gmra.mrb[112].mxu1 %vm1177_vm2, %v1096_v29  ;;  %v1152_v29 = vsel %vm628_vm1, %v1147_v19, %v1151_v22  ;;  %v17535_v19 = vld [vmem:[%s19634_s1 + $0x1c] sm:$0xf]  ;;  %v6913_v22 = vrot.slane %v16293_v17, 2  ;;  %v16305_v17 = vld [vmem:[%s17019_s22 + $0x1a8] sm:$0xff]  }
  0xff   : > { %13950 = vmatprep.mubr.msk.bf16.mxu1 %vm1177_vm2, %v1104_v32  ;;  %v16699_v32 = vld [vmem:[%s17019_s22 + $0x108] sm:$0xff]   ;;  %16172 = vmatprep.subr.msk.bf16.mxu0 %vm1382_vm0, %v17535_v19 }
 0x100   : > { %v6897_v33 = vrot.slane %v16699_v32, 2  ;;  %v17561_v32 = vld [vmem:[%s17019_s22 + $0x30] sm:$0xff]  }
 0x101   : > { %14569 = vmatmul.mubr.msk.bf16.gmra.mrb[44].mxu0 %vm1177_vm2, %v6884_v38  ;;  %v6896_v38 = vsel %vm6835_vm4, %v6893_v14, %v6895_v12 }
 0x102   : > { %14572 = vmatprep.mubr.msk.bf16.mxu0 %vm1177_vm2, %v6886_v42  ;;  %v6898_v42 = vsel %vm6835_vm4, %v6895_v12, %v6897_v33  ;;  %v6900_v56 = vsel %vm6835_vm4, %v6897_v33, %v6899_v47  ;;  %v16295_v12 = vld [vmem:[%s17019_s22 + $0x158] sm:$0xff]  }
 0x103   : > { %v6917_v30 = vrot.slane %v16295_v12, 2  ;;  %v16306_v12 = vld [vmem:[%s17019_s22 + $0x1b0] sm:$0xff]  }
 0x106   : > { %13951 = vmatmul.mubr.msk.bf16.gmra.mrb[116].mxu1 %vm1177_vm2, %v1112_v44  ;;  %v1169_v44 = vshrl.u32 %v17471_v23, 16 }
 0x107   : > { %13954 = vmatprep.mubr.msk.bf16.mxu1 %vm1177_vm2, %v1120_v49  ;;  %v1168_v49 = vsel %vm628_vm1, %v1163_v39, %v1167_v40  ;;  %v6921_v39 = vrot.slane %v16297_v37, 2  ;;  %v17657_v37 = vld [vmem:[%s17019_s22 + $0x90] sm:$0xff]  }
 0x108   : > { %v1171_v52 = vor.u32 %v1169_v44, %v1167_v40  ;;  %v17572_v40 = vld [vmem:[%s17019_s22 + $0x38] sm:$0xff]   ;;  %v16298_v44 = vld [vmem:[%s17019_s22 + $0x170] sm:$0xff]  }
 0x109   : > { %14573 = vmatmul.mubr.msk.bf16.gmra.mrb[48].mxu0 %vm1177_vm2, %v6888_v59  ;;  %v16289_v59 = vld [vmem:[%s17019_s22 + $0x128] sm:$0xff]   ;;  %v6923_v47 = vrot.slane %v16298_v44, 2 }
 0x10a   : > { %14576 = vmatprep.mubr.msk.bf16.mxu0 %vm1177_vm2, %v6890_v0  ;;  %v1176_v60 = vsel %vm628_vm1, %v1171_v52, %v1175_v55  ;;  %v6903_v0 = vrot.slane %v16702_v61, 2  ;;  %v6905_v1 = vrot.slane %v16289_v59, 2  ;;  %v16300_v55 = vld [vmem:[%s17019_s22 + $0x180] sm:$0xff]   ;;  %v17604_v61 = vld [vmem:[%s17019_s22 + $0x58] sm:$0xff]   ;;  %v16309_v44 = vld [vmem:[%s17019_s22 + $0x1c8] sm:$0xff]  }
 0x10b   : > { %v6924_v52 = vsel %vm6835_vm4, %v6921_v39, %v6923_v47  ;;  %v6927_v59 = vrot.slane %v16300_v55, 2  ;;  %v16310_v55 = vld [vmem:[%s17019_s22 + $0x1d0] sm:$0xff]  }
 0x10c   : > { %v6906_v5 = vsel %vm6835_vm4, %v6903_v0, %v6905_v1  ;;  %v6908_v14 = vsel %vm6835_vm4, %v6905_v1, %v6907_v8 }
 0x10e   : > { %13955 = vmatmul.mubr.msk.bf16.gmra.mrb[120].mxu1 %vm1177_vm2, %v1128_v2  ;;  %v6904_v2 = vsel %vm6835_vm4, %v6901_v51, %v6903_v0  ;;  %v17593_v51 = vld [vmem:[%s17019_s22 + $0x50] sm:$0xff]   ;;  %v17609_v0 = vld [vmem:[%s17019_s22 + $0x60] sm:$0xff]  }
 0x10f   : > { %13958 = vmatprep.mubr.msk.bf16.mxu1 %vm1177_vm2, %v1136_v7  ;;  %v3028_v7 = vsel %vm1382_vm0, %v17282_v28, 0  ;;  %v6910_v28 = vsel %vm6835_vm4, %v6907_v8, %v6909_v11  ;;  %v17620_v8 = vld [vmem:[%s17019_s22 + $0x68] sm:$0xff]  }
 0x111   : > { %14577 = vmatmul.mubr.msk.bf16.gmra.mrb[52].mxu0 %vm1177_vm2, %v6892_v18  ;;  %v6911_v18 = vrot.slane %v16292_v15, 2  ;;  %v16304_v15 = vld [vmem:[%s17019_s22 + $0x1a0] sm:$0xff]  }
 0x112   : > { %14580 = vmatprep.mubr.msk.bf16.mxu0 %vm1177_vm2, %v6894_v24  ;;  %v17540_v24 = vld [vmem:[%s17019_s22 + $0x18] sm:$0xff]  }
 0x113   : > { %v6914_v54 = vsel %vm6835_vm4, %v6911_v18, %v6913_v22 }
 0x116   : > { %13959 = vmatmul.mubr.msk.bf16.gmra.mrb[124].mxu1 %vm1177_vm2, %v1144_v26  ;;  %v6912_v26 = vsel %vm6835_vm4, %v6909_v11, %v6911_v18  ;;  %v17625_v11 = vld [vmem:[%s17019_s22 + $0x70] sm:$0xff]   ;;  %v6935_v18 = vrot.slane %v16304_v15, 2 }
 0x117   : > { %13962 = vmatprep.mubr.msk.bf16.mxu1 %vm1177_vm2, %v1152_v29  ;;  %v6915_v29 = vrot.slane %v16294_v27, 2  ;;  %v17641_v27 = vld [vmem:[%s17019_s22 + $0x80] sm:$0xff]  }
 0x119   : > { %14581 = vmatmul.mubr.msk.bf16.gmra.mrb[56].mxu0 %vm1177_vm2, %v6896_v38  ;;  %v6916_v33 = vsel %vm6835_vm4, %v6913_v22, %v6915_v29  ;;  %v6918_v35 = vsel %vm6835_vm4, %v6915_v29, %v6917_v30  ;;  %v6919_v38 = vrot.slane %v16296_v34, 2  ;;  %v6937_v22 = vrot.slane %v16305_v17, 2  ;;  %v17705_v17 = vld [vmem:[%s17019_s22 + $0xc0] sm:$0xff]  }
 0x11a   : > { %14584 = vmatprep.mubr.msk.bf16.mxu0 %vm1177_vm2, %v6898_v42  ;;  %v17577_v42 = vld [vmem:[%s17019_s22 + $0x40] sm:$0xff]  }
 0x11b   : > { %v6922_v45 = vsel %vm6835_vm4, %v6919_v38, %v6921_v39  ;;  %v6938_v29 = vsel %vm6835_vm4, %v6935_v18, %v6937_v22  ;;  %v16308_v39 = vld [vmem:[%s17019_s22 + $0x1c0] sm:$0xff]  }
 0x11e   : > { %13963 = vmatmul.mubr.msk.bf16.gmra.mrb[128].mxu1 %vm1177_vm2, %v1160_v43  ;;  %v6920_v43 = vsel %vm6835_vm4, %v6917_v30, %v6919_v38  ;;  %v16307_v30 = vld [vmem:[%s17019_s22 + $0x1b8] sm:$0xff]  }
 0x11f   : > { %13966 = vmatprep.mubr.msk.bf16.mxu1 %vm1177_vm2, %v1168_v49  ;;  %v6925_v49 = vrot.slane %v16299_v46, 2  ;;  %v6941_v34 = vrot.slane %v16307_v30, 2  ;;  %v6945_v46 = vrot.slane %v16309_v44, 2  ;;  %v16317_v44 = vld [vmem:[%s17019_s22 + $0x208] sm:$0xff]  }
 0x121   : > { %14585 = vmatmul.mubr.msk.bf16.gmra.mrb[60].mxu0 %vm1177_vm2, %v6900_v56  ;;  %v6926_v56 = vsel %vm6835_vm4, %v6923_v47, %v6925_v49  ;;  %v6928_v1 = vsel %vm6835_vm4, %v6925_v49, %v6927_v59  ;;  %v17668_v47 = vld [vmem:[%s17019_s22 + $0x98] sm:$0xff]   ;;  %v17673_v49 = vld [vmem:[%s17019_s22 + $0xa0] sm:$0xff]  }
 0x122   : > { %14588 = vmatprep.mubr.msk.bf16.mxu0 %vm1177_vm2, %v6902_v58  ;;  %v16301_v58 = vld [vmem:[%s17019_s22 + $0x188] sm:$0xff]  }
 0x126   : > { %13967 = vmatmul.mubr.msk.bf16.gmra.mrb[132].mxu1 %vm1177_vm2, %v1176_v60  ;;  %v6929_v60 = vrot.slane %v16301_v58, 2  ;;  %v16311_v58 = vld [vmem:[%s17019_s22 + $0x1d8] sm:$0xff]  }
 0x127   : > { %13972 = vmatprep.mubr.msk.bf16.mxu1 %vm1177_vm2, %v17024_v9  ;;  %v17522_v9 = vld [vmem:[%s17019_s22 + $0x10] sm:$0xff]  }
 0x128   : > { %v6930_v4 = vsel %vm6835_vm4, %v6927_v59, %v6929_v60  ;;  %v6947_v59 = vrot.slane %v16310_v55, 2  ;;  %v17737_v55 = vld [vmem:[%s17019_s22 + $0xe0] sm:$0xff]  }
 0x129   : > { %14589 = vmatmul.mubr.msk.bf16.gmra.mrb[64].mxu0 %vm1177_vm2, %v6904_v2  ;;  %v16302_v2 = vld [vmem:[%s17019_s22 + $0x190] sm:$0xff]  }
 0x12a   : > { %14592 = vmatprep.mubr.msk.bf16.mxu0 %vm1177_vm2, %v6906_v5  ;;  %v16303_v5 = vld [vmem:[%s17019_s22 + $0x198] sm:$0xff]   ;;  %v6931_v6 = vrot.slane %v16302_v2, 2  ;;  %v17689_v2 = vld [vmem:[%s17019_s22 + $0xb0] sm:$0xff]  }
 0x12e   : > { %13973 = vmatmul.mubr.msk.bf16.vlgmr.msra.gmra.mrb[0].mxu1 %vm1177_vm2, %v17517_v13 }
 0x12f   : > { %14109 = vmatpush3.bf16.msra.mxu1 %v3028_v7  ;;  %13976 = vmatprep.mubr.msk.bf16.mxu1 %vm1177_vm2, %v17522_v9  ;;  %v6933_v7 = vrot.slane %v16303_v5, 2  ;;  %v16312_v5 = vld [vmem:[%s17019_s22 + $0x1e0] sm:$0xff]  }
 0x131   : > { %14593 = vmatmul.mubr.msk.bf16.gmra.mrb[68].mxu0 %vm1177_vm2, %v6908_v14  ;;  %v6932_v14 = vsel %vm6835_vm4, %v6929_v60, %v6931_v6  ;;  %v6949_v60 = vrot.slane %v16311_v58, 2  ;;  %v16318_v58 = vld [vmem:[%s17019_s22 + $0x210] sm:$0xff]  }
 0x132   : > { %14596 = vmatprep.mubr.msk.bf16.mxu0 %vm1177_vm2, %v6910_v28  ;;  %v6934_v28 = vsel %vm6835_vm4, %v6931_v6, %v6933_v7 }
 0x133   : > { %v6950_v6 = vsel %vm6835_vm4, %v6947_v59, %v6949_v60 }
 0x136   : > { %13977 = vmatmul.mubr.msk.bf16.gmra.mrb[4].mxu1 %vm1177_vm2, %v17540_v24 }
 0x137   : > { %13980 = vmatprep.mubr.msk.bf16.mxu1 %vm1177_vm2, %v17545_v25 }
 0x139   : > { %14597 = vmatmul.mubr.msk.bf16.gmra.mrb[72].mxu0 %vm1177_vm2, %v6912_v26  ;;  %v17636_v26 = vld [vmem:[%s17019_s22 + $0x78] sm:$0xff]  }
 0x13a   : > { %14600 = vmatprep.mubr.msk.bf16.mxu0 %vm1177_vm2, %v6914_v54  ;;  %v6936_v54 = vsel %vm6835_vm4, %v6933_v7, %v6935_v18  ;;  %v16313_v7 = vld [vmem:[%s17019_s22 + $0x1e8] sm:$0xff]  }
 0x13b   : > { %v6953_v15 = vrot.slane %v16313_v7, 2  ;;  %v17753_v7 = vld [vmem:[%s17019_s22 + $0xf0] sm:$0xff]  }
 0x13e   : > { %13981 = vmatmul.mubr.msk.bf16.gmra.mrb[8].mxu1 %vm1177_vm2, %v17556_v31 }
 0x13f   : > { %13984 = vmatprep.mubr.msk.bf16.mxu1 %vm1177_vm2, %v17561_v32 }
 0x141   : > { %14601 = vmatmul.mubr.msk.bf16.gmra.mrb[76].mxu0 %vm1177_vm2, %v6916_v33  ;;  %v6939_v33 = vrot.slane %v16306_v12, 2  ;;  %v16315_v12 = vld [vmem:[%s17019_s22 + $0x1f8] sm:$0xff]  }
 0x142   : > { %14604 = vmatprep.mubr.msk.bf16.mxu0 %vm1177_vm2, %v6918_v35  ;;  %v17652_v35 = vld [vmem:[%s17019_s22 + $0x88] sm:$0xff]   ;;  %v6957_v30 = vrot.slane %v16315_v12, 2 }
 0x143   : > { %v6940_v38 = vsel %vm6835_vm4, %v6937_v22, %v6939_v33  ;;  %v16314_v22 = vld [vmem:[%s17019_s22 + $0x1f0] sm:$0xff]  }
 0x146   : > { %13985 = vmatmul.mubr.msk.bf16.gmra.mrb[12].mxu1 %vm1177_vm2, %v17572_v40 }
 0x147   : > { %13988 = vmatprep.mubr.msk.bf16.mxu1 %vm1177_vm2, %v17577_v42 }
 0x149   : > { %14605 = vmatmul.mubr.msk.bf16.gmra.mrb[80].mxu0 %vm1177_vm2, %v6920_v43  ;;  %v6942_v43 = vsel %vm6835_vm4, %v6939_v33, %v6941_v34  ;;  %v17716_v33 = vld [vmem:[%s17019_s22 + $0xc8] sm:$0xff]  }
 0x14a   : > { %14608 = vmatprep.mubr.msk.bf16.mxu0 %vm1177_vm2, %v6922_v45  ;;  %v6943_v45 = vrot.slane %v16308_v39, 2  ;;  %v16316_v39 = vld [vmem:[%s17019_s22 + $0x200] sm:$0xff]  }
 0x14e   : > { %13989 = vmatmul.mubr.msk.bf16.gmra.mrb[16].mxu1 %vm1177_vm2, %v17588_v50 }
 0x14f   : > { %13992 = vmatprep.mubr.msk.bf16.mxu1 %vm1177_vm2, %v17593_v51 }
 0x151   : > { %14609 = vmatmul.mubr.msk.bf16.gmra.mrb[84].mxu0 %vm1177_vm2, %v6924_v52  ;;  %v6944_v52 = vsel %vm6835_vm4, %v6941_v34, %v6943_v45  ;;  %v17721_v34 = vld [vmem:[%s17019_s22 + $0xd0] sm:$0xff]  }
 0x152   : > { %14612 = vmatprep.mubr.msk.bf16.mxu0 %vm1177_vm2, %v6926_v56  ;;  %v6946_v56 = vsel %vm6835_vm4, %v6943_v45, %v6945_v46  ;;  %v6959_v45 = vrot.slane %v16316_v39, 2  ;;  %v17771_v39 = vld [vmem:[%s17019_s22 + $0x100] sm:$0xff]  }
 0x156   : > { %13993 = vmatmul.mubr.msk.bf16.gmra.mrb[20].mxu1 %vm1177_vm2, %v17604_v61 }
 0x157   : > { %13996 = vmatprep.mubr.msk.bf16.mxu1 %vm1177_vm2, %v17609_v0 }
 0x159   : > { %14613 = vmatmul.mubr.msk.bf16.gmra.mrb[88].mxu0 %vm1177_vm2, %v6928_v1  ;;  %v17684_v1 = vld [vmem:[%s17019_s22 + $0xa8] sm:$0xff]  }
 0x15a   : > { %14616 = vmatprep.mubr.msk.bf16.mxu0 %vm1177_vm2, %v6930_v4  ;;  %v6948_v4 = vsel %vm6835_vm4, %v6945_v46, %v6947_v59  ;;  %v6961_v46 = vrot.slane %v16317_v44, 2  ;;  %v16322_v44 = vld [vmem:[%s17019_s22 + $0x230] ss:$0 sps:$4 sm:$0x33]  }
 0x15c   : > { %v6962_v59 = vsel %vm6835_vm4, %v6959_v45, %v6961_v46 }
 0x15e   : > { %13997 = vmatmul.mubr.msk.bf16.gmra.mrb[24].mxu1 %vm1177_vm2, %v17620_v8 }
 0x15f   : > { %14000 = vmatprep.mubr.msk.bf16.mxu1 %vm1177_vm2, %v17625_v11 }
 0x161   : > { %14617 = vmatmul.mubr.msk.bf16.gmra.mrb[92].mxu0 %vm1177_vm2, %v6932_v14  ;;  %v6951_v14 = vrot.slane %v16312_v5, 2 }
 0x162   : > { %14620 = vmatprep.mubr.msk.bf16.mxu0 %vm1177_vm2, %v6934_v28  ;;  %v17700_v28 = vld [vmem:[%s17019_s22 + $0xb8] sm:$0xff]  }
 0x163   : > { %v6952_v18 = vsel %vm6835_vm4, %v6949_v60, %v6951_v14  ;;  %v16319_v60 = vld [vmem:[%s17019_s22 + $0x218] sm:$0xff]  }
 0x164   : > { %v6965_v5 = vrot.slane %v16319_v60, 2 }
 0x166   : > { %14001 = vmatmul.mubr.msk.bf16.gmra.mrb[28].mxu1 %vm1177_vm2, %v17636_v26 }
 0x167   : > { %14004 = vmatprep.mubr.msk.bf16.mxu1 %vm1177_vm2, %v17641_v27 }
 0x169   : > { %14621 = vmatmul.mubr.msk.bf16.gmra.mrb[96].mxu0 %vm1177_vm2, %v6936_v54  ;;  %v6954_v54 = vsel %vm6835_vm4, %v6951_v14, %v6953_v15 }
 0x16a   : > { %14624 = vmatprep.mubr.msk.bf16.mxu0 %vm1177_vm2, %v6938_v29  ;;  %v6955_v29 = vrot.slane %v16314_v22, 2  ;;  %v16321_v22 = vld [vmem:[%s17019_s22 + $0x228] sm:$0xff]  }
 0x16b   : > { %v6969_v12 = vrot.slane %v16321_v22, 2  ;;  %v17803_v22 = vld [vmem:[%s17019_s22 + $0x38] sm:$0xff]  }
 0x16e   : > { %14005 = vmatmul.mubr.msk.bf16.gmra.mrb[32].mxu1 %vm1177_vm2, %v17652_v35 }
 0x16f   : > { %14008 = vmatprep.mubr.msk.bf16.mxu1 %vm1177_vm2, %v17657_v37 }
 0x171   : > { %14625 = vmatmul.mubr.msk.bf16.gmra.mrb[100].mxu0 %vm1177_vm2, %v6940_v38  ;;  %v6956_v38 = vsel %vm6835_vm4, %v6953_v15, %v6955_v29  ;;  %v16320_v15 = vld [vmem:[%s17019_s22 + $0x220] sm:$0xff]  }
 0x172   : > { %14628 = vmatprep.mubr.msk.bf16.mxu0 %vm1177_vm2, %v6942_v43  ;;  %v6958_v43 = vsel %vm6835_vm4, %v6955_v29, %v6957_v30  ;;  %v17764_v29 = vld [vmem:[%s17019_s22 + $0xf8] sm:$0xff]  }
 0x176   : > { %14009 = vmatmul.mubr.msk.bf16.gmra.mrb[36].mxu1 %vm1177_vm2, %v17668_v47 }
 0x177   : > { %14012 = vmatprep.mubr.msk.bf16.mxu1 %vm1177_vm2, %v17673_v49 }
 0x179   : > { %14629 = vmatmul.mubr.msk.bf16.gmra.mrb[104].mxu0 %vm1177_vm2, %v6944_v52  ;;  %v17732_v52 = vld [vmem:[%s17019_s22 + $0xd8] sm:$0xff]  }
 0x17a   : > { %14632 = vmatprep.mubr.msk.bf16.mxu0 %vm1177_vm2, %v6946_v56  ;;  %v6960_v56 = vsel %vm6835_vm4, %v6957_v30, %v6959_v45  ;;  %v7893_v30 = vld [vmem:[%s17019_s22 + $0x20] sm:$0xc] }
 0x17e   : > { %14013 = vmatmul.mubr.msk.bf16.gmra.mrb[40].mxu1 %vm1177_vm2, %v17684_v1 }
 0x17f   : > { %14016 = vmatprep.mubr.msk.bf16.mxu1 %vm1177_vm2, %v17689_v2 }
 0x181   : > { %14633 = vmatmul.mubr.msk.bf16.gmra.mrb[108].mxu0 %vm1177_vm2, %v6948_v4  ;;  %v6963_v4 = vrot.slane %v16318_v58, 2  ;;  %v6971_v58 = vrot.slane %v16322_v44, 2  ;;  %v17821_v44 = vld [vmem:[%s17019_s22 + $0x40] sm:$0xff]  }
 0x182   : > { %14636 = vmatprep.mubr.msk.bf16.mxu0 %vm1177_vm2, %v6950_v6  ;;  %v17748_v6 = vld [vmem:[%s17019_s22 + $0xe8] sm:$0xff]   ;;  %19695 = vst [vmem:[#allocation5_spill] sm:$0xff] %v17821_v44 }
 0x183   : > { %v6964_v14 = vsel %vm6835_vm4, %v6961_v46, %v6963_v4 }
 0x186   : > { %14017 = vmatmul.mubr.msk.bf16.gmra.mrb[44].mxu1 %vm1177_vm2, %v17700_v28 }
 0x187   : > { %14020 = vmatprep.mubr.msk.bf16.mxu1 %vm1177_vm2, %v17705_v17 }
 0x189   : > { %14637 = vmatmul.mubr.msk.bf16.gmra.mrb[112].mxu0 %vm1177_vm2, %v6952_v18  ;;  %v6966_v18 = vsel %vm6835_vm4, %v6963_v4, %v6965_v5  ;;  %v17788_v4 = vld [vmem:[%s17019_s22 + $0x108] sm:$0xff]  }
 0x18a   : > { %14640 = vmatprep.mubr.msk.bf16.mxu0 %vm1177_vm2, %v6954_v54  ;;  %v6967_v54 = vrot.slane %v16320_v15, 2  ;;  %v17799_v15 = vld [vmem:[%s17019_s22 + $0x30] sm:$0xff]  }
 0x18c   : > { %v6970_v45 = vsel %vm6835_vm4, %v6967_v54, %v6969_v12 }
 0x18e   : > { %14021 = vmatmul.mubr.msk.bf16.gmra.mrb[48].mxu1 %vm1177_vm2, %v17716_v33 }
 0x18f   : > { %14024 = vmatprep.mubr.msk.bf16.mxu1 %vm1177_vm2, %v17721_v34 }
 0x191   : > { %14641 = vmatmul.mubr.msk.bf16.gmra.mrb[116].mxu0 %vm1177_vm2, %v6956_v38  ;;  %v7894_v38 = vld [vmem:[%s17019_s22 + $0x24] sm:$0xf] }
 0x192   : > { %14644 = vmatprep.mubr.msk.bf16.mxu0 %vm1177_vm2, %v6958_v43  ;;  %v6968_v43 = vsel %vm6835_vm4, %v6965_v5, %v6967_v54  ;;  %v17778_v46 = vcombine.low %v7893_v30, %v7894_v38  ;;  %v17793_v5 = vld [vmem:[%s17019_s22 + $0x110] sm:$0xff]   ;;  %v8378_v54 = vrot.slane %v17799_v15, 2  ;;  %v8380_v30 = vrot.slane %v17803_v22, 2  ;;  %v17810_v38 = vld [vmem:[%s17019_s22 + $0x118] sm:$0xff]  }
 0x196   : > { %14025 = vmatmul.mubr.msk.bf16.gmra.mrb[52].mxu1 %vm1177_vm2, %v17732_v52 }
 0x197   : > { %14028 = vmatprep.mubr.msk.bf16.mxu1 %vm1177_vm2, %v17737_v55 }
 0x199   : > { %14645 = vmatmul.mubr.msk.bf16.gmra.mrb[120].mxu0 %vm1177_vm2, %v6960_v56  ;;  %v17781_v56 = vld [vmem:[%s17019_s22 + $0x28] sm:$0xff]  }
 0x19a   : > { %14648 = vmatprep.mubr.msk.bf16.mxu0 %vm1177_vm2, %v6962_v59  ;;  %v8375_v59 = vrot.slane %v17778_v46, 2  ;;  %v8376_v60 = vrot.slane %v17781_v56, 2 }
 0x19e   : > { %14029 = vmatmul.mubr.msk.bf16.gmra.mrb[56].mxu1 %vm1177_vm2, %v17748_v6 }
 0x19f   : > { %14032 = vmatprep.mubr.msk.bf16.mxu1 %vm1177_vm2, %v17753_v7 }
 0x1a1   : > { %14649 = vmatmul.mubr.msk.bf16.gmra.mrb[124].mxu0 %vm1177_vm2, %v6964_v14  ;;  %v6972_v14 = vsel %vm6835_vm4, %v6969_v12, %v6971_v58  ;;  %v17815_v12 = vld [vmem:[%s17019_s22 + $0x120] sm:$0xff]   ;;  %v8381_v58 = vsel %vm6835_vm4, %v8378_v54, %v8380_v30 }
 0x1a2   : > { %14652 = vmatprep.mubr.msk.bf16.mxu0 %vm1177_vm2, %v6966_v18  ;;  %v8377_v18 = vsel %vm6835_vm4, %v8375_v59, %v8376_v60  ;;  %v17827_v59 = vld [vmem:[%s17019_s22 + $0x48] sm:$0xff]  }
 0x1a3   : > { %19696 = vst [vmem:[#allocation6_spill] sm:$0xff] %v17827_v59 }
 0x1a6   : > { %14033 = vmatmul.mubr.msk.bf16.gmra.mrb[60].mxu1 %vm1177_vm2, %v17764_v29 }
 0x1a7   : > { %14036 = vmatprep.mubr.msk.bf16.mxu1 %vm1177_vm2, %v17771_v39 }
 0x1a9   : > { %14653 = vmatmul.mubr.msk.bf16.gmra.mrb[128].mxu0 %vm1177_vm2, %v6968_v43  ;;  %v8379_v43 = vsel %vm6835_vm4, %v8376_v60, %v8378_v54  ;;  %v8382_v60 = vrot.slane %v17821_v44, 2  ;;  %v17846_v54 = vld [vmem:[%s17019_s22 + $0x130] sm:$0xff]   ;;  %v16346_v44 = vld [vmem:[%s17019_s22 + $0xd8] sm:$0xff]  }
 0x1aa   : > { %14656 = vmatprep.mubr.msk.bf16.mxu0 %vm1177_vm2, %v6970_v45  ;;  %v10264_v45 = vsel %vm1382_vm0, %v17535_v19, 0  ;;  %v8384_v19 = vrot.slane %v17827_v59, 2  ;;  %19697 = vst [vmem:[#allocation7_spill] sm:$0xff] %v17846_v54  ;;  %v18011_v59 = vld [vmem:[%s17019_s22 + $0x1a8] sm:$0xff]  }
 0x1ab   : > { %19726 = vst [vmem:[#allocation36_spill] sm:$0xff] %v18011_v59 }
 0x1ae   : > { %14037 = vmatmul.mubr.msk.bf16.gmra.mrb[64].mxu1 %vm1177_vm2, %v17788_v4 }
 0x1af   : > { %14040 = vmatprep.mubr.msk.bf16.mxu1 %vm1177_vm2, %v17793_v5 }
 0x1b1   : > { %14657 = vmatmul.mubr.msk.bf16.gmra.mrb[132].mxu0 %vm1177_vm2, %v6972_v14  ;;  %v17833_v14 = vld [vmem:[%s19634_s1 + $0xc] sm:$0xf] }
 0x1b2   : > { %14662 = vmatprep.mubr.msk.bf16.mxu0 %vm1177_vm2, %v8377_v18  ;;  %16167 = vmatprep.subr.msk.bf16.mxu1 %vm1382_vm0, %v17833_v14  ;;  %v17841_v18 = vld [vmem:[%s17019_s22 + $0x128] sm:$0xff]  }
 0x1b6   : > { %14041 = vmatmul.mubr.msk.bf16.gmra.mrb[68].mxu1 %vm1177_vm2, %v17810_v38 }
 0x1b7   : > { %14044 = vmatprep.mubr.msk.bf16.mxu1 %vm1177_vm2, %v17815_v12 }
 0x1b9   : > { %14663 = vmatmul.mubr.msk.bf16.vlgmr.msra.gmra.mrb[0].mxu0 %vm1177_vm2, %v8379_v43  ;;  %v8383_v43 = vsel %vm6835_vm4, %v8380_v30, %v8382_v60  ;;  %v17868_v30 = vld [vmem:[%s17019_s22 + $0x140] sm:$0xff]  }
 0x1ba   : > { %14799 = vmatpush3.bf16.msra.mxu0 %v10264_v45  ;;  %14666 = vmatprep.mubr.msk.bf16.mxu0 %vm1177_vm2, %v8381_v58  ;;  %v17852_v45 = vld [vmem:[%s17019_s22 + $0x50] sm:$0xff]   ;;  %v8385_v58 = vsel %vm6835_vm4, %v8382_v60, %v8384_v19  ;;  %19701 = vst [vmem:[#allocation11_spill] sm:$0xff] %v17868_v30 }
 0x1bb   : > { %19698 = vst [vmem:[#allocation8_spill] sm:$0xff] %v17852_v45  ;;  %v8386_v3 = vrot.slane %v17852_v45, 2  ;;  %v17878_v45 = vld [vmem:[%s17019_s22 + $0x68] sm:$0xff]  }
 0x1bc   : > { %19703 = vst [vmem:[#allocation13_spill] sm:$0xff] %v17878_v45 }
 0x1bd   : > { %v8387_v60 = vsel %vm6835_vm4, %v8384_v19, %v8386_v3  ;;  %v17890_v19 = vld [vmem:[%s17019_s22 + $0x150] sm:$0xff]  }
 0x1be   : > { %14045 = vmatmul.mubr.msk.bf16.gmra.mrb[72].mxu1 %vm1177_vm2, %v17841_v18  ;;  %19705 = vst [vmem:[#allocation15_spill] sm:$0xff] %v17890_v19 }
 0x1bf   : > { %14048 = vmatprep.mubr.msk.bf16.mxu1 %vm1177_vm2, %v17846_v54  ;;  %v17863_v54 = vld [vmem:[%s17019_s22 + $0x138] sm:$0xff]  }
 0x1c0   : > { %19700 = vst [vmem:[#allocation10_spill] sm:$0xff] %v17863_v54 }
 0x1c1   : > { %14667 = vmatmul.mubr.msk.bf16.gmra.mrb[4].mxu0 %vm1177_vm2, %v8383_v43  ;;  %v17874_v43 = vld [vmem:[%s17019_s22 + $0x60] sm:$0xff]  }
 0x1c2   : > { %14670 = vmatprep.mubr.msk.bf16.mxu0 %vm1177_vm2, %v8385_v58  ;;  %19702 = vst [vmem:[#allocation12_spill] sm:$0xff] %v17874_v43  ;;  %v8389_v58 = vsel %vm6835_vm4, %v8386_v3, %v8388_v20  ;;  %v8390_v48 = vrot.slane %v17874_v43, 2  ;;  %v17900_v43 = vld [vmem:[%s17019_s22 + $0x78] sm:$0xff]  }
 0x1c3   : > { %19707 = vst [vmem:[#allocation17_spill] sm:$0xff] %v17900_v43 }
 0x1c4   : > { %v8391_v3 = vsel %vm6835_vm4, %v8388_v20, %v8390_v48  ;;  %v17912_v20 = vld [vmem:[%s17019_s22 + $0x160] sm:$0xff]  }
 0x1c5   : > { %19709 = vst [vmem:[#allocation19_spill] sm:$0xff] %v17912_v20 }
 0x1c6   : > { %14049 = vmatmul.mubr.msk.bf16.gmra.mrb[76].mxu1 %vm1177_vm2, %v17863_v54  ;;  %v8392_v54 = vrot.slane %v17878_v45, 2 }
 0x1c7   : > { %14052 = vmatprep.mubr.msk.bf16.mxu1 %vm1177_vm2, %v17868_v30  ;;  %v17885_v30 = vld [vmem:[%s17019_s22 + $0x148] sm:$0xff]  }
 0x1c8   : > { %19704 = vst [vmem:[#allocation14_spill] sm:$0xff] %v17885_v30 }
 0x1c9   : > { %14671 = vmatmul.mubr.msk.bf16.gmra.mrb[8].mxu0 %vm1177_vm2, %v8387_v60  ;;  %v17896_v60 = vld [vmem:[%s17019_s22 + $0x70] sm:$0xff]  }
 0x1ca   : > { %14674 = vmatprep.mubr.msk.bf16.mxu0 %vm1177_vm2, %v8389_v58  ;;  %19706 = vst [vmem:[#allocation16_spill] sm:$0xff] %v17896_v60  ;;  %v8393_v58 = vsel %vm6835_vm4, %v8390_v48, %v8392_v54  ;;  %v8394_v45 = vrot.slane %v17896_v60, 2  ;;  %v17922_v60 = vld [vmem:[%s17019_s22 + $0x88] sm:$0xff]  }
 0x1cb   : > { %19711 = vst [vmem:[#allocation21_spill] sm:$0xff] %v17922_v60 }
 0x1cc   : > { %v8395_v48 = vsel %vm6835_vm4, %v8392_v54, %v8394_v45  ;;  %v17934_v54 = vld [vmem:[%s17019_s22 + $0x170] sm:$0xff]  }
 0x1cd   : > { %19713 = vst [vmem:[#allocation23_spill] sm:$0xff] %v17934_v54 }
 0x1ce   : > { %14053 = vmatmul.mubr.msk.bf16.gmra.mrb[80].mxu1 %vm1177_vm2, %v17885_v30  ;;  %v8396_v30 = vrot.slane %v17900_v43, 2 }
 0x1cf   : > { %14056 = vmatprep.mubr.msk.bf16.mxu1 %vm1177_vm2, %v17890_v19  ;;  %v17907_v19 = vld [vmem:[%s17019_s22 + $0x158] sm:$0xff]  }
 0x1d0   : > { %19708 = vst [vmem:[#allocation18_spill] sm:$0xff] %v17907_v19 }
 0x1d1   : > { %14675 = vmatmul.mubr.msk.bf16.gmra.mrb[12].mxu0 %vm1177_vm2, %v8391_v3  ;;  %v17918_v3 = vld [vmem:[%s17019_s22 + $0x80] sm:$0xff]  }
 0x1d2   : > { %14678 = vmatprep.mubr.msk.bf16.mxu0 %vm1177_vm2, %v8393_v58  ;;  %19710 = vst [vmem:[#allocation20_spill] sm:$0xff] %v17918_v3  ;;  %v8397_v58 = vsel %vm6835_vm4, %v8394_v45, %v8396_v30  ;;  %v8398_v43 = vrot.slane %v17918_v3, 2  ;;  %v17944_v3 = vld [vmem:[%s17019_s22 + $0x98] sm:$0xff]  }
 0x1d3   : > { %19715 = vst [vmem:[#allocation25_spill] sm:$0xff] %v17944_v3 }
 0x1d4   : > { %v8399_v45 = vsel %vm6835_vm4, %v8396_v30, %v8398_v43  ;;  %v17956_v30 = vld [vmem:[%s17019_s22 + $0x180] sm:$0xff]  }
 0x1d5   : > { %19717 = vst [vmem:[#allocation27_spill] sm:$0xff] %v17956_v30 }
 0x1d6   : > { %14057 = vmatmul.mubr.msk.bf16.gmra.mrb[84].mxu1 %vm1177_vm2, %v17907_v19  ;;  %v8400_v19 = vrot.slane %v17922_v60, 2 }
 0x1d7   : > { %14060 = vmatprep.mubr.msk.bf16.mxu1 %vm1177_vm2, %v17912_v20  ;;  %v17929_v20 = vld [vmem:[%s17019_s22 + $0x168] sm:$0xff]  }
 0x1d8   : > { %19712 = vst [vmem:[#allocation22_spill] sm:$0xff] %v17929_v20 }
 0x1d9   : > { %14679 = vmatmul.mubr.msk.bf16.gmra.mrb[16].mxu0 %vm1177_vm2, %v8395_v48  ;;  %v17940_v48 = vld [vmem:[%s17019_s22 + $0x90] sm:$0xff]  }
 0x1da   : > { %14682 = vmatprep.mubr.msk.bf16.mxu0 %vm1177_vm2, %v8397_v58  ;;  %19714 = vst [vmem:[#allocation24_spill] sm:$0xff] %v17940_v48  ;;  %v8401_v58 = vsel %vm6835_vm4, %v8398_v43, %v8400_v19  ;;  %v8402_v60 = vrot.slane %v17940_v48, 2  ;;  %v17966_v48 = vld [vmem:[%s17019_s22 + $0xa8] sm:$0xff]  }
 0x1db   : > { %19719 = vst [vmem:[#allocation29_spill] sm:$0xff] %v17966_v48 }
 0x1dc   : > { %v8403_v43 = vsel %vm6835_vm4, %v8400_v19, %v8402_v60  ;;  %v17978_v19 = vld [vmem:[%s17019_s22 + $0x190] sm:$0xff]  }
 0x1dd   : > { %19721 = vst [vmem:[#allocation31_spill] sm:$0xff] %v17978_v19 }
 0x1de   : > { %14061 = vmatmul.mubr.msk.bf16.gmra.mrb[88].mxu1 %vm1177_vm2, %v17929_v20  ;;  %v8404_v20 = vrot.slane %v17944_v3, 2 }
 0x1df   : > { %14064 = vmatprep.mubr.msk.bf16.mxu1 %vm1177_vm2, %v17934_v54  ;;  %v17951_v54 = vld [vmem:[%s17019_s22 + $0x178] sm:$0xff]  }
 0x1e0   : > { %19716 = vst [vmem:[#allocation26_spill] sm:$0xff] %v17951_v54 }
 0x1e1   : > { %14683 = vmatmul.mubr.msk.bf16.gmra.mrb[20].mxu0 %vm1177_vm2, %v8399_v45  ;;  %v17962_v45 = vld [vmem:[%s17019_s22 + $0xa0] sm:$0xff]  }
 0x1e2   : > { %14686 = vmatprep.mubr.msk.bf16.mxu0 %vm1177_vm2, %v8401_v58  ;;  %19718 = vst [vmem:[#allocation28_spill] sm:$0xff] %v17962_v45  ;;  %v8405_v58 = vsel %vm6835_vm4, %v8402_v60, %v8404_v20  ;;  %v8406_v3 = vrot.slane %v17962_v45, 2  ;;  %v17988_v45 = vld [vmem:[%s17019_s22 + $0xb8] sm:$0xff]  }
 0x1e3   : > { %19723 = vst [vmem:[#allocation33_spill] sm:$0xff] %v17988_v45 }
 0x1e4   : > { %v8407_v60 = vsel %vm6835_vm4, %v8404_v20, %v8406_v3  ;;  %v18000_v20 = vld [vmem:[%s17019_s22 + $0x1a0] sm:$0xff]  }
 0x1e5   : > { %19725 = vst [vmem:[#allocation35_spill] sm:$0xff] %v18000_v20 }
 0x1e6   : > { %14065 = vmatmul.mubr.msk.bf16.gmra.mrb[92].mxu1 %vm1177_vm2, %v17951_v54  ;;  %v8408_v54 = vrot.slane %v17966_v48, 2 }
 0x1e7   : > { %14068 = vmatprep.mubr.msk.bf16.mxu1 %vm1177_vm2, %v17956_v30  ;;  %v17973_v30 = vld [vmem:[%s17019_s22 + $0x188] sm:$0xff]  }
 0x1e8   : > { %19720 = vst [vmem:[#allocation30_spill] sm:$0xff] %v17973_v30 }
 0x1e9   : > { %14687 = vmatmul.mubr.msk.bf16.gmra.mrb[24].mxu0 %vm1177_vm2, %v8403_v43  ;;  %v17984_v43 = vld [vmem:[%s17019_s22 + $0xb0] sm:$0xff]  }
 0x1ea   : > { %14690 = vmatprep.mubr.msk.bf16.mxu0 %vm1177_vm2, %v8405_v58  ;;  %19722 = vst [vmem:[#allocation32_spill] sm:$0xff] %v17984_v43  ;;  %v8409_v58 = vsel %vm6835_vm4, %v8406_v3, %v8408_v54  ;;  %v8410_v48 = vrot.slane %v17984_v43, 2  ;;  %v16344_v43 = vld [vmem:[%s17019_s22 + $0xc8] sm:$0xff]  }
 0x1ec   : > { %v8411_v3 = vsel %vm6835_vm4, %v8408_v54, %v8410_v48 }
 0x1ee   : > { %14069 = vmatmul.mubr.msk.bf16.gmra.mrb[96].mxu1 %vm1177_vm2, %v17973_v30  ;;  %v8412_v30 = vrot.slane %v17988_v45, 2 }
 0x1ef   : > { %14072 = vmatprep.mubr.msk.bf16.mxu1 %vm1177_vm2, %v17978_v19  ;;  %v17995_v19 = vld [vmem:[%s17019_s22 + $0x198] sm:$0xff]  }
 0x1f0   : > { %19724 = vst [vmem:[#allocation34_spill] sm:$0xff] %v17995_v19 }
 0x1f1   : > { %14691 = vmatmul.mubr.msk.bf16.gmra.mrb[28].mxu0 %vm1177_vm2, %v8407_v60  ;;  %v16343_v60 = vld [vmem:[%s17019_s22 + $0xc0] sm:$0xff]  }
 0x1f2   : > { %14694 = vmatprep.mubr.msk.bf16.mxu0 %vm1177_vm2, %v8409_v58  ;;  %v8413_v58 = vsel %vm6835_vm4, %v8410_v48, %v8412_v30  ;;  %v8414_v45 = vrot.slane %v16343_v60, 2  ;;  %v16345_v48 = vld [vmem:[%s17019_s22 + $0xd0] sm:$0xff]   ;;  %v8420_v60 = vrot.slane %v16346_v44, 2 }
 0x1f4   : > { %v8415_v54 = vsel %vm6835_vm4, %v8412_v30, %v8414_v45 }
 0x1f6   : > { %14073 = vmatmul.mubr.msk.bf16.gmra.mrb[100].mxu1 %vm1177_vm2, %v17995_v19  ;;  %v8416_v19 = vrot.slane %v16344_v43, 2  ;;  %v8418_v43 = vrot.slane %v16345_v48, 2 }
 0x1f7   : > { %14076 = vmatprep.mubr.msk.bf16.mxu1 %vm1177_vm2, %v18000_v20  ;;  %v16756_v20 = vld [vmem:[%s17019_s22 + $0x1b0] sm:$0xff]  }
 0x1f8   : > { %v8419_v30 = vsel %vm6835_vm4, %v8416_v19, %v8418_v43 }
 0x1f9   : > { %14695 = vmatmul.mubr.msk.bf16.gmra.mrb[32].mxu0 %vm1177_vm2, %v8411_v3  ;;  %v8417_v3 = vsel %vm6835_vm4, %v8414_v45, %v8416_v19  ;;  %v16347_v45 = vld [vmem:[%s17019_s22 + $0xe0] sm:$0xff]  }
 0x1fa   : > { %14698 = vmatprep.mubr.msk.bf16.mxu0 %vm1177_vm2, %v8413_v58  ;;  %v18024_v58 = vld [vmem:[%s17019_s22 + $0x1b8] sm:$0xff]   ;;  %v8422_v44 = vrot.slane %v16347_v45, 2 }
 0x1fb   : > { %19727 = vst [vmem:[#allocation37_spill] sm:$0xff] %v18024_v58 }
 0x1fc   : > { %v8423_v19 = vsel %vm6835_vm4, %v8420_v60, %v8422_v44 }
 0x1fe   : > { %14077 = vmatmul.mubr.msk.bf16.gmra.mrb[104].mxu1 %vm1177_vm2, %v18011_v59  ;;  %v16348_v59 = vld [vmem:[%s17019_s22 + $0xe8] sm:$0xff]  }
 0x1ff   : > { %14080 = vmatprep.mubr.msk.bf16.mxu1 %vm1177_vm2, %v16756_v20  ;;  %v16758_v20 = vld [vmem:[%s17019_s22 + $0x1c0] sm:$0xff]   ;;  %v8424_v48 = vrot.slane %v16348_v59, 2 }
 0x201   : > { %14699 = vmatmul.mubr.msk.bf16.gmra.mrb[36].mxu0 %vm1177_vm2, %v8415_v54  ;;  %v8421_v54 = vsel %vm6835_vm4, %v8418_v43, %v8420_v60  ;;  %v8425_v43 = vsel %vm6835_vm4, %v8422_v44, %v8424_v48  ;;  %v16351_v60 = vld [vmem:[%s17019_s22 + $0x100] sm:$0xff]  }
 0x202   : > { %14702 = vmatprep.mubr.msk.bf16.mxu0 %vm1177_vm2, %v8417_v3  ;;  %v16759_v3 = vld [vmem:[%s17019_s22 + $0x1c8] sm:$0xff]   ;;  %v8430_v44 = vrot.slane %v16351_v60, 2  ;;  %v16760_v60 = vld [vmem:[%s17019_s22 + $0x4] sm:$0xf] }
 0x206   : > { %14081 = vmatmul.mubr.msk.bf16.gmra.mrb[108].mxu1 %vm1177_vm2, %v18024_v58  ;;  %v16350_v58 = vld [vmem:[%s17019_s22 + $0xf8] sm:$0xff]  }
 0x207   : > { %14084 = vmatprep.mubr.msk.bf16.mxu1 %vm1177_vm2, %v16758_v20  ;;  %v16349_v20 = vld [vmem:[%s17019_s22 + $0xf0] sm:$0xff]   ;;  %v8428_v59 = vrot.slane %v16350_v58, 2 }
 0x209   : > { %14703 = vmatmul.mubr.msk.bf16.gmra.mrb[40].mxu0 %vm1177_vm2, %v8419_v30  ;;  %v8426_v30 = vrot.slane %v16349_v20, 2 }
 0x20a   : > { %14706 = vmatprep.mubr.msk.bf16.mxu0 %vm1177_vm2, %v8421_v54  ;;  %v16352_v54 = vld [vmem:[%s17019_s22 + $0x108] sm:$0xff]  }
 0x20b   : > { %v8429_v45 = vsel %vm6835_vm4, %v8426_v30, %v8428_v59  ;;  %v8432_v58 = vrot.slane %v16352_v54, 2  ;;  %v16357_v54 = vld [vmem:[%s17019_s22 + $0x130] sm:$0xff]  }
 0x20e   : > { %14085 = vmatmul.mubr.msk.bf16.gmra.mrb[112].mxu1 %vm1177_vm2, %v16759_v3  ;;  %v16354_v3 = vld [vmem:[%s17019_s22 + $0x118] sm:$0xff]  }
 0x20f   : > { %14088 = vmatprep.mubr.msk.bf16.mxu1 %vm1177_vm2, %v17381_v53  ;;  %v8427_v53 = vsel %vm6835_vm4, %v8424_v48, %v8426_v30  ;;  %v8433_v48 = vsel %vm6835_vm4, %v8430_v44, %v8432_v58  ;;  %v8436_v20 = vrot.slane %v16354_v3, 2  ;;  %v16356_v30 = vld [vmem:[%s17019_s22 + $0x128] sm:$0xff]  }
 0x211   : > { %14707 = vmatmul.mubr.msk.bf16.gmra.mrb[44].mxu0 %vm1177_vm2, %v8423_v19 }
 0x212   : > { %14710 = vmatprep.mubr.msk.bf16.mxu0 %vm1177_vm2, %v8425_v43 }
 0x216   : > { %14089 = vmatmul.mubr.msk.bf16.gmra.mrb[116].mxu1 %vm1177_vm2, %v17390_v63  ;;  %v8431_v63 = vsel %vm6835_vm4, %v8428_v59, %v8430_v44  ;;  %v2679_v59 = vld [vmem:[%s17019_s22] sm:$0xe] }
 0x217   : > { %14092 = vmatprep.mubr.msk.bf16.mxu1 %vm1177_vm2, %v17398_v10  ;;  %v16353_v10 = vld [vmem:[%s17019_s22 + $0x110] sm:$0xff]  }
 0x218   : > { %v8434_v19 = vrot.slane %v16353_v10, 2  ;;  %v16359_v10 = vld [vmem:[%s17019_s22 + $0x138] sm:$0xff]  }
 0x219   : > { %14711 = vmatmul.mubr.msk.bf16.gmra.mrb[48].mxu0 %vm1177_vm2, %v8427_v53 }
 0x21a   : > { %14714 = vmatprep.mubr.msk.bf16.mxu0 %vm1177_vm2, %v8429_v45  ;;  %v8437_v43 = vsel %vm6835_vm4, %v8434_v19, %v8436_v20  ;;  %v12584_v45 = vcombine.low %v2679_v59, %v16760_v60  ;;  %v16362_v60 = vld [vmem:[%s17019_s22 + $0x150] sm:$0xff]  }
 0x21c   : > { %v2686_v44 = vrot.slane %v12584_v45, 1  ;;  %v2695_v45 = vrot.slane %v17556_v31, 1 }
 0x21e   : > { %14093 = vmatmul.mubr.msk.bf16.gmra.mrb[120].mxu1 %vm1177_vm2, %v17409_v21  ;;  %v8435_v21 = vsel %vm6835_vm4, %v8432_v58, %v8434_v19  ;;  %v2687_v58 = vrot.slane %v17517_v13, 1  ;;  %v2689_v13 = vrot.slane %v17522_v9, 1  ;;  %v16360_v19 = vld [vmem:[%s17019_s22 + $0x140] sm:$0xff]  }
 0x21f   : > { %14096 = vmatprep.mubr.msk.bf16.mxu1 %vm1177_vm2, %v17426_v36  ;;  %v16355_v36 = vld [vmem:[%s17019_s22 + $0x120] sm:$0xff]   ;;  %v8446_v9 = vrot.slane %v16360_v19, 2 }
 0x220   : > { %v8438_v53 = vrot.slane %v16355_v36, 2  ;;  %v16361_v36 = vld [vmem:[%s17019_s22 + $0x148] sm:$0xff]  }
 0x221   : > { %14715 = vmatmul.mubr.msk.bf16.gmra.mrb[52].mxu0 %vm1177_vm2, %v8431_v63  ;;  %v8448_v59 = vrot.slane %v16361_v36, 2  ;;  %v16366_v36 = vld [vmem:[%s17019_s22 + $0x170] sm:$0xff]  }
 0x222   : > { %14718 = vmatprep.mubr.msk.bf16.mxu0 %vm1177_vm2, %v8433_v48  ;;  %v2688_v48 = vsel %vm2685_vm5, %v2686_v44, %v2687_v58  ;;  %v18124_v44 = vld [vmem:[%s19634_s1 + $0x20] sm:$0xf] }
 0x223   : > { %16173 = vmatprep.subr.msk.bf16.mxu0 %vm1382_vm0, %v18124_v44 }
 0x226   : > { %14097 = vmatmul.mubr.msk.bf16.gmra.mrb[124].mxu1 %vm1177_vm2, %v17431_v41  ;;  %v8440_v41 = vrot.slane %v16356_v30, 2 }
 0x227   : > { %14100 = vmatprep.mubr.msk.bf16.mxu1 %vm1177_vm2, %v17446_v57  ;;  %v8439_v57 = vsel %vm6835_vm4, %v8436_v20, %v8438_v53  ;;  %v2691_v20 = vrot.slane %v17540_v24, 1  ;;  %v2693_v24 = vrot.slane %v17545_v25, 1 }
 0x228   : > { %v8441_v63 = vsel %vm6835_vm4, %v8438_v53, %v8440_v41 }
 0x229   : > { %14719 = vmatmul.mubr.msk.bf16.gmra.mrb[56].mxu0 %vm1177_vm2, %v8435_v21  ;;  %v2692_v30 = vsel %vm2685_vm5, %v2689_v13, %v2691_v20  ;;  %v2694_v25 = vsel %vm2685_vm5, %v2691_v20, %v2693_v24  ;;  %v2696_v31 = vsel %vm2685_vm5, %v2693_v24, %v2695_v45 }
 0x22a   : > { %14722 = vmatprep.mubr.msk.bf16.mxu0 %vm1177_vm2, %v8437_v43  ;;  %v2690_v43 = vsel %vm2685_vm5, %v2687_v58, %v2689_v13  ;;  %v16365_v13 = vld [vmem:[%s17019_s22 + $0x168] sm:$0xff]  }
 0x22e   : > { %14101 = vmatmul.mubr.msk.bf16.gmra.mrb[128].mxu1 %vm1177_vm2, %v17451_v62  ;;  %v8442_v62 = vrot.slane %v16357_v54, 2  ;;  %v8450_v54 = vrot.slane %v16362_v60, 2  ;;  %v16368_v60 = vld [vmem:[%s17019_s22 + $0x180] sm:$0xff]  }
 0x22f   : > { %14104 = vmatprep.mubr.msk.bf16.mxu1 %vm1177_vm2, %v17466_v16  ;;  %v8444_v16 = vrot.slane %v16359_v10, 2 }
 0x230   : > { %v8443_v3 = vsel %vm6835_vm4, %v8440_v41, %v8442_v62  ;;  %v8449_v41 = vsel %vm6835_vm4, %v8446_v9, %v8448_v59  ;;  %v8451_v10 = vsel %vm6835_vm4, %v8448_v59, %v8450_v54  ;;  %v8458_v59 = vrot.slane %v16366_v36, 2 }
 0x231   : > { %14723 = vmatmul.mubr.msk.bf16.gmra.mrb[60].mxu0 %vm1177_vm2, %v8439_v57  ;;  %v8445_v21 = vsel %vm6835_vm4, %v8442_v62, %v8444_v16  ;;  %v8447_v53 = vsel %vm6835_vm4, %v8444_v16, %v8446_v9  ;;  %v16363_v57 = vld [vmem:[%s17019_s22 + $0x158] sm:$0xff]   ;;  %v16364_v62 = vld [vmem:[%s17019_s22 + $0x160] sm:$0xff]  }
 0x232   : > { %14726 = vmatprep.mubr.msk.bf16.mxu0 %vm1177_vm2, %v8441_v63  ;;  %v8452_v58 = vrot.slane %v16363_v57, 2  ;;  %v2697_v63 = vrot.slane %v17561_v32, 1  ;;  %v8454_v19 = vrot.slane %v16364_v62, 2  ;;  %v8456_v32 = vrot.slane %v16365_v13, 2  ;;  %v16367_v9 = vld [vmem:[%s17019_s22 + $0x178] sm:$0xff]  }
 0x233   : > { %v16371_v62 = vld [vmem:[%s17019_s22 + $0x198] sm:$0xff]  }
 0x234   : > { %v8453_v16 = vsel %vm6835_vm4, %v8450_v54, %v8452_v58 }
 0x236   : > { %14105 = vmatmul.mubr.msk.bf16.gmra.mrb[132].mxu1 %vm1177_vm2, %v17471_v23  ;;  %v4567_v23 = vsel %vm1382_vm0, %v17833_v14, 0  ;;  %v16761_v14 = vld [vmem:[%s19634_s1 + $0x10] sm:$0xf] }
 0x237   : > { %14110 = vmatprep.mubr.msk.bf16.mxu1 %vm1177_vm2, %v2688_v48  ;;  %v2699_v48 = vrot.slane %v17572_v40, 1  ;;  %v2701_v40 = vrot.slane %v17577_v42, 1  ;;  %v8460_v42 = vrot.slane %v16367_v9, 2  ;;  %v16374_v9 = vld [vmem:[%s17019_s22 + $0x1b0] sm:$0xff]  }
 0x239   : > { %14727 = vmatmul.mubr.msk.bf16.gmra.mrb[64].mxu0 %vm1177_vm2, %v8443_v3  ;;  %v2698_v3 = vsel %vm2685_vm5, %v2695_v45, %v2697_v63  ;;  %v2700_v20 = vsel %vm2685_vm5, %v2697_v63, %v2699_v48  ;;  %v2707_v45 = vrot.slane %v17604_v61, 1  ;;  %v2709_v61 = vrot.slane %v17609_v0, 1 }
 0x23a   : > { %14730 = vmatprep.mubr.msk.bf16.mxu0 %vm1177_vm2, %v8445_v21  ;;  %v8455_v21 = vsel %vm6835_vm4, %v8452_v58, %v8454_v19  ;;  %v16370_v58 = vld [vmem:[%s17019_s22 + $0x190] sm:$0xff]   ;;  %v2711_v63 = vrot.slane %v17620_v8, 1  ;;  %v8468_v0 = vrot.slane %v16371_v62, 2  ;;  %v2713_v8 = vrot.slane %v17625_v11, 1 }
 0x23c   : > { %v2712_v13 = vsel %vm2685_vm5, %v2709_v61, %v2711_v63 }
 0x23e   : > { %14111 = vmatmul.mubr.msk.bf16.vlgmr.msra.gmra.mrb[0].mxu1 %vm1177_vm2, %v2690_v43  ;;  %v2703_v43 = vrot.slane %v17588_v50, 1  ;;  %v2705_v50 = vrot.slane %v17593_v51, 1 }
 0x23f   : > { %14247 = vmatpush3.bf16.msra.mxu1 %v4567_v23  ;;  %14114 = vmatprep.mubr.msk.bf16.mxu1 %vm1177_vm2, %v2692_v30  ;;  %v8457_v23 = vsel %vm6835_vm4, %v8454_v19, %v8456_v32  ;;  %v2702_v30 = vsel %vm2685_vm5, %v2699_v48, %v2701_v40  ;;  %v2710_v48 = vsel %vm2685_vm5, %v2707_v45, %v2709_v61  ;;  %v16372_v19 = vld [vmem:[%s17019_s22 + $0x1a0] sm:$0xff]  }
 0x240   : > { %16169 = vmatprep.subr.msk.bf16.mxu1 %vm1382_vm0, %v16761_v14  ;;  %v2704_v24 = vsel %vm2685_vm5, %v2701_v40, %v2703_v43  ;;  %v8461_v14 = vsel %vm6835_vm4, %v8458_v59, %v8460_v42  ;;  %v2706_v57 = vsel %vm2685_vm5, %v2703_v43, %v2705_v50  ;;  %v2708_v54 = vsel %vm2685_vm5, %v2705_v50, %v2707_v45  ;;  %v16373_v40 = vld [vmem:[%s17019_s22 + $0x1a8] sm:$0xff]   ;;  %v16376_v45 = vld [vmem:[%s17019_s22 + $0x1c0] sm:$0xff]  }
 0x241   : > { %14731 = vmatmul.mubr.msk.bf16.gmra.mrb[68].mxu0 %vm1177_vm2, %v8447_v53  ;;  %v8459_v53 = vsel %vm6835_vm4, %v8456_v32, %v8458_v59  ;;  %v8470_v36 = vrot.slane %v16372_v19, 2  ;;  %v8472_v11 = vrot.slane %v16373_v40, 2  ;;  %v8474_v50 = vrot.slane %v16374_v9, 2  ;;  %v16381_v19 = vld [vmem:[%s17019_s22 + $0x1e8] sm:$0xff]  }
 0x242   : > { %14734 = vmatprep.mubr.msk.bf16.mxu0 %vm1177_vm2, %v8449_v41  ;;  %v16369_v41 = vld [vmem:[%s17019_s22 + $0x188] sm:$0xff]  }
 0x243   : > { %v8464_v51 = vrot.slane %v16369_v41, 2  ;;  %v8473_v59 = vsel %vm6835_vm4, %v8470_v36, %v8472_v11 }
 0x246   : > { %14115 = vmatmul.mubr.msk.bf16.gmra.mrb[4].mxu1 %vm1177_vm2, %v2694_v25  ;;  %v8462_v25 = vrot.slane %v16368_v60, 2  ;;  %v8475_v60 = vsel %vm6835_vm4, %v8472_v11, %v8474_v50 }
 0x247   : > { %14118 = vmatprep.mubr.msk.bf16.mxu1 %vm1177_vm2, %v2696_v31 }
 0x248   : > { %v8463_v31 = vsel %vm6835_vm4, %v8460_v42, %v8462_v25 }
 0x249   : > { %14735 = vmatmul.mubr.msk.bf16.gmra.mrb[72].mxu0 %vm1177_vm2, %v8451_v10  ;;  %v8465_v10 = vsel %vm6835_vm4, %v8462_v25, %v8464_v51 }
 0x24a   : > { %14738 = vmatprep.mubr.msk.bf16.mxu0 %vm1177_vm2, %v8453_v16  ;;  %v8466_v16 = vrot.slane %v16370_v58, 2  ;;  %v2727_v58 = vrot.slane %v17684_v1, 1  ;;  %v2729_v1 = vrot.slane %v17689_v2, 1  ;;  %v8488_v2 = vrot.slane %v16381_v19, 2 }
 0x24c   : > { %v8469_v32 = vsel %vm6835_vm4, %v8466_v16, %v8468_v0 }
 0x24e   : > { %14119 = vmatmul.mubr.msk.bf16.gmra.mrb[8].mxu1 %vm1177_vm2, %v2698_v3  ;;  %v8467_v3 = vsel %vm6835_vm4, %v8464_v51, %v8466_v16 }
 0x24f   : > { %14122 = vmatprep.mubr.msk.bf16.mxu1 %vm1177_vm2, %v2700_v20  ;;  %v2715_v20 = vrot.slane %v17636_v26, 1  ;;  %v2717_v26 = vrot.slane %v17641_v27, 1 }
 0x251   : > { %14739 = vmatmul.mubr.msk.bf16.gmra.mrb[76].mxu0 %vm1177_vm2, %v8455_v21  ;;  %v2714_v21 = vsel %vm2685_vm5, %v2711_v63, %v2713_v8  ;;  %v2716_v43 = vsel %vm2685_vm5, %v2713_v8, %v2715_v20  ;;  %v2718_v42 = vsel %vm2685_vm5, %v2715_v20, %v2717_v26  ;;  %v2731_v8 = vrot.slane %v17700_v28, 1 }
 0x252   : > { %14742 = vmatprep.mubr.msk.bf16.mxu0 %vm1177_vm2, %v8457_v23  ;;  %v8471_v23 = vsel %vm6835_vm4, %v8468_v0, %v8470_v36  ;;  %v16380_v0 = vld [vmem:[%s17019_s22 + $0x1e0] sm:$0xff]   ;;  %v2730_v20 = vsel %vm2685_vm5, %v2727_v58, %v2729_v1  ;;  %v2733_v28 = vrot.slane %v17705_v17, 1  ;;  %v16382_v36 = vld [vmem:[%s17019_s22 + $0x1f0] sm:$0xff]  }
 0x253   : > { %v2732_v40 = vsel %vm2685_vm5, %v2729_v1, %v2731_v8  ;;  %v8490_v9 = vrot.slane %v16382_v36, 2  ;;  %v2751_v1 = vrot.slane %v17788_v4, 1  ;;  %v9448_v4 = vshrl.u32 %v17781_v56, 16  ;;  %v16392_v36 = vld [vmem:[%s17019_s22 + $0x240] ss:$0 sps:$4 sm:$0x33]  }
 0x256   : > { %14123 = vmatmul.mubr.msk.bf16.gmra.mrb[12].mxu1 %vm1177_vm2, %v2702_v30  ;;  %v2719_v30 = vrot.slane %v17652_v35, 1  ;;  %v2721_v35 = vrot.slane %v17657_v37, 1 }
 0x257   : > { %14126 = vmatprep.mubr.msk.bf16.mxu1 %vm1177_vm2, %v2704_v24  ;;  %v16375_v24 = vld [vmem:[%s17019_s22 + $0x1b8] sm:$0xff]  }
 0x258   : > { %v8476_v27 = vrot.slane %v16375_v24, 2  ;;  %v2722_v25 = vsel %vm2685_vm5, %v2719_v30, %v2721_v35  ;;  %v16384_v24 = vld [vmem:[%s17019_s22 + $0x200] sm:$0xff]  }
 0x259   : > { %14743 = vmatmul.mubr.msk.bf16.gmra.mrb[80].mxu0 %vm1177_vm2, %v8459_v53  ;;  %v2720_v53 = vsel %vm2685_vm5, %v2717_v26, %v2719_v30  ;;  %v16383_v26 = vld [vmem:[%s17019_s22 + $0x1f8] sm:$0xff]  }
 0x25a   : > { %14746 = vmatprep.mubr.msk.bf16.mxu0 %vm1177_vm2, %v8461_v14  ;;  %v2723_v14 = vrot.slane %v17668_v47, 1  ;;  %v8477_v41 = vsel %vm6835_vm4, %v8474_v50, %v8476_v27  ;;  %v2725_v47 = vrot.slane %v17673_v49, 1  ;;  %v8492_v17 = vrot.slane %v16383_v26, 2 }
 0x25c   : > { %v2724_v51 = vsel %vm2685_vm5, %v2721_v35, %v2723_v14  ;;  %v2726_v62 = vsel %vm2685_vm5, %v2723_v14, %v2725_v47  ;;  %v2728_v16 = vsel %vm2685_vm5, %v2725_v47, %v2727_v58  ;;  %v8493_v50 = vsel %vm6835_vm4, %v8490_v9, %v8492_v17  ;;  %v16386_v14 = vld [vmem:[%s17019_s22 + $0x210] sm:$0xff]  }
 0x25d   : > { %v8494_v35 = vrot.slane %v16384_v24, 2  ;;  %v9469_v24 = vshll.u32 %v17803_v22, 16 }
 0x25e   : > { %14127 = vmatmul.mubr.msk.bf16.gmra.mrb[16].mxu1 %vm1177_vm2, %v2706_v57  ;;  %v16377_v57 = vld [vmem:[%s17019_s22 + $0x1c8] sm:$0xff]  }
 0x25f   : > { %14130 = vmatprep.mubr.msk.bf16.mxu1 %vm1177_vm2, %v2708_v54  ;;  %v8478_v54 = vrot.slane %v16376_v45, 2  ;;  %v8480_v37 = vrot.slane %v16377_v57, 2  ;;  %v8495_v45 = vsel %vm6835_vm4, %v8492_v17, %v8494_v35  ;;  %v9460_v17 = vshll.u32 %v17799_v15, 16 }
 0x261   : > { %14747 = vmatmul.mubr.msk.bf16.gmra.mrb[84].mxu0 %vm1177_vm2, %v8463_v31  ;;  %v8479_v61 = vsel %vm6835_vm4, %v8476_v27, %v8478_v54  ;;  %v16378_v31 = vld [vmem:[%s17019_s22 + $0x1d0] sm:$0xff]   ;;  %v8481_v63 = vsel %vm6835_vm4, %v8478_v54, %v8480_v37 }
 0x262   : > { %14750 = vmatprep.mubr.msk.bf16.mxu0 %vm1177_vm2, %v8465_v10  ;;  %v16379_v10 = vld [vmem:[%s17019_s22 + $0x1d8] sm:$0xff]  }
 0x263   : > { %v8484_v49 = vrot.slane %v16379_v10, 2 }
 0x266   : > { %14131 = vmatmul.mubr.msk.bf16.gmra.mrb[20].mxu1 %vm1177_vm2, %v2710_v48  ;;  %v8482_v48 = vrot.slane %v16378_v31, 2  ;;  %v2747_v31 = vrot.slane %v17764_v29, 1 }
 0x267   : > { %14134 = vmatprep.mubr.msk.bf16.mxu1 %vm1177_vm2, %v2712_v13 }
 0x268   : > { %v8483_v13 = vsel %vm6835_vm4, %v8480_v37, %v8482_v48 }
 0x269   : > { %14751 = vmatmul.mubr.msk.bf16.gmra.mrb[88].mxu0 %vm1177_vm2, %v8467_v3  ;;  %v8485_v3 = vsel %vm6835_vm4, %v8482_v48, %v8484_v49 }
 0x26a   : > { %14754 = vmatprep.mubr.msk.bf16.mxu0 %vm1177_vm2, %v8469_v32  ;;  %v8486_v32 = vrot.slane %v16380_v0, 2 }
 0x26c   : > { %v8489_v11 = vsel %vm6835_vm4, %v8486_v32, %v8488_v2 }
 0x26e   : > { %14135 = vmatmul.mubr.msk.bf16.gmra.mrb[24].mxu1 %vm1177_vm2, %v2714_v21  ;;  %v8487_v21 = vsel %vm6835_vm4, %v8484_v49, %v8486_v32  ;;  %v16390_v49 = vld [vmem:[%s17019_s22 + $0x230] sm:$0xff]   ;;  %v9443_v32 = vshll.u32 %v17778_v46, 16 }
 0x26f   : > { %14138 = vmatprep.mubr.msk.bf16.mxu1 %vm1177_vm2, %v2716_v43  ;;  %v2735_v43 = vrot.slane %v17716_v33, 1  ;;  %v2737_v33 = vrot.slane %v17721_v34, 1 }
 0x270   : > { %v9445_v26 = vrot.slane %v9443_v32, 3 }
 0x271   : > { %14755 = vmatmul.mubr.msk.bf16.gmra.mrb[92].mxu0 %vm1177_vm2, %v8471_v23  ;;  %v2734_v23 = vsel %vm2685_vm5, %v2731_v8, %v2733_v28  ;;  %v2736_v30 = vsel %vm2685_vm5, %v2733_v28, %v2735_v43  ;;  %v2738_v27 = vsel %vm2685_vm5, %v2735_v43, %v2737_v33  ;;  %v2755_v43 = vrot.slane %v17810_v38, 1 }
 0x272   : > { %14758 = vmatprep.mubr.msk.bf16.mxu0 %vm1177_vm2, %v8473_v59  ;;  %v8491_v59 = vsel %vm6835_vm4, %v8488_v2, %v8490_v9  ;;  %v2753_v2 = vrot.slane %v17793_v5, 1  ;;  %v8510_v9 = vrot.slane %v16392_v36, 2  ;;  %v9466_v38 = vshrl.u32 %v17803_v22, 16 }
 0x274   : > { %v2756_v5 = vsel %vm2685_vm5, %v2753_v2, %v2755_v43 }
 0x276   : > { %14139 = vmatmul.mubr.msk.bf16.gmra.mrb[28].mxu1 %vm1177_vm2, %v2718_v42  ;;  %v2739_v42 = vrot.slane %v17732_v52, 1  ;;  %v2741_v52 = vrot.slane %v17737_v55, 1 }
 0x277   : > { %14142 = vmatprep.mubr.msk.bf16.mxu1 %vm1177_vm2, %v2720_v53  ;;  %v16385_v53 = vld [vmem:[%s17019_s22 + $0x208] sm:$0xff]  }
 0x278   : > { %v8496_v34 = vrot.slane %v16385_v53, 2  ;;  %v2742_v54 = vsel %vm2685_vm5, %v2739_v42, %v2741_v52 }
 0x279   : > { %14759 = vmatmul.mubr.msk.bf16.gmra.mrb[96].mxu0 %vm1177_vm2, %v8475_v60  ;;  %v2740_v60 = vsel %vm2685_vm5, %v2737_v33, %v2739_v42  ;;  %v2757_v42 = vrot.slane %v17815_v12, 1  ;;  %v19728_v12 = vld [vmem:[#allocation5_spill] sm:$0xff] }
 0x27a   : > { %14762 = vmatprep.mubr.msk.bf16.mxu0 %vm1177_vm2, %v8477_v41  ;;  %v2743_v41 = vrot.slane %v17748_v6, 1  ;;  %v8497_v57 = vsel %vm6835_vm4, %v8494_v35, %v8496_v34  ;;  %v2745_v6 = vrot.slane %v17753_v7, 1  ;;  %v2759_v35 = vrot.slane %v17841_v18, 1 }
 0x27b   : > { %v2758_v22 = vsel %vm2685_vm5, %v2755_v43, %v2757_v42 }
 0x27c   : > { %v2744_v37 = vsel %vm2685_vm5, %v2741_v52, %v2743_v41  ;;  %v2746_v10 = vsel %vm2685_vm5, %v2743_v41, %v2745_v6  ;;  %v2748_v48 = vsel %vm2685_vm5, %v2745_v6, %v2747_v31  ;;  %v9478_v41 = vshll.u32 %v19728_v12, 16 }
 0x27e   : > { %14143 = vmatmul.mubr.msk.bf16.gmra.mrb[32].mxu1 %vm1177_vm2, %v2722_v25  ;;  %v16387_v25 = vld [vmem:[%s17019_s22 + $0x218] sm:$0xff]  }
 0x27f   : > { %14146 = vmatprep.mubr.msk.bf16.mxu1 %vm1177_vm2, %v2724_v51  ;;  %v8498_v51 = vrot.slane %v16386_v14, 2  ;;  %v8500_v55 = vrot.slane %v16387_v25, 2  ;;  %v9475_v14 = vshrl.u32 %v19728_v12, 16  ;;  %v19729_v25 = vld [vmem:[#allocation6_spill] sm:$0xff] }
 0x280   : > { %v9484_v18 = vshrl.u32 %v19729_v25, 16 }
 0x281   : > { %14763 = vmatmul.mubr.msk.bf16.gmra.mrb[100].mxu0 %vm1177_vm2, %v8479_v61  ;;  %v8499_v47 = vsel %vm6835_vm4, %v8496_v34, %v8498_v51  ;;  %v16388_v61 = vld [vmem:[%s17019_s22 + $0x220] sm:$0xff]   ;;  %v8501_v58 = vsel %vm6835_vm4, %v8498_v51, %v8500_v55  ;;  %v9471_v34 = vrot.slane %v9469_v24, 3  ;;  %v19730_v51 = vld [vmem:[#allocation7_spill] sm:$0xff]  ;;  %v9477_v6 = vrot.slane %v9475_v14, 2  ;;  %v19741_v14 = vld [vmem:[#allocation17_spill] sm:$0xff] }
 0x282   : > { %14766 = vmatprep.mubr.msk.bf16.mxu0 %vm1177_vm2, %v8481_v63  ;;  %v16389_v63 = vld [vmem:[%s17019_s22 + $0x228] sm:$0xff]  }
 0x283   : > { %v8504_v7 = vrot.slane %v16389_v63, 2 }
 0x286   : > { %14147 = vmatmul.mubr.msk.bf16.gmra.mrb[36].mxu1 %vm1177_vm2, %v2726_v62  ;;  %v8502_v62 = vrot.slane %v16388_v61, 2  ;;  %v19731_v61 = vld [vmem:[#allocation10_spill] sm:$0xff] }
 0x287   : > { %14150 = vmatprep.mubr.msk.bf16.mxu1 %vm1177_vm2, %v2728_v16  ;;  %v2749_v16 = vrot.slane %v17771_v39, 1  ;;  %v9440_v39 = vshrl.u32 %v17778_v46, 16  ;;  %v9450_v46 = vrot.slane %v9448_v4, 2  ;;  %v19735_v4 = vld [vmem:[#allocation14_spill] sm:$0xff] }
 0x288   : > { %v8503_v29 = vsel %vm6835_vm4, %v8500_v55, %v8502_v62  ;;  %v8505_v0 = vsel %vm6835_vm4, %v8502_v62, %v8504_v7 }
 0x289   : > { %14767 = vmatmul.mubr.msk.bf16.gmra.mrb[104].mxu0 %vm1177_vm2, %v8483_v13  ;;  %v16391_v13 = vld [vmem:[%s17019_s22 + $0x238] sm:$0xff]   ;;  %v2750_v8 = vsel %vm2685_vm5, %v2747_v31, %v2749_v16  ;;  %v2752_v19 = vsel %vm2685_vm5, %v2749_v16, %v2751_v1  ;;  %v2763_v31 = vrot.slane %v19731_v61, 1 }
 0x28a   : > { %14770 = vmatprep.mubr.msk.bf16.mxu0 %vm1177_vm2, %v8485_v3  ;;  %v8506_v3 = vrot.slane %v16390_v49, 2 }
 0x28c   : > { %v8507_v28 = vsel %vm6835_vm4, %v8504_v7, %v8506_v3 }
 0x28e   : > { %14151 = vmatmul.mubr.msk.bf16.gmra.mrb[40].mxu1 %vm1177_vm2, %v2730_v20  ;;  %v8508_v20 = vrot.slane %v16391_v13, 2 }
 0x28f   : > { %14154 = vmatprep.mubr.msk.bf16.mxu1 %vm1177_vm2, %v2732_v40  ;;  %v9451_v40 = vshll.u32 %v17781_v56, 16  ;;  %v2754_v56 = vsel %vm2685_vm5, %v2751_v1, %v2753_v2 }
 0x291   : > { %14771 = vmatmul.mubr.msk.bf16.gmra.mrb[108].mxu0 %vm1177_vm2, %v8487_v21  ;;  %v8509_v21 = vsel %vm6835_vm4, %v8506_v3, %v8508_v20  ;;  %v19734_v3 = vld [vmem:[#allocation11_spill] sm:$0xff] }
 0x292   : > { %14774 = vmatprep.mubr.msk.bf16.mxu0 %vm1177_vm2, %v8489_v11  ;;  %v9442_v11 = vrot.slane %v9440_v39, 2 }
 0x294   : > { %v9446_v33 = vor.u32 %v9445_v26, %v9442_v11  ;;  %v19736_v26 = vld [vmem:[#allocation12_spill] sm:$0xff] }
 0x296   : > { %14155 = vmatmul.mubr.msk.bf16.gmra.mrb[44].mxu1 %vm1177_vm2, %v2734_v23  ;;  %v9453_v23 = vrot.slane %v9451_v40, 3  ;;  %v2767_v40 = vrot.slane %v19735_v4, 1 }
 0x297   : > { %14158 = vmatprep.mubr.msk.bf16.mxu1 %vm1177_vm2, %v2736_v30  ;;  %v9457_v30 = vshrl.u32 %v17799_v15, 16 }
 0x299   : > { %14775 = vmatmul.mubr.msk.bf16.gmra.mrb[112].mxu0 %vm1177_vm2, %v8491_v59  ;;  %v9454_v59 = vor.u32 %v9453_v23, %v9450_v46  ;;  %v9459_v53 = vrot.slane %v9457_v30, 2  ;;  %v9511_v46 = vshrl.u32 %v19736_v26, 16  ;;  %v9514_v23 = vshll.u32 %v19736_v26, 16  ;;  %v19749_v26 = vld [vmem:[#allocation25_spill] sm:$0xff] }
 0x29a   : > { %14778 = vmatprep.mubr.msk.bf16.mxu0 %vm1177_vm2, %v8493_v50  ;;  %v8511_v50 = vsel %vm6835_vm4, %v8508_v20, %v8510_v9  ;;  %v19737_v9 = vld [vmem:[#allocation13_spill] sm:$0xff] }
 0x29b   : > { %v9455_v15 = vsel %vm9438_vm6, %v9446_v33, %v9454_v59  ;;  %v9523_v30 = vshll.u32 %v19737_v9, 16  ;;  %v9516_v24 = vrot.slane %v9514_v23, 3  ;;  %v9577_v23 = vshll.u32 %v19749_v26, 16 }
 0x29e   : > { %14159 = vmatmul.mubr.msk.bf16.gmra.mrb[48].mxu1 %vm1177_vm2, %v2738_v27  ;;  %v9462_v27 = vrot.slane %v9460_v17, 3  ;;  %v19738_v17 = vld [vmem:[#allocation15_spill] sm:$0xff] }
 0x29f   : > { %14162 = vmatprep.mubr.msk.bf16.mxu1 %vm1177_vm2, %v2740_v60  ;;  %v9468_v60 = vrot.slane %v9466_v38, 2  ;;  %v2769_v33 = vrot.slane %v19738_v17, 1  ;;  %v9513_v38 = vrot.slane %v9511_v46, 2  ;;  %v9574_v46 = vshrl.u32 %v19749_v26, 16 }
 0x2a0   : > { %v9463_v52 = vor.u32 %v9462_v27, %v9459_v53 }
 0x2a1   : > { %14779 = vmatmul.mubr.msk.bf16.gmra.mrb[116].mxu0 %vm1177_vm2, %v8495_v45  ;;  %v2760_v45 = vsel %vm2685_vm5, %v2757_v42, %v2759_v35  ;;  %v19739_v42 = vld [vmem:[#allocation18_spill] sm:$0xff] }
 0x2a2   : > { %14782 = vmatprep.mubr.msk.bf16.mxu0 %vm1177_vm2, %v8497_v57  ;;  %v9472_v57 = vor.u32 %v9471_v34, %v9468_v60  ;;  %v9464_v55 = vsel %vm9438_vm6, %v9454_v59, %v9463_v52  ;;  %v9517_v60 = vor.u32 %v9516_v24, %v9513_v38  ;;  %v9576_v24 = vrot.slane %v9574_v46, 2 }
 0x2a4   : > { %v9473_v63 = vsel %vm9438_vm6, %v9463_v52, %v9472_v57 }
 0x2a6   : > { %14163 = vmatmul.mubr.msk.bf16.gmra.mrb[52].mxu1 %vm1177_vm2, %v2742_v54  ;;  %v9487_v54 = vshll.u32 %v19729_v25, 16  ;;  %v19742_v25 = vld [vmem:[#allocation19_spill] sm:$0xff] }
 0x2a7   : > { %14166 = vmatprep.mubr.msk.bf16.mxu1 %vm1177_vm2, %v2744_v37  ;;  %v2761_v37 = vrot.slane %v19730_v51, 1 }
 0x2a8   : > { %v9489_v62 = vrot.slane %v9487_v54, 3 }
 0x2a9   : > { %14783 = vmatmul.mubr.msk.bf16.gmra.mrb[120].mxu0 %vm1177_vm2, %v8499_v47  ;;  %v9480_v47 = vrot.slane %v9478_v41, 3  ;;  %v2764_v16 = vsel %vm2685_vm5, %v2761_v37, %v2763_v31  ;;  %v9538_v41 = vshrl.u32 %v19741_v14, 16 }
 0x2aa   : > { %14786 = vmatprep.mubr.msk.bf16.mxu0 %vm1177_vm2, %v8501_v58  ;;  %v11328_v58 = vsel %vm1382_vm0, %v18124_v44, 0  ;;  %v19733_v44 = vld [vmem:[#allocation9_spill] sm:$0xff] }
 0x2ab   : > { %v9481_v7 = vor.u32 %v9480_v47, %v9477_v6  ;;  %v9540_v61 = vrot.slane %v9538_v41, 2 }
 0x2ad   : > { %v9482_v20 = vsel %vm9438_vm6, %v9472_v57, %v9481_v7  ;;  %v9541_v57 = vshll.u32 %v19741_v14, 16 }
 0x2ae   : > { %14167 = vmatmul.mubr.msk.bf16.gmra.mrb[56].mxu1 %vm1177_vm2, %v2746_v10  ;;  %v9486_v10 = vrot.slane %v9484_v18, 2  ;;  %v2773_v18 = vrot.slane %v19742_v25, 1 }
 0x2af   : > { %14170 = vmatprep.mubr.msk.bf16.mxu1 %vm1177_vm2, %v2748_v48  ;;  %v2762_v48 = vsel %vm2685_vm5, %v2759_v35, %v2761_v37  ;;  %v9525_v35 = vrot.slane %v9523_v30, 3 }
 0x2b0   : > { %v9490_v13 = vor.u32 %v9489_v62, %v9486_v10  ;;  %v19744_v62 = vld [vmem:[#allocation20_spill] sm:$0xff] }
 0x2b1   : > { %14787 = vmatmul.mubr.msk.bf16.gmra.mrb[124].mxu0 %vm1177_vm2, %v8503_v29  ;;  %v19732_v29 = vld [vmem:[#allocation8_spill] sm:$0xff] }
 0x2b2   : > { %14790 = vmatprep.mubr.msk.bf16.mxu0 %vm1177_vm2, %v8505_v0  ;;  %v9493_v49 = vshrl.u32 %v19732_v29, 16  ;;  %v9496_v1 = vshll.u32 %v19732_v29, 16  ;;  %v9502_v0 = vshrl.u32 %v19733_v44, 16  ;;  %v9491_v2 = vsel %vm9438_vm6, %v9481_v7, %v9490_v13  ;;  %v19745_v29 = vld [vmem:[#allocation21_spill] sm:$0xff] }
 0x2b3   : > { %v9550_v7 = vshll.u32 %v19744_v62, 16 }
 0x2b4   : > { %v9495_v39 = vrot.slane %v9493_v49, 2  ;;  %v9498_v32 = vrot.slane %v9496_v1, 3  ;;  %v9556_v49 = vshrl.u32 %v19745_v29, 16  ;;  %v9559_v1 = vshll.u32 %v19745_v29, 16 }
 0x2b6   : > { %14171 = vmatmul.mubr.msk.bf16.gmra.mrb[60].mxu1 %vm1177_vm2, %v2750_v8  ;;  %v9505_v8 = vshll.u32 %v19733_v44, 16  ;;  %v9499_v43 = vor.u32 %v9498_v32, %v9495_v39  ;;  %v9558_v32 = vrot.slane %v9556_v49, 2  ;;  %v9561_v4 = vrot.slane %v9559_v1, 3 }
 0x2b7   : > { %14174 = vmatprep.mubr.msk.bf16.mxu1 %vm1177_vm2, %v2752_v19  ;;  %v2765_v19 = vrot.slane %v19734_v3, 1  ;;  %v9552_v3 = vrot.slane %v9550_v7, 3 }
 0x2b8   : > { %v9500_v59 = vsel %vm9438_vm6, %v9490_v13, %v9499_v43  ;;  %v19746_v13 = vld [vmem:[#allocation23_spill] sm:$0xff] }
 0x2b9   : > { %14791 = vmatmul.mubr.msk.bf16.gmra.mrb[128].mxu0 %vm1177_vm2, %v8507_v28  ;;  %v9504_v28 = vrot.slane %v9502_v0, 2  ;;  %v2766_v36 = vsel %vm2685_vm5, %v2763_v31, %v2765_v19  ;;  %v2768_v11 = vsel %vm2685_vm5, %v2765_v19, %v2767_v40  ;;  %v9543_v31 = vrot.slane %v9541_v57, 3  ;;  %v19747_v19 = vld [vmem:[#allocation26_spill] sm:$0xff] }
 0x2ba   : > { %14794 = vmatprep.mubr.msk.bf16.mxu0 %vm1177_vm2, %v8509_v21  ;;  %v9507_v21 = vrot.slane %v9505_v8, 3  ;;  %v2777_v44 = vrot.slane %v19746_v13, 1 }
 0x2be   : > { %14175 = vmatmul.mubr.msk.bf16.gmra.mrb[64].mxu1 %vm1177_vm2, %v2754_v56  ;;  %v9508_v56 = vor.u32 %v9507_v21, %v9504_v28  ;;  %v19748_v21 = vld [vmem:[#allocation24_spill] sm:$0xff] }
 0x2bf   : > { %14178 = vmatprep.mubr.msk.bf16.mxu1 %vm1177_vm2, %v2756_v5  ;;  %v9520_v5 = vshrl.u32 %v19737_v9, 16 }
 0x2c0   : > { %v9509_v53 = vsel %vm9438_vm6, %v9499_v43, %v9508_v56  ;;  %v9518_v54 = vsel %vm9438_vm6, %v9508_v56, %v9517_v60  ;;  %v9568_v43 = vshll.u32 %v19748_v21, 16  ;;  %v19750_v56 = vld [vmem:[#allocation27_spill] sm:$0xff] }
 0x2c1   : > { %14795 = vmatmul.mubr.msk.bf16.gmra.mrb[132].mxu0 %vm1177_vm2, %v8511_v50  ;;  %v2771_v50 = vrot.slane %v19739_v42, 1  ;;  %v9522_v27 = vrot.slane %v9520_v5, 2  ;;  %v2781_v9 = vrot.slane %v19750_v56, 1  ;;  %v9579_v42 = vrot.slane %v9577_v23, 3 }
 0x2c2   : > { %14800 = vmatprep.mubr.msk.bf16.mxu0 %vm1177_vm2, %v9455_v15  ;;  %v2770_v15 = vsel %vm2685_vm5, %v2767_v40, %v2769_v33  ;;  %v9570_v17 = vrot.slane %v9568_v43, 3 }
 0x2c3   : > { %v2772_v34 = vsel %vm2685_vm5, %v2769_v33, %v2771_v50  ;;  %v9526_v12 = vor.u32 %v9525_v35, %v9522_v27  ;;  %v19751_v33 = vld [vmem:[#allocation30_spill] sm:$0xff]  ;;  %v19752_v35 = vld [vmem:[#allocation28_spill] sm:$0xff] }
 0x2c5   : > { %v9527_v47 = vsel %vm9438_vm6, %v9517_v60, %v9526_v12  ;;  %v9586_v60 = vshll.u32 %v19752_v35, 16 }
 0x2c6   : > { %14179 = vmatmul.mubr.msk.bf16.gmra.mrb[68].mxu1 %vm1177_vm2, %v2758_v22  ;;  %v19740_v22 = vld [vmem:[#allocation16_spill] sm:$0xff] }
 0x2c7   : > { %14182 = vmatprep.mubr.msk.bf16.mxu1 %vm1177_vm2, %v2760_v45  ;;  %v9529_v52 = vshrl.u32 %v19740_v22, 16  ;;  %v9532_v45 = vshll.u32 %v19740_v22, 16  ;;  %v19753_v22 = vld [vmem:[#allocation29_spill] sm:$0xff]  ;;  %v9588_v25 = vrot.slane %v9586_v60, 3 }
 0x2c9   : > { %14801 = vmatmul.mubr.msk.bf16.vlgmr.msra.gmra.mrb[0].mxu0 %vm1177_vm2, %v9464_v55  ;;  %v9531_v51 = vrot.slane %v9529_v52, 2  ;;  %v9534_v37 = vrot.slane %v9532_v45, 3  ;;  %v19743_v55 = vld [vmem:[#allocation22_spill] sm:$0xff]  ;;  %v9592_v52 = vshrl.u32 %v19753_v22, 16  ;;  %v9595_v45 = vshll.u32 %v19753_v22, 16 }
 0x2ca   : > { %14937 = vmatpush3.bf16.msra.mxu0 %v11328_v58  ;;  %14804 = vmatprep.mubr.msk.bf16.mxu0 %vm1177_vm2, %v9473_v63  ;;  %v2775_v6 = vrot.slane %v19743_v55, 1  ;;  %v2774_v58 = vsel %vm2685_vm5, %v2771_v50, %v2773_v18 }
 0x2cb   : > { %v9535_v63 = vor.u32 %v9534_v37, %v9531_v51  ;;  %v9594_v37 = vrot.slane %v9592_v52, 2  ;;  %v9597_v55 = vrot.slane %v9595_v45, 3 }
 0x2cc   : > { %v2776_v10 = vsel %vm2685_vm5, %v2773_v18, %v2775_v6  ;;  %v2778_v40 = vsel %vm2685_vm5, %v2775_v6, %v2777_v44  ;;  %v19755_v18 = vld [vmem:[#allocation34_spill] sm:$0xff] }
 0x2cd   : > { %v9536_v0 = vsel %vm9438_vm6, %v9526_v12, %v9535_v63  ;;  %v19754_v12 = vld [vmem:[#allocation31_spill] sm:$0xff] }
 0x2ce   : > { %14183 = vmatmul.mubr.msk.bf16.gmra.mrb[72].mxu1 %vm1177_vm2, %v2762_v48  ;;  %v9547_v48 = vshrl.u32 %v19744_v62, 16  ;;  %v2785_v14 = vrot.slane %v19754_v12, 1  ;;  %v19757_v62 = vld [vmem:[#allocation33_spill] sm:$0xff] }
 0x2cf   : > { %14186 = vmatprep.mubr.msk.bf16.mxu1 %vm1177_vm2, %v2764_v16  ;;  %v9544_v16 = vor.u32 %v9543_v31, %v9540_v61  ;;  %v19756_v31 = vld [vmem:[#allocation32_spill] sm:$0xff]  ;;  %v9613_v7 = vshll.u32 %v19757_v62, 16 }
 0x2d0   : > { %v9549_v8 = vrot.slane %v9547_v48, 2  ;;  %v9610_v48 = vshrl.u32 %v19757_v62, 16 }
 0x2d1   : > { %14805 = vmatmul.mubr.msk.bf16.gmra.mrb[4].mxu0 %vm1177_vm2, %v9482_v20  ;;  %v2779_v20 = vrot.slane %v19747_v19, 1  ;;  %v9545_v39 = vsel %vm9438_vm6, %v9535_v63, %v9544_v16  ;;  %v9604_v63 = vshll.u32 %v19756_v31, 16  ;;  %v9615_v19 = vrot.slane %v9613_v7, 3 }
 0x2d2   : > { %14808 = vmatprep.mubr.msk.bf16.mxu0 %vm1177_vm2, %v9491_v2  ;;  %v9553_v2 = vor.u32 %v9552_v3, %v9549_v8  ;;  %v9612_v3 = vrot.slane %v9610_v48, 2 }
 0x2d3   : > { %v2780_v28 = vsel %vm2685_vm5, %v2777_v44, %v2779_v20  ;;  %v2782_v50 = vsel %vm2685_vm5, %v2779_v20, %v2781_v9  ;;  %v9606_v13 = vrot.slane %v9604_v63, 3  ;;  %v19759_v44 = vld [vmem:[#allocation36_spill] sm:$0xff] }
 0x2d4   : > { %v9554_v5 = vsel %vm9438_vm6, %v9544_v16, %v9553_v2  ;;  %v19758_v16 = vld [vmem:[#allocation35_spill] sm:$0xff] }
 0x2d5   : > { %v2789_v29 = vrot.slane %v19758_v16, 1 }
 0x2d6   : > { %14187 = vmatmul.mubr.msk.bf16.gmra.mrb[76].mxu1 %vm1177_vm2, %v2766_v36  ;;  %v9565_v36 = vshrl.u32 %v19748_v21, 16  ;;  %v16763_v21 = vld [vmem:[%s17019_s22 + $0xc8] sm:$0xff]  }
 0x2d7   : > { %14190 = vmatprep.mubr.msk.bf16.mxu1 %vm1177_vm2, %v2768_v11  ;;  %v9562_v11 = vor.u32 %v9561_v4, %v9558_v32  ;;  %v16762_v4 = vld [vmem:[%s17019_s22 + $0xc0] sm:$0xff]   ;;  %v9631_v43 = vshll.u32 %v16763_v21, 16 }
 0x2d8   : > { %v9567_v30 = vrot.slane %v9565_v36, 2  ;;  %v9628_v36 = vshrl.u32 %v16763_v21, 16 }
 0x2d9   : > { %14809 = vmatmul.mubr.msk.bf16.gmra.mrb[8].mxu0 %vm1177_vm2, %v9500_v59  ;;  %v2783_v59 = vrot.slane %v19751_v33, 1  ;;  %v9563_v38 = vsel %vm9438_vm6, %v9553_v2, %v9562_v11  ;;  %v9622_v2 = vshll.u32 %v16762_v4, 16  ;;  %v9633_v33 = vrot.slane %v9631_v43, 3 }
 0x2da   : > { %14812 = vmatprep.mubr.msk.bf16.mxu0 %vm1177_vm2, %v9509_v53  ;;  %v9571_v53 = vor.u32 %v9570_v17, %v9567_v30  ;;  %v9630_v17 = vrot.slane %v9628_v36, 2 }
 0x2db   : > { %v2784_v27 = vsel %vm2685_vm5, %v2781_v9, %v2783_v59  ;;  %v2786_v6 = vsel %vm2685_vm5, %v2783_v59, %v2785_v14  ;;  %v9624_v56 = vrot.slane %v9622_v2, 3  ;;  %v19760_v9 = vld [vmem:[#allocation37_spill] sm:$0xff] }
 0x2dc   : > { %v9572_v41 = vsel %vm9438_vm6, %v9562_v11, %v9571_v53  ;;  %v16764_v11 = vld [vmem:[%s17019_s22 + $0x1b0] sm:$0xff]  }
 0x2dd   : > { %v2793_v26 = vrot.slane %v16764_v11, 1 }
 0x2de   : > { %14191 = vmatmul.mubr.msk.bf16.gmra.mrb[80].mxu1 %vm1177_vm2, %v2770_v15  ;;  %v9583_v15 = vshrl.u32 %v19752_v35, 16  ;;  %v16766_v35 = vld [vmem:[%s17019_s22 + $0xd8] sm:$0xff]  }
 0x2df   : > { %14194 = vmatprep.mubr.msk.bf16.mxu1 %vm1177_vm2, %v2772_v34  ;;  %v9580_v34 = vor.u32 %v9579_v42, %v9576_v24  ;;  %v16765_v42 = vld [vmem:[%s17019_s22 + $0xd0] sm:$0xff]   ;;  %v9649_v60 = vshll.u32 %v16766_v35, 16 }
 0x2e0   : > { %v9585_v57 = vrot.slane %v9583_v15, 2  ;;  %v9646_v15 = vshrl.u32 %v16766_v35, 16 }
 0x2e1   : > { %14813 = vmatmul.mubr.msk.bf16.gmra.mrb[12].mxu0 %vm1177_vm2, %v9518_v54  ;;  %v2787_v54 = vrot.slane %v19755_v18, 1  ;;  %v9581_v51 = vsel %vm9438_vm6, %v9571_v53, %v9580_v34  ;;  %v9640_v53 = vshll.u32 %v16765_v42, 16  ;;  %v9651_v18 = vrot.slane %v9649_v60, 3 }
 0x2e2   : > { %14816 = vmatprep.mubr.msk.bf16.mxu0 %vm1177_vm2, %v9527_v47  ;;  %v9589_v47 = vor.u32 %v9588_v25, %v9585_v57  ;;  %v9648_v25 = vrot.slane %v9646_v15, 2 }
 0x2e3   : > { %v2788_v61 = vsel %vm2685_vm5, %v2785_v14, %v2787_v54  ;;  %v2790_v20 = vsel %vm2685_vm5, %v2787_v54, %v2789_v29  ;;  %v9642_v12 = vrot.slane %v9640_v53, 3  ;;  %v16768_v14 = vld [vmem:[%s17019_s22 + $0x1c8] sm:$0xff]  }
 0x2e4   : > { %v9590_v49 = vsel %vm9438_vm6, %v9580_v34, %v9589_v47  ;;  %v16767_v34 = vld [vmem:[%s17019_s22 + $0x1c0] sm:$0xff]  }
 0x2e5   : > { %v2797_v22 = vrot.slane %v16767_v34, 1 }
 0x2e6   : > { %14195 = vmatmul.mubr.msk.bf16.gmra.mrb[84].mxu1 %vm1177_vm2, %v2774_v58  ;;  %v9601_v58 = vshrl.u32 %v19756_v31, 16  ;;  %v16770_v31 = vld [vmem:[%s17019_s22 + $0xe8] sm:$0xff]  }
 0x2e7   : > { %14198 = vmatprep.mubr.msk.bf16.mxu1 %vm1177_vm2, %v2776_v10  ;;  %v9598_v10 = vor.u32 %v9597_v55, %v9594_v37  ;;  %v16769_v55 = vld [vmem:[%s17019_s22 + $0xe0] sm:$0xff]   ;;  %v9667_v63 = vshll.u32 %v16770_v31, 16 }
 0x2e8   : > { %v9603_v1 = vrot.slane %v9601_v58, 2  ;;  %v9664_v58 = vshrl.u32 %v16770_v31, 16 }
 0x2e9   : > { %14817 = vmatmul.mubr.msk.bf16.gmra.mrb[16].mxu0 %vm1177_vm2, %v9536_v0  ;;  %v2791_v0 = vrot.slane %v19759_v44, 1  ;;  %v9599_v8 = vsel %vm9438_vm6, %v9589_v47, %v9598_v10  ;;  %v9658_v47 = vshll.u32 %v16769_v55, 16  ;;  %v9669_v44 = vrot.slane %v9667_v63, 3 }
 0x2ea   : > { %14820 = vmatprep.mubr.msk.bf16.mxu0 %vm1177_vm2, %v9545_v39  ;;  %v9607_v39 = vor.u32 %v9606_v13, %v9603_v1  ;;  %v9666_v13 = vrot.slane %v9664_v58, 2 }
 0x2eb   : > { %v2792_v32 = vsel %vm2685_vm5, %v2789_v29, %v2791_v0  ;;  %v2794_v59 = vsel %vm2685_vm5, %v2791_v0, %v2793_v26  ;;  %v9660_v16 = vrot.slane %v9658_v47, 3  ;;  %v16772_v29 = vld [vmem:[%s17019_s22 + $0x1d8] sm:$0xff]  }
 0x2ec   : > { %v9608_v46 = vsel %vm9438_vm6, %v9598_v10, %v9607_v39  ;;  %v16771_v10 = vld [vmem:[%s17019_s22 + $0x1d0] sm:$0xff]  }
 0x2ed   : > { %v2801_v62 = vrot.slane %v16771_v10, 1 }
 0x2ee   : > { %14199 = vmatmul.mubr.msk.bf16.gmra.mrb[88].mxu1 %vm1177_vm2, %v2778_v40  ;;  %v9619_v40 = vshrl.u32 %v16762_v4, 16  ;;  %v16774_v4 = vld [vmem:[%s17019_s22 + $0xf8] sm:$0xff]  }
 0x2ef   : > { %14202 = vmatprep.mubr.msk.bf16.mxu1 %vm1177_vm2, %v2780_v28  ;;  %v9616_v28 = vor.u32 %v9615_v19, %v9612_v3  ;;  %v16773_v19 = vld [vmem:[%s17019_s22 + $0xf0] sm:$0xff]   ;;  %v9685_v2 = vshll.u32 %v16774_v4, 16 }
 0x2f0   : > { %v9621_v23 = vrot.slane %v9619_v40, 2  ;;  %v9682_v40 = vshrl.u32 %v16774_v4, 16 }
 0x2f1   : > { %14821 = vmatmul.mubr.msk.bf16.gmra.mrb[20].mxu0 %vm1177_vm2, %v9554_v5  ;;  %v2795_v5 = vrot.slane %v19760_v9, 1  ;;  %v9617_v30 = vsel %vm9438_vm6, %v9607_v39, %v9616_v28  ;;  %v9676_v39 = vshll.u32 %v16773_v19, 16  ;;  %v9687_v9 = vrot.slane %v9685_v2, 3 }
 0x2f2   : > { %14824 = vmatprep.mubr.msk.bf16.mxu0 %vm1177_vm2, %v9563_v38  ;;  %v9625_v38 = vor.u32 %v9624_v56, %v9621_v23  ;;  %v9684_v56 = vrot.slane %v9682_v40, 2 }
 0x2f3   : > { %v2796_v24 = vsel %vm2685_vm5, %v2793_v26, %v2795_v5  ;;  %v2798_v54 = vsel %vm2685_vm5, %v2795_v5, %v2797_v22  ;;  %v9678_v11 = vrot.slane %v9676_v39, 3  ;;  %v16776_v26 = vld [vmem:[%s17019_s22 + $0x1e8] sm:$0xff]  }
 0x2f4   : > { %v9626_v52 = vsel %vm9438_vm6, %v9616_v28, %v9625_v38  ;;  %v16775_v28 = vld [vmem:[%s17019_s22 + $0x1e0] sm:$0xff]  }
 0x2f5   : > { %v2805_v21 = vrot.slane %v16775_v28, 1 }
 0x2f6   : > { %14203 = vmatmul.mubr.msk.bf16.gmra.mrb[92].mxu1 %vm1177_vm2, %v2782_v50  ;;  %v9637_v50 = vshrl.u32 %v16765_v42, 16  ;;  %v16778_v42 = vld [vmem:[%s17019_s22 + $0x108] sm:$0xff]  }
 0x2f7   : > { %14206 = vmatprep.mubr.msk.bf16.mxu1 %vm1177_vm2, %v2784_v27  ;;  %v9634_v27 = vor.u32 %v9633_v33, %v9630_v17  ;;  %v16777_v33 = vld [vmem:[%s17019_s22 + $0x100] sm:$0xff]   ;;  %v9703_v53 = vshll.u32 %v16778_v42, 16 }
 0x2f8   : > { %v9639_v45 = vrot.slane %v9637_v50, 2  ;;  %v9700_v50 = vshrl.u32 %v16778_v42, 16  ;;  %v16791_v42 = vld [vmem:[%s17019_s22 + $0x220] ss:$0 sps:$4 sm:$0x11]  }
 0x2f9   : > { %14825 = vmatmul.mubr.msk.bf16.gmra.mrb[24].mxu0 %vm1177_vm2, %v9572_v41  ;;  %v2799_v41 = vrot.slane %v16768_v14, 1  ;;  %v9635_v57 = vsel %vm9438_vm6, %v9625_v38, %v9634_v27  ;;  %v9694_v38 = vshll.u32 %v16777_v33, 16  ;;  %v9705_v14 = vrot.slane %v9703_v53, 3 }
 0x2fa   : > { %14828 = vmatprep.mubr.msk.bf16.mxu0 %vm1177_vm2, %v9581_v51  ;;  %v9643_v51 = vor.u32 %v9642_v12, %v9639_v45  ;;  %v9702_v12 = vrot.slane %v9700_v50, 2  ;;  %v2821_v50 = vrot.slane %v16791_v42, 1 }
 0x2fb   : > { %v2800_v37 = vsel %vm2685_vm5, %v2797_v22, %v2799_v41  ;;  %v2802_v0 = vsel %vm2685_vm5, %v2799_v41, %v2801_v62  ;;  %v9696_v34 = vrot.slane %v9694_v38, 3  ;;  %v16780_v22 = vld [vmem:[%s17019_s22 + $0x1f8] sm:$0xff]  }
 0x2fc   : > { %v9644_v48 = vsel %vm9438_vm6, %v9634_v27, %v9643_v51  ;;  %v16779_v27 = vld [vmem:[%s17019_s22 + $0x1f0] sm:$0xff]  }
 0x2fd   : > { %v2809_v35 = vrot.slane %v16779_v27, 1 }
 0x2fe   : > { %14207 = vmatmul.mubr.msk.bf16.gmra.mrb[96].mxu1 %vm1177_vm2, %v2786_v6  ;;  %v9655_v6 = vshrl.u32 %v16769_v55, 16  ;;  %v16782_v55 = vld [vmem:[%s17019_s22 + $0x118] sm:$0xff]  }
 0x2ff   : > { %14210 = vmatprep.mubr.msk.bf16.mxu1 %vm1177_vm2, %v2788_v61  ;;  %v9652_v61 = vor.u32 %v9651_v18, %v9648_v25  ;;  %v16781_v18 = vld [vmem:[%s17019_s22 + $0x110] sm:$0xff]   ;;  %v9721_v47 = vshll.u32 %v16782_v55, 16 }
 0x300   : > { %v9657_v7 = vrot.slane %v9655_v6, 2  ;;  %v9718_v6 = vshrl.u32 %v16782_v55, 16 }
 0x301   : > { %14829 = vmatmul.mubr.msk.bf16.gmra.mrb[28].mxu0 %vm1177_vm2, %v9590_v49  ;;  %v2803_v49 = vrot.slane %v16772_v29, 1  ;;  %v9653_v1 = vsel %vm9438_vm6, %v9643_v51, %v9652_v61  ;;  %v9712_v51 = vshll.u32 %v16781_v18, 16  ;;  %v9723_v29 = vrot.slane %v9721_v47, 3 }
 0x302   : > { %14832 = vmatprep.mubr.msk.bf16.mxu0 %vm1177_vm2, %v9599_v8  ;;  %v9661_v8 = vor.u32 %v9660_v16, %v9657_v7  ;;  %v9720_v16 = vrot.slane %v9718_v6, 2  ;;  %v16795_v6 = vld [vmem:[%s17019_s22 + $0x20] sm:$0xff]  }
 0x303   : > { %v2804_v3 = vsel %vm2685_vm5, %v2801_v62, %v2803_v49  ;;  %v2806_v5 = vsel %vm2685_vm5, %v2803_v49, %v2805_v21  ;;  %v9714_v10 = vrot.slane %v9712_v51, 3  ;;  %v16784_v62 = vld [vmem:[%s17019_s22 + $0x208] sm:$0xff]   ;;  %v4228_v47 = vrot.slane %v16795_v6, 1 }
 0x304   : > { %v9662_v36 = vsel %vm9438_vm6, %v9652_v61, %v9661_v8  ;;  %v16783_v61 = vld [vmem:[%s17019_s22 + $0x200] sm:$0xff]   ;;  %v16794_v51 = vld [vmem:[%s17019_s22 + $0x148] sm:$0xff]  }
 0x305   : > { %v2813_v31 = vrot.slane %v16783_v61, 1  ;;  %v9775_v55 = vshll.u32 %v16794_v51, 16 }
 0x306   : > { %14211 = vmatmul.mubr.msk.bf16.gmra.mrb[100].mxu1 %vm1177_vm2, %v2790_v20  ;;  %v9673_v20 = vshrl.u32 %v16773_v19, 16  ;;  %v16786_v19 = vld [vmem:[%s17019_s22 + $0x128] sm:$0xff]  }
 0x307   : > { %14214 = vmatprep.mubr.msk.bf16.mxu1 %vm1177_vm2, %v2792_v32  ;;  %v9670_v32 = vor.u32 %v9669_v44, %v9666_v13  ;;  %v9739_v39 = vshll.u32 %v16786_v19, 16 }
 0x308   : > { %v9675_v43 = vrot.slane %v9673_v20, 2  ;;  %v9736_v20 = vshrl.u32 %v16786_v19, 16 }
 0x309   : > { %14833 = vmatmul.mubr.msk.bf16.gmra.mrb[32].mxu0 %vm1177_vm2, %v9608_v46  ;;  %v2807_v46 = vrot.slane %v16776_v26, 1  ;;  %v9671_v23 = vsel %vm9438_vm6, %v9661_v8, %v9670_v32  ;;  %v9741_v26 = vrot.slane %v9739_v39, 3  ;;  %v16799_v39 = vld [vmem:[%s17019_s22 + $0x30] sm:$0xff]  }
 0x30a   : > { %14836 = vmatprep.mubr.msk.bf16.mxu0 %vm1177_vm2, %v9617_v30  ;;  %v9679_v30 = vor.u32 %v9678_v11, %v9675_v43  ;;  %v9738_v11 = vrot.slane %v9736_v20, 2  ;;  %v19762_v20 = vld [vmem:[#allocation2_spill] sm:$0xff] }
 0x30b   : > { %v2808_v17 = vsel %vm2685_vm5, %v2805_v21, %v2807_v46  ;;  %v2810_v41 = vsel %vm2685_vm5, %v2807_v46, %v2809_v35  ;;  %v16788_v21 = vld [vmem:[%s17019_s22 + $0x218] sm:$0xff]  }
 0x30c   : > { %v9680_v15 = vsel %vm9438_vm6, %v9670_v32, %v9679_v30  ;;  %v16787_v32 = vld [vmem:[%s17019_s22 + $0x210] sm:$0xff]  }
 0x30d   : > { %v2817_v4 = vrot.slane %v16787_v32, 1  ;;  %v4232_v32 = vrot.slane %v16799_v39, 1 }
 0x30e   : > { %14215 = vmatmul.mubr.msk.bf16.gmra.mrb[104].mxu1 %vm1177_vm2, %v2794_v59  ;;  %v9691_v59 = vshrl.u32 %v16777_v33, 16  ;;  %v16790_v33 = vld [vmem:[%s17019_s22 + $0x138] sm:$0xff]  }
 0x30f   : > { %14218 = vmatprep.mubr.msk.bf16.mxu1 %vm1177_vm2, %v2796_v24  ;;  %v9688_v24 = vor.u32 %v9687_v9, %v9684_v56  ;;  %v16789_v9 = vld [vmem:[%s17019_s22 + $0x130] sm:$0xff]   ;;  %v9757_v38 = vshll.u32 %v16790_v33, 16 }
 0x310   : > { %v9693_v60 = vrot.slane %v9691_v59, 2  ;;  %v9754_v59 = vshrl.u32 %v16790_v33, 16 }
 0x311   : > { %14837 = vmatmul.mubr.msk.bf16.gmra.mrb[36].mxu0 %vm1177_vm2, %v9626_v52  ;;  %v2811_v52 = vrot.slane %v16780_v22, 1  ;;  %v9689_v45 = vsel %vm9438_vm6, %v9679_v30, %v9688_v24  ;;  %v9748_v30 = vshll.u32 %v16789_v9, 16 }
 0x312   : > { %14840 = vmatprep.mubr.msk.bf16.mxu0 %vm1177_vm2, %v9635_v57  ;;  %v9697_v57 = vor.u32 %v9696_v34, %v9693_v60  ;;  %v16792_v60 = vld [vmem:[%s17019_s22 + $0x18] sm:$0xff]  }
 0x313   : > { %v2812_v25 = vsel %vm2685_vm5, %v2809_v35, %v2811_v52  ;;  %v2814_v49 = vsel %vm2685_vm5, %v2811_v52, %v2813_v31  ;;  %v9750_v27 = vrot.slane %v9748_v30, 3  ;;  %v19761_v35 = vld [vmem:[#allocation3_spill] sm:$0xff]  ;;  %v4226_v34 = vrot.slane %v16792_v60, 1 }
 0x314   : > { %v9698_v58 = vsel %vm9438_vm6, %v9688_v24, %v9697_v57  ;;  %v9756_v52 = vrot.slane %v9754_v59, 2 }
 0x316   : > { %14219 = vmatmul.mubr.msk.bf16.gmra.mrb[108].mxu1 %vm1177_vm2, %v2798_v54  ;;  %v9709_v54 = vshrl.u32 %v16781_v18, 16 }
 0x317   : > { %14222 = vmatprep.mubr.msk.bf16.mxu1 %vm1177_vm2, %v2800_v37  ;;  %v9706_v37 = vor.u32 %v9705_v14, %v9702_v12 }
 0x318   : > { %v9711_v63 = vrot.slane %v9709_v54, 2 }
 0x319   : > { %14841 = vmatmul.mubr.msk.bf16.gmra.mrb[40].mxu0 %vm1177_vm2, %v9644_v48  ;;  %v2815_v48 = vrot.slane %v16784_v62, 1  ;;  %v9707_v7 = vsel %vm9438_vm6, %v9697_v57, %v9706_v37  ;;  %v16793_v57 = vld [vmem:[%s17019_s22 + $0x140] sm:$0xff]  }
 0x31a   : > { %14844 = vmatprep.mubr.msk.bf16.mxu0 %vm1177_vm2, %v9653_v1  ;;  %v16785_v1 = vld [vmem:[%s17019_s22 + $0x120] sm:$0xff]   ;;  %v9766_v18 = vshll.u32 %v16793_v57, 16 }
 0x31b   : > { %v9727_v13 = vshrl.u32 %v16785_v1, 16  ;;  %v9730_v44 = vshll.u32 %v16785_v1, 16  ;;  %v2816_v8 = vsel %vm2685_vm5, %v2813_v31, %v2815_v48  ;;  %v2818_v46 = vsel %vm2685_vm5, %v2815_v48, %v2817_v4  ;;  %v16797_v1 = vld [vmem:[%s17019_s22 + $0x150] sm:$0xff]  }
 0x31d   : > { %v9729_v40 = vrot.slane %v9727_v13, 2  ;;  %v9732_v2 = vrot.slane %v9730_v44, 3  ;;  %v9781_v13 = vshrl.u32 %v16797_v1, 16  ;;  %v9784_v44 = vshll.u32 %v16797_v1, 16 }
 0x31e   : > { %14223 = vmatmul.mubr.msk.bf16.gmra.mrb[112].mxu1 %vm1177_vm2, %v2802_v0  ;;  %v9715_v0 = vor.u32 %v9714_v10, %v9711_v63  ;;  %v16796_v63 = vld [vmem:[%s17019_s22 + $0x28] sm:$0xff]  }
 0x31f   : > { %14226 = vmatprep.mubr.msk.bf16.mxu1 %vm1177_vm2, %v2804_v3  ;;  %v9724_v3 = vor.u32 %v9723_v29, %v9720_v16  ;;  %v4230_v10 = vrot.slane %v16796_v63, 1  ;;  %v4229_v16 = vsel %vm2685_vm5, %v4226_v34, %v4228_v47 }
 0x320   : > { %v9716_v28 = vsel %vm9438_vm6, %v9706_v37, %v9715_v0  ;;  %v9772_v37 = vshrl.u32 %v16794_v51, 16  ;;  %v16807_v51 = vld [vmem:[%s17019_s22 + $0x50] sm:$0xff]  }
 0x321   : > { %14845 = vmatmul.mubr.msk.bf16.gmra.mrb[44].mxu0 %vm1177_vm2, %v9662_v36  ;;  %v2819_v36 = vrot.slane %v16788_v21, 1  ;;  %v9725_v43 = vsel %vm9438_vm6, %v9715_v0, %v9724_v3 }
 0x322   : > { %14848 = vmatprep.mubr.msk.bf16.mxu0 %vm1177_vm2, %v9671_v23  ;;  %v9733_v23 = vor.u32 %v9732_v2, %v9729_v40  ;;  %v9774_v48 = vrot.slane %v9772_v37, 2  ;;  %v9783_v40 = vrot.slane %v9781_v13, 2  ;;  %v9786_v2 = vrot.slane %v9784_v44, 3  ;;  %v16810_v13 = vld [vmem:[%s17019_s22 + $0x188] sm:$0xff]  }
 0x323   : > { %v2820_v56 = vsel %vm2685_vm5, %v2817_v4, %v2819_v36  ;;  %v2822_v12 = vsel %vm2685_vm5, %v2819_v36, %v2821_v50  ;;  %v4240_v37 = vrot.slane %v16807_v51, 1  ;;  %v9844_v44 = vshrl.u32 %v16810_v13, 16 }
 0x324   : > { %v9734_v24 = vsel %vm9438_vm6, %v9724_v3, %v9733_v23 }
 0x326   : > { %14227 = vmatmul.mubr.msk.bf16.gmra.mrb[116].mxu1 %vm1177_vm2, %v2806_v5  ;;  %v9745_v5 = vshrl.u32 %v16789_v9, 16 }
 0x327   : > { %14230 = vmatprep.mubr.msk.bf16.mxu1 %vm1177_vm2, %v2808_v17  ;;  %v9742_v17 = vor.u32 %v9741_v26, %v9738_v11  ;;  %v4233_v26 = vsel %vm2685_vm5, %v4230_v10, %v4232_v32 }
 0x328   : > { %v9747_v53 = vrot.slane %v9745_v5, 2 }
 0x329   : > { %14849 = vmatmul.mubr.msk.bf16.gmra.mrb[48].mxu0 %vm1177_vm2, %v9680_v15  ;;  %v4225_v15 = vrot.slane %v19761_v35, 1  ;;  %v9743_v22 = vsel %vm9438_vm6, %v9733_v23, %v9742_v17 }
 0x32a   : > { %14852 = vmatprep.mubr.msk.bf16.mxu0 %vm1177_vm2, %v9689_v45  ;;  %v9759_v45 = vrot.slane %v9757_v38, 3  ;;  %v9751_v14 = vor.u32 %v9750_v27, %v9747_v53  ;;  %v16803_v38 = vld [vmem:[%s17019_s22 + $0x40] sm:$0xff]   ;;  %v16804_v27 = vld [vmem:[%s17019_s22 + $0x48] sm:$0xff]  }
 0x32b   : > { %v4238_v35 = vrot.slane %v16804_v27, 1 }
 0x32c   : > { %v9760_v54 = vor.u32 %v9759_v45, %v9756_v52  ;;  %v9752_v61 = vsel %vm9438_vm6, %v9742_v17, %v9751_v14  ;;  %v16802_v17 = vld [vmem:[%s17019_s22 + $0x168] sm:$0xff]  }
 0x32d   : > { %v9808_v33 = vshrl.u32 %v16802_v17, 16  ;;  %v9811_v59 = vshll.u32 %v16802_v17, 16 }
 0x32e   : > { %14231 = vmatmul.mubr.msk.bf16.gmra.mrb[120].mxu1 %vm1177_vm2, %v2810_v41  ;;  %v4227_v41 = vsel %vm2685_vm5, %v4225_v15, %v4226_v34  ;;  %v9761_v62 = vsel %vm9438_vm6, %v9751_v14, %v9760_v54 }
 0x32f   : > { %14234 = vmatprep.mubr.msk.bf16.mxu1 %vm1177_vm2, %v2812_v25  ;;  %v9763_v25 = vshrl.u32 %v16793_v57, 16  ;;  %v9810_v60 = vrot.slane %v9808_v33, 2  ;;  %v9813_v34 = vrot.slane %v9811_v59, 3 }
 0x331   : > { %14853 = vmatmul.mubr.msk.bf16.gmra.mrb[52].mxu0 %vm1177_vm2, %v9698_v58  ;;  %v9765_v31 = vrot.slane %v9763_v25, 2  ;;  %v9768_v58 = vrot.slane %v9766_v18, 3  ;;  %v9814_v57 = vor.u32 %v9813_v34, %v9810_v60  ;;  %v16806_v25 = vld [vmem:[%s17019_s22 + $0x178] sm:$0xff]   ;;  %v16817_v34 = vld [vmem:[%s17019_s22 + $0x1a0] sm:$0xff]  }
 0x332   : > { %14856 = vmatprep.mubr.msk.bf16.mxu0 %vm1177_vm2, %v9707_v7  ;;  %v9777_v7 = vrot.slane %v9775_v55, 3  ;;  %v9826_v18 = vshrl.u32 %v16806_v25, 16 }
 0x333   : > { %v9769_v29 = vor.u32 %v9768_v58, %v9765_v31 }
 0x334   : > { %v9778_v0 = vor.u32 %v9777_v7, %v9774_v48  ;;  %v9828_v63 = vrot.slane %v9826_v18, 2 }
 0x335   : > { %v9770_v4 = vsel %vm9438_vm6, %v9760_v54, %v9769_v29  ;;  %v9829_v54 = vshll.u32 %v16806_v25, 16 }
 0x336   : > { %14235 = vmatmul.mubr.msk.bf16.gmra.mrb[124].mxu1 %vm1177_vm2, %v2814_v49  ;;  %v4231_v49 = vsel %vm2685_vm5, %v4228_v47, %v4230_v10  ;;  %v9779_v36 = vsel %vm9438_vm6, %v9769_v29, %v9778_v0 }
 0x337   : > { %14238 = vmatprep.mubr.msk.bf16.mxu1 %vm1177_vm2, %v2816_v8  ;;  %v16798_v8 = vld [vmem:[%s17019_s22 + $0x158] sm:$0xff]   ;;  %v9831_v10 = vrot.slane %v9829_v54, 3 }
 0x338   : > { %v9790_v3 = vshrl.u32 %v16798_v8, 16  ;;  %v9793_v19 = vshll.u32 %v16798_v8, 16  ;;  %v16811_v8 = vld [vmem:[%s17019_s22 + $0x60] sm:$0xff]  }
 0x339   : > { %14857 = vmatmul.mubr.msk.bf16.gmra.mrb[56].mxu0 %vm1177_vm2, %v9716_v28  ;;  %v16800_v28 = vld [vmem:[%s17019_s22 + $0x38] sm:$0xff]   ;;  %v9832_v1 = vor.u32 %v9831_v10, %v9828_v63  ;;  %v16821_v10 = vld [vmem:[%s17019_s22 + $0x1b0] sm:$0xff]  }
 0x33a   : > { %14860 = vmatprep.mubr.msk.bf16.mxu0 %vm1177_vm2, %v9725_v43  ;;  %v4234_v21 = vrot.slane %v16800_v28, 1  ;;  %v9792_v43 = vrot.slane %v9790_v3, 2  ;;  %v9795_v11 = vrot.slane %v9793_v19, 3  ;;  %v4244_v3 = vrot.slane %v16811_v8, 1 }
 0x33c   : > { %v4235_v23 = vsel %vm2685_vm5, %v4232_v32, %v4234_v21  ;;  %v9796_v30 = vor.u32 %v9795_v11, %v9792_v43  ;;  %v16812_v32 = vld [vmem:[%s17019_s22 + $0x68] sm:$0xff]   ;;  %v16813_v11 = vld [vmem:[%s17019_s22 + $0x190] sm:$0xff]  }
 0x33e   : > { %14239 = vmatmul.mubr.msk.bf16.gmra.mrb[128].mxu1 %vm1177_vm2, %v2818_v46  ;;  %v9787_v46 = vor.u32 %v9786_v2, %v9783_v40  ;;  %v9846_v2 = vrot.slane %v9844_v44, 2 }
 0x33f   : > { %14242 = vmatprep.mubr.msk.bf16.mxu1 %vm1177_vm2, %v2820_v56  ;;  %v16801_v56 = vld [vmem:[%s17019_s22 + $0x160] sm:$0xff]  }
 0x340   : > { %v9799_v9 = vshrl.u32 %v16801_v56, 16  ;;  %v9802_v5 = vshll.u32 %v16801_v56, 16  ;;  %v9788_v42 = vsel %vm9438_vm6, %v9778_v0, %v9787_v46  ;;  %v9797_v15 = vsel %vm9438_vm6, %v9787_v46, %v9796_v30  ;;  %v16814_v56 = vld [vmem:[%s17019_s22 + $0x198] sm:$0xff]  }
 0x341   : > { %14861 = vmatmul.mubr.msk.bf16.gmra.mrb[60].mxu0 %vm1177_vm2, %v9734_v24  ;;  %v4236_v24 = vrot.slane %v16803_v38, 1  ;;  %v9847_v0 = vshll.u32 %v16810_v13, 16  ;;  %v9856_v46 = vshll.u32 %v16813_v11, 16 }
 0x342   : > { %14864 = vmatprep.mubr.msk.bf16.mxu0 %vm1177_vm2, %v9743_v22  ;;  %v9801_v50 = vrot.slane %v9799_v9, 2  ;;  %v9804_v53 = vrot.slane %v9802_v5, 3  ;;  %v9862_v9 = vshrl.u32 %v16814_v56, 16  ;;  %v9865_v5 = vshll.u32 %v16814_v56, 16 }
 0x343   : > { %v4237_v22 = vsel %vm2685_vm5, %v4234_v21, %v4236_v24  ;;  %v4239_v45 = vsel %vm2685_vm5, %v4236_v24, %v4238_v35  ;;  %v9849_v28 = vrot.slane %v9847_v0, 3  ;;  %v9858_v38 = vrot.slane %v9856_v46, 3  ;;  %v16816_v24 = vld [vmem:[%s17019_s22 + $0x78] sm:$0xff]  }
 0x344   : > { %v9805_v52 = vor.u32 %v9804_v53, %v9801_v50  ;;  %v9864_v53 = vrot.slane %v9862_v9, 2  ;;  %v9867_v27 = vrot.slane %v9865_v5, 3 }
 0x346   : > { %14243 = vmatmul.mubr.msk.bf16.gmra.mrb[132].mxu1 %vm1177_vm2, %v2822_v12  ;;  %v16805_v12 = vld [vmem:[%s17019_s22 + $0x170] sm:$0xff]   ;;  %v9806_v55 = vsel %vm9438_vm6, %v9796_v30, %v9805_v52  ;;  %v9815_v58 = vsel %vm9438_vm6, %v9805_v52, %v9814_v57  ;;  %v9874_v52 = vshll.u32 %v16817_v34, 16 }
 0x347   : > { %14248 = vmatprep.mubr.msk.bf16.mxu1 %vm1177_vm2, %v4227_v41  ;;  %v9817_v14 = vshrl.u32 %v16805_v12, 16  ;;  %v9820_v41 = vshll.u32 %v16805_v12, 16  ;;  %v16815_v30 = vld [vmem:[%s17019_s22 + $0x70] sm:$0xff]   ;;  %v16818_v12 = vld [vmem:[%s17019_s22 + $0x1a8] sm:$0xff]  }
 0x348   : > { %v4248_v17 = vrot.slane %v16815_v30, 1  ;;  %v9876_v51 = vrot.slane %v9874_v52, 3 }
 0x349   : > { %14865 = vmatmul.mubr.msk.bf16.gmra.mrb[64].mxu0 %vm1177_vm2, %v9752_v61  ;;  %v9819_v6 = vrot.slane %v9817_v14, 2  ;;  %v9822_v47 = vrot.slane %v9820_v41, 3  ;;  %v16808_v61 = vld [vmem:[%s17019_s22 + $0x58] sm:$0xff]   ;;  %v9880_v14 = vshrl.u32 %v16818_v12, 16  ;;  %v9883_v41 = vshll.u32 %v16818_v12, 16 }
 0x34a   : > { %14868 = vmatprep.mubr.msk.bf16.mxu0 %vm1177_vm2, %v9761_v62  ;;  %v4242_v31 = vrot.slane %v16808_v61, 1  ;;  %v4241_v62 = vsel %vm2685_vm5, %v4238_v35, %v4240_v37 }
 0x34b   : > { %v9823_v48 = vor.u32 %v9822_v47, %v9819_v6  ;;  %v9882_v47 = vrot.slane %v9880_v14, 2  ;;  %v9885_v61 = vrot.slane %v9883_v41, 3 }
 0x34c   : > { %v4243_v7 = vsel %vm2685_vm5, %v4240_v37, %v4242_v31  ;;  %v4245_v21 = vsel %vm2685_vm5, %v4242_v31, %v4244_v3  ;;  %v16820_v37 = vld [vmem:[%s17019_s22 + $0x88] sm:$0xff]  }
 0x34d   : > { %v9824_v19 = vsel %vm9438_vm6, %v9814_v57, %v9823_v48  ;;  %v9833_v40 = vsel %vm9438_vm6, %v9823_v48, %v9832_v1  ;;  %v16819_v57 = vld [vmem:[%s17019_s22 + $0x80] sm:$0xff]   ;;  %v9892_v48 = vshll.u32 %v16821_v10, 16 }
 0x34e   : > { %14249 = vmatmul.mubr.msk.bf16.vlgmr.msra.gmra.mrb[0].mxu1 %vm1177_vm2, %v4229_v16  ;;  %v16809_v16 = vld [vmem:[%s17019_s22 + $0x180] sm:$0xff]   ;;  %v4252_v25 = vrot.slane %v16819_v57, 1 }
 0x34f   : > { %15075 = vmatpush3.bf16.msra.mxu1 %v19762_v20  ;;  %14252 = vmatprep.mubr.msk.bf16.mxu1 %vm1177_vm2, %v4231_v49  ;;  %v9835_v29 = vshrl.u32 %v16809_v16, 16  ;;  %v9838_v49 = vshll.u32 %v16809_v16, 16  ;;  %v16822_v16 = vld [vmem:[%s17019_s22 + $0x1b8] sm:$0xff]   ;;  %v9894_v8 = vrot.slane %v9892_v48, 3 }
 0x351   : > { %14869 = vmatmul.mubr.msk.bf16.gmra.mrb[68].mxu0 %vm1177_vm2, %v9770_v4  ;;  %v9837_v20 = vrot.slane %v9835_v29, 2  ;;  %v9840_v39 = vrot.slane %v9838_v49, 3  ;;  %v4246_v4 = vrot.slane %v16812_v32, 1  ;;  %v9898_v29 = vshrl.u32 %v16822_v16, 16 }
 0x352   : > { %14872 = vmatprep.mubr.msk.bf16.mxu0 %vm1177_vm2, %v9779_v36  ;;  %v9901_v49 = vshll.u32 %v16822_v16, 16 }
 0x353   : > { %v9841_v36 = vor.u32 %v9840_v39, %v9837_v20  ;;  %v4247_v43 = vsel %vm2685_vm5, %v4244_v3, %v4246_v4  ;;  %v4249_v35 = vsel %vm2685_vm5, %v4246_v4, %v4248_v17  ;;  %v16824_v3 = vld [vmem:[%s17019_s22 + $0x98] sm:$0xff]   ;;  %v9900_v39 = vrot.slane %v9898_v29, 2 }
 0x354   : > { %v9903_v32 = vrot.slane %v9901_v49, 3 }
 0x355   : > { %v9842_v33 = vsel %vm9438_vm6, %v9832_v1, %v9841_v36  ;;  %v16823_v1 = vld [vmem:[%s17019_s22 + $0x90] sm:$0xff]  }
 0x356   : > { %14253 = vmatmul.mubr.msk.bf16.gmra.mrb[4].mxu1 %vm1177_vm2, %v4233_v26  ;;  %v9853_v26 = vshrl.u32 %v16813_v11, 16  ;;  %v4256_v13 = vrot.slane %v16823_v1, 1  ;;  %v16826_v11 = vld [vmem:[%s17019_s22 + $0x1c8] sm:$0xff]  }
 0x357   : > { %14256 = vmatprep.mubr.msk.bf16.mxu1 %vm1177_vm2, %v4235_v23  ;;  %v9850_v23 = vor.u32 %v9849_v28, %v9846_v2  ;;  %v16825_v28 = vld [vmem:[%s17019_s22 + $0x1c0] sm:$0xff]   ;;  %v9919_v46 = vshll.u32 %v16826_v11, 16 }
 0x358   : > { %v9855_v59 = vrot.slane %v9853_v26, 2  ;;  %v9916_v26 = vshrl.u32 %v16826_v11, 16 }
 0x359   : > { %14873 = vmatmul.mubr.msk.bf16.gmra.mrb[72].mxu0 %vm1177_vm2, %v9788_v42  ;;  %v4250_v42 = vrot.slane %v16816_v24, 1  ;;  %v9851_v50 = vsel %vm9438_vm6, %v9841_v36, %v9850_v23  ;;  %v9910_v36 = vshll.u32 %v16825_v28, 16  ;;  %v9921_v24 = vrot.slane %v9919_v46, 3 }
 0x35a   : > { %14876 = vmatprep.mubr.msk.bf16.mxu0 %vm1177_vm2, %v9797_v15  ;;  %v9859_v15 = vor.u32 %v9858_v38, %v9855_v59  ;;  %v9918_v38 = vrot.slane %v9916_v26, 2 }
 0x35b   : > { %v4251_v60 = vsel %vm2685_vm5, %v4248_v17, %v4250_v42  ;;  %v4253_v31 = vsel %vm2685_vm5, %v4250_v42, %v4252_v25  ;;  %v9912_v30 = vrot.slane %v9910_v36, 3  ;;  %v16828_v17 = vld [vmem:[%s17019_s22 + $0xa8] sm:$0xff]  }
 0x35c   : > { %v9860_v18 = vsel %vm9438_vm6, %v9850_v23, %v9859_v15  ;;  %v16827_v23 = vld [vmem:[%s17019_s22 + $0xa0] sm:$0xff]  }
 0x35d   : > { %v4260_v56 = vrot.slane %v16827_v23, 1 }
 0x35e   : > { %14257 = vmatmul.mubr.msk.bf16.gmra.mrb[8].mxu1 %vm1177_vm2, %v4237_v22  ;;  %v9871_v22 = vshrl.u32 %v16817_v34, 16  ;;  %v16830_v34 = vld [vmem:[%s17019_s22 + $0x1d8] sm:$0xff]  }
 0x35f   : > { %14260 = vmatprep.mubr.msk.bf16.mxu1 %vm1177_vm2, %v4239_v45  ;;  %v9868_v45 = vor.u32 %v9867_v27, %v9864_v53  ;;  %v16829_v27 = vld [vmem:[%s17019_s22 + $0x1d0] sm:$0xff]   ;;  %v9937_v52 = vshll.u32 %v16830_v34, 16 }
 0x360   : > { %v9873_v54 = vrot.slane %v9871_v22, 2  ;;  %v9934_v22 = vshrl.u32 %v16830_v34, 16 }
 0x361   : > { %14877 = vmatmul.mubr.msk.bf16.gmra.mrb[76].mxu0 %vm1177_vm2, %v9806_v55  ;;  %v4254_v55 = vrot.slane %v16820_v37, 1  ;;  %v9869_v6 = vsel %vm9438_vm6, %v9859_v15, %v9868_v45  ;;  %v9928_v15 = vshll.u32 %v16829_v27, 16  ;;  %v9939_v37 = vrot.slane %v9937_v52, 3 }
 0x362   : > { %14880 = vmatprep.mubr.msk.bf16.mxu0 %vm1177_vm2, %v9815_v58  ;;  %v9877_v58 = vor.u32 %v9876_v51, %v9873_v54  ;;  %v9936_v51 = vrot.slane %v9934_v22, 2 }
 0x363   : > { %v4255_v63 = vsel %vm2685_vm5, %v4252_v25, %v4254_v55  ;;  %v4257_v4 = vsel %vm2685_vm5, %v4254_v55, %v4256_v13  ;;  %v9930_v57 = vrot.slane %v9928_v15, 3  ;;  %v16832_v25 = vld [vmem:[%s17019_s22 + $0xb8] sm:$0xff]  }
 0x364   : > { %v9878_v44 = vsel %vm9438_vm6, %v9868_v45, %v9877_v58  ;;  %v16831_v45 = vld [vmem:[%s17019_s22 + $0xb0] sm:$0xff]  }
 0x365   : > { %v4264_v12 = vrot.slane %v16831_v45, 1 }
 0x366   : > { %14261 = vmatmul.mubr.msk.bf16.gmra.mrb[12].mxu1 %vm1177_vm2, %v4241_v62  ;;  %v9889_v62 = vshrl.u32 %v16821_v10, 16  ;;  %v16834_v10 = vld [vmem:[%s17019_s22 + $0x1e8] sm:$0xff]  }
 0x367   : > { %14264 = vmatprep.mubr.msk.bf16.mxu1 %vm1177_vm2, %v4243_v7  ;;  %v9886_v7 = vor.u32 %v9885_v61, %v9882_v47  ;;  %v16833_v61 = vld [vmem:[%s17019_s22 + $0x1e0] sm:$0xff]   ;;  %v9955_v48 = vshll.u32 %v16834_v10, 16 }
 0x368   : > { %v9891_v0 = vrot.slane %v9889_v62, 2  ;;  %v9952_v62 = vshrl.u32 %v16834_v10, 16 }
 0x369   : > { %14881 = vmatmul.mubr.msk.bf16.gmra.mrb[80].mxu0 %vm1177_vm2, %v9824_v19  ;;  %v4258_v19 = vrot.slane %v16824_v3, 1  ;;  %v9887_v20 = vsel %vm9438_vm6, %v9877_v58, %v9886_v7  ;;  %v9946_v58 = vshll.u32 %v16833_v61, 16  ;;  %v9957_v3 = vrot.slane %v9955_v48, 3 }
 0x36a   : > { %14884 = vmatprep.mubr.msk.bf16.mxu0 %vm1177_vm2, %v9833_v40  ;;  %v9895_v40 = vor.u32 %v9894_v8, %v9891_v0  ;;  %v9954_v8 = vrot.slane %v9952_v62, 2 }
 0x36b   : > { %v4259_v2 = vsel %vm2685_vm5, %v4256_v13, %v4258_v19  ;;  %v4261_v42 = vsel %vm2685_vm5, %v4258_v19, %v4260_v56  ;;  %v9948_v1 = vrot.slane %v9946_v58, 3  ;;  %v16836_v13 = vld [vmem:[%s17019_s22 + $0xc8] sm:$0xff]  }
 0x36c   : > { %v9896_v9 = vsel %vm9438_vm6, %v9886_v7, %v9895_v40  ;;  %v16835_v7 = vld [vmem:[%s17019_s22 + $0xc0] sm:$0xff]  }
 0x36d   : > { %v4268_v16 = vrot.slane %v16835_v7, 1 }
 0x36e   : > { %14265 = vmatmul.mubr.msk.bf16.gmra.mrb[16].mxu1 %vm1177_vm2, %v4245_v21  ;;  %v9907_v21 = vshrl.u32 %v16825_v28, 16  ;;  %v16838_v28 = vld [vmem:[%s17019_s22 + $0x1f8] sm:$0xff]  }
 0x36f   : > { %14268 = vmatprep.mubr.msk.bf16.mxu1 %vm1177_vm2, %v4247_v43  ;;  %v9904_v43 = vor.u32 %v9903_v32, %v9900_v39  ;;  %v16837_v32 = vld [vmem:[%s17019_s22 + $0x1f0] sm:$0xff]   ;;  %v9973_v36 = vshll.u32 %v16838_v28, 16 }
 0x370   : > { %v9909_v5 = vrot.slane %v9907_v21, 2  ;;  %v9970_v21 = vshrl.u32 %v16838_v28, 16 }
 0x371   : > { %14885 = vmatmul.mubr.msk.bf16.gmra.mrb[84].mxu0 %vm1177_vm2, %v9842_v33  ;;  %v4262_v33 = vrot.slane %v16828_v17, 1  ;;  %v9905_v59 = vsel %vm9438_vm6, %v9895_v40, %v9904_v43  ;;  %v9964_v40 = vshll.u32 %v16837_v32, 16  ;;  %v9975_v17 = vrot.slane %v9973_v36, 3 }
 0x372   : > { %14888 = vmatprep.mubr.msk.bf16.mxu0 %vm1177_vm2, %v9851_v50  ;;  %v9913_v50 = vor.u32 %v9912_v30, %v9909_v5  ;;  %v9972_v30 = vrot.slane %v9970_v21, 2 }
 0x373   : > { %v4263_v53 = vsel %vm2685_vm5, %v4260_v56, %v4262_v33  ;;  %v4265_v55 = vsel %vm2685_vm5, %v4262_v33, %v4264_v12  ;;  %v9966_v23 = vrot.slane %v9964_v40, 3  ;;  %v16840_v56 = vld [vmem:[%s17019_s22 + $0xd8] sm:$0xff]  }
 0x374   : > { %v9914_v14 = vsel %vm9438_vm6, %v9904_v43, %v9913_v50  ;;  %v16839_v43 = vld [vmem:[%s17019_s22 + $0xd0] sm:$0xff]  }
 0x375   : > { %v4272_v11 = vrot.slane %v16839_v43, 1 }
 0x376   : > { %14269 = vmatmul.mubr.msk.bf16.gmra.mrb[20].mxu1 %vm1177_vm2, %v4249_v35  ;;  %v9925_v35 = vshrl.u32 %v16829_v27, 16  ;;  %v16842_v27 = vld [vmem:[%s17019_s22 + $0x208] sm:$0xff]  }
 0x377   : > { %14272 = vmatprep.mubr.msk.bf16.mxu1 %vm1177_vm2, %v4251_v60  ;;  %v9922_v60 = vor.u32 %v9921_v24, %v9918_v38  ;;  %v16841_v24 = vld [vmem:[%s17019_s22 + $0x200] sm:$0xff]   ;;  %v9991_v15 = vshll.u32 %v16842_v27, 16 }
 0x378   : > { %v9927_v41 = vrot.slane %v9925_v35, 2  ;;  %v9988_v35 = vshrl.u32 %v16842_v27, 16 }
 0x379   : > { %14889 = vmatmul.mubr.msk.bf16.gmra.mrb[88].mxu0 %vm1177_vm2, %v9860_v18  ;;  %v4266_v18 = vrot.slane %v16832_v25, 1  ;;  %v9923_v54 = vsel %vm9438_vm6, %v9913_v50, %v9922_v60  ;;  %v9982_v50 = vshll.u32 %v16841_v24, 16  ;;  %v9993_v25 = vrot.slane %v9991_v15, 3 }
 0x37a   : > { %14892 = vmatprep.mubr.msk.bf16.mxu0 %vm1177_vm2, %v9869_v6  ;;  %v9931_v6 = vor.u32 %v9930_v57, %v9927_v41  ;;  %v9990_v57 = vrot.slane %v9988_v35, 2 }
 0x37b   : > { %v4267_v47 = vsel %vm2685_vm5, %v4264_v12, %v4266_v18  ;;  %v4269_v19 = vsel %vm2685_vm5, %v4266_v18, %v4268_v16  ;;  %v9984_v45 = vrot.slane %v9982_v50, 3  ;;  %v16844_v12 = vld [vmem:[%s17019_s22 + $0xe8] sm:$0xff]  }
 0x37c   : > { %v9932_v29 = vsel %vm9438_vm6, %v9922_v60, %v9931_v6  ;;  %v16843_v60 = vld [vmem:[%s17019_s22 + $0xe0] sm:$0xff]  }
 0x37d   : > { %v4276_v34 = vrot.slane %v16843_v60, 1 }
 0x37e   : > { %14273 = vmatmul.mubr.msk.bf16.gmra.mrb[24].mxu1 %vm1177_vm2, %v4253_v31  ;;  %v9943_v31 = vshrl.u32 %v16833_v61, 16  ;;  %v16846_v61 = vld [vmem:[%s17019_s22 + $0x218] sm:$0xff]  }
 0x37f   : > { %14276 = vmatprep.mubr.msk.bf16.mxu1 %vm1177_vm2, %v4255_v63  ;;  %v9940_v63 = vor.u32 %v9939_v37, %v9936_v51  ;;  %v16845_v37 = vld [vmem:[%s17019_s22 + $0x210] sm:$0xff]   ;;  %v10009_v58 = vshll.u32 %v16846_v61, 16 }
 0x380   : > { %v9945_v49 = vrot.slane %v9943_v31, 2  ;;  %v10006_v31 = vshrl.u32 %v16846_v61, 16 }
 0x381   : > { %14893 = vmatmul.mubr.msk.bf16.gmra.mrb[92].mxu0 %vm1177_vm2, %v9878_v44  ;;  %v4270_v44 = vrot.slane %v16836_v13, 1  ;;  %v9941_v0 = vsel %vm9438_vm6, %v9931_v6, %v9940_v63  ;;  %v10000_v6 = vshll.u32 %v16845_v37, 16  ;;  %v10011_v13 = vrot.slane %v10009_v58, 3  ;;  %v18736_v58 = vld [vmem:[%s17019_s22 + $0x128] sm:$0xff]  }
 0x382   : > { %14896 = vmatprep.mubr.msk.bf16.mxu0 %vm1177_vm2, %v9887_v20  ;;  %v9949_v20 = vor.u32 %v9948_v1, %v9945_v49  ;;  %v10008_v1 = vrot.slane %v10006_v31, 2 }
 0x383   : > { %v4271_v39 = vsel %vm2685_vm5, %v4268_v16, %v4270_v44  ;;  %v4273_v33 = vsel %vm2685_vm5, %v4270_v44, %v4272_v11  ;;  %v10002_v7 = vrot.slane %v10000_v6, 3  ;;  %v16848_v16 = vld [vmem:[%s17019_s22 + $0xf8] sm:$0xff]  }
 0x384   : > { %v9950_v26 = vsel %vm9438_vm6, %v9940_v63, %v9949_v20  ;;  %v16847_v63 = vld [vmem:[%s17019_s22 + $0xf0] sm:$0xff]  }
 0x385   : > { %v4280_v10 = vrot.slane %v16847_v63, 1  ;;  %v4294_v63 = vrot.slane %v18736_v58, 1 }
 0x386   : > { %14277 = vmatmul.mubr.msk.bf16.gmra.mrb[28].mxu1 %vm1177_vm2, %v4257_v4  ;;  %v9961_v4 = vshrl.u32 %v16837_v32, 16  ;;  %v16850_v32 = vld [vmem:[%s17019_s22 + $0x228] sm:$0xff]  }
 0x387   : > { %14280 = vmatprep.mubr.msk.bf16.mxu1 %vm1177_vm2, %v4259_v2  ;;  %v9958_v2 = vor.u32 %v9957_v3, %v9954_v8  ;;  %v16849_v3 = vld [vmem:[%s17019_s22 + $0x220] sm:$0xff]   ;;  %v10027_v40 = vshll.u32 %v16850_v32, 16 }
 0x388   : > { %v9963_v46 = vrot.slane %v9961_v4, 2  ;;  %v10024_v4 = vshrl.u32 %v16850_v32, 16  ;;  %v16863_v32 = vld [vmem:[%s17019_s22 + $0x30] sm:$0xff]  }
 0x389   : > { %14897 = vmatmul.mubr.msk.bf16.gmra.mrb[96].mxu0 %vm1177_vm2, %v9896_v9  ;;  %v4274_v9 = vrot.slane %v16840_v56, 1  ;;  %v9959_v5 = vsel %vm9438_vm6, %v9949_v20, %v9958_v2  ;;  %v10018_v20 = vshll.u32 %v16849_v3, 16  ;;  %v10029_v56 = vrot.slane %v10027_v40, 3 }
 0x38a   : > { %14900 = vmatprep.mubr.msk.bf16.mxu0 %vm1177_vm2, %v9905_v59  ;;  %v9967_v59 = vor.u32 %v9966_v23, %v9963_v46  ;;  %v10026_v23 = vrot.slane %v10024_v4, 2  ;;  %v10989_v4 = vrot.slane %v16863_v32, 3 }
 0x38b   : > { %v4275_v38 = vsel %vm2685_vm5, %v4272_v11, %v4274_v9  ;;  %v4277_v18 = vsel %vm2685_vm5, %v4274_v9, %v4276_v34  ;;  %v10020_v43 = vrot.slane %v10018_v20, 3  ;;  %v16852_v11 = vld [vmem:[%s17019_s22 + $0x108] sm:$0xff]  }
 0x38c   : > { %v9968_v22 = vsel %vm9438_vm6, %v9958_v2, %v9967_v59  ;;  %v16851_v2 = vld [vmem:[%s17019_s22 + $0x100] sm:$0xff]  }
 0x38d   : > { %v4284_v28 = vrot.slane %v16851_v2, 1  ;;  %v16864_v2 = vld [vmem:[%s17019_s22 + $0x38] sm:$0xff]  }
 0x38e   : > { %14281 = vmatmul.mubr.msk.bf16.gmra.mrb[32].mxu1 %vm1177_vm2, %v4261_v42  ;;  %v9979_v42 = vshrl.u32 %v16841_v24, 16  ;;  %v16854_v24 = vld [vmem:[%s17019_s22 + $0x238] sm:$0xff]  }
 0x38f   : > { %14284 = vmatprep.mubr.msk.bf16.mxu1 %vm1177_vm2, %v4263_v53  ;;  %v9976_v53 = vor.u32 %v9975_v17, %v9972_v30  ;;  %v16853_v17 = vld [vmem:[%s17019_s22 + $0x230] sm:$0xff]   ;;  %v10045_v50 = vshll.u32 %v16854_v24, 16 }
 0x390   : > { %v9981_v52 = vrot.slane %v9979_v42, 2  ;;  %v10042_v42 = vshrl.u32 %v16854_v24, 16  ;;  %v18790_v24 = vld [vmem:[%s17019_s22 + $0x158] sm:$0xff]  }
 0x391   : > { %14901 = vmatmul.mubr.msk.bf16.gmra.mrb[100].mxu0 %vm1177_vm2, %v9914_v14  ;;  %v4278_v14 = vrot.slane %v16844_v12, 1  ;;  %v9977_v41 = vsel %vm9438_vm6, %v9967_v59, %v9976_v53  ;;  %v10036_v59 = vshll.u32 %v16853_v17, 16 }
 0x392   : > { %14904 = vmatprep.mubr.msk.bf16.mxu0 %vm1177_vm2, %v9923_v54  ;;  %v9985_v54 = vor.u32 %v9984_v45, %v9981_v52  ;;  %v16393_v52 = vld [vmem:[%s17019_s22 + $0x240] ss:$0 sps:$4 sm:$0x77]   ;;  %v10044_v12 = vrot.slane %v10042_v42, 2  ;;  %v4306_v42 = vrot.slane %v18790_v24, 1 }
 0x393   : > { %v4279_v51 = vsel %vm2685_vm5, %v4276_v34, %v4278_v14  ;;  %v4281_v44 = vsel %vm2685_vm5, %v4278_v14, %v4280_v10  ;;  %v10038_v60 = vrot.slane %v10036_v59, 3  ;;  %v16856_v34 = vld [vmem:[%s17019_s22 + $0x118] sm:$0xff]   ;;  %v10047_v14 = vrot.slane %v10045_v50, 3 }
 0x394   : > { %v9986_v62 = vsel %vm9438_vm6, %v9976_v53, %v9985_v54  ;;  %v16855_v53 = vld [vmem:[%s17019_s22 + $0x110] sm:$0xff]  }
 0x395   : > { %v4288_v27 = vrot.slane %v16855_v53, 1 }
 0x396   : > { %14285 = vmatmul.mubr.msk.bf16.gmra.mrb[36].mxu1 %vm1177_vm2, %v4265_v55  ;;  %v9997_v55 = vshrl.u32 %v16845_v37, 16  ;;  %v10979_v37 = vld [vmem:[%s17019_s22 + $0x20] sm:$0x8] }
 0x397   : > { %14288 = vmatprep.mubr.msk.bf16.mxu1 %vm1177_vm2, %v4267_v47  ;;  %v9994_v47 = vor.u32 %v9993_v25, %v9990_v57 }
 0x398   : > { %v9999_v48 = vrot.slane %v9997_v55, 2  ;;  %v16857_v55 = vld [vmem:[%s17019_s22 + $0x120] sm:$0xff]  }
 0x399   : > { %14905 = vmatmul.mubr.msk.bf16.gmra.mrb[104].mxu0 %vm1177_vm2, %v9932_v29  ;;  %v4282_v29 = vrot.slane %v16848_v16, 1  ;;  %v9995_v49 = vsel %vm9438_vm6, %v9985_v54, %v9994_v47  ;;  %v10054_v54 = vshll.u32 %v16393_v52, 16  ;;  %v4292_v6 = vrot.slane %v16857_v55, 1  ;;  %v18821_v55 = vld [vmem:[%s17019_s22 + $0x170] sm:$0xff]  }
 0x39a   : > { %14908 = vmatprep.mubr.msk.bf16.mxu0 %vm1177_vm2, %v9941_v0  ;;  %v10003_v0 = vor.u32 %v10002_v7, %v9999_v48 }
 0x39b   : > { %v4283_v8 = vsel %vm2685_vm5, %v4280_v10, %v4282_v29  ;;  %v4285_v9 = vsel %vm2685_vm5, %v4282_v29, %v4284_v28  ;;  %v10056_v31 = vrot.slane %v10054_v54, 3  ;;  %v4295_v29 = vsel %vm2685_vm5, %v4292_v6, %v4294_v63 }
 0x39c   : > { %v10004_v21 = vsel %vm9438_vm6, %v9994_v47, %v10003_v0 }
 0x39e   : > { %14289 = vmatmul.mubr.msk.bf16.gmra.mrb[40].mxu1 %vm1177_vm2, %v4269_v19  ;;  %v10015_v19 = vshrl.u32 %v16849_v3, 16  ;;  %v18754_v3 = vld [vmem:[%s17019_s22 + $0x138] sm:$0xff]  }
 0x39f   : > { %14292 = vmatprep.mubr.msk.bf16.mxu1 %vm1177_vm2, %v4271_v39  ;;  %v10012_v39 = vor.u32 %v10011_v13, %v10008_v1  ;;  %v16860_v1 = vld [vmem:[%s17019_s22 + $0x28] sm:$0xff]  }
 0x3a0   : > { %v10017_v36 = vrot.slane %v10015_v19, 2  ;;  %v10987_v13 = vrot.slane %v16860_v1, 3  ;;  %v4298_v19 = vrot.slane %v18754_v3, 1 }
 0x3a1   : > { %14909 = vmatmul.mubr.msk.bf16.gmra.mrb[108].mxu0 %vm1177_vm2, %v9950_v26  ;;  %v4286_v26 = vrot.slane %v16852_v11, 1  ;;  %v10013_v46 = vsel %vm9438_vm6, %v10003_v0, %v10012_v39  ;;  %v18772_v11 = vld [vmem:[%s17019_s22 + $0x148] sm:$0xff]  }
 0x3a2   : > { %14912 = vmatprep.mubr.msk.bf16.mxu0 %vm1177_vm2, %v9959_v5  ;;  %v10021_v5 = vor.u32 %v10020_v43, %v10017_v36  ;;  %v10990_v43 = vsel %vm10985_vm7, %v10987_v13, %v10989_v4 }
 0x3a3   : > { %v4287_v30 = vsel %vm2685_vm5, %v4284_v28, %v4286_v26  ;;  %v10991_v28 = vrot.slane %v16864_v2, 3 }
 0x3a4   : > { %v10022_v35 = vsel %vm9438_vm6, %v10012_v39, %v10021_v5 }
 0x3a6   : > { %14293 = vmatmul.mubr.msk.bf16.gmra.mrb[44].mxu1 %vm1177_vm2, %v4273_v33  ;;  %v10033_v33 = vshrl.u32 %v16853_v17, 16 }
 0x3a7   : > { %14296 = vmatprep.mubr.msk.bf16.mxu1 %vm1177_vm2, %v4275_v38  ;;  %v10030_v38 = vor.u32 %v10029_v56, %v10026_v23  ;;  %v16867_v56 = vld [vmem:[%s17019_s22 + $0x40] sm:$0xff]  }
 0x3a8   : > { %v10035_v15 = vrot.slane %v10033_v33, 2  ;;  %v18785_v33 = vld [vmem:[%s17019_s22 + $0x150] sm:$0xff]  }
 0x3a9   : > { %14913 = vmatmul.mubr.msk.bf16.gmra.mrb[112].mxu0 %vm1177_vm2, %v9968_v22  ;;  %v4290_v22 = vrot.slane %v16856_v34, 1  ;;  %v10031_v45 = vsel %vm9438_vm6, %v10021_v5, %v10030_v38  ;;  %v4304_v59 = vrot.slane %v18785_v33, 1 }
 0x3aa   : > { %14916 = vmatprep.mubr.msk.bf16.mxu0 %vm1177_vm2, %v9977_v41  ;;  %v4289_v41 = vsel %vm2685_vm5, %v4286_v26, %v4288_v27  ;;  %v10039_v57 = vor.u32 %v10038_v60, %v10035_v15  ;;  %v4302_v26 = vrot.slane %v18772_v11, 1  ;;  %v16872_v60 = vld [vmem:[%s17019_s22 + $0x58] sm:$0xff]  }
 0x3ab   : > { %v4291_v25 = vsel %vm2685_vm5, %v4288_v27, %v4290_v22  ;;  %v4293_v7 = vsel %vm2685_vm5, %v4290_v22, %v4292_v6  ;;  %v16871_v27 = vld [vmem:[%s17019_s22 + $0x50] sm:$0xff]   ;;  %v4307_v15 = vsel %vm2685_vm5, %v4304_v59, %v4306_v42  ;;  %v10999_v34 = vrot.slane %v16872_v60, 3  ;;  %v18803_v22 = vld [vmem:[%s17019_s22 + $0x160] sm:$0xff]  }
 0x3ac   : > { %v10040_v47 = vsel %vm9438_vm6, %v10030_v38, %v10039_v57  ;;  %v4305_v53 = vsel %vm2685_vm5, %v4302_v26, %v4304_v59  ;;  %v4312_v6 = vrot.slane %v18821_v55, 1  ;;  %v16891_v60 = vld [vmem:[%s17019_s22 + $0xa0] sm:$0xff]  }
 0x3ae   : > { %14297 = vmatmul.mubr.msk.bf16.gmra.mrb[48].mxu1 %vm1177_vm2, %v4277_v18  ;;  %v10051_v18 = vshrl.u32 %v16393_v52, 16  ;;  %v4308_v52 = vrot.slane %v18803_v22, 1 }
 0x3af   : > { %14300 = vmatprep.mubr.msk.bf16.mxu1 %vm1177_vm2, %v4279_v51  ;;  %v10048_v51 = vor.u32 %v10047_v14, %v10044_v12  ;;  %v18808_v12 = vld [vmem:[%s17019_s22 + $0x168] sm:$0xff]  }
 0x3b0   : > { %v10053_v61 = vrot.slane %v10051_v18, 2  ;;  %v4310_v14 = vrot.slane %v18808_v12, 1 }
 0x3b1   : > { %14917 = vmatmul.mubr.msk.bf16.gmra.mrb[116].mxu0 %vm1177_vm2, %v9986_v62  ;;  %v10049_v10 = vsel %vm9438_vm6, %v10039_v57, %v10048_v51  ;;  %v16859_v62 = vld [vmem:[%s17019_s22 + $0x24] sm:$0xf]  ;;  %v4309_v57 = vsel %vm2685_vm5, %v4306_v42, %v4308_v52 }
 0x3b2   : > { %14920 = vmatprep.mubr.msk.bf16.mxu0 %vm1177_vm2, %v9995_v49  ;;  %v13140_v48 = vcombine.low %v10979_v37, %v16859_v62  ;;  %v10057_v16 = vor.u32 %v10056_v31, %v10053_v61  ;;  %v4311_v54 = vsel %vm2685_vm5, %v4308_v52, %v4310_v14  ;;  %v18826_v61 = vld [vmem:[%s17019_s22 + $0x178] sm:$0xff]   ;;  %v16879_v62 = vld [vmem:[%s17019_s22 + $0x70] sm:$0xff]  }
 0x3b3   : > { %v4314_v31 = vrot.slane %v18826_v61, 1 }
 0x3b4   : > { %v10986_v49 = vrot.slane %v13140_v48, 3  ;;  %v11005_v48 = vrot.slane %v16879_v62, 3  ;;  %v18911_v62 = vld [vmem:[%s17019_s22 + $0x1c0] sm:$0xff]  }
 0x3b6   : > { %14301 = vmatmul.mubr.msk.bf16.gmra.mrb[52].mxu1 %vm1177_vm2, %v4281_v44  ;;  %v18749_v44 = vld [vmem:[%s17019_s22 + $0x130] sm:$0xff]   ;;  %v10988_v20 = vsel %vm10985_vm7, %v10986_v49, %v10987_v13  ;;  %v18839_v49 = vld [vmem:[%s17019_s22 + $0x180] sm:$0xff]  }
 0x3b7   : > { %14304 = vmatprep.mubr.msk.bf16.mxu1 %vm1177_vm2, %v4283_v8  ;;  %v4296_v0 = vrot.slane %v18749_v44, 1  ;;  %v10058_v8 = vsel %vm9438_vm6, %v10048_v51, %v10057_v16  ;;  %v16876_v51 = vld [vmem:[%s17019_s22 + $0x68] sm:$0xff]   ;;  %v16880_v16 = vld [vmem:[%s17019_s22 + $0x78] sm:$0xff]   ;;  %v4316_v1 = vrot.slane %v18839_v49, 1 }
 0x3b8   : > { %v11003_v37 = vrot.slane %v16876_v51, 3 }
 0x3b9   : > { %14921 = vmatmul.mubr.msk.bf16.gmra.mrb[120].mxu0 %vm1177_vm2, %v10004_v21  ;;  %v4297_v39 = vsel %vm2685_vm5, %v4294_v63, %v4296_v0  ;;  %v4299_v40 = vsel %vm2685_vm5, %v4296_v0, %v4298_v19  ;;  %v18767_v21 = vld [vmem:[%s17019_s22 + $0x140] sm:$0xff]   ;;  %v18844_v0 = vld [vmem:[%s17019_s22 + $0x188] sm:$0xff]  }
 0x3ba   : > { %14924 = vmatprep.mubr.msk.bf16.mxu0 %vm1177_vm2, %v10013_v46  ;;  %v4300_v36 = vrot.slane %v18767_v21, 1  ;;  %v10992_v46 = vsel %vm10985_vm7, %v10989_v4, %v10991_v28  ;;  %v11006_v13 = vsel %vm10985_vm7, %v11003_v37, %v11005_v48 }
 0x3bc   : > { %v4301_v23 = vsel %vm2685_vm5, %v4298_v19, %v4300_v36  ;;  %v4303_v5 = vsel %vm2685_vm5, %v4300_v36, %v4302_v26  ;;  %v18862_v26 = vld [vmem:[%s17019_s22 + $0x198] sm:$0xff]  }
 0x3be   : > { %14305 = vmatmul.mubr.msk.bf16.gmra.mrb[56].mxu1 %vm1177_vm2, %v4285_v9  ;;  %v10993_v9 = vrot.slane %v16867_v56, 3 }
 0x3bf   : > { %14308 = vmatprep.mubr.msk.bf16.mxu1 %vm1177_vm2, %v4287_v30  ;;  %v16868_v30 = vld [vmem:[%s17019_s22 + $0x48] sm:$0xff]  }
 0x3c0   : > { %v10995_v17 = vrot.slane %v16868_v30, 3  ;;  %v10994_v38 = vsel %vm10985_vm7, %v10991_v28, %v10993_v9  ;;  %v18857_v28 = vld [vmem:[%s17019_s22 + $0x190] sm:$0xff]  }
 0x3c1   : > { %14925 = vmatmul.mubr.msk.bf16.gmra.mrb[124].mxu0 %vm1177_vm2, %v10022_v35  ;;  %v10997_v35 = vrot.slane %v16871_v27, 3  ;;  %v4320_v36 = vrot.slane %v18857_v28, 1 }
 0x3c2   : > { %14928 = vmatprep.mubr.msk.bf16.mxu0 %vm1177_vm2, %v10031_v45  ;;  %v10996_v50 = vsel %vm10985_vm7, %v10993_v9, %v10995_v17  ;;  %v16887_v9 = vld [vmem:[%s17019_s22 + $0x90] sm:$0xff]  }
 0x3c3   : > { %v10998_v45 = vsel %vm10985_vm7, %v10995_v17, %v10997_v35  ;;  %v16888_v17 = vld [vmem:[%s17019_s22 + $0x98] sm:$0xff]  }
 0x3c4   : > { %v11015_v59 = vrot.slane %v16888_v17, 3  ;;  %v16903_v17 = vld [vmem:[%s17019_s22 + $0xd0] sm:$0xff]  }
 0x3c6   : > { %14309 = vmatmul.mubr.msk.bf16.gmra.mrb[60].mxu1 %vm1177_vm2, %v4289_v41  ;;  %v11000_v41 = vsel %vm10985_vm7, %v10997_v35, %v10999_v34 }
 0x3c7   : > { %14312 = vmatprep.mubr.msk.bf16.mxu1 %vm1177_vm2, %v4291_v25  ;;  %v16875_v25 = vld [vmem:[%s17019_s22 + $0x60] sm:$0xff]  }
 0x3c8   : > { %v11001_v18 = vrot.slane %v16875_v25, 3 }
 0x3c9   : > { %14929 = vmatmul.mubr.msk.bf16.gmra.mrb[128].mxu0 %vm1177_vm2, %v10040_v47 }
 0x3ca   : > { %14932 = vmatprep.mubr.msk.bf16.mxu0 %vm1177_vm2, %v10049_v10  ;;  %v11002_v47 = vsel %vm10985_vm7, %v10999_v34, %v11001_v18  ;;  %v11004_v63 = vsel %vm10985_vm7, %v11001_v18, %v11003_v37  ;;  %v4313_v10 = vsel %vm2685_vm5, %v4310_v14, %v4312_v6  ;;  %v11017_v34 = vrot.slane %v16891_v60, 3  ;;  %v18898_v18 = vld [vmem:[%s17019_s22 + $0x1b8] sm:$0xff]  }
 0x3cc   : > { %v11018_v25 = vsel %vm10985_vm7, %v11015_v59, %v11017_v34 }
 0x3ce   : > { %14313 = vmatmul.mubr.msk.bf16.gmra.mrb[64].mxu1 %vm1177_vm2, %v4293_v7  ;;  %v4315_v7 = vsel %vm2685_vm5, %v4312_v6, %v4314_v31  ;;  %v16895_v6 = vld [vmem:[%s17019_s22 + $0xb0] sm:$0xff]  }
 0x3cf   : > { %14316 = vmatprep.mubr.msk.bf16.mxu1 %vm1177_vm2, %v4295_v29  ;;  %v11007_v29 = vrot.slane %v16880_v16, 3  ;;  %v18916_v16 = vld [vmem:[%s17019_s22 + $0x1c8] sm:$0xff]  }
 0x3d1   : > { %14933 = vmatmul.mubr.msk.bf16.gmra.mrb[132].mxu0 %vm1177_vm2, %v10058_v8  ;;  %v4318_v8 = vrot.slane %v18844_v0, 1  ;;  %v11008_v19 = vsel %vm10985_vm7, %v11005_v48, %v11007_v29  ;;  %v4332_v48 = vrot.slane %v18911_v62, 1 }
 0x3d2   : > { %14938 = vmatprep.mubr.msk.bf16.mxu0 %vm1177_vm2, %v10988_v20  ;;  %v4317_v20 = vsel %vm2685_vm5, %v4314_v31, %v4316_v1 }
 0x3d3   : > { %v4319_v4 = vsel %vm2685_vm5, %v4316_v1, %v4318_v8  ;;  %v4321_v56 = vsel %vm2685_vm5, %v4318_v8, %v4320_v36  ;;  %v16899_v8 = vld [vmem:[%s17019_s22 + $0xc0] sm:$0xff]  }
 0x3d6   : > { %14317 = vmatmul.mubr.msk.bf16.gmra.mrb[68].mxu1 %vm1177_vm2, %v4297_v39  ;;  %v16883_v39 = vld [vmem:[%s17019_s22 + $0x80] sm:$0xff]  }
 0x3d7   : > { %14320 = vmatprep.mubr.msk.bf16.mxu1 %vm1177_vm2, %v4299_v40  ;;  %v11009_v32 = vrot.slane %v16883_v39, 3  ;;  %v16884_v40 = vld [vmem:[%s17019_s22 + $0x88] sm:$0xff]  }
 0x3d8   : > { %v11011_v2 = vrot.slane %v16884_v40, 3  ;;  %v16900_v39 = vld [vmem:[%s17019_s22 + $0xc8] sm:$0xff]  }
 0x3d9   : > { %14939 = vmatmul.mubr.msk.bf16.vlgmr.msra.gmra.mrb[0].mxu0 %vm1177_vm2, %v10990_v43  ;;  %v11010_v43 = vsel %vm10985_vm7, %v11007_v29, %v11009_v32  ;;  %v4334_v29 = vrot.slane %v18916_v16, 1 }
 0x3da   : > { %14942 = vmatprep.mubr.msk.bf16.mxu0 %vm1177_vm2, %v10992_v46  ;;  %v4322_v46 = vrot.slane %v18862_v26, 1 }
 0x3dc   : > { %v4323_v30 = vsel %vm2685_vm5, %v4320_v36, %v4322_v46  ;;  %v18934_v36 = vld [vmem:[%s17019_s22 + $0x1d8] sm:$0xff]  }
 0x3de   : > { %14321 = vmatmul.mubr.msk.bf16.gmra.mrb[72].mxu1 %vm1177_vm2, %v4301_v23  ;;  %v11012_v23 = vsel %vm10985_vm7, %v11009_v32, %v11011_v2  ;;  %v11027_v32 = vrot.slane %v16900_v39, 3 }
 0x3df   : > { %14324 = vmatprep.mubr.msk.bf16.mxu1 %vm1177_vm2, %v4303_v5  ;;  %v11013_v5 = vrot.slane %v16887_v9, 3 }
 0x3e1   : > { %14943 = vmatmul.mubr.msk.bf16.gmra.mrb[4].mxu0 %vm1177_vm2, %v10994_v38  ;;  %v18875_v38 = vld [vmem:[%s17019_s22 + $0x1a0] sm:$0xff]   ;;  %v11016_v35 = vsel %vm10985_vm7, %v11013_v5, %v11015_v59  ;;  %v11029_v59 = vrot.slane %v16903_v17, 3 }
 0x3e2   : > { %14946 = vmatprep.mubr.msk.bf16.mxu0 %vm1177_vm2, %v10996_v50  ;;  %v4324_v42 = vrot.slane %v18875_v38, 1  ;;  %v11014_v50 = vsel %vm10985_vm7, %v11011_v2, %v11013_v5  ;;  %v19007_v17 = vld [vmem:[%s17019_s22 + $0x200] sm:$0xff]  }
 0x3e3   : > { %v11030_v60 = vsel %vm10985_vm7, %v11027_v32, %v11029_v59 }
 0x3e6   : > { %14325 = vmatmul.mubr.msk.bf16.gmra.mrb[76].mxu1 %vm1177_vm2, %v4305_v53  ;;  %v18880_v53 = vld [vmem:[%s17019_s22 + $0x1a8] sm:$0xff]  }
 0x3e7   : > { %14328 = vmatprep.mubr.msk.bf16.mxu1 %vm1177_vm2, %v4307_v15  ;;  %v4326_v27 = vrot.slane %v18880_v53, 1  ;;  %v4325_v15 = vsel %vm2685_vm5, %v4322_v46, %v4324_v42 }
 0x3e9   : > { %14947 = vmatmul.mubr.msk.bf16.gmra.mrb[8].mxu0 %vm1177_vm2, %v10998_v45  ;;  %v4327_v52 = vsel %vm2685_vm5, %v4324_v42, %v4326_v27  ;;  %v16892_v45 = vld [vmem:[%s17019_s22 + $0xa8] sm:$0xff]  }
 0x3ea   : > { %14950 = vmatprep.mubr.msk.bf16.mxu0 %vm1177_vm2, %v11000_v41  ;;  %v11019_v14 = vrot.slane %v16892_v45, 3  ;;  %v18893_v41 = vld [vmem:[%s17019_s22 + $0x1b0] sm:$0xff]  }
 0x3ec   : > { %v11020_v51 = vsel %vm10985_vm7, %v11017_v34, %v11019_v14  ;;  %v18960_v34 = vld [vmem:[%s17019_s22 + $0x1e8] sm:$0xff]  }
 0x3ee   : > { %14329 = vmatmul.mubr.msk.bf16.gmra.mrb[80].mxu1 %vm1177_vm2, %v4309_v57  ;;  %v4328_v57 = vrot.slane %v18893_v41, 1 }
 0x3ef   : > { %14332 = vmatprep.mubr.msk.bf16.mxu1 %vm1177_vm2, %v4311_v54  ;;  %v4330_v54 = vrot.slane %v18898_v18, 1 }
 0x3f0   : > { %v4329_v37 = vsel %vm2685_vm5, %v4326_v27, %v4328_v57 }
 0x3f1   : > { %14951 = vmatmul.mubr.msk.bf16.gmra.mrb[12].mxu0 %vm1177_vm2, %v11002_v47  ;;  %v11021_v47 = vrot.slane %v16895_v6, 3  ;;  %v4331_v31 = vsel %vm2685_vm5, %v4328_v57, %v4330_v54 }
 0x3f2   : > { %14954 = vmatprep.mubr.msk.bf16.mxu0 %vm1177_vm2, %v11004_v63  ;;  %v16896_v63 = vld [vmem:[%s17019_s22 + $0xb8] sm:$0xff]  }
 0x3f6   : > { %14333 = vmatmul.mubr.msk.bf16.gmra.mrb[84].mxu1 %vm1177_vm2, %v4313_v10  ;;  %v11023_v10 = vrot.slane %v16896_v63, 3 }
 0x3f7   : > { %14336 = vmatprep.mubr.msk.bf16.mxu1 %vm1177_vm2, %v4315_v7  ;;  %v11022_v7 = vsel %vm10985_vm7, %v11019_v14, %v11021_v47 }
 0x3f8   : > { %v11024_v1 = vsel %vm10985_vm7, %v11021_v47, %v11023_v10 }
 0x3f9   : > { %14955 = vmatmul.mubr.msk.bf16.gmra.mrb[16].mxu0 %vm1177_vm2, %v11006_v13  ;;  %v4333_v13 = vsel %vm2685_vm5, %v4330_v54, %v4332_v48 }
 0x3fa   : > { %14958 = vmatprep.mubr.msk.bf16.mxu0 %vm1177_vm2, %v11008_v19  ;;  %v11025_v19 = vrot.slane %v16899_v8, 3 }
 0x3fc   : > { %v11026_v2 = vsel %vm10985_vm7, %v11023_v10, %v11025_v19  ;;  %v18981_v10 = vld [vmem:[%s17019_s22 + $0x1f0] sm:$0xff]  }
 0x3fe   : > { %14337 = vmatmul.mubr.msk.bf16.gmra.mrb[88].mxu1 %vm1177_vm2, %v4317_v20  ;;  %v4335_v20 = vsel %vm2685_vm5, %v4332_v48, %v4334_v29  ;;  %v4344_v48 = vrot.slane %v18981_v10, 1 }
 0x3ff   : > { %14340 = vmatprep.mubr.msk.bf16.mxu1 %vm1177_vm2, %v4319_v4  ;;  %v18929_v4 = vld [vmem:[%s17019_s22 + $0x1d0] sm:$0xff]  }
 0x400   : > { %v4336_v40 = vrot.slane %v18929_v4, 1 }
 0x401   : > { %14959 = vmatmul.mubr.msk.bf16.gmra.mrb[20].mxu0 %vm1177_vm2, %v11010_v43  ;;  %v4338_v43 = vrot.slane %v18934_v36, 1 }
 0x402   : > { %14962 = vmatprep.mubr.msk.bf16.mxu0 %vm1177_vm2, %v11012_v23  ;;  %v11028_v23 = vsel %vm10985_vm7, %v11025_v19, %v11027_v32  ;;  %v4337_v5 = vsel %vm2685_vm5, %v4334_v29, %v4336_v40  ;;  %v18986_v29 = vld [vmem:[%s17019_s22 + $0x1f8] sm:$0xff]  }
 0x403   : > { %v4339_v42 = vsel %vm2685_vm5, %v4336_v40, %v4338_v43  ;;  %v16911_v40 = vld [vmem:[%s17019_s22 + $0xf0] sm:$0xff]  }
 0x406   : > { %14341 = vmatmul.mubr.msk.bf16.gmra.mrb[92].mxu1 %vm1177_vm2, %v4321_v56 }
 0x407   : > { %14344 = vmatprep.mubr.msk.bf16.mxu1 %vm1177_vm2, %v4323_v30 }
 0x409   : > { %14963 = vmatmul.mubr.msk.bf16.gmra.mrb[24].mxu0 %vm1177_vm2, %v11014_v50  ;;  %v16904_v50 = vld [vmem:[%s17019_s22 + $0xd8] sm:$0xff]  }
 0x40a   : > { %14966 = vmatprep.mubr.msk.bf16.mxu0 %vm1177_vm2, %v11016_v35  ;;  %v11031_v27 = vrot.slane %v16904_v50, 3  ;;  %v18955_v35 = vld [vmem:[%s17019_s22 + $0x1e0] sm:$0xff]   ;;  %v19012_v50 = vld [vmem:[%s17019_s22 + $0x208] sm:$0xff]  }
 0x40c   : > { %v11032_v14 = vsel %vm10985_vm7, %v11029_v59, %v11031_v27  ;;  %v4348_v59 = vrot.slane %v19007_v17, 1 }
 0x40e   : > { %14345 = vmatmul.mubr.msk.bf16.gmra.mrb[96].mxu1 %vm1177_vm2, %v4325_v15  ;;  %v4340_v15 = vrot.slane %v18955_v35, 1 }
 0x40f   : > { %14348 = vmatprep.mubr.msk.bf16.mxu1 %vm1177_vm2, %v4327_v52  ;;  %v4342_v52 = vrot.slane %v18960_v34, 1 }
 0x410   : > { %v4341_v54 = vsel %vm2685_vm5, %v4338_v43, %v4340_v15 }
 0x411   : > { %14967 = vmatmul.mubr.msk.bf16.gmra.mrb[28].mxu0 %vm1177_vm2, %v11018_v25  ;;  %v4343_v47 = vsel %vm2685_vm5, %v4340_v15, %v4342_v52  ;;  %v4345_v39 = vsel %vm2685_vm5, %v4342_v52, %v4344_v48 }
 0x412   : > { %14970 = vmatprep.mubr.msk.bf16.mxu0 %vm1177_vm2, %v11020_v51 }
 0x416   : > { %14349 = vmatmul.mubr.msk.bf16.gmra.mrb[100].mxu1 %vm1177_vm2, %v4329_v37  ;;  %v16907_v37 = vld [vmem:[%s17019_s22 + $0xe0] sm:$0xff]  }
 0x417   : > { %14352 = vmatprep.mubr.msk.bf16.mxu1 %vm1177_vm2, %v4331_v31  ;;  %v11033_v6 = vrot.slane %v16907_v37, 3  ;;  %v16908_v31 = vld [vmem:[%s17019_s22 + $0xe8] sm:$0xff]  }
 0x418   : > { %v11035_v63 = vrot.slane %v16908_v31, 3 }
 0x419   : > { %14971 = vmatmul.mubr.msk.bf16.gmra.mrb[32].mxu0 %vm1177_vm2, %v11022_v7  ;;  %v11034_v7 = vsel %vm10985_vm7, %v11031_v27, %v11033_v6  ;;  %v4350_v27 = vrot.slane %v19012_v50, 1 }
 0x41a   : > { %14974 = vmatprep.mubr.msk.bf16.mxu0 %vm1177_vm2, %v11024_v1  ;;  %v4346_v1 = vrot.slane %v18986_v29, 1  ;;  %v11036_v8 = vsel %vm10985_vm7, %v11033_v6, %v11035_v63  ;;  %v16915_v6 = vld [vmem:[%s17019_s22 + $0x100] sm:$0xff]  }
 0x41b   : > { %v4351_v31 = vsel %vm2685_vm5, %v4348_v59, %v4350_v27 }
 0x41c   : > { %v4347_v43 = vsel %vm2685_vm5, %v4344_v48, %v4346_v1 }
 0x41e   : > { %14353 = vmatmul.mubr.msk.bf16.gmra.mrb[104].mxu1 %vm1177_vm2, %v4333_v13 }
 0x41f   : > { %14356 = vmatprep.mubr.msk.bf16.mxu1 %vm1177_vm2, %v4335_v20 }
 0x421   : > { %v18937_v46 = vpop.f32.mrb[0].mxu1  ;;  %14975 = vmatmul.mubr.msk.bf16.gmra.mrb[36].mxu0 %vm1177_vm2, %v11026_v2  ;;  %v11037_v2 = vrot.slane %v16911_v40, 3 }
 0x422   : > { %v18940_v56 = vpop.f32.mrb[1].mxu1  ;;  %14978 = vmatprep.mubr.msk.bf16.mxu0 %vm1177_vm2, %v11028_v23  ;;  %v16912_v23 = vld [vmem:[%s17019_s22 + $0xf8] sm:$0xff]  }
 0x423   : > { %v18943_v9 = vpop.f32.mrb[2].mxu1 }
 0x424   : > { %v18946_v30 = vpop.f32.mrb[3].mxu1 }
 0x426   : > { %14357 = vmatmul.mubr.msk.bf16.gmra.mrb[108].mxu1 %vm1177_vm2, %v4337_v5  ;;  %v11039_v5 = vrot.slane %v16912_v23, 3 }
 0x427   : > { %14360 = vmatprep.mubr.msk.bf16.mxu1 %vm1177_vm2, %v4339_v42  ;;  %v11038_v42 = vsel %vm10985_vm7, %v11035_v63, %v11037_v2  ;;  %v16916_v63 = vld [vmem:[%s17019_s22 + $0x108] sm:$0xff]  }
 0x428   : > { %v11043_v48 = vrot.slane %v16916_v63, 3 }
 0x429   : > { %v18963_v45 = vpop.f32.mrb[4].mxu1  ;;  %14979 = vmatmul.mubr.msk.bf16.gmra.mrb[40].mxu0 %vm1177_vm2, %v11030_v60  ;;  %v11040_v60 = vsel %vm10985_vm7, %v11037_v2, %v11039_v5 }
 0x42a   : > { %v18966_v57 = vpop.f32.mrb[5].mxu1  ;;  %14982 = vmatprep.mubr.msk.bf16.mxu0 %vm1177_vm2, %v11032_v14 }
 0x42b   : > { %v18969_v25 = vpop.f32.mrb[6].mxu1 }
 0x42c   : > { %v18972_v51 = vpop.f32.mrb[7].mxu1 }
 0x42e   : > { %14361 = vmatmul.mubr.msk.bf16.gmra.mrb[112].mxu1 %vm1177_vm2, %v4341_v54  ;;  %v4349_v54 = vsel %vm2685_vm5, %v4346_v1, %v4348_v59 }
 0x42f   : > { %14364 = vmatprep.mubr.msk.bf16.mxu1 %vm1177_vm2, %v4343_v47  ;;  %v11041_v47 = vrot.slane %v16915_v6, 3 }
 0x431   : > { %v18989_v13 = vpop.f32.mrb[8].mxu1  ;;  %14983 = vmatmul.mubr.msk.bf16.gmra.mrb[44].mxu0 %vm1177_vm2, %v11034_v7  ;;  %v19033_v7 = vld [vmem:[%s17019_s22 + $0x210] sm:$0xff]  }
 0x432   : > { %v18992_v19 = vpop.f32.mrb[9].mxu1  ;;  %14986 = vmatprep.mubr.msk.bf16.mxu0 %vm1177_vm2, %v11036_v8  ;;  %v4352_v1 = vrot.slane %v19033_v7, 1  ;;  %v11042_v8 = vsel %vm10985_vm7, %v11039_v5, %v11041_v47  ;;  %v16919_v5 = vld [vmem:[%s17019_s22 + $0x110] sm:$0xff]  }
 0x433   : > { %v18995_v20 = vpop.f32.mrb[10].mxu1 }
 0x434   : > { %v18998_v32 = vpop.f32.mrb[11].mxu1 }
 0x436   : > { %14365 = vmatmul.mubr.msk.bf16.gmra.mrb[116].mxu1 %vm1177_vm2, %v4345_v39  ;;  %v19038_v39 = vld [vmem:[%s17019_s22 + $0x218] sm:$0xff]  }
 0x437   : > { %14368 = vmatprep.mubr.msk.bf16.mxu1 %vm1177_vm2, %v4347_v43  ;;  %v4354_v40 = vrot.slane %v19038_v39, 1  ;;  %v11044_v43 = vsel %vm10985_vm7, %v11041_v47, %v11043_v48  ;;  %v19059_v47 = vld [vmem:[%s17019_s22 + $0x220] sm:$0xff]  }
 0x438   : > { %19770 = vst [vmem:[#allocation14_spill] sm:$0xff] %v19059_v47 }
 0x439   : > { %v19015_v15 = vpop.f32.mrb[12].mxu1  ;;  %14987 = vmatmul.mubr.msk.bf16.gmra.mrb[48].mxu0 %vm1177_vm2, %v11038_v42  ;;  %v4353_v42 = vsel %vm2685_vm5, %v4350_v27, %v4352_v1  ;;  %v4355_v6 = vsel %vm2685_vm5, %v4352_v1, %v4354_v40  ;;  %v4356_v27 = vrot.slane %v19059_v47, 1  ;;  %v5604_v1 = vshrl.u32 %v18736_v58, 16 }
 0x43a   : > { %v19018_v52 = vpop.f32.mrb[13].mxu1  ;;  %14990 = vmatprep.mubr.msk.bf16.mxu0 %vm1177_vm2, %v11040_v60 }
 0x43b   : > { %19763 = vst [vmem:[#allocation5_spill] sm:$0xff] %v19018_v52  ;;  %v19021_v14 = vpop.f32.mrb[14].mxu1 }
 0x43c   : > { %19764 = vst [vmem:[#allocation6_spill] sm:$0xff] %v19021_v14  ;;  %v19024_v37 = vpop.f32.mrb[15].mxu1 }
 0x43d   : > { %19765 = vst [vmem:[#allocation7_spill] sm:$0xff] %v19024_v37  ;;  %v16923_v37 = vld [vmem:[%s17019_s22 + $0x120] sm:$0xff]  }
 0x43e   : > { %14369 = vmatmul.mubr.msk.bf16.gmra.mrb[120].mxu1 %vm1177_vm2, %v4349_v54  ;;  %v11045_v54 = vrot.slane %v16919_v5, 3  ;;  %v5607_v5 = vshll.u32 %v18736_v58, 16  ;;  %v11049_v14 = vrot.slane %v16923_v37, 3  ;;  %v5622_v37 = vshrl.u32 %v18754_v3, 16 }
 0x43f   : > { %14372 = vmatprep.mubr.msk.bf16.mxu1 %vm1177_vm2, %v4351_v31  ;;  %v16920_v31 = vld [vmem:[%s17019_s22 + $0x118] sm:$0xff]  }
 0x440   : > { %v11047_v63 = vrot.slane %v16920_v31, 3 }
 0x441   : > { %v19041_v2 = vpop.f32.mrb[16].mxu1  ;;  %14991 = vmatmul.mubr.msk.bf16.gmra.mrb[52].mxu0 %vm1177_vm2, %v11042_v8  ;;  %v11046_v8 = vsel %vm10985_vm7, %v11043_v48, %v11045_v54  ;;  %v4357_v48 = vsel %vm2685_vm5, %v4354_v40, %v4356_v27  ;;  %v5613_v40 = vshrl.u32 %v18749_v44, 16 }
 0x442   : > { %19766 = vst [vmem:[#allocation10_spill] sm:$0xff] %v19041_v2  ;;  %v19044_v23 = vpop.f32.mrb[17].mxu1  ;;  %14994 = vmatprep.mubr.msk.bf16.mxu0 %vm1177_vm2, %v11044_v43 }
 0x443   : > { %19767 = vst [vmem:[#allocation8_spill] sm:$0xff] %v19044_v23  ;;  %v19047_v59 = vpop.f32.mrb[18].mxu1  ;;  %v16395_v23 = vld [vmem:[%s17019_s22 + $0x230] ss:$0 sps:$4 sm:$0x11]  }
 0x444   : > { %19768 = vst [vmem:[#allocation9_spill] sm:$0xff] %v19047_v59  ;;  %v19050_v60 = vpop.f32.mrb[19].mxu1 }
 0x445   : > { %19769 = vst [vmem:[#allocation11_spill] sm:$0xff] %v19050_v60  ;;  %v19064_v60 = vld [vmem:[%s17019_s22 + $0x228] sm:$0xff]  }
 0x446   : > { %14373 = vmatmul.mubr.msk.bf16.gmra.mrb[124].mxu1 %vm1177_vm2, %v4353_v42  ;;  %19771 = vst [vmem:[#allocation12_spill] sm:$0xff] %v19064_v60  ;;  %v4358_v43 = vrot.slane %v19064_v60, 1  ;;  %v11048_v42 = vsel %vm10985_vm7, %v11045_v54, %v11047_v63  ;;  %v5609_v60 = vrot.slane %v5607_v5, 2  ;;  %v16924_v54 = vld [vmem:[%s17019_s22 + $0x128] sm:$0xff]  }
 0x447   : > { %14376 = vmatprep.mubr.msk.bf16.mxu1 %vm1177_vm2, %v4355_v6  ;;  %v11051_v52 = vrot.slane %v16924_v54, 3  ;;  %v19778_v54 = vld [vmem:[#allocation4_spill] sm:$0xff] }
 0x448   : > { %v4359_v58 = vsel %vm2685_vm5, %v4356_v27, %v4358_v43  ;;  %v5625_v27 = vshll.u32 %v18754_v3, 16  ;;  %v16925_v3 = vld [vmem:[%s17019_s22 + $0x130] sm:$0xff]  }
 0x449   : > { %v19069_v31 = vpop.f32.mrb[20].mxu1  ;;  %14995 = vmatmul.mubr.msk.bf16.gmra.mrb[56].mxu0 %vm1177_vm2, %v11046_v8  ;;  %v4360_v8 = vrot.slane %v16395_v23, 1  ;;  %v11052_v5 = vsel %vm10985_vm7, %v11049_v14, %v11051_v52 }
 0x44a   : > { %19772 = vst [vmem:[#allocation13_spill] sm:$0xff] %v19069_v31  ;;  %v19072_v6 = vpop.f32.mrb[21].mxu1  ;;  %14998 = vmatprep.mubr.msk.bf16.mxu0 %vm1177_vm2, %v11048_v42  ;;  %v5606_v31 = vrot.slane %v5604_v1, 1  ;;  %v11050_v42 = vsel %vm10985_vm7, %v11047_v63, %v11049_v14  ;;  %v5624_v14 = vrot.slane %v5622_v37, 1  ;;  %v5643_v37 = vshll.u32 %v18772_v11, 16 }
 0x44b   : > { %19773 = vst [vmem:[#allocation15_spill] sm:$0xff] %v19072_v6  ;;  %v19075_v59 = vpop.f32.mrb[22].mxu1  ;;  %v5627_v6 = vrot.slane %v5625_v27, 2 }
 0x44c   : > { %19774 = vst [vmem:[#allocation18_spill] sm:$0xff] %v19075_v59  ;;  %v19079_v2 = vpop.f32.mrb[23].mxu1  ;;  %v5610_v59 = vor.u32 %v5609_v60, %v5606_v31  ;;  %v11053_v31 = vrot.slane %v16925_v3, 3 }
 0x44d   : > { %19775 = vst [vmem:[#allocation16_spill] sm:$0xff] %v19079_v2  ;;  %v5616_v2 = vshll.u32 %v18749_v44, 16  ;;  %v4361_v44 = vsel %vm2685_vm5, %v4358_v43, %v4360_v8  ;;  %v5634_v8 = vshll.u32 %v18767_v21, 16 }
 0x44e   : > { %14377 = vmatmul.mubr.msk.bf16.gmra.mrb[128].mxu1 %vm1177_vm2, %v4357_v48 }
 0x44f   : > { %14380 = vmatprep.mubr.msk.bf16.mxu1 %vm1177_vm2, %v4359_v58  ;;  %v5615_v58 = vrot.slane %v5613_v40, 1  ;;  %v5618_v63 = vrot.slane %v5616_v2, 2  ;;  %v5631_v2 = vshrl.u32 %v18767_v21, 16  ;;  %v11054_v40 = vsel %vm10985_vm7, %v11051_v52, %v11053_v31 }
 0x450   : > { %v5636_v52 = vrot.slane %v5634_v8, 2 }
 0x451   : > { %v19092_v1 = vpop.f32.mrb[24].mxu1  ;;  %14999 = vmatmul.mubr.msk.bf16.gmra.mrb[60].mxu0 %vm1177_vm2, %v11050_v42  ;;  %v5619_v43 = vor.u32 %v5618_v63, %v5615_v58  ;;  %v5628_v42 = vor.u32 %v5627_v6, %v5624_v14  ;;  %v5633_v58 = vrot.slane %v5631_v2, 1  ;;  %v16928_v14 = vld [vmem:[%s17019_s22 + $0x148] sm:$0xff]   ;;  %v5652_v2 = vshll.u32 %v18785_v33, 16 }
 0x452   : > { %19776 = vst [vmem:[#allocation17_spill] sm:$0xff] %v19092_v1  ;;  %v19095_v48 = vpop.f32.mrb[25].mxu1  ;;  %15002 = vmatprep.mubr.msk.bf16.mxu0 %vm1177_vm2, %v11052_v5  ;;  %v5611_v1 = vsel %vm5288_vm3, %v19778_v54, %v5610_v59  ;;  %v5640_v5 = vshrl.u32 %v18772_v11, 16  ;;  %v16927_v11 = vld [vmem:[%s17019_s22 + $0x140] sm:$0xff]  }
 0x453   : > { %19777 = vst [vmem:[#allocation19_spill] sm:$0xff] %v19095_v48  ;;  %v19098_v23 = vpop.f32.mrb[26].mxu1  ;;  %v16926_v48 = vld [vmem:[%s17019_s22 + $0x138] sm:$0xff]   ;;  %v5620_v21 = vsel %vm5288_vm3, %v5610_v59, %v5619_v43  ;;  %v11057_v63 = vrot.slane %v16927_v11, 3  ;;  %v5629_v3 = vsel %vm5288_vm3, %v5619_v43, %v5628_v42  ;;  %v5649_v59 = vshrl.u32 %v18785_v33, 16 }
 0x454   : > { %v19101_v60 = vpop.f32.mrb[27].mxu1  ;;  %v11055_v47 = vrot.slane %v16926_v48, 3  ;;  %v5642_v54 = vrot.slane %v5640_v5, 1  ;;  %v5658_v11 = vshrl.u32 %v18790_v24, 16  ;;  %v5661_v43 = vshll.u32 %v18790_v24, 16  ;;  %v16929_v24 = vld [vmem:[%s17019_s22 + $0x150] sm:$0xff]  }
 0x456   : > { %14381 = vmatmul.mubr.msk.bf16.gmra.mrb[132].mxu1 %vm1177_vm2, %v4361_v44  ;;  %v11056_v48 = vsel %vm10985_vm7, %v11053_v31, %v11055_v47  ;;  %v5645_v31 = vrot.slane %v5643_v37, 2  ;;  %v11058_v8 = vsel %vm10985_vm7, %v11055_v47, %v11057_v63  ;;  %v5654_v47 = vrot.slane %v5652_v2, 2 }
 0x457   : > { %14454 = vmatprep.mubr.msk.bf16.mxu1 %vm1177_vm2, %v5611_v1 }
 0x459   : > { %v19115_v27 = vpop.f32.mrb[28].mxu1  ;;  %15003 = vmatmul.mubr.msk.bf16.gmra.mrb[64].mxu0 %vm1177_vm2, %v11054_v40  ;;  %v5637_v40 = vor.u32 %v5636_v52, %v5633_v58  ;;  %v5651_v52 = vrot.slane %v5649_v59, 1  ;;  %v5670_v59 = vshll.u32 %v18803_v22, 16 }
 0x45a   : > { %v19118_v44 = vpop.f32.mrb[29].mxu1  ;;  %15006 = vmatprep.mubr.msk.bf16.mxu0 %vm1177_vm2, %v11056_v48  ;;  %v5646_v48 = vor.u32 %v5645_v31, %v5642_v54  ;;  %v11061_v54 = vrot.slane %v16929_v24, 3  ;;  %v5676_v24 = vshrl.u32 %v18808_v12, 16 }
 0x45b   : > { %19779 = vst [vmem:[#allocation22_spill] sm:$0xff] %v19118_v44  ;;  %v19121_v1 = vpop.f32.mrb[30].mxu1  ;;  %v11059_v44 = vrot.slane %v16928_v14, 3  ;;  %v5638_v33 = vsel %vm5288_vm3, %v5628_v42, %v5637_v40  ;;  %v5660_v14 = vrot.slane %v5658_v11, 1  ;;  %v5667_v42 = vshrl.u32 %v18803_v22, 16 }
 0x45c   : > { %v19124_v6 = vpop.f32.mrb[31].mxu1  ;;  %v5647_v31 = vsel %vm5288_vm3, %v5637_v40, %v5646_v48  ;;  %v5679_v40 = vshll.u32 %v18808_v12, 16  ;;  %v16931_v12 = vld [vmem:[%s17019_s22 + $0x160] sm:$0xff]  }
 0x45d   : > { %v11060_v37 = vsel %vm10985_vm7, %v11057_v63, %v11059_v44  ;;  %v5663_v63 = vrot.slane %v5661_v43, 2  ;;  %v11062_v2 = vsel %vm10985_vm7, %v11059_v44, %v11061_v54  ;;  %v5672_v44 = vrot.slane %v5670_v59, 2 }
 0x45e   : > { %14455 = vmatmul.mubr.msk.bf16.vlgmr.msra.gmra.mrb[68].mxu1 %vm1177_vm2, %v5620_v21 }
 0x45f   : > { %14458 = vmatprep.mubr.msk.bf16.mxu1 %vm1177_vm2, %v5629_v3 }
 0x461   : > { %v19137_v5 = vpop.f32.mrb[32].mxu1  ;;  %15007 = vmatmul.mubr.msk.bf16.gmra.mrb[68].mxu0 %vm1177_vm2, %v11058_v8  ;;  %v5655_v8 = vor.u32 %v5654_v47, %v5651_v52  ;;  %v5669_v52 = vrot.slane %v5667_v42, 1  ;;  %v5688_v42 = vshll.u32 %v18821_v55, 16 }
 0x462   : > { %19780 = vst [vmem:[#allocation20_spill] sm:$0xff] %v19137_v5  ;;  %v19140_v21 = vpop.f32.mrb[33].mxu1  ;;  %15010 = vmatprep.mubr.msk.bf16.mxu0 %vm1177_vm2, %v11060_v37  ;;  %v16930_v5 = vld [vmem:[%s17019_s22 + $0x158] sm:$0xff]   ;;  %v5664_v37 = vor.u32 %v5663_v63, %v5660_v14  ;;  %v5678_v63 = vrot.slane %v5676_v24, 1 }
 0x463   : > { %19781 = vst [vmem:[#allocation21_spill] sm:$0xff] %v19140_v21  ;;  %v19143_v58 = vpop.f32.mrb[34].mxu1  ;;  %v11063_v21 = vrot.slane %v16930_v5, 3  ;;  %v5656_v22 = vsel %vm5288_vm3, %v5646_v48, %v5655_v8  ;;  %v5685_v48 = vshrl.u32 %v18821_v55, 16 }
 0x464   : > { %v19146_v3 = vpop.f32.mrb[35].mxu1  ;;  %v5665_v14 = vsel %vm5288_vm3, %v5655_v8, %v5664_v37  ;;  %v5697_v8 = vshll.u32 %v18826_v61, 16 }
 0x465   : > { %v11064_v43 = vsel %vm10985_vm7, %v11061_v54, %v11063_v21  ;;  %v5681_v54 = vrot.slane %v5679_v40, 2 }
 0x466   : > { %14459 = vmatmul.mubr.msk.bf16.gmra.mrb[72].mxu1 %vm1177_vm2, %v5638_v33 }
 0x467   : > { %14462 = vmatprep.mubr.msk.bf16.mxu1 %vm1177_vm2, %v5647_v31  ;;  %v11065_v31 = vrot.slane %v16931_v12, 3  ;;  %v5694_v12 = vshrl.u32 %v18826_v61, 16  ;;  %v16933_v61 = vld [vmem:[%s17019_s22 + $0x170] sm:$0xff]  }
 0x469   : > { %v19159_v11 = vpop.f32.mrb[36].mxu1  ;;  %15011 = vmatmul.mubr.msk.bf16.gmra.mrb[72].mxu0 %vm1177_vm2, %v11062_v2  ;;  %v5673_v2 = vor.u32 %v5672_v44, %v5669_v52  ;;  %v11066_v59 = vsel %vm10985_vm7, %v11063_v21, %v11065_v31  ;;  %v5687_v52 = vrot.slane %v5685_v48, 1  ;;  %v5690_v21 = vrot.slane %v5688_v42, 2 }
 0x46a   : > { %19782 = vst [vmem:[#allocation23_spill] sm:$0xff] %v19159_v11  ;;  %v19162_v5 = vpop.f32.mrb[37].mxu1  ;;  %15014 = vmatprep.mubr.msk.bf16.mxu0 %vm1177_vm2, %v11064_v43  ;;  %v16932_v11 = vld [vmem:[%s17019_s22 + $0x168] sm:$0xff]   ;;  %v5682_v43 = vor.u32 %v5681_v54, %v5678_v63  ;;  %v5696_v54 = vrot.slane %v5694_v12, 1  ;;  %v5706_v48 = vshll.u32 %v18839_v49, 16 }
 0x46b   : > { %19783 = vst [vmem:[#allocation26_spill] sm:$0xff] %v19162_v5  ;;  %v19165_v33 = vpop.f32.mrb[38].mxu1  ;;  %v11067_v5 = vrot.slane %v16932_v11, 3  ;;  %v5674_v55 = vsel %vm5288_vm3, %v5664_v37, %v5673_v2  ;;  %v5703_v37 = vshrl.u32 %v18839_v49, 16 }
 0x46c   : > { %v19168_v47 = vpop.f32.mrb[39].mxu1  ;;  %v5683_v63 = vsel %vm5288_vm3, %v5673_v2, %v5682_v43  ;;  %v5715_v2 = vshll.u32 %v18844_v0, 16 }
 0x46d   : > { %v11068_v40 = vsel %vm10985_vm7, %v11065_v31, %v11067_v5  ;;  %v5699_v31 = vrot.slane %v5697_v8, 2 }
 0x46e   : > { %14463 = vmatmul.mubr.msk.bf16.gmra.mrb[76].mxu1 %vm1177_vm2, %v5656_v22 }
 0x46f   : > { %14466 = vmatprep.mubr.msk.bf16.mxu1 %vm1177_vm2, %v5665_v14  ;;  %v11069_v14 = vrot.slane %v16933_v61, 3  ;;  %v5712_v61 = vshrl.u32 %v18844_v0, 16  ;;  %v16935_v0 = vld [vmem:[%s17019_s22 + $0x180] sm:$0xff]  }
 0x471   : > { %v19181_v24 = vpop.f32.mrb[40].mxu1  ;;  %15015 = vmatmul.mubr.msk.bf16.gmra.mrb[76].mxu0 %vm1177_vm2, %v11066_v59  ;;  %v5691_v59 = vor.u32 %v5690_v21, %v5687_v52  ;;  %v11070_v42 = vsel %vm10985_vm7, %v11067_v5, %v11069_v14  ;;  %v5705_v52 = vrot.slane %v5703_v37, 1  ;;  %v5708_v5 = vrot.slane %v5706_v48, 2 }
 0x472   : > { %19784 = vst [vmem:[#allocation24_spill] sm:$0xff] %v19181_v24  ;;  %v19184_v11 = vpop.f32.mrb[41].mxu1  ;;  %15018 = vmatprep.mubr.msk.bf16.mxu0 %vm1177_vm2, %v11068_v40  ;;  %v16934_v24 = vld [vmem:[%s17019_s22 + $0x178] sm:$0xff]   ;;  %v5700_v40 = vor.u32 %v5699_v31, %v5696_v54  ;;  %v5714_v31 = vrot.slane %v5712_v61, 1  ;;  %v5724_v37 = vshll.u32 %v18857_v28, 16 }
 0x473   : > { %19785 = vst [vmem:[#allocation25_spill] sm:$0xff] %v19184_v11  ;;  %v19187_v22 = vpop.f32.mrb[42].mxu1  ;;  %v11071_v11 = vrot.slane %v16934_v24, 3  ;;  %v5692_v49 = vsel %vm5288_vm3, %v5682_v43, %v5691_v59  ;;  %v5721_v43 = vshrl.u32 %v18857_v28, 16 }
 0x474   : > { %v19190_v44 = vpop.f32.mrb[43].mxu1  ;;  %v5701_v54 = vsel %vm5288_vm3, %v5691_v59, %v5700_v40  ;;  %v5733_v59 = vshll.u32 %v18862_v26, 16 }
 0x475   : > { %v11072_v8 = vsel %vm10985_vm7, %v11069_v14, %v11071_v11  ;;  %v5717_v14 = vrot.slane %v5715_v2, 2 }
 0x476   : > { %14467 = vmatmul.mubr.msk.bf16.gmra.mrb[80].mxu1 %vm1177_vm2, %v5674_v55 }
 0x477   : > { %14470 = vmatprep.mubr.msk.bf16.mxu1 %vm1177_vm2, %v5683_v63  ;;  %v11073_v63 = vrot.slane %v16935_v0, 3  ;;  %v5730_v0 = vshrl.u32 %v18862_v26, 16  ;;  %v16937_v26 = vld [vmem:[%s17019_s22 + $0x190] sm:$0xff]  }
 0x479   : > { %v19203_v12 = vpop.f32.mrb[44].mxu1  ;;  %15019 = vmatmul.mubr.msk.bf16.gmra.mrb[80].mxu0 %vm1177_vm2, %v11070_v42  ;;  %v5709_v42 = vor.u32 %v5708_v5, %v5705_v52  ;;  %v11074_v48 = vsel %vm10985_vm7, %v11071_v11, %v11073_v63  ;;  %v5723_v52 = vrot.slane %v5721_v43, 1  ;;  %v5726_v11 = vrot.slane %v5724_v37, 2 }
 0x47a   : > { %19786 = vst [vmem:[#allocation27_spill] sm:$0xff] %v19203_v12  ;;  %v19206_v24 = vpop.f32.mrb[45].mxu1  ;;  %15022 = vmatprep.mubr.msk.bf16.mxu0 %vm1177_vm2, %v11072_v8  ;;  %v16936_v12 = vld [vmem:[%s17019_s22 + $0x188] sm:$0xff]   ;;  %v5718_v8 = vor.u32 %v5717_v14, %v5714_v31  ;;  %v5732_v14 = vrot.slane %v5730_v0, 1  ;;  %v5742_v43 = vshll.u32 %v18875_v38, 16 }
 0x47b   : > { %19787 = vst [vmem:[#allocation30_spill] sm:$0xff] %v19206_v24  ;;  %v19209_v55 = vpop.f32.mrb[46].mxu1  ;;  %v11075_v24 = vrot.slane %v16936_v12, 3  ;;  %v5710_v28 = vsel %vm5288_vm3, %v5700_v40, %v5709_v42  ;;  %v5739_v40 = vshrl.u32 %v18875_v38, 16 }
 0x47c   : > { %v19212_v21 = vpop.f32.mrb[47].mxu1  ;;  %v5719_v31 = vsel %vm5288_vm3, %v5709_v42, %v5718_v8  ;;  %v5751_v42 = vshll.u32 %v18880_v53, 16 }
 0x47d   : > { %v11076_v2 = vsel %vm10985_vm7, %v11073_v63, %v11075_v24  ;;  %v5735_v63 = vrot.slane %v5733_v59, 2 }
 0x47e   : > { %14471 = vmatmul.mubr.msk.bf16.gmra.mrb[84].mxu1 %vm1177_vm2, %v5692_v49 }
 0x47f   : > { %14474 = vmatprep.mubr.msk.bf16.mxu1 %vm1177_vm2, %v5701_v54  ;;  %v11077_v54 = vrot.slane %v16937_v26, 3  ;;  %v5748_v26 = vshrl.u32 %v18880_v53, 16  ;;  %v16939_v53 = vld [vmem:[%s17019_s22 + $0x1a0] sm:$0xff]  }
 0x481   : > { %v19225_v61 = vpop.f32.mrb[48].mxu1  ;;  %15023 = vmatmul.mubr.msk.bf16.gmra.mrb[84].mxu0 %vm1177_vm2, %v11074_v48  ;;  %v5727_v48 = vor.u32 %v5726_v11, %v5723_v52  ;;  %v11078_v37 = vsel %vm10985_vm7, %v11075_v24, %v11077_v54  ;;  %v5741_v52 = vrot.slane %v5739_v40, 1  ;;  %v5744_v24 = vrot.slane %v5742_v43, 2 }
 0x482   : > { %19788 = vst [vmem:[#allocation28_spill] sm:$0xff] %v19225_v61  ;;  %v19228_v12 = vpop.f32.mrb[49].mxu1  ;;  %15026 = vmatprep.mubr.msk.bf16.mxu0 %vm1177_vm2, %v11076_v2  ;;  %v16938_v61 = vld [vmem:[%s17019_s22 + $0x198] sm:$0xff]   ;;  %v5736_v2 = vor.u32 %v5735_v63, %v5732_v14  ;;  %v5750_v63 = vrot.slane %v5748_v26, 1  ;;  %v5760_v40 = vshll.u32 %v18893_v41, 16 }
 0x483   : > { %19789 = vst [vmem:[#allocation29_spill] sm:$0xff] %v19228_v12  ;;  %v19231_v49 = vpop.f32.mrb[50].mxu1  ;;  %v11079_v12 = vrot.slane %v16938_v61, 3  ;;  %v5728_v38 = vsel %vm5288_vm3, %v5718_v8, %v5727_v48  ;;  %v5757_v8 = vshrl.u32 %v18893_v41, 16 }
 0x484   : > { %v19234_v5 = vpop.f32.mrb[51].mxu1  ;;  %v5737_v14 = vsel %vm5288_vm3, %v5727_v48, %v5736_v2  ;;  %v5769_v48 = vshll.u32 %v18898_v18, 16 }
 0x485   : > { %v11080_v59 = vsel %vm10985_vm7, %v11077_v54, %v11079_v12  ;;  %v5753_v54 = vrot.slane %v5751_v42, 2 }
 0x486   : > { %14475 = vmatmul.mubr.msk.bf16.gmra.mrb[88].mxu1 %vm1177_vm2, %v5710_v28 }
 0x487   : > { %14478 = vmatprep.mubr.msk.bf16.mxu1 %vm1177_vm2, %v5719_v31  ;;  %v11081_v31 = vrot.slane %v16939_v53, 3  ;;  %v5766_v53 = vshrl.u32 %v18898_v18, 16  ;;  %v16941_v18 = vld [vmem:[%s17019_s22 + $0x1b0] sm:$0xff]  }
 0x489   : > { %v19247_v0 = vpop.f32.mrb[52].mxu1  ;;  %15027 = vmatmul.mubr.msk.bf16.gmra.mrb[88].mxu0 %vm1177_vm2, %v11078_v37  ;;  %v5745_v37 = vor.u32 %v5744_v24, %v5741_v52  ;;  %v11082_v43 = vsel %vm10985_vm7, %v11079_v12, %v11081_v31  ;;  %v5759_v52 = vrot.slane %v5757_v8, 1  ;;  %v5762_v12 = vrot.slane %v5760_v40, 2 }
 0x48a   : > { %19790 = vst [vmem:[#allocation31_spill] sm:$0xff] %v19247_v0  ;;  %v19250_v61 = vpop.f32.mrb[53].mxu1  ;;  %15030 = vmatprep.mubr.msk.bf16.mxu0 %vm1177_vm2, %v11080_v59  ;;  %v16940_v0 = vld [vmem:[%s17019_s22 + $0x1a8] sm:$0xff]   ;;  %v5754_v59 = vor.u32 %v5753_v54, %v5750_v63  ;;  %v5768_v54 = vrot.slane %v5766_v53, 1  ;;  %v5778_v8 = vshll.u32 %v18911_v62, 16 }
 0x48b   : > { %19791 = vst [vmem:[#allocation34_spill] sm:$0xff] %v19250_v61  ;;  %v19253_v28 = vpop.f32.mrb[54].mxu1  ;;  %v11083_v61 = vrot.slane %v16940_v0, 3  ;;  %v5746_v41 = vsel %vm5288_vm3, %v5736_v2, %v5745_v37  ;;  %v5775_v2 = vshrl.u32 %v18911_v62, 16 }
 0x48c   : > { %v19256_v11 = vpop.f32.mrb[55].mxu1  ;;  %v5755_v63 = vsel %vm5288_vm3, %v5745_v37, %v5754_v59  ;;  %v5787_v37 = vshll.u32 %v18916_v16, 16 }
 0x48d   : > { %v11084_v42 = vsel %vm10985_vm7, %v11081_v31, %v11083_v61  ;;  %v5771_v31 = vrot.slane %v5769_v48, 2 }
 0x48e   : > { %14479 = vmatmul.mubr.msk.bf16.gmra.mrb[92].mxu1 %vm1177_vm2, %v5728_v38 }
 0x48f   : > { %14482 = vmatprep.mubr.msk.bf16.mxu1 %vm1177_vm2, %v5737_v14  ;;  %v11085_v14 = vrot.slane %v16941_v18, 3  ;;  %v5784_v18 = vshrl.u32 %v18916_v16, 16  ;;  %v16943_v16 = vld [vmem:[%s17019_s22 + $0x1c0] sm:$0xff]  }
 0x491   : > { %v19269_v26 = vpop.f32.mrb[56].mxu1  ;;  %15031 = vmatmul.mubr.msk.bf16.gmra.mrb[92].mxu0 %vm1177_vm2, %v11082_v43  ;;  %v5763_v43 = vor.u32 %v5762_v12, %v5759_v52  ;;  %v11086_v40 = vsel %vm10985_vm7, %v11083_v61, %v11085_v14  ;;  %v5777_v52 = vrot.slane %v5775_v2, 1  ;;  %v5780_v61 = vrot.slane %v5778_v8, 2 }
 0x492   : > { %19792 = vst [vmem:[#allocation32_spill] sm:$0xff] %v19269_v26  ;;  %v19272_v0 = vpop.f32.mrb[57].mxu1  ;;  %15034 = vmatprep.mubr.msk.bf16.mxu0 %vm1177_vm2, %v11084_v42  ;;  %v16942_v26 = vld [vmem:[%s17019_s22 + $0x1b8] sm:$0xff]   ;;  %v5772_v42 = vor.u32 %v5771_v31, %v5768_v54  ;;  %v5786_v31 = vrot.slane %v5784_v18, 1  ;;  %v5796_v2 = vshll.u32 %v18929_v4, 16 }
 0x493   : > { %19793 = vst [vmem:[#allocation33_spill] sm:$0xff] %v19272_v0  ;;  %v19275_v38 = vpop.f32.mrb[58].mxu1  ;;  %v11087_v0 = vrot.slane %v16942_v26, 3  ;;  %v5764_v62 = vsel %vm5288_vm3, %v5754_v59, %v5763_v43  ;;  %v5793_v59 = vshrl.u32 %v18929_v4, 16 }
 0x494   : > { %v19278_v24 = vpop.f32.mrb[59].mxu1  ;;  %v5773_v54 = vsel %vm5288_vm3, %v5763_v43, %v5772_v42  ;;  %v5805_v43 = vshll.u32 %v18934_v36, 16 }
 0x495   : > { %v11088_v48 = vsel %vm10985_vm7, %v11085_v14, %v11087_v0  ;;  %v5789_v14 = vrot.slane %v5787_v37, 2 }
 0x496   : > { %14483 = vmatmul.mubr.msk.bf16.gmra.mrb[96].mxu1 %vm1177_vm2, %v5746_v41 }
 0x497   : > { %14486 = vmatprep.mubr.msk.bf16.mxu1 %vm1177_vm2, %v5755_v63  ;;  %v11089_v63 = vrot.slane %v16943_v16, 3  ;;  %v5802_v16 = vshrl.u32 %v18934_v36, 16  ;;  %v16945_v36 = vld [vmem:[%s17019_s22 + $0x1d0] sm:$0xff]  }
 0x499   : > { %v19291_v53 = vpop.f32.mrb[60].mxu1  ;;  %15035 = vmatmul.mubr.msk.bf16.gmra.mrb[96].mxu0 %vm1177_vm2, %v11086_v40  ;;  %v5781_v40 = vor.u32 %v5780_v61, %v5777_v52  ;;  %v11090_v8 = vsel %vm10985_vm7, %v11087_v0, %v11089_v63  ;;  %v5795_v52 = vrot.slane %v5793_v59, 1  ;;  %v5798_v0 = vrot.slane %v5796_v2, 2 }
 0x49a   : > { %19794 = vst [vmem:[#allocation35_spill] sm:$0xff] %v19291_v53  ;;  %v19294_v26 = vpop.f32.mrb[61].mxu1  ;;  %15038 = vmatprep.mubr.msk.bf16.mxu0 %vm1177_vm2, %v11088_v48  ;;  %v16944_v53 = vld [vmem:[%s17019_s22 + $0x1c8] sm:$0xff]   ;;  %v5790_v48 = vor.u32 %v5789_v14, %v5786_v31  ;;  %v5807_v14 = vrot.slane %v5805_v43, 2  ;;  %v5811_v59 = vshrl.u32 %v18955_v35, 16  ;;  %v5814_v2 = vshll.u32 %v18955_v35, 16 }
 0x49b   : > { %19795 = vst [vmem:[#allocation36_spill] sm:$0xff] %v19294_v26  ;;  %v19297_v41 = vpop.f32.mrb[62].mxu1  ;;  %v11091_v26 = vrot.slane %v16944_v53, 3  ;;  %v5782_v4 = vsel %vm5288_vm3, %v5772_v42, %v5781_v40  ;;  %v5799_v42 = vor.u32 %v5798_v0, %v5795_v52  ;;  %v16947_v43 = vld [vmem:[%s17019_s22 + $0x1e0] sm:$0xff]  }
 0x49c   : > { %v19300_v12 = vpop.f32.mrb[63].mxu1  ;;  %v5791_v31 = vsel %vm5288_vm3, %v5781_v40, %v5790_v48  ;;  %v5823_v40 = vshll.u32 %v18960_v34, 16  ;;  %v5813_v52 = vrot.slane %v5811_v59, 1  ;;  %v5816_v0 = vrot.slane %v5814_v2, 2 }
 0x49d   : > { %v11092_v37 = vsel %vm10985_vm7, %v11089_v63, %v11091_v26  ;;  %v5804_v63 = vrot.slane %v5802_v16, 1  ;;  %v5829_v59 = vshrl.u32 %v18981_v10, 16 }
 0x49e   : > { %14487 = vmatmul.mubr.msk.bf16.gmra.mrb[100].mxu1 %vm1177_vm2, %v5764_v62 }
 0x49f   : > { %14490 = vmatprep.mubr.msk.bf16.mxu1 %vm1177_vm2, %v5773_v54  ;;  %v11093_v54 = vrot.slane %v16945_v36, 3  ;;  %v5820_v36 = vshrl.u32 %v18960_v34, 16 }
 0x4a1   : > { %v19313_v18 = vpop.f32.mrb[64].mxu1  ;;  %15039 = vmatmul.mubr.msk.bf16.gmra.mrb[100].mxu0 %vm1177_vm2, %v11090_v8  ;;  %v11094_v8 = vsel %vm10985_vm7, %v11091_v26, %v11093_v54  ;;  %v5822_v26 = vrot.slane %v5820_v36, 1 }
 0x4a2   : > { %19796 = vst [vmem:[#allocation37_spill] sm:$0xff] %v19313_v18  ;;  %v19316_v53 = vpop.f32.mrb[65].mxu1  ;;  %15042 = vmatprep.mubr.msk.bf16.mxu0 %vm1177_vm2, %v11092_v37  ;;  %v5808_v37 = vor.u32 %v5807_v14, %v5804_v63  ;;  %v16948_v63 = vld [vmem:[%s17019_s22 + $0x1e8] sm:$0xff]  }
 0x4a3   : > { %19797 = vst [vmem:[#allocation3_spill] sm:$0xff] %v19316_v53  ;;  %v19319_v62 = vpop.f32.mrb[66].mxu1  ;;  %v16946_v53 = vld [vmem:[%s17019_s22 + $0x1d8] sm:$0xff]   ;;  %v11099_v14 = vrot.slane %v16948_v63, 3 }
 0x4a4   : > { %v19322_v61 = vpop.f32.mrb[67].mxu1  ;;  %v11095_v18 = vrot.slane %v16946_v53, 3  ;;  %v11097_v53 = vrot.slane %v16947_v43, 3  ;;  %v5809_v35 = vsel %vm5288_vm3, %v5799_v42, %v5808_v37  ;;  %v5841_v43 = vshll.u32 %v18986_v29, 16 }
 0x4a5   : > { %19798 = vst [vmem:[#allocation2_spill] sm:$0xff] %v19322_v61 }
 0x4a6   : > { %14491 = vmatmul.mubr.msk.bf16.gmra.mrb[104].mxu1 %vm1177_vm2, %v5782_v4  ;;  %v11096_v16 = vsel %vm10985_vm7, %v11093_v54, %v11095_v18  ;;  %v5800_v4 = vsel %vm5288_vm3, %v5790_v48, %v5799_v42  ;;  %v11098_v34 = vsel %vm10985_vm7, %v11095_v18, %v11097_v53  ;;  %v5817_v48 = vor.u32 %v5816_v0, %v5813_v52 }
 0x4a7   : > { %14494 = vmatprep.mubr.msk.bf16.mxu1 %vm1177_vm2, %v5791_v31  ;;  %v5825_v31 = vrot.slane %v5823_v40, 2  ;;  %v5832_v42 = vshll.u32 %v18981_v10, 16  ;;  %v16949_v10 = vld [vmem:[%s17019_s22 + $0x1f0] sm:$0xff]   ;;  %v5831_v0 = vrot.slane %v5829_v59, 1 }
 0x4a8   : > { %v11101_v52 = vrot.slane %v16949_v10, 3 }
 0x4a9   : > { %15043 = vmatmul.mubr.msk.bf16.gmra.mrb[104].mxu0 %vm1177_vm2, %v11094_v8  ;;  %v5826_v40 = vor.u32 %v5825_v31, %v5822_v26  ;;  %v16950_v26 = vld [vmem:[%s17019_s22 + $0x1f8] sm:$0xff]  }
 0x4aa   : > { %15046 = vmatprep.mubr.msk.bf16.mxu0 %vm1177_vm2, %v11096_v16  ;;  %v5838_v16 = vshrl.u32 %v18986_v29, 16  ;;  %v5834_v29 = vrot.slane %v5832_v42, 2  ;;  %v11103_v31 = vrot.slane %v16950_v26, 3  ;;  %v11102_v63 = vsel %vm10985_vm7, %v11099_v14, %v11101_v52 }
 0x4ac   : > { %v14940_v61 = vpop.f32.mrb[0].mxu0 }
 0x4ad   : > { %v15076_v54 = vadd.f32 %v14940_v61, %v18937_v46  ;;  %v11364_v8 = vpop.f32.mrb[1].mxu0  ;;  %v11100_v61 = vsel %vm10985_vm7, %v11097_v53, %v11099_v14  ;;  %v5843_v53 = vrot.slane %v5841_v43, 2  ;;  %v16951_v43 = vld [vmem:[%s17019_s22 + $0x200] sm:$0xff]  }
 0x4ae   : > { %14495 = vmatmul.mubr.msk.bf16.gmra.mrb[108].mxu1 %vm1177_vm2, %v5800_v4  ;;  %v15077_v2 = vadd.f32 %v11364_v8, %v18940_v56  ;;  %v14941_v36 = vpop.f32.mrb[2].mxu0  ;;  %v5818_v56 = vsel %vm5288_vm3, %v5808_v37, %v5817_v48  ;;  %v5847_v8 = vshrl.u32 %v19007_v17, 16 }
 0x4af   : > { %14498 = vmatprep.mubr.msk.bf16.mxu1 %vm1177_vm2, %v5809_v35  ;;  %16396 = vtanh.f32 %v15076_v54  ;;  %v15078_v46 = vadd.f32 %v14941_v36, %v18943_v9  ;;  %v11367_v18 = vpop.f32.mrb[3].mxu0  ;;  %v5827_v9 = vsel %vm5288_vm3, %v5817_v48, %v5826_v40  ;;  %v5840_v35 = vrot.slane %v5838_v16, 1 }
 0x4b0   : > { %16398 = vtanh.f32 %v15077_v2  ;;  %v15079_v4 = vadd.f32 %v11367_v18, %v18946_v30  ;;  %v5835_v54 = vor.u32 %v5834_v29, %v5831_v0  ;;  %v5850_v48 = vshll.u32 %v19007_v17, 16  ;;  %v16952_v0 = vld [vmem:[%s17019_s22 + $0x208] sm:$0xff]  }
 0x4b1   : > { %16400 = vtanh.f32 %v15078_v46  ;;  %15047 = vmatmul.mubr.msk.bf16.gmra.mrb[108].mxu0 %vm1177_vm2, %v11098_v34  ;;  %v5844_v2 = vor.u32 %v5843_v53, %v5840_v35  ;;  %v5856_v36 = vshrl.u32 %v19012_v50, 16  ;;  %v5859_v16 = vshll.u32 %v19012_v50, 16 }
 0x4b2   : > { %16402 = vtanh.f32 %v15079_v4  ;;  %15050 = vmatprep.mubr.msk.bf16.mxu0 %vm1177_vm2, %v11100_v61  ;;  %v11104_v17 = vsel %vm10985_vm7, %v11101_v52, %v11103_v31  ;;  %v11105_v46 = vrot.slane %v16951_v43, 3  ;;  %v5836_v18 = vsel %vm5288_vm3, %v5826_v40, %v5835_v54 }
 0x4b3   : > { %v5849_v61 = vrot.slane %v5847_v8, 1  ;;  %v5852_v4 = vrot.slane %v5850_v48, 2  ;;  %v5858_v10 = vrot.slane %v5856_v36, 1  ;;  %v5861_v52 = vrot.slane %v5859_v16, 2  ;;  %v16953_v16 = vld [vmem:[%s17019_s22 + $0x210] sm:$0xff]  }
 0x4b4   : > { %v14944_v30 = vpop.f32.mrb[4].mxu0  ;;  %v11107_v29 = vrot.slane %v16952_v0, 3  ;;  %v11106_v40 = vsel %vm10985_vm7, %v11103_v31, %v11105_v46  ;;  %v5874_v48 = vshrl.u32 %v19038_v39, 16  ;;  %v5877_v31 = vshll.u32 %v19038_v39, 16  ;;  %v19800_v0 = vld [vmem:[#allocation5_spill] sm:$0xff] }
 0x4b5   : > { %v15080_v34 = vadd.f32 %v14944_v30, %v18963_v45  ;;  %v11380_v37 = vpop.f32.mrb[5].mxu0  ;;  %v5853_v30 = vor.u32 %v5852_v4, %v5849_v61  ;;  %v5862_v8 = vor.u32 %v5861_v52, %v5858_v10  ;;  %v19799_v10 = vld [vmem:[#allocation14_spill] sm:$0xff] }
 0x4b6   : > { %14499 = vmatmul.mubr.msk.bf16.gmra.mrb[112].mxu1 %vm1177_vm2, %v5818_v56  ;;  %v15081_v59 = vadd.f32 %v11380_v37, %v18966_v57  ;;  %v14945_v42 = vpop.f32.mrb[6].mxu0  ;;  %v5883_v52 = vshrl.u32 %v19799_v10, 16 }
 0x4b7   : > { %14502 = vmatprep.mubr.msk.bf16.mxu1 %vm1177_vm2, %v5827_v9  ;;  %16404 = vtanh.f32 %v15080_v34  ;;  %v15082_v45 = vadd.f32 %v14945_v42, %v18969_v25  ;;  %v11383_v14 = vpop.f32.mrb[7].mxu0  ;;  %v5868_v34 = vshll.u32 %v19033_v7, 16  ;;  %v11108_v42 = vsel %vm10985_vm7, %v11105_v46, %v11107_v29  ;;  %v16954_v46 = vld [vmem:[%s17019_s22 + $0x218] sm:$0xff]  }
 0x4b8   : > { %16406 = vtanh.f32 %v15081_v59  ;;  %v15083_v57 = vadd.f32 %v11383_v14, %v18972_v51  ;;  %v5845_v51 = vsel %vm5288_vm3, %v5835_v54, %v5844_v2  ;;  %v5854_v39 = vsel %vm5288_vm3, %v5844_v2, %v5853_v30 }
 0x4b9   : > { %v16397_v50 = vpop.eup %16396  ;;  %16408 = vtanh.f32 %v15082_v45  ;;  %15051 = vmatmul.mubr.msk.bf16.gmra.mrb[112].mxu0 %vm1177_vm2, %v11102_v63  ;;  %v5865_v63 = vshrl.u32 %v19033_v7, 16  ;;  %v11109_v7 = vrot.slane %v16953_v16, 3  ;;  %v5870_v14 = vrot.slane %v5868_v34, 2 }
 0x4ba   : > { %v16399_v25 = vpop.eup %16398  ;;  %12181 = vst [vmem:[%s19373_s11 + $0x10] sm:$0xff] %v16397_v50  ;;  %16410 = vtanh.f32 %v15083_v57  ;;  %15054 = vmatprep.mubr.msk.bf16.mxu0 %vm1177_vm2, %v11104_v17  ;;  %v5876_v17 = vrot.slane %v5874_v48, 1  ;;  %v5879_v57 = vrot.slane %v5877_v31, 2  ;;  %v11111_v50 = vrot.slane %v16954_v46, 3  ;;  %v16955_v48 = vld [vmem:[%s17019_s22 + $0x220] sm:$0xff]  }
 0x4bb   : > { %v16401_v56 = vpop.eup %16400  ;;  %12179 = vst [vmem:[%s19373_s11] sm:$0xff] %v16399_v25  ;;  %v5867_v45 = vrot.slane %v5865_v63, 1  ;;  %v11110_v2 = vsel %vm10985_vm7, %v11107_v29, %v11109_v7  ;;  %v11113_v31 = vrot.slane %v16955_v48, 3 }
 0x4bc   : > { %v16403_v9 = vpop.eup %16402  ;;  %12182 = vst [vmem:[%s19373_s11 + $0x18] sm:$0xff] %v16401_v56  ;;  %v14948_v35 = vpop.f32.mrb[8].mxu0  ;;  %v5886_v56 = vshll.u32 %v19799_v10, 16  ;;  %v11112_v34 = vsel %vm10985_vm7, %v11109_v7, %v11111_v50 }
 0x4bd   : > { %12180 = vst [vmem:[%s19373_s11 + $0x8] sm:$0xff] %v16403_v9  ;;  %v15084_v53 = vadd.f32 %v14948_v35, %v18989_v13  ;;  %v11396_v26 = vpop.f32.mrb[9].mxu0  ;;  %v11114_v10 = vsel %vm10985_vm7, %v11111_v50, %v11113_v31 }
 0x4be   : > { %14503 = vmatmul.mubr.msk.bf16.gmra.mrb[116].mxu1 %vm1177_vm2, %v5836_v18  ;;  %v15085_v37 = vadd.f32 %v11396_v26, %v18992_v19  ;;  %v14949_v54 = vpop.f32.mrb[10].mxu0 }
 0x4bf   : > { %14506 = vmatprep.mubr.msk.bf16.mxu1 %vm1177_vm2, %v5845_v51  ;;  %16412 = vtanh.f32 %v15084_v53  ;;  %v15086_v13 = vadd.f32 %v14949_v54, %v18995_v20  ;;  %v11399_v59 = vpop.f32.mrb[11].mxu0  ;;  %v5871_v51 = vor.u32 %v5870_v14, %v5867_v45  ;;  %v19801_v53 = vld [vmem:[#allocation12_spill] sm:$0xff]  ;;  %v16956_v14 = vld [vmem:[%s17019_s22 + $0x228] sm:$0xff]  }
 0x4c0   : > { %16414 = vtanh.f32 %v15085_v37  ;;  %v15087_v36 = vadd.f32 %v11399_v59, %v18998_v32  ;;  %v5863_v32 = vsel %vm5288_vm3, %v5853_v30, %v5862_v8  ;;  %v5892_v26 = vshrl.u32 %v19801_v53, 16  ;;  %v19803_v37 = vld [vmem:[#allocation7_spill] sm:$0xff] }
 0x4c1   : > { %v16405_v19 = vpop.eup %16404  ;;  %16416 = vtanh.f32 %v15086_v13  ;;  %15055 = vmatmul.mubr.msk.bf16.gmra.mrb[116].mxu0 %vm1177_vm2, %v11106_v40  ;;  %v5880_v40 = vor.u32 %v5879_v57, %v5876_v17  ;;  %v5895_v29 = vshll.u32 %v19801_v53, 16  ;;  %v5872_v59 = vsel %vm5288_vm3, %v5862_v8, %v5871_v51  ;;  %v19804_v17 = vld [vmem:[#allocation10_spill] sm:$0xff]  ;;  %v19807_v53 = vld [vmem:[#allocation11_spill] sm:$0xff] }
 0x4c2   : > { %v16407_v20 = vpop.eup %16406  ;;  %12185 = vst [vmem:[%s19373_s11 + $0x30] sm:$0xff] %v16405_v19  ;;  %16418 = vtanh.f32 %v15087_v36  ;;  %15058 = vmatprep.mubr.msk.bf16.mxu0 %vm1177_vm2, %v11108_v42  ;;  %v5885_v42 = vrot.slane %v5883_v52, 1  ;;  %v5888_v36 = vrot.slane %v5886_v56, 2  ;;  %v5894_v19 = vrot.slane %v5892_v26, 1  ;;  %v19806_v56 = vld [vmem:[#allocation9_spill] sm:$0xff] }
 0x4c3   : > { %v16409_v43 = vpop.eup %16408  ;;  %12183 = vst [vmem:[%s19373_s11 + $0x20] sm:$0xff] %v16407_v20  ;;  %v5881_v7 = vsel %vm5288_vm3, %v5871_v51, %v5880_v40  ;;  %v11115_v20 = vrot.slane %v16956_v14, 3 }
 0x4c4   : > { %v16411_v18 = vpop.eup %16410  ;;  %12186 = vst [vmem:[%s19373_s11 + $0x38] sm:$0xff] %v16409_v43  ;;  %v14952_v61 = vpop.f32.mrb[12].mxu0  ;;  %v5889_v46 = vor.u32 %v5888_v36, %v5885_v42 }
 0x4c5   : > { %12184 = vst [vmem:[%s19373_s11 + $0x28] sm:$0xff] %v16411_v18  ;;  %v15088_v4 = vadd.f32 %v14952_v61, %v19015_v15  ;;  %v11412_v25 = vpop.f32.mrb[13].mxu0  ;;  %v19802_v15 = vld [vmem:[#allocation6_spill] sm:$0xff]  ;;  %v16957_v18 = vld [vmem:[%s17019_s22 + $0x230] ss:$0 sps:$4 sm:$0x33]  }
 0x4c6   : > { %14507 = vmatmul.mubr.msk.bf16.gmra.mrb[120].mxu1 %vm1177_vm2, %v5854_v39  ;;  %v15089_v9 = vadd.f32 %v11412_v25, %v19800_v0  ;;  %v14953_v35 = vpop.f32.mrb[14].mxu0  ;;  %v5897_v39 = vrot.slane %v5895_v29, 2  ;;  %v5901_v61 = vshrl.u32 %v16957_v18, 16  ;;  %v5890_v50 = vsel %vm5288_vm3, %v5880_v40, %v5889_v46  ;;  %v19808_v40 = vld [vmem:[#allocation13_spill] sm:$0xff] }
 0x4c7   : > { %14510 = vmatprep.mubr.msk.bf16.mxu1 %vm1177_vm2, %v5863_v32  ;;  %16420 = vtanh.f32 %v15088_v4  ;;  %v15090_v30 = vadd.f32 %v14953_v35, %v19802_v15  ;;  %v11415_v63 = vpop.f32.mrb[15].mxu0  ;;  %v19805_v4 = vld [vmem:[#allocation8_spill] sm:$0xff]  ;;  %v11116_v35 = vsel %vm10985_vm7, %v11113_v31, %v11115_v20  ;;  %v16959_v31 = vld [vmem:[%s17019_s22 + $0x238] sm:$0xff]  }
 0x4c8   : > { %16422 = vtanh.f32 %v15089_v9  ;;  %v15091_v54 = vadd.f32 %v11415_v63, %v19803_v37  ;;  %v5898_v52 = vor.u32 %v5897_v39, %v5894_v19  ;;  %v5903_v15 = vrot.slane %v5901_v61, 1  ;;  %v19809_v19 = vld [vmem:[#allocation15_spill] sm:$0xff] }
 0x4c9   : > { %v16413_v13 = vpop.eup %16412  ;;  %16424 = vtanh.f32 %v15090_v30  ;;  %15059 = vmatmul.mubr.msk.bf16.gmra.mrb[120].mxu0 %vm1177_vm2, %v11110_v2  ;;  %v5904_v2 = vshll.u32 %v16957_v18, 16 }
 0x4ca   : > { %v16415_v16 = vpop.eup %16414  ;;  %12189 = vst [vmem:[%s19373_s11 + $0x50] sm:$0xff] %v16413_v13  ;;  %16426 = vtanh.f32 %v15091_v54  ;;  %15062 = vmatprep.mubr.msk.bf16.mxu0 %vm1177_vm2, %v11112_v34  ;;  %v16958_v34 = vld [vmem:[%s17019_s22 + $0x230] sm:$0xff]   ;;  %v5899_v54 = vsel %vm5288_vm3, %v5889_v46, %v5898_v52  ;;  %v11119_v13 = vrot.slane %v16959_v31, 3  ;;  %v19814_v31 = vld [vmem:[#allocation22_spill] sm:$0xff] }
 0x4cb   : > { %v16417_v45 = vpop.eup %16416  ;;  %12187 = vst [vmem:[%s19373_s11 + $0x40] sm:$0xff] %v16415_v16  ;;  %v5906_v30 = vrot.slane %v5904_v2, 2  ;;  %v11117_v37 = vrot.slane %v16958_v34, 3 }
 0x4cc   : > { %v16419_v32 = vpop.eup %16418  ;;  %12190 = vst [vmem:[%s19373_s11 + $0x58] sm:$0xff] %v16417_v45  ;;  %v14956_v8 = vpop.f32.mrb[16].mxu0 }
 0x4cd   : > { %12188 = vst [vmem:[%s19373_s11 + $0x48] sm:$0xff] %v16419_v32  ;;  %v15092_v57 = vadd.f32 %v14956_v8, %v19804_v17  ;;  %v11428_v43 = vpop.f32.mrb[17].mxu0  ;;  %v11118_v14 = vsel %vm10985_vm7, %v11115_v20, %v11117_v37  ;;  %v19810_v32 = vld [vmem:[#allocation18_spill] sm:$0xff] }
 0x4ce   : > { %14511 = vmatmul.mubr.msk.bf16.gmra.mrb[124].mxu1 %vm1177_vm2, %v5872_v59  ;;  %v15093_v25 = vadd.f32 %v11428_v43, %v19805_v4  ;;  %v14957_v51 = vpop.f32.mrb[18].mxu0  ;;  %v19811_v43 = vld [vmem:[#allocation16_spill] sm:$0xff]  ;;  %v16960_v20 = vld [vmem:[%s17019_s22 + $0x240] ss:$0 sps:$4 sm:$0x77]  }
 0x4cf   : > { %14514 = vmatprep.mubr.msk.bf16.mxu1 %vm1177_vm2, %v5881_v7  ;;  %16428 = vtanh.f32 %v15092_v57  ;;  %v15094_v0 = vadd.f32 %v14957_v51, %v19806_v56  ;;  %v11431_v9 = vpop.f32.mrb[19].mxu0  ;;  %v5907_v7 = vor.u32 %v5906_v30, %v5903_v15  ;;  %v11120_v57 = vsel %vm10985_vm7, %v11117_v37, %v11119_v13  ;;  %v19812_v56 = vld [vmem:[#allocation17_spill] sm:$0xff] }
 0x4d0   : > { %16430 = vtanh.f32 %v15093_v25  ;;  %v15095_v26 = vadd.f32 %v11431_v9, %v19807_v53  ;;  %v11121_v4 = vrot.slane %v16960_v20, 3  ;;  %v19817_v20 = vld [vmem:[#allocation23_spill] sm:$0xff] }
 0x4d1   : > { %v16421_v29 = vpop.eup %16420  ;;  %16432 = vtanh.f32 %v15094_v0  ;;  %15063 = vmatmul.mubr.msk.bf16.gmra.mrb[124].mxu0 %vm1177_vm2, %v11114_v10  ;;  %v5908_v61 = vsel %vm5288_vm3, %v5898_v52, %v5907_v7  ;;  %v19813_v52 = vld [vmem:[#allocation19_spill] sm:$0xff] }
 0x4d2   : > { %v16423_v63 = vpop.eup %16422  ;;  %12193 = vst [vmem:[%s19373_s11 + $0x70] sm:$0xff] %v16421_v29  ;;  %16434 = vtanh.f32 %v15095_v26  ;;  %15066 = vmatprep.mubr.msk.bf16.mxu0 %vm1177_vm2, %v11116_v35  ;;  %v11122_v26 = vsel %vm10985_vm7, %v11119_v13, %v11121_v4 }
 0x4d3   : > { %v16425_v48 = vpop.eup %16424  ;;  %12191 = vst [vmem:[%s19373_s11 + $0x60] sm:$0xff] %v16423_v63 }
 0x4d4   : > { %v16427_v59 = vpop.eup %16426  ;;  %12194 = vst [vmem:[%s19373_s11 + $0x78] sm:$0xff] %v16425_v48  ;;  %v14960_v42 = vpop.f32.mrb[20].mxu0 }
 0x4d5   : > { %12192 = vst [vmem:[%s19373_s11 + $0x68] sm:$0xff] %v16427_v59  ;;  %v15096_v36 = vadd.f32 %v14960_v42, %v19808_v40  ;;  %v11444_v16 = vpop.f32.mrb[21].mxu0 }
 0x4d6   : > { %14515 = vmatmul.mubr.msk.bf16.gmra.mrb[128].mxu1 %vm1177_vm2, %v5890_v50  ;;  %v15097_v39 = vadd.f32 %v11444_v16, %v19809_v19  ;;  %v14961_v45 = vpop.f32.mrb[22].mxu0 }
 0x4d7   : > { %14518 = vmatprep.mubr.msk.bf16.mxu1 %vm1177_vm2, %v5899_v54  ;;  %16436 = vtanh.f32 %v15096_v36  ;;  %v15098_v8 = vadd.f32 %v14961_v45, %v19810_v32  ;;  %v11447_v17 = vpop.f32.mrb[23].mxu0 }
 0x4d8   : > { %16438 = vtanh.f32 %v15097_v39  ;;  %v15099_v46 = vadd.f32 %v11447_v17, %v19811_v43  ;;  %v19815_v39 = vld [vmem:[#allocation20_spill] sm:$0xff] }
 0x4d9   : > { %v16429_v18 = vpop.eup %16428  ;;  %16440 = vtanh.f32 %v15098_v8  ;;  %15067 = vmatmul.mubr.msk.bf16.gmra.mrb[128].mxu0 %vm1177_vm2, %v11118_v14  ;;  %v19816_v14 = vld [vmem:[#allocation21_spill] sm:$0xff] }
 0x4da   : > { %v16431_v2 = vpop.eup %16430  ;;  %12197 = vst [vmem:[%s19373_s11 + $0x90] sm:$0xff] %v16429_v18  ;;  %16442 = vtanh.f32 %v15099_v46  ;;  %15070 = vmatprep.mubr.msk.bf16.mxu0 %vm1177_vm2, %v11120_v57 }
 0x4db   : > { %v16433_v25 = vpop.eup %16432  ;;  %12195 = vst [vmem:[%s19373_s11 + $0x80] sm:$0xff] %v16431_v2 }
 0x4dc   : > { %v16435_v51 = vpop.eup %16434  ;;  %12198 = vst [vmem:[%s19373_s11 + $0x98] sm:$0xff] %v16433_v25  ;;  %v14964_v10 = vpop.f32.mrb[24].mxu0  ;;  %v19818_v25 = vld [vmem:[#allocation26_spill] sm:$0xff] }
 0x4dd   : > { %12196 = vst [vmem:[%s19373_s11 + $0x88] sm:$0xff] %v16435_v51  ;;  %v15100_v0 = vadd.f32 %v14964_v10, %v19812_v56  ;;  %v11460_v9 = vpop.f32.mrb[25].mxu0 }
 0x4de   : > { %14519 = vmatmul.mubr.msk.bf16.gmra.mrb[132].mxu1 %vm1177_vm2, %v5908_v61  ;;  %v15101_v35 = vadd.f32 %v11460_v9, %v19813_v52  ;;  %v14965_v53 = vpop.f32.mrb[26].mxu0 }
 0x4df   : > { %16444 = vtanh.f32 %v15100_v0  ;;  %v15102_v29 = vadd.f32 %v14965_v53, %v19098_v23  ;;  %v11463_v50 = vpop.f32.mrb[27].mxu0 }
 0x4e0   : > { %16446 = vtanh.f32 %v15101_v35  ;;  %v15103_v15 = vadd.f32 %v11463_v50, %v19101_v60 }
 0x4e1   : > { %v16437_v30 = vpop.eup %16436  ;;  %16448 = vtanh.f32 %v15102_v29  ;;  %15071 = vmatmul.mubr.msk.bf16.gmra.mrb[132].mxu0 %vm1177_vm2, %v11122_v26  ;;  %v19819_v29 = vld [vmem:[#allocation24_spill] sm:$0xff] }
 0x4e2   : > { %v16439_v63 = vpop.eup %16438  ;;  %12201 = vst [vmem:[%s19373_s11 + $0xb0] sm:$0xff] %v16437_v30  ;;  %16450 = vtanh.f32 %v15103_v15  ;;  %v19820_v15 = vld [vmem:[#allocation25_spill] sm:$0xff] }
 0x4e3   : > { %v16441_v34 = vpop.eup %16440  ;;  %12199 = vst [vmem:[%s19373_s11 + $0xa0] sm:$0xff] %v16439_v63 }
 0x4e4   : > { %v16443_v37 = vpop.eup %16442  ;;  %12202 = vst [vmem:[%s19373_s11 + $0xb8] sm:$0xff] %v16441_v34  ;;  %v14968_v54 = vpop.f32.mrb[28].mxu0 }
 0x4e5   : > { %12200 = vst [vmem:[%s19373_s11 + $0xa8] sm:$0xff] %v16443_v37  ;;  %v15104_v23 = vadd.f32 %v14968_v54, %v19115_v27  ;;  %v11476_v48 = vpop.f32.mrb[29].mxu0 }
 0x4e6   : > { %v15105_v60 = vadd.f32 %v11476_v48, %v19814_v31  ;;  %v14969_v13 = vpop.f32.mrb[30].mxu0 }
 0x4e7   : > { %16452 = vtanh.f32 %v15104_v23  ;;  %v15106_v59 = vadd.f32 %v14969_v13, %v19121_v1  ;;  %v11479_v42 = vpop.f32.mrb[31].mxu0  ;;  %v19821_v13 = vld [vmem:[#allocation27_spill] sm:$0xff] }
 0x4e8   : > { %16454 = vtanh.f32 %v15105_v60  ;;  %v15107_v40 = vadd.f32 %v11479_v42, %v19124_v6  ;;  %v19822_v42 = vld [vmem:[#allocation30_spill] sm:$0xff] }
 0x4e9   : > { %v16445_v36 = vpop.eup %16444  ;;  %16456 = vtanh.f32 %v15106_v59 }
 0x4ea   : > { %v16447_v16 = vpop.eup %16446  ;;  %12205 = vst [vmem:[%s19373_s11 + $0xd0] sm:$0xff] %v16445_v36  ;;  %16458 = vtanh.f32 %v15107_v40 }
 0x4eb   : > { %v16449_v7 = vpop.eup %16448  ;;  %12203 = vst [vmem:[%s19373_s11 + $0xc0] sm:$0xff] %v16447_v16 }
 0x4ec   : > { %v16451_v27 = vpop.eup %16450  ;;  %12206 = vst [vmem:[%s19373_s11 + $0xd8] sm:$0xff] %v16449_v7  ;;  %v14972_v19 = vpop.f32.mrb[32].mxu0 }
 0x4ed   : > { %12204 = vst [vmem:[%s19373_s11 + $0xc8] sm:$0xff] %v16451_v27  ;;  %v15108_v45 = vadd.f32 %v14972_v19, %v19815_v39  ;;  %v11492_v1 = vpop.f32.mrb[33].mxu0 }
 0x4ee   : > { %v15109_v32 = vadd.f32 %v11492_v1, %v19816_v14  ;;  %v14973_v6 = vpop.f32.mrb[34].mxu0  ;;  %v19823_v14 = vld [vmem:[#allocation28_spill] sm:$0xff] }
 0x4ef   : > { %16460 = vtanh.f32 %v15108_v45  ;;  %v15110_v8 = vadd.f32 %v14973_v6, %v19143_v58  ;;  %v11495_v17 = vpop.f32.mrb[35].mxu0  ;;  %v19824_v6 = vld [vmem:[#allocation29_spill] sm:$0xff] }
 0x4f0   : > { %16462 = vtanh.f32 %v15109_v32  ;;  %v15111_v57 = vadd.f32 %v11495_v17, %v19146_v3 }
 0x4f1   : > { %v16453_v43 = vpop.eup %16452  ;;  %16464 = vtanh.f32 %v15110_v8 }
 0x4f2   : > { %v16455_v46 = vpop.eup %16454  ;;  %12209 = vst [vmem:[%s19373_s11 + $0xf0] sm:$0xff] %v16453_v43  ;;  %16466 = vtanh.f32 %v15111_v57 }
 0x4f3   : > { %v16457_v18 = vpop.eup %16456  ;;  %12207 = vst [vmem:[%s19373_s11 + $0xe0] sm:$0xff] %v16455_v46 }
 0x4f4   : > { %v16459_v61 = vpop.eup %16458  ;;  %12210 = vst [vmem:[%s19373_s11 + $0xf8] sm:$0xff] %v16457_v18  ;;  %v14976_v2 = vpop.f32.mrb[36].mxu0 }
 0x4f5   : > { %12208 = vst [vmem:[%s19373_s11 + $0xe8] sm:$0xff] %v16459_v61  ;;  %v15112_v4 = vadd.f32 %v14976_v2, %v19817_v20  ;;  %v11508_v58 = vpop.f32.mrb[37].mxu0 }
 0x4f6   : > { %v15113_v51 = vadd.f32 %v11508_v58, %v19818_v25  ;;  %v14977_v3 = vpop.f32.mrb[38].mxu0  ;;  %v19826_v25 = vld [vmem:[#allocation34_spill] sm:$0xff] }
 0x4f7   : > { %16468 = vtanh.f32 %v15112_v4  ;;  %v15114_v10 = vadd.f32 %v14977_v3, %v19165_v33  ;;  %v11511_v56 = vpop.f32.mrb[39].mxu0  ;;  %v19825_v4 = vld [vmem:[#allocation31_spill] sm:$0xff] }
 0x4f8   : > { %16470 = vtanh.f32 %v15113_v51  ;;  %v15115_v0 = vadd.f32 %v11511_v56, %v19168_v47 }
 0x4f9   : > { %v16461_v9 = vpop.eup %16460  ;;  %16472 = vtanh.f32 %v15114_v10 }
 0x4fa   : > { %v16463_v52 = vpop.eup %16462  ;;  %12213 = vst [vmem:[%s19373_s11 + $0x110] sm:$0xff] %v16461_v9  ;;  %16474 = vtanh.f32 %v15115_v0 }
 0x4fb   : > { %v16465_v35 = vpop.eup %16464  ;;  %12211 = vst [vmem:[%s19373_s11 + $0x100] sm:$0xff] %v16463_v52 }
 0x4fc   : > { %v16467_v53 = vpop.eup %16466  ;;  %12214 = vst [vmem:[%s19373_s11 + $0x118] sm:$0xff] %v16465_v35  ;;  %v14980_v26 = vpop.f32.mrb[40].mxu0 }
 0x4fd   : > { %12212 = vst [vmem:[%s19373_s11 + $0x108] sm:$0xff] %v16467_v53  ;;  %v15116_v50 = vadd.f32 %v14980_v26, %v19819_v29  ;;  %v11524_v33 = vpop.f32.mrb[41].mxu0  ;;  %v19827_v26 = vld [vmem:[#allocation32_spill] sm:$0xff] }
 0x4fe   : > { %v15117_v30 = vadd.f32 %v11524_v33, %v19820_v15  ;;  %v14981_v47 = vpop.f32.mrb[42].mxu0 }
 0x4ff   : > { %16476 = vtanh.f32 %v15116_v50  ;;  %v15118_v63 = vadd.f32 %v14981_v47, %v19187_v22  ;;  %v11527_v34 = vpop.f32.mrb[43].mxu0  ;;  %v19828_v50 = vld [vmem:[#allocation33_spill] sm:$0xff] }
 0x500   : > { %16478 = vtanh.f32 %v15117_v30  ;;  %v15119_v37 = vadd.f32 %v11527_v34, %v19190_v44 }
 0x501   : > { %v16469_v54 = vpop.eup %16468  ;;  %16480 = vtanh.f32 %v15118_v63 }
 0x502   : > { %v16471_v23 = vpop.eup %16470  ;;  %12217 = vst [vmem:[%s19373_s11 + $0x130] sm:$0xff] %v16469_v54  ;;  %16482 = vtanh.f32 %v15119_v37 }
 0x503   : > { %v16473_v48 = vpop.eup %16472  ;;  %12215 = vst [vmem:[%s19373_s11 + $0x120] sm:$0xff] %v16471_v23 }
 0x504   : > { %v16475_v31 = vpop.eup %16474  ;;  %12218 = vst [vmem:[%s19373_s11 + $0x138] sm:$0xff] %v16473_v48  ;;  %v14984_v60 = vpop.f32.mrb[44].mxu0  ;;  %v19829_v48 = vld [vmem:[#allocation35_spill] sm:$0xff] }
 0x505   : > { %12216 = vst [vmem:[%s19373_s11 + $0x128] sm:$0xff] %v16475_v31  ;;  %v15120_v59 = vadd.f32 %v14984_v60, %v19821_v13  ;;  %v11540_v22 = vpop.f32.mrb[45].mxu0  ;;  %v19830_v60 = vld [vmem:[#allocation36_spill] sm:$0xff] }
 0x506   : > { %v15121_v40 = vadd.f32 %v11540_v22, %v19822_v42  ;;  %v14985_v44 = vpop.f32.mrb[46].mxu0 }
 0x507   : > { %16484 = vtanh.f32 %v15120_v59  ;;  %v15122_v36 = vadd.f32 %v14985_v44, %v19209_v55  ;;  %v11543_v16 = vpop.f32.mrb[47].mxu0 }
 0x508   : > { %16486 = vtanh.f32 %v15121_v40  ;;  %v15123_v7 = vadd.f32 %v11543_v16, %v19212_v21 }
 0x509   : > { %v16477_v27 = vpop.eup %16476  ;;  %16488 = vtanh.f32 %v15122_v36 }
 0x50a   : > { %v16479_v19 = vpop.eup %16478  ;;  %12221 = vst [vmem:[%s19373_s11 + $0x150] sm:$0xff] %v16477_v27  ;;  %16490 = vtanh.f32 %v15123_v7  ;;  %v19831_v27 = vld [vmem:[#allocation37_spill] sm:$0xff] }
 0x50b   : > { %v16481_v39 = vpop.eup %16480  ;;  %12219 = vst [vmem:[%s19373_s11 + $0x140] sm:$0xff] %v16479_v19 }
 0x50c   : > { %v16483_v45 = vpop.eup %16482  ;;  %12222 = vst [vmem:[%s19373_s11 + $0x158] sm:$0xff] %v16481_v39  ;;  %v14988_v1 = vpop.f32.mrb[48].mxu0 }
 0x50d   : > { %12220 = vst [vmem:[%s19373_s11 + $0x148] sm:$0xff] %v16483_v45  ;;  %v15124_v32 = vadd.f32 %v14988_v1, %v19823_v14  ;;  %v11556_v55 = vpop.f32.mrb[49].mxu0 }
 0x50e   : > { %v15125_v8 = vadd.f32 %v11556_v55, %v19824_v6  ;;  %v14989_v21 = vpop.f32.mrb[50].mxu0  ;;  %v19833_v55 = vld [vmem:[#allocation2_spill] sm:$0xff] }
 0x50f   : > { %16492 = vtanh.f32 %v15124_v32  ;;  %v15126_v17 = vadd.f32 %v14989_v21, %v19231_v49  ;;  %v11559_v57 = vpop.f32.mrb[51].mxu0 }
 0x510   : > { %16494 = vtanh.f32 %v15125_v8  ;;  %v15127_v43 = vadd.f32 %v11559_v57, %v19234_v5 }
 0x511   : > { %v16485_v46 = vpop.eup %16484  ;;  %16496 = vtanh.f32 %v15126_v17 }
 0x512   : > { %v16487_v18 = vpop.eup %16486  ;;  %12225 = vst [vmem:[%s19373_s11 + $0x170] sm:$0xff] %v16485_v46  ;;  %16498 = vtanh.f32 %v15127_v43 }
 0x513   : > { %v16489_v61 = vpop.eup %16488  ;;  %12223 = vst [vmem:[%s19373_s11 + $0x160] sm:$0xff] %v16487_v18 }
 0x514   : > { %v16491_v2 = vpop.eup %16490  ;;  %12226 = vst [vmem:[%s19373_s11 + $0x178] sm:$0xff] %v16489_v61  ;;  %v14992_v20 = vpop.f32.mrb[52].mxu0 }
 0x515   : > { %12224 = vst [vmem:[%s19373_s11 + $0x168] sm:$0xff] %v16491_v2  ;;  %v15128_v58 = vadd.f32 %v14992_v20, %v19825_v4  ;;  %v11572_v49 = vpop.f32.mrb[53].mxu0 }
 0x516   : > { %v15129_v51 = vadd.f32 %v11572_v49, %v19826_v25  ;;  %v14993_v5 = vpop.f32.mrb[54].mxu0 }
 0x517   : > { %16500 = vtanh.f32 %v15128_v58  ;;  %v15130_v3 = vadd.f32 %v14993_v5, %v19253_v28  ;;  %v11575_v10 = vpop.f32.mrb[55].mxu0 }
 0x518   : > { %16502 = vtanh.f32 %v15129_v51  ;;  %v15131_v56 = vadd.f32 %v11575_v10, %v19256_v11 }
 0x519   : > { %v16493_v0 = vpop.eup %16492  ;;  %16504 = vtanh.f32 %v15130_v3 }
 0x51a   : > { %v16495_v9 = vpop.eup %16494  ;;  %12229 = vst [vmem:[%s19373_s11 + $0x190] sm:$0xff] %v16493_v0  ;;  %16506 = vtanh.f32 %v15131_v56 }
 0x51b   : > { %v16497_v52 = vpop.eup %16496  ;;  %12227 = vst [vmem:[%s19373_s11 + $0x180] sm:$0xff] %v16495_v9 }
 0x51c   : > { %v16499_v35 = vpop.eup %16498  ;;  %12230 = vst [vmem:[%s19373_s11 + $0x198] sm:$0xff] %v16497_v52  ;;  %v14996_v53 = vpop.f32.mrb[56].mxu0 }
 0x51d   : > { %12228 = vst [vmem:[%s19373_s11 + $0x188] sm:$0xff] %v16499_v35  ;;  %v15132_v29 = vadd.f32 %v14996_v53, %v19827_v26  ;;  %v11588_v28 = vpop.f32.mrb[57].mxu0 }
 0x51e   : > { %v15133_v33 = vadd.f32 %v11588_v28, %v19828_v50  ;;  %v14997_v11 = vpop.f32.mrb[58].mxu0 }
 0x51f   : > { %16508 = vtanh.f32 %v15132_v29  ;;  %v15134_v15 = vadd.f32 %v14997_v11, %v19275_v38  ;;  %v11591_v30 = vpop.f32.mrb[59].mxu0 }
 0x520   : > { %16510 = vtanh.f32 %v15133_v33  ;;  %v15135_v47 = vadd.f32 %v11591_v30, %v19278_v24 }
 0x521   : > { %v16501_v63 = vpop.eup %16500  ;;  %16512 = vtanh.f32 %v15134_v15 }
 0x522   : > { %v16503_v34 = vpop.eup %16502  ;;  %12233 = vst [vmem:[%s19373_s11 + $0x1b0] sm:$0xff] %v16501_v63  ;;  %16514 = vtanh.f32 %v15135_v47 }
 0x523   : > { %v16505_v37 = vpop.eup %16504  ;;  %12231 = vst [vmem:[%s19373_s11 + $0x1a0] sm:$0xff] %v16503_v34 }
 0x524   : > { %v16507_v54 = vpop.eup %16506  ;;  %12234 = vst [vmem:[%s19373_s11 + $0x1b8] sm:$0xff] %v16505_v37  ;;  %v15000_v23 = vpop.f32.mrb[60].mxu0 }
 0x525   : > { %12232 = vst [vmem:[%s19373_s11 + $0x1a8] sm:$0xff] %v16507_v54  ;;  %v15136_v31 = vadd.f32 %v15000_v23, %v19829_v48  ;;  %v11604_v38 = vpop.f32.mrb[61].mxu0 }
 0x526   : > { %v15137_v13 = vadd.f32 %v11604_v38, %v19830_v60  ;;  %v15001_v24 = vpop.f32.mrb[62].mxu0 }
 0x527   : > { %16516 = vtanh.f32 %v15136_v31  ;;  %v15138_v59 = vadd.f32 %v15001_v24, %v19297_v41  ;;  %v11607_v22 = vpop.f32.mrb[63].mxu0  ;;  %v19832_v41 = vld [vmem:[#allocation3_spill] sm:$0xff] }
 0x528   : > { %16518 = vtanh.f32 %v15137_v13  ;;  %v15139_v42 = vadd.f32 %v11607_v22, %v19300_v12 }
 0x529   : > { %v16509_v40 = vpop.eup %16508  ;;  %16520 = vtanh.f32 %v15138_v59 }
 0x52a   : > { %v16511_v44 = vpop.eup %16510  ;;  %12237 = vst [vmem:[%s19373_s11 + $0x1d0] sm:$0xff] %v16509_v40  ;;  %16522 = vtanh.f32 %v15139_v42 }
 0x52b   : > { %v16513_v36 = vpop.eup %16512  ;;  %12235 = vst [vmem:[%s19373_s11 + $0x1c0] sm:$0xff] %v16511_v44 }
 0x52c   : > { %v16515_v16 = vpop.eup %16514  ;;  %12238 = vst [vmem:[%s19373_s11 + $0x1d8] sm:$0xff] %v16513_v36  ;;  %v15004_v7 = vpop.f32.mrb[64].mxu0 }
 0x52d   : > { %12236 = vst [vmem:[%s19373_s11 + $0x1c8] sm:$0xff] %v16515_v16  ;;  %v15140_v19 = vadd.f32 %v15004_v7, %v19831_v27  ;;  %v11620_v39 = vpop.f32.mrb[65].mxu0 }
 0x52e   : > { %v15141_v45 = vadd.f32 %v11620_v39, %v19832_v41  ;;  %v15005_v1 = vpop.f32.mrb[66].mxu0 }
 0x52f   : > { %16524 = vtanh.f32 %v15140_v19  ;;  %v15142_v12 = vadd.f32 %v15005_v1, %v19319_v62  ;;  %v11623_v14 = vpop.f32.mrb[67].mxu0 }
 0x530   : > { %16526 = vtanh.f32 %v15141_v45  ;;  %v15143_v6 = vadd.f32 %v11623_v14, %v19833_v55 }
 0x531   : > { %v14456_v32 = vpop.f32.mrb[68].mxu1  ;;  %v16517_v21 = vpop.eup %16516  ;;  %16528 = vtanh.f32 %v15142_v12 }
 0x532   : > { %v6422_v8 = vpop.f32.mrb[69].mxu1  ;;  %v16519_v57 = vpop.eup %16518  ;;  %12241 = vst [vmem:[%s19373_s11 + $0x1f0] sm:$0xff] %v16517_v21  ;;  %16530 = vtanh.f32 %v15143_v6 }
 0x533   : > { %v14457_v17 = vpop.f32.mrb[70].mxu1  ;;  %v16521_v46 = vpop.eup %16520  ;;  %12239 = vst [vmem:[%s19373_s11 + $0x1e0] sm:$0xff] %v16519_v57 }
 0x534   : > { %v6425_v43 = vpop.f32.mrb[71].mxu1  ;;  %v16523_v18 = vpop.eup %16522  ;;  %12242 = vst [vmem:[%s19373_s11 + $0x1f8] sm:$0xff] %v16521_v46 }
 0x535   : > { %v15008_v62 = vpop.f32.mrb[68].mxu0  ;;  %12240 = vst [vmem:[%s19373_s11 + $0x1e8] sm:$0xff] %v16523_v18 }
 0x536   : > { %v15144_v61 = vadd.f32 %v15008_v62, %v14456_v32  ;;  %v11636_v2 = vpop.f32.mrb[69].mxu0 }
 0x537   : > { %v15145_v20 = vadd.f32 %v11636_v2, %v6422_v8  ;;  %v15009_v4 = vpop.f32.mrb[70].mxu0 }
 0x538   : > { %16532 = vtanh.f32 %v15144_v61  ;;  %v15146_v58 = vadd.f32 %v15009_v4, %v14457_v17  ;;  %v11639_v49 = vpop.f32.mrb[71].mxu0 }
 0x539   : > { %v14460_v25 = vpop.f32.mrb[72].mxu1  ;;  %16534 = vtanh.f32 %v15145_v20  ;;  %v15147_v51 = vadd.f32 %v11639_v49, %v6425_v43  ;;  %v16525_v3 = vpop.eup %16524 }
 0x53a   : > { %v6438_v5 = vpop.f32.mrb[73].mxu1  ;;  %16536 = vtanh.f32 %v15146_v58  ;;  %v16527_v56 = vpop.eup %16526  ;;  %12245 = vst [vmem:[%s19373_s11 + $0x210] sm:$0xff] %v16525_v3 }
 0x53b   : > { %v14461_v10 = vpop.f32.mrb[74].mxu1  ;;  %16538 = vtanh.f32 %v15147_v51  ;;  %v16529_v9 = vpop.eup %16528  ;;  %12243 = vst [vmem:[%s19373_s11 + $0x200] sm:$0xff] %v16527_v56 }
 0x53c   : > { %v6441_v0 = vpop.f32.mrb[75].mxu1  ;;  %v16531_v52 = vpop.eup %16530  ;;  %12246 = vst [vmem:[%s19373_s11 + $0x218] sm:$0xff] %v16529_v9 }
 0x53d   : > { %v15012_v35 = vpop.f32.mrb[72].mxu0  ;;  %12244 = vst [vmem:[%s19373_s11 + $0x208] sm:$0xff] %v16531_v52 }
 0x53e   : > { %v15148_v53 = vadd.f32 %v15012_v35, %v14460_v25  ;;  %v11652_v26 = vpop.f32.mrb[73].mxu0 }
 0x53f   : > { %v15149_v29 = vadd.f32 %v11652_v26, %v6438_v5  ;;  %v15013_v28 = vpop.f32.mrb[74].mxu0 }
 0x540   : > { %16540 = vtanh.f32 %v15148_v53  ;;  %v15150_v50 = vadd.f32 %v15013_v28, %v14461_v10  ;;  %v11655_v33 = vpop.f32.mrb[75].mxu0 }
 0x541   : > { %v14464_v11 = vpop.f32.mrb[76].mxu1  ;;  %16542 = vtanh.f32 %v15149_v29  ;;  %v15151_v15 = vadd.f32 %v11655_v33, %v6441_v0 }
 0x542   : > { %v6454_v30 = vpop.f32.mrb[77].mxu1  ;;  %v16533_v47 = vpop.eup %16532  ;;  %16544 = vtanh.f32 %v15150_v50 }
 0x543   : > { %v14465_v63 = vpop.f32.mrb[78].mxu1  ;;  %v16535_v34 = vpop.eup %16534  ;;  %12249 = vst [vmem:[%s19373_s11 + $0x230] sm:$0xff] %v16533_v47  ;;  %16546 = vtanh.f32 %v15151_v15 }
 0x544   : > { %v6457_v37 = vpop.f32.mrb[79].mxu1  ;;  %v16537_v54 = vpop.eup %16536  ;;  %12247 = vst [vmem:[%s19373_s11 + $0x220] sm:$0xff] %v16535_v34 }
 0x545   : > { %v16539_v23 = vpop.eup %16538  ;;  %12250 = vst [vmem:[%s19373_s11 + $0x238] sm:$0xff] %v16537_v54  ;;  %v15016_v48 = vpop.f32.mrb[76].mxu0 }
 0x546   : > { %12248 = vst [vmem:[%s19373_s11 + $0x228] sm:$0xff] %v16539_v23  ;;  %v15152_v31 = vadd.f32 %v15016_v48, %v14464_v11  ;;  %v11668_v38 = vpop.f32.mrb[77].mxu0 }
 0x547   : > { %v15153_v60 = vadd.f32 %v11668_v38, %v6454_v30  ;;  %v15017_v13 = vpop.f32.mrb[78].mxu0 }
 0x548   : > { %16548 = vtanh.f32 %v15152_v31  ;;  %v15154_v24 = vadd.f32 %v15017_v13, %v14465_v63  ;;  %v11671_v59 = vpop.f32.mrb[79].mxu0 }
 0x549   : > { %v14468_v22 = vpop.f32.mrb[80].mxu1  ;;  %16550 = vtanh.f32 %v15153_v60  ;;  %v15155_v42 = vadd.f32 %v11671_v59, %v6457_v37 }
 0x54a   : > { %v6470_v40 = vpop.f32.mrb[81].mxu1  ;;  %v16541_v44 = vpop.eup %16540  ;;  %16552 = vtanh.f32 %v15154_v24 }
 0x54b   : > { %v14469_v36 = vpop.f32.mrb[82].mxu1  ;;  %v16543_v16 = vpop.eup %16542  ;;  %12253 = vst [vmem:[%s19373_s11 + $0x250] sm:$0xff] %v16541_v44  ;;  %16554 = vtanh.f32 %v15155_v42 }
 0x54c   : > { %v6473_v7 = vpop.f32.mrb[83].mxu1  ;;  %v16545_v27 = vpop.eup %16544  ;;  %12251 = vst [vmem:[%s19373_s11 + $0x240] sm:$0xff] %v16543_v16 }
 0x54d   : > { %v16547_v19 = vpop.eup %16546  ;;  %12254 = vst [vmem:[%s19373_s11 + $0x258] sm:$0xff] %v16545_v27  ;;  %v15020_v39 = vpop.f32.mrb[80].mxu0 }
 0x54e   : > { %12252 = vst [vmem:[%s19373_s11 + $0x248] sm:$0xff] %v16547_v19  ;;  %v15156_v41 = vadd.f32 %v15020_v39, %v14468_v22  ;;  %v11684_v45 = vpop.f32.mrb[81].mxu0 }
 0x54f   : > { %v15157_v1 = vadd.f32 %v11684_v45, %v6470_v40  ;;  %v15021_v12 = vpop.f32.mrb[82].mxu0 }
 0x550   : > { %16556 = vtanh.f32 %v15156_v41  ;;  %v15158_v14 = vadd.f32 %v15021_v12, %v14469_v36  ;;  %v11687_v32 = vpop.f32.mrb[83].mxu0 }
 0x551   : > { %v14472_v55 = vpop.f32.mrb[84].mxu1  ;;  %16558 = vtanh.f32 %v15157_v1  ;;  %v15159_v6 = vadd.f32 %v11687_v32, %v6473_v7 }
 0x552   : > { %v6486_v8 = vpop.f32.mrb[85].mxu1  ;;  %v16549_v21 = vpop.eup %16548  ;;  %16560 = vtanh.f32 %v15158_v14 }
 0x553   : > { %v14473_v17 = vpop.f32.mrb[86].mxu1  ;;  %v16551_v57 = vpop.eup %16550  ;;  %12257 = vst [vmem:[%s19373_s11 + $0x270] sm:$0xff] %v16549_v21  ;;  %16562 = vtanh.f32 %v15159_v6 }
 0x554   : > { %v6489_v43 = vpop.f32.mrb[87].mxu1  ;;  %v16553_v46 = vpop.eup %16552  ;;  %12255 = vst [vmem:[%s19373_s11 + $0x260] sm:$0xff] %v16551_v57 }
 0x555   : > { %v16555_v18 = vpop.eup %16554  ;;  %12258 = vst [vmem:[%s19373_s11 + $0x278] sm:$0xff] %v16553_v46  ;;  %v15024_v62 = vpop.f32.mrb[84].mxu0 }
 0x556   : > { %12256 = vst [vmem:[%s19373_s11 + $0x268] sm:$0xff] %v16555_v18  ;;  %v15160_v61 = vadd.f32 %v15024_v62, %v14472_v55  ;;  %v11700_v2 = vpop.f32.mrb[85].mxu0 }
 0x557   : > { %v15161_v20 = vadd.f32 %v11700_v2, %v6486_v8  ;;  %v15025_v4 = vpop.f32.mrb[86].mxu0 }
 0x558   : > { %16564 = vtanh.f32 %v15160_v61  ;;  %v15162_v58 = vadd.f32 %v15025_v4, %v14473_v17  ;;  %v11703_v49 = vpop.f32.mrb[87].mxu0 }
 0x559   : > { %v14476_v25 = vpop.f32.mrb[88].mxu1  ;;  %16566 = vtanh.f32 %v15161_v20  ;;  %v15163_v51 = vadd.f32 %v11703_v49, %v6489_v43 }
 0x55a   : > { %v6502_v5 = vpop.f32.mrb[89].mxu1  ;;  %v16557_v3 = vpop.eup %16556  ;;  %16568 = vtanh.f32 %v15162_v58 }
 0x55b   : > { %v14477_v10 = vpop.f32.mrb[90].mxu1  ;;  %v16559_v56 = vpop.eup %16558  ;;  %12261 = vst [vmem:[%s19373_s11 + $0x290] sm:$0xff] %v16557_v3  ;;  %16570 = vtanh.f32 %v15163_v51 }
 0x55c   : > { %v6505_v0 = vpop.f32.mrb[91].mxu1  ;;  %v16561_v9 = vpop.eup %16560  ;;  %12259 = vst [vmem:[%s19373_s11 + $0x280] sm:$0xff] %v16559_v56 }
 0x55d   : > { %v16563_v52 = vpop.eup %16562  ;;  %12262 = vst [vmem:[%s19373_s11 + $0x298] sm:$0xff] %v16561_v9  ;;  %v15028_v35 = vpop.f32.mrb[88].mxu0 }
 0x55e   : > { %12260 = vst [vmem:[%s19373_s11 + $0x288] sm:$0xff] %v16563_v52  ;;  %v15164_v53 = vadd.f32 %v15028_v35, %v14476_v25  ;;  %v11716_v26 = vpop.f32.mrb[89].mxu0 }
 0x55f   : > { %v15165_v29 = vadd.f32 %v11716_v26, %v6502_v5  ;;  %v15029_v28 = vpop.f32.mrb[90].mxu0 }
 0x560   : > { %16572 = vtanh.f32 %v15164_v53  ;;  %v15166_v50 = vadd.f32 %v15029_v28, %v14477_v10  ;;  %v11719_v33 = vpop.f32.mrb[91].mxu0 }
 0x561   : > { %v14480_v11 = vpop.f32.mrb[92].mxu1  ;;  %16574 = vtanh.f32 %v15165_v29  ;;  %v15167_v15 = vadd.f32 %v11719_v33, %v6505_v0 }
 0x562   : > { %v6518_v30 = vpop.f32.mrb[93].mxu1  ;;  %v16565_v47 = vpop.eup %16564  ;;  %16576 = vtanh.f32 %v15166_v50 }
 0x563   : > { %v14481_v63 = vpop.f32.mrb[94].mxu1  ;;  %v16567_v34 = vpop.eup %16566  ;;  %12265 = vst [vmem:[%s19373_s11 + $0x2b0] sm:$0xff] %v16565_v47  ;;  %16578 = vtanh.f32 %v15167_v15 }
 0x564   : > { %v6521_v37 = vpop.f32.mrb[95].mxu1  ;;  %v16569_v54 = vpop.eup %16568  ;;  %12263 = vst [vmem:[%s19373_s11 + $0x2a0] sm:$0xff] %v16567_v34 }
 0x565   : > { %v16571_v23 = vpop.eup %16570  ;;  %12266 = vst [vmem:[%s19373_s11 + $0x2b8] sm:$0xff] %v16569_v54  ;;  %v15032_v48 = vpop.f32.mrb[92].mxu0 }
 0x566   : > { %12264 = vst [vmem:[%s19373_s11 + $0x2a8] sm:$0xff] %v16571_v23  ;;  %v15168_v31 = vadd.f32 %v15032_v48, %v14480_v11  ;;  %v11732_v38 = vpop.f32.mrb[93].mxu0 }
 0x567   : > { %v15169_v60 = vadd.f32 %v11732_v38, %v6518_v30  ;;  %v15033_v13 = vpop.f32.mrb[94].mxu0 }
 0x568   : > { %16580 = vtanh.f32 %v15168_v31  ;;  %v15170_v24 = vadd.f32 %v15033_v13, %v14481_v63  ;;  %v11735_v59 = vpop.f32.mrb[95].mxu0 }
 0x569   : > { %v14484_v22 = vpop.f32.mrb[96].mxu1  ;;  %16582 = vtanh.f32 %v15169_v60  ;;  %v15171_v42 = vadd.f32 %v11735_v59, %v6521_v37 }
 0x56a   : > { %v6534_v40 = vpop.f32.mrb[97].mxu1  ;;  %v16573_v44 = vpop.eup %16572  ;;  %16584 = vtanh.f32 %v15170_v24 }
 0x56b   : > { %v14485_v36 = vpop.f32.mrb[98].mxu1  ;;  %v16575_v16 = vpop.eup %16574  ;;  %12269 = vst [vmem:[%s19373_s11 + $0x2d0] sm:$0xff] %v16573_v44  ;;  %16586 = vtanh.f32 %v15171_v42 }
 0x56c   : > { %v6537_v7 = vpop.f32.mrb[99].mxu1  ;;  %v16577_v27 = vpop.eup %16576  ;;  %12267 = vst [vmem:[%s19373_s11 + $0x2c0] sm:$0xff] %v16575_v16 }
 0x56d   : > { %v16579_v19 = vpop.eup %16578  ;;  %12270 = vst [vmem:[%s19373_s11 + $0x2d8] sm:$0xff] %v16577_v27  ;;  %v15036_v39 = vpop.f32.mrb[96].mxu0 }
 0x56e   : > { %12268 = vst [vmem:[%s19373_s11 + $0x2c8] sm:$0xff] %v16579_v19  ;;  %v15172_v41 = vadd.f32 %v15036_v39, %v14484_v22  ;;  %v11748_v45 = vpop.f32.mrb[97].mxu0 }
 0x56f   : > { %v15173_v1 = vadd.f32 %v11748_v45, %v6534_v40  ;;  %v15037_v12 = vpop.f32.mrb[98].mxu0 }
 0x570   : > { %16588 = vtanh.f32 %v15172_v41  ;;  %v15174_v14 = vadd.f32 %v15037_v12, %v14485_v36  ;;  %v11751_v32 = vpop.f32.mrb[99].mxu0 }
 0x571   : > { %v14488_v55 = vpop.f32.mrb[100].mxu1  ;;  %16590 = vtanh.f32 %v15173_v1  ;;  %v15175_v6 = vadd.f32 %v11751_v32, %v6537_v7 }
 0x572   : > { %v6550_v8 = vpop.f32.mrb[101].mxu1  ;;  %v16581_v21 = vpop.eup %16580  ;;  %16592 = vtanh.f32 %v15174_v14 }
 0x573   : > { %v14489_v17 = vpop.f32.mrb[102].mxu1  ;;  %v16583_v57 = vpop.eup %16582  ;;  %12273 = vst [vmem:[%s19373_s11 + $0x2f0] sm:$0xff] %v16581_v21  ;;  %16594 = vtanh.f32 %v15175_v6 }
 0x574   : > { %v6553_v43 = vpop.f32.mrb[103].mxu1  ;;  %v16585_v46 = vpop.eup %16584  ;;  %12271 = vst [vmem:[%s19373_s11 + $0x2e0] sm:$0xff] %v16583_v57 }
 0x575   : > { %v16587_v18 = vpop.eup %16586  ;;  %12274 = vst [vmem:[%s19373_s11 + $0x2f8] sm:$0xff] %v16585_v46  ;;  %v15040_v62 = vpop.f32.mrb[100].mxu0 }
 0x576   : > { %12272 = vst [vmem:[%s19373_s11 + $0x2e8] sm:$0xff] %v16587_v18  ;;  %v15176_v61 = vadd.f32 %v15040_v62, %v14488_v55  ;;  %v11764_v2 = vpop.f32.mrb[101].mxu0 }
 0x577   : > { %v15177_v20 = vadd.f32 %v11764_v2, %v6550_v8  ;;  %v15041_v4 = vpop.f32.mrb[102].mxu0 }
 0x578   : > { %16596 = vtanh.f32 %v15176_v61  ;;  %v15178_v58 = vadd.f32 %v15041_v4, %v14489_v17  ;;  %v11767_v49 = vpop.f32.mrb[103].mxu0 }
 0x579   : > { %v14492_v25 = vpop.f32.mrb[104].mxu1  ;;  %16598 = vtanh.f32 %v15177_v20  ;;  %v15179_v51 = vadd.f32 %v11767_v49, %v6553_v43 }
 0x57a   : > { %v6566_v5 = vpop.f32.mrb[105].mxu1  ;;  %v16589_v3 = vpop.eup %16588  ;;  %16600 = vtanh.f32 %v15178_v58 }
 0x57b   : > { %v14493_v10 = vpop.f32.mrb[106].mxu1  ;;  %v16591_v56 = vpop.eup %16590  ;;  %12277 = vst [vmem:[%s19373_s11 + $0x310] sm:$0xff] %v16589_v3  ;;  %16602 = vtanh.f32 %v15179_v51 }
 0x57c   : > { %v6569_v0 = vpop.f32.mrb[107].mxu1  ;;  %v16593_v9 = vpop.eup %16592  ;;  %12275 = vst [vmem:[%s19373_s11 + $0x300] sm:$0xff] %v16591_v56 }
 0x57d   : > { %v16595_v52 = vpop.eup %16594  ;;  %12278 = vst [vmem:[%s19373_s11 + $0x318] sm:$0xff] %v16593_v9  ;;  %v15044_v35 = vpop.f32.mrb[104].mxu0 }
 0x57e   : > { %12276 = vst [vmem:[%s19373_s11 + $0x308] sm:$0xff] %v16595_v52  ;;  %v15180_v53 = vadd.f32 %v15044_v35, %v14492_v25  ;;  %v11780_v26 = vpop.f32.mrb[105].mxu0 }
 0x57f   : > { %v15181_v29 = vadd.f32 %v11780_v26, %v6566_v5  ;;  %v15045_v28 = vpop.f32.mrb[106].mxu0 }
 0x580   : > { %16604 = vtanh.f32 %v15180_v53  ;;  %v15182_v50 = vadd.f32 %v15045_v28, %v14493_v10  ;;  %v11783_v33 = vpop.f32.mrb[107].mxu0 }
 0x581   : > { %v14496_v11 = vpop.f32.mrb[108].mxu1  ;;  %16606 = vtanh.f32 %v15181_v29  ;;  %v15183_v15 = vadd.f32 %v11783_v33, %v6569_v0 }
 0x582   : > { %v6582_v30 = vpop.f32.mrb[109].mxu1  ;;  %v16597_v47 = vpop.eup %16596  ;;  %16608 = vtanh.f32 %v15182_v50 }
 0x583   : > { %v14497_v63 = vpop.f32.mrb[110].mxu1  ;;  %v16599_v34 = vpop.eup %16598  ;;  %12281 = vst [vmem:[%s19373_s11 + $0x330] sm:$0xff] %v16597_v47  ;;  %16610 = vtanh.f32 %v15183_v15 }
 0x584   : > { %v6585_v37 = vpop.f32.mrb[111].mxu1  ;;  %v16601_v54 = vpop.eup %16600  ;;  %12279 = vst [vmem:[%s19373_s11 + $0x320] sm:$0xff] %v16599_v34 }
 0x585   : > { %v16603_v23 = vpop.eup %16602  ;;  %12282 = vst [vmem:[%s19373_s11 + $0x338] sm:$0xff] %v16601_v54  ;;  %v15048_v48 = vpop.f32.mrb[108].mxu0 }
 0x586   : > { %12280 = vst [vmem:[%s19373_s11 + $0x328] sm:$0xff] %v16603_v23  ;;  %v15184_v31 = vadd.f32 %v15048_v48, %v14496_v11  ;;  %v11796_v38 = vpop.f32.mrb[109].mxu0 }
 0x587   : > { %v15185_v60 = vadd.f32 %v11796_v38, %v6582_v30  ;;  %v15049_v13 = vpop.f32.mrb[110].mxu0 }
 0x588   : > { %16612 = vtanh.f32 %v15184_v31  ;;  %v15186_v24 = vadd.f32 %v15049_v13, %v14497_v63  ;;  %v11799_v59 = vpop.f32.mrb[111].mxu0 }
 0x589   : > { %v14500_v22 = vpop.f32.mrb[112].mxu1  ;;  %16614 = vtanh.f32 %v15185_v60  ;;  %v15187_v42 = vadd.f32 %v11799_v59, %v6585_v37 }
 0x58a   : > { %v6598_v40 = vpop.f32.mrb[113].mxu1  ;;  %v16605_v44 = vpop.eup %16604  ;;  %16616 = vtanh.f32 %v15186_v24 }
 0x58b   : > { %v14501_v36 = vpop.f32.mrb[114].mxu1  ;;  %v16607_v16 = vpop.eup %16606  ;;  %12285 = vst [vmem:[%s19373_s11 + $0x350] sm:$0xff] %v16605_v44  ;;  %16618 = vtanh.f32 %v15187_v42 }
 0x58c   : > { %v6601_v7 = vpop.f32.mrb[115].mxu1  ;;  %v16609_v27 = vpop.eup %16608  ;;  %12283 = vst [vmem:[%s19373_s11 + $0x340] sm:$0xff] %v16607_v16 }
 0x58d   : > { %v16611_v19 = vpop.eup %16610  ;;  %12286 = vst [vmem:[%s19373_s11 + $0x358] sm:$0xff] %v16609_v27  ;;  %v15052_v39 = vpop.f32.mrb[112].mxu0 }
 0x58e   : > { %12284 = vst [vmem:[%s19373_s11 + $0x348] sm:$0xff] %v16611_v19  ;;  %v15188_v41 = vadd.f32 %v15052_v39, %v14500_v22  ;;  %v11812_v45 = vpop.f32.mrb[113].mxu0 }
 0x58f   : > { %v15189_v1 = vadd.f32 %v11812_v45, %v6598_v40  ;;  %v15053_v12 = vpop.f32.mrb[114].mxu0 }
 0x590   : > { %16620 = vtanh.f32 %v15188_v41  ;;  %v15190_v14 = vadd.f32 %v15053_v12, %v14501_v36  ;;  %v11815_v32 = vpop.f32.mrb[115].mxu0 }
 0x591   : > { %v14504_v55 = vpop.f32.mrb[116].mxu1  ;;  %16622 = vtanh.f32 %v15189_v1  ;;  %v15191_v6 = vadd.f32 %v11815_v32, %v6601_v7 }
 0x592   : > { %v6614_v8 = vpop.f32.mrb[117].mxu1  ;;  %v16613_v21 = vpop.eup %16612  ;;  %16624 = vtanh.f32 %v15190_v14 }
 0x593   : > { %v14505_v17 = vpop.f32.mrb[118].mxu1  ;;  %v16615_v57 = vpop.eup %16614  ;;  %12289 = vst [vmem:[%s19373_s11 + $0x370] sm:$0xff] %v16613_v21  ;;  %16626 = vtanh.f32 %v15191_v6 }
 0x594   : > { %v6617_v43 = vpop.f32.mrb[119].mxu1  ;;  %v16617_v46 = vpop.eup %16616  ;;  %12287 = vst [vmem:[%s19373_s11 + $0x360] sm:$0xff] %v16615_v57 }
 0x595   : > { %v16619_v18 = vpop.eup %16618  ;;  %12290 = vst [vmem:[%s19373_s11 + $0x378] sm:$0xff] %v16617_v46  ;;  %v15056_v62 = vpop.f32.mrb[116].mxu0 }
 0x596   : > { %12288 = vst [vmem:[%s19373_s11 + $0x368] sm:$0xff] %v16619_v18  ;;  %v15192_v61 = vadd.f32 %v15056_v62, %v14504_v55  ;;  %v11828_v2 = vpop.f32.mrb[117].mxu0 }
 0x597   : > { %v15193_v20 = vadd.f32 %v11828_v2, %v6614_v8  ;;  %v15057_v4 = vpop.f32.mrb[118].mxu0 }
 0x598   : > { %16628 = vtanh.f32 %v15192_v61  ;;  %v15194_v58 = vadd.f32 %v15057_v4, %v14505_v17  ;;  %v11831_v49 = vpop.f32.mrb[119].mxu0 }
 0x599   : > { %v14508_v25 = vpop.f32.mrb[120].mxu1  ;;  %16630 = vtanh.f32 %v15193_v20  ;;  %v15195_v51 = vadd.f32 %v11831_v49, %v6617_v43 }
 0x59a   : > { %v6630_v5 = vpop.f32.mrb[121].mxu1  ;;  %v16621_v3 = vpop.eup %16620  ;;  %16632 = vtanh.f32 %v15194_v58 }
 0x59b   : > { %v14509_v10 = vpop.f32.mrb[122].mxu1  ;;  %v16623_v56 = vpop.eup %16622  ;;  %12293 = vst [vmem:[%s19373_s11 + $0x390] sm:$0xff] %v16621_v3  ;;  %16634 = vtanh.f32 %v15195_v51 }
 0x59c   : > { %v6633_v0 = vpop.f32.mrb[123].mxu1  ;;  %v16625_v9 = vpop.eup %16624  ;;  %12291 = vst [vmem:[%s19373_s11 + $0x380] sm:$0xff] %v16623_v56 }
 0x59d   : > { %v16627_v52 = vpop.eup %16626  ;;  %12294 = vst [vmem:[%s19373_s11 + $0x398] sm:$0xff] %v16625_v9  ;;  %v15060_v35 = vpop.f32.mrb[120].mxu0 }
 0x59e   : > { %12292 = vst [vmem:[%s19373_s11 + $0x388] sm:$0xff] %v16627_v52  ;;  %v15196_v53 = vadd.f32 %v15060_v35, %v14508_v25  ;;  %v11844_v26 = vpop.f32.mrb[121].mxu0 }
 0x59f   : > { %v15197_v29 = vadd.f32 %v11844_v26, %v6630_v5  ;;  %v15061_v28 = vpop.f32.mrb[122].mxu0 }
 0x5a0   : > { %16636 = vtanh.f32 %v15196_v53  ;;  %v15198_v50 = vadd.f32 %v15061_v28, %v14509_v10  ;;  %v11847_v33 = vpop.f32.mrb[123].mxu0 }
 0x5a1   : > { %v14512_v11 = vpop.f32.mrb[124].mxu1  ;;  %16638 = vtanh.f32 %v15197_v29  ;;  %v15199_v15 = vadd.f32 %v11847_v33, %v6633_v0 }
 0x5a2   : > { %v6646_v30 = vpop.f32.mrb[125].mxu1  ;;  %v16629_v47 = vpop.eup %16628  ;;  %16640 = vtanh.f32 %v15198_v50 }
 0x5a3   : > { %v14513_v63 = vpop.f32.mrb[126].mxu1  ;;  %v16631_v34 = vpop.eup %16630  ;;  %12297 = vst [vmem:[%s19373_s11 + $0x3b0] sm:$0xff] %v16629_v47  ;;  %16642 = vtanh.f32 %v15199_v15 }
 0x5a4   : > { %v6649_v37 = vpop.f32.mrb[127].mxu1  ;;  %v16633_v54 = vpop.eup %16632  ;;  %12295 = vst [vmem:[%s19373_s11 + $0x3a0] sm:$0xff] %v16631_v34 }
 0x5a5   : > { %v16635_v23 = vpop.eup %16634  ;;  %12298 = vst [vmem:[%s19373_s11 + $0x3b8] sm:$0xff] %v16633_v54  ;;  %v15064_v48 = vpop.f32.mrb[124].mxu0 }
 0x5a6   : > { %12296 = vst [vmem:[%s19373_s11 + $0x3a8] sm:$0xff] %v16635_v23  ;;  %v15200_v31 = vadd.f32 %v15064_v48, %v14512_v11  ;;  %v11860_v38 = vpop.f32.mrb[125].mxu0 }
 0x5a7   : > { %v15201_v60 = vadd.f32 %v11860_v38, %v6646_v30  ;;  %v15065_v13 = vpop.f32.mrb[126].mxu0 }
 0x5a8   : > { %16644 = vtanh.f32 %v15200_v31  ;;  %v15202_v24 = vadd.f32 %v15065_v13, %v14513_v63  ;;  %v11863_v59 = vpop.f32.mrb[127].mxu0 }
 0x5a9   : > { %v14516_v22 = vpop.f32.mrb[128].mxu1  ;;  %16646 = vtanh.f32 %v15201_v60  ;;  %v15203_v42 = vadd.f32 %v11863_v59, %v6649_v37 }
 0x5aa   : > { %v6662_v40 = vpop.f32.mrb[129].mxu1  ;;  %v16637_v44 = vpop.eup %16636  ;;  %16648 = vtanh.f32 %v15202_v24 }
 0x5ab   : > { %v14517_v36 = vpop.f32.mrb[130].mxu1  ;;  %v16639_v16 = vpop.eup %16638  ;;  %12301 = vst [vmem:[%s19373_s11 + $0x3d0] sm:$0xff] %v16637_v44  ;;  %16650 = vtanh.f32 %v15203_v42 }
 0x5ac   : > { %v6665_v7 = vpop.f32.mrb[131].mxu1  ;;  %v16641_v27 = vpop.eup %16640  ;;  %12299 = vst [vmem:[%s19373_s11 + $0x3c0] sm:$0xff] %v16639_v16 }
 0x5ad   : > { %v16643_v19 = vpop.eup %16642  ;;  %12302 = vst [vmem:[%s19373_s11 + $0x3d8] sm:$0xff] %v16641_v27  ;;  %v15068_v39 = vpop.f32.mrb[128].mxu0 }
 0x5ae   : > { %12300 = vst [vmem:[%s19373_s11 + $0x3c8] sm:$0xff] %v16643_v19  ;;  %v15204_v41 = vadd.f32 %v15068_v39, %v14516_v22  ;;  %v11876_v45 = vpop.f32.mrb[129].mxu0 }
 0x5af   : > { %v15205_v1 = vadd.f32 %v11876_v45, %v6662_v40  ;;  %v15069_v12 = vpop.f32.mrb[130].mxu0 }
 0x5b0   : > { %16652 = vtanh.f32 %v15204_v41  ;;  %v15206_v14 = vadd.f32 %v15069_v12, %v14517_v36  ;;  %v11879_v32 = vpop.f32.mrb[131].mxu0 }
 0x5b1   : > { %v14520_v55 = vpop.f32.mrb[132].mxu1  ;;  %16654 = vtanh.f32 %v15205_v1  ;;  %v15207_v6 = vadd.f32 %v11879_v32, %v6665_v7 }
 0x5b2   : > { %v6678_v8 = vpop.f32.mrb[133].mxu1  ;;  %v16645_v21 = vpop.eup %16644  ;;  %16656 = vtanh.f32 %v15206_v14 }
 0x5b3   : > { %v14521_v17 = vpop.f32.mrb[134].mxu1  ;;  %v16647_v57 = vpop.eup %16646  ;;  %12305 = vst [vmem:[%s19373_s11 + $0x3f0] sm:$0xff] %v16645_v21  ;;  %16658 = vtanh.f32 %v15207_v6 }
 0x5b4   : > { %v6681_v43 = vpop.f32.mrb[135].mxu1  ;;  %v16649_v46 = vpop.eup %16648  ;;  %12303 = vst [vmem:[%s19373_s11 + $0x3e0] sm:$0xff] %v16647_v57 }
 0x5b5   : > { %v16651_v18 = vpop.eup %16650  ;;  %12306 = vst [vmem:[%s19373_s11 + $0x3f8] sm:$0xff] %v16649_v46  ;;  %v15072_v62 = vpop.f32.mrb[132].mxu0 }
 0x5b6   : > { %12304 = vst [vmem:[%s19373_s11 + $0x3e8] sm:$0xff] %v16651_v18  ;;  %v15208_v61 = vadd.f32 %v15072_v62, %v14520_v55  ;;  %v11892_v2 = vpop.f32.mrb[133].mxu0 }
 0x5b7   : > { %v15209_v20 = vadd.f32 %v11892_v2, %v6678_v8  ;;  %v15073_v4 = vpop.f32.mrb[134].mxu0 }
 0x5b8   : > { %16660 = vtanh.f32 %v15208_v61  ;;  %v15210_v58 = vadd.f32 %v15073_v4, %v14521_v17  ;;  %v11895_v49 = vpop.f32.mrb[135].mxu0 }
 0x5b9   : > { %16662 = vtanh.f32 %v15209_v20  ;;  %v15211_v25 = vadd.f32 %v11895_v49, %v6681_v43 }
 0x5ba   : > { %v16653_v51 = vpop.eup %16652  ;;  %16664 = vtanh.f32 %v15210_v58 }
 0x5bb   : > { %v16655_v5 = vpop.eup %16654  ;;  %12309 = vst [vmem:[%s19373_s11 + $0x410] sm:$0xff] %v16653_v51  ;;  %16666 = vtanh.f32 %v15211_v25 }
 0x5bc   : > { %v16657_v3 = vpop.eup %16656  ;;  %12307 = vst [vmem:[%s19373_s11 + $0x400] sm:$0xff] %v16655_v5 }
 0x5bd   : > { %v16659_v10 = vpop.eup %16658  ;;  %12310 = vst [vmem:[%s19373_s11 + $0x418] sm:$0xff] %v16657_v3 }
 0x5be   : > { %12308 = vst [vmem:[%s19373_s11 + $0x408] sm:$0xff] %v16659_v10 }
 0x5c2   : > { %v16661_v56 = vpop.eup %16660 }
 0x5c3   : > { %v16663_v0 = vpop.eup %16662  ;;  %12313 = vst [vmem:[%s19373_s11 + $0x430] sm:$0xff] %v16661_v56 }
 0x5c4   : > { %v16665_v9 = vpop.eup %16664  ;;  %12311 = vst [vmem:[%s19373_s11 + $0x420] sm:$0xff] %v16663_v0 }
 0x5c5   : > { %v16667_v52 = vpop.eup %16666  ;;  %12314 = vst [vmem:[%s19373_s11 + $0x438] sm:$0xff] %v16665_v9 }
 0x5c6   : > { %12312 = vst [vmem:[%s19373_s11 + $0x428] sm:$0xff] %v16667_v52 }
 0x5c7 PF: > { %s12_s9 = sadd.s32 1, %s16967_s9  }
 0x5c8   : > { %p9_p4 = scmp.ge.s32.totalorder %s12_s9, 4  }
 0x5ca   :  { %11 = sbr.rel (!%p9_p4) target bundleno = 1 (0x1), region = 66 }

</bundles_post_ra>
